<compile_context>
chip_gen: v6e
topology: v6e:2x2x1
jax: 0.10.0
libtpu: 0.0.40
codegen_flags: <defaults>
</compile_context>

<pallas_src>
import functools

import numpy as np
import jax
import jax.numpy as jnp
from jax import lax
from jax.experimental import pallas as pl
from jax.experimental.pallas import tpu as pltpu

EPS = 1e-3  # BatchNorm2d eps=0.001


def _inception_aux_kernel(x_ref, p_ref, w0_ref, b0_ref, w1_ref, b1_ref,
                          wf_ref, bf_ref, o_ref, h0f_ref, *, B):
    # x_ref:  (B*HWp, Cin) bf16   -- B images, rows = image-major, spatial-minor
    # p_ref:  (25*B, B*HWp) bf16  -- {0,1} block-diagonal pooling matrix (rows p-major, b-minor)
    # w0_ref: (Cin, 128) bf16     -- conv0 1x1 weight with BN scale and 1/25 folded in
    # w1_ref: (3200, 768) bf16    -- conv1 5x5 weight flattened over (tap, in-ch), BN folded
    # wf_ref: (768, NC_pad) bf16  -- fc weight, zero-padded to lane-dense NC_pad
    # h0f_ref: (B, 3200) f32 scratch -- flattened conv0 activations
    x = x_ref[...]

    # avg_pool2d(5, stride=3): one matmul -> (25*B, Cin) f32 (window sum; /25 lives in w0)
    pooled = jnp.dot(p_ref[...], x, preferred_element_type=jnp.float32)

    # conv0 (1x1) + BN + ReLU: one matmul -> (25*B, 128) f32
    h0 = jnp.dot(pooled.astype(jnp.bfloat16), w0_ref[...],
                 preferred_element_type=jnp.float32)
    h0 = jnp.maximum(h0 + b0_ref[...], 0.0)

    # flatten the 25 taps onto the lane dim: (25*B, 128) -> (B, 3200)
    # rows are p-major so each (B,128) f32 source slice is one vreg-aligned block
    for p in range(25):
        h0f_ref[:, p * 128:(p + 1) * 128] = h0[p * B:(p + 1) * B, :]

    # conv1 (5x5 VALID -> 1x1 pixel) + BN + ReLU as ONE K=3200 matmul -> (B, 768)
    h1 = jnp.dot(h0f_ref[...].astype(jnp.bfloat16), w1_ref[...],
                 preferred_element_type=jnp.float32)
    h1 = jnp.maximum(h1 + b1_ref[...], 0.0).astype(jnp.bfloat16)

    # adaptive_avg_pool2d((1,1)) is identity (1x1 spatial); flatten + fc (lane-dense out)
    logits = jnp.dot(h1, wf_ref[...], preferred_element_type=jnp.float32) + bf_ref[...]
    o_ref[...] = logits


def inception_aux_forward(x_nchw, params, num_classes, *, batch_block=8):
    N, Cin, H, W = x_nchw.shape
    PH = (H - 5) // 3 + 1
    PW = (W - 5) // 3 + 1
    assert PH == 5 and PW == 5, "conv1 (5x5, VALID) requires a 5x5 pooled map (H=W=17)"
    HW = H * W
    HWp = ((HW + 7) // 8) * 8                      # pad per-image rows to sublane multiple
    B = batch_block
    Npad = ((N + B - 1) // B) * B
    NCpad = ((num_classes + 127) // 128) * 128     # lane-dense output width

    # NCHW -> (N, HW, C), pad spatial rows and batch, flatten to (Npad*HWp, Cin), bf16
    x = jnp.transpose(x_nchw, (0, 2, 3, 1)).reshape(N, HW, Cin)
    x = jnp.pad(x, ((0, Npad - N), (0, HWp - HW), (0, 0)))
    x = x.reshape(Npad * HWp, Cin).astype(jnp.bfloat16)

    # {0,1} block-diagonal pooling matrix for one B-image block:
    #   Pb[p*B + b, b*HWp + s] = 1  iff pixel s lies in 5x5 window p (stride 3)
    Pb = np.zeros((25 * B, B * HWp), dtype=np.float32)
    for oi in range(PH):
        for oj in range(PW):
            p = oi * PW + oj
            for di in range(5):
                for dj in range(5):
                    s = (3 * oi + di) * W + (3 * oj + dj)
                    for b in range(B):
                        Pb[p * B + b, b * HWp + s] = 1.0
    Pb = jnp.asarray(Pb).astype(jnp.bfloat16)      # exact in bf16 ({0,1})

    (w0_oihw, g0, be0, m0, v0,
     w1_oihw, g1, be1, m1, v1, fc_w, fc_b) = params

    # fold eval-mode BN (and the 1/25 average-pool scale) into the bias-free conv weights
    s0 = g0 / jnp.sqrt(v0 + EPS)                                           # (128,)
    w0 = (jnp.transpose(w0_oihw[:, :, 0, 0]) * s0[None, :] / 25.0).astype(jnp.bfloat16)  # (Cin,128)
    b0 = (be0 - m0 * s0).reshape(1, -1)                                    # (1,128) f32

    s1 = g1 / jnp.sqrt(v1 + EPS)                                           # (768,)
    w1 = (jnp.transpose(w1_oihw, (2, 3, 1, 0)).reshape(25 * 128, 768)
          * s1[None, :]).astype(jnp.bfloat16)                              # (3200,768)
    b1 = (be1 - m1 * s1).reshape(1, -1)                                    # (1,768) f32

    wf = jnp.pad(jnp.transpose(fc_w),
                 ((0, 0), (0, NCpad - num_classes))).astype(jnp.bfloat16)  # (768,NCpad)
    bf = jnp.pad(fc_b, (0, NCpad - num_classes)).reshape(1, -1)            # (1,NCpad) f32

    kernel = functools.partial(_inception_aux_kernel, B=B)
    out = pl.pallas_call(
        kernel,
        out_shape=jax.ShapeDtypeStruct((Npad, NCpad), jnp.float32),
        grid=(Npad // B,),
        in_specs=[
            pl.BlockSpec((B * HWp, Cin), lambda i: (i, 0)),        # x block (B images)
            pl.BlockSpec((25 * B, B * HWp), lambda i: (0, 0)),     # pooling matrix (invariant)
            pl.BlockSpec((Cin, 128), lambda i: (0, 0)),            # w0
            pl.BlockSpec((1, 128), lambda i: (0, 0)),              # b0
            pl.BlockSpec((25 * 128, 768), lambda i: (0, 0)),       # w1 (flattened)
            pl.BlockSpec((1, 768), lambda i: (0, 0)),              # b1
            pl.BlockSpec((768, NCpad), lambda i: (0, 0)),          # fc weight (padded)
            pl.BlockSpec((1, NCpad), lambda i: (0, 0)),            # fc bias (padded)
        ],
        out_specs=pl.BlockSpec((B, NCpad), lambda i: (i, 0)),
        scratch_shapes=[pltpu.VMEM((B, 25 * 128), jnp.float32)],   # flattened conv0 activations
        compiler_params=pltpu.CompilerParams(
            dimension_semantics=("parallel",),
            vmem_limit_bytes=32 * 1024 * 1024),   # real footprint ~12.5 MB
    )(x, Pb, w0, b0, w1, b1, wf, bf)
    return out[:N, :num_classes]


def init_params(key, in_channels, num_classes):
    ks = jax.random.split(key, 12)
    # conv0 (BasicConv2d): Conv2d(in, 128, k=1, bias=False) + BN(128)
    w0 = jax.random.normal(ks[0], (128, in_channels, 1, 1), jnp.float32) * 0.1
    g0 = jax.random.uniform(ks[1], (128,), jnp.float32, 0.5, 1.5)
    be0 = jax.random.normal(ks[2], (128,), jnp.float32) * 0.1
    m0 = jax.random.normal(ks[3], (128,), jnp.float32) * 0.1
    v0 = jax.random.uniform(ks[4], (128,), jnp.float32, 0.5, 1.5)
    # conv1 (BasicConv2d): Conv2d(128, 768, k=5, bias=False) + BN(768)
    w1 = jax.random.normal(ks[5], (768, 128, 5, 5), jnp.float32) * 0.01
    g1 = jax.random.uniform(ks[6], (768,), jnp.float32, 0.5, 1.5)
    be1 = jax.random.normal(ks[7], (768,), jnp.float32) * 0.1
    m1 = jax.random.normal(ks[8], (768,), jnp.float32) * 0.1
    v1 = jax.random.uniform(ks[9], (768,), jnp.float32, 0.5, 1.5)
    # fc: Linear(768, num_classes)
    fc_w = jax.random.normal(ks[10], (num_classes, 768), jnp.float32) * 0.05
    fc_b = jax.random.normal(ks[11], (num_classes,), jnp.float32) * 0.05
    return (w0, g0, be0, m0, v0, w1, g1, be1, m1, v1, fc_w, fc_b)


def reference_forward(x_nchw, params):
    """Pure-JAX f32 reference mirroring the PyTorch forward (eval-mode BN)."""
    (w0, g0, be0, m0, v0, w1, g1, be1, m1, v1, fc_w, fc_b) = params
    dn = ("NCHW", "OIHW", "NCHW")
    p = lax.reduce_window(x_nchw, 0.0, lax.add,
                          (1, 1, 5, 5), (1, 1, 3, 3), "VALID") / 25.0
    y = lax.conv_general_dilated(p, w0, (1, 1), "VALID", dimension_numbers=dn)
    y = (y - m0[None, :, None, None]) * (g0 / jnp.sqrt(v0 + EPS))[None, :, None, None] \
        + be0[None, :, None, None]
    y = jnp.maximum(y, 0.0)
    z = lax.conv_general_dilated(y, w1, (1, 1), "VALID", dimension_numbers=dn)
    z = (z - m1[None, :, None, None]) * (g1 / jnp.sqrt(v1 + EPS))[None, :, None, None] \
        + be1[None, :, None, None]
    z = jnp.maximum(z, 0.0)
    feat = jnp.mean(z, axis=(2, 3))                  # adaptive avg pool (1,1) + flatten
    return feat @ fc_w.T + fc_b


if __name__ == "__main__":
    # H=W=17 so pool -> 5x5 and conv1(5x5) -> 1x1, as in Inception v3's aux head.
    N, Cin, H, W = 16, 16, 17, 17
    num_classes = 10
    key = jax.random.PRNGKey(0)
    kx, kp = jax.random.split(key)
    x = jax.random.normal(kx, (N, Cin, H, W), jnp.float32)
    params = init_params(kp, Cin, num_classes)

    out = jax.block_until_ready(inception_aux_forward(x, params, num_classes))

    # Reference in f32, fed with the same bf16-quantized x / conv / fc weights the
    # kernel consumes, so the comparison isolates kernel correctness from bf16 rounding.
    q = lambda a: a.astype(jnp.bfloat16).astype(jnp.float32)
    (w0, g0, be0, m0, v0, w1, g1, be1, m1, v1, fc_w, fc_b) = params
    params_q = (q(w0), g0, be0, m0, v0, q(w1), g1, be1, m1, v1, q(fc_w), fc_b)
    ref = jax.block_until_ready(reference_forward(q(x), params_q))

    assert out.shape == (N, num_classes)
    np.testing.assert_allclose(np.asarray(out), np.asarray(ref), rtol=2e-2, atol=2e-2)
    print("KERNEL_OK")
</pallas_src>

<mosaic_0001>
module attributes {stable_mosaic.version = 11 : i64} {
  func.func @_inception_aux_kernel(%arg0: i32, %arg1: memref<2368x16xbf16, #tpu.memory_space<vmem>>, %arg2: memref<200x2368xbf16, #tpu.memory_space<vmem>>, %arg3: memref<16x128xbf16, #tpu.memory_space<vmem>>, %arg4: memref<1x128xf32, #tpu.memory_space<vmem>>, %arg5: memref<3200x768xbf16, #tpu.memory_space<vmem>>, %arg6: memref<1x768xf32, #tpu.memory_space<vmem>>, %arg7: memref<768x128xbf16, #tpu.memory_space<vmem>>, %arg8: memref<1x128xf32, #tpu.memory_space<vmem>>, %arg9: memref<8x128xf32, #tpu.memory_space<vmem>>, %arg10: memref<8x3200xf32, #tpu.memory_space<vmem>>) attributes {dimension_semantics = [#tpu.dimension_semantics<parallel>], iteration_bounds = array<i64: 2>, scalar_prefetch = 0 : i64, scratch_operands = 1 : i64, tpu.core_type = #tpu.core_type<tc>, window_params = [{transform_indices = @transform_0, window_bounds = array<i64: 2368, 16>}, {pipeline_mode = #tpu.pipeline_mode<synchronous>, transform_indices = @transform_1, window_bounds = array<i64: 200, 2368>}, {pipeline_mode = #tpu.pipeline_mode<synchronous>, transform_indices = @transform_2, window_bounds = array<i64: 16, 128>}, {pipeline_mode = #tpu.pipeline_mode<synchronous>, transform_indices = @transform_3, window_bounds = array<i64: 1, 128>}, {pipeline_mode = #tpu.pipeline_mode<synchronous>, transform_indices = @transform_4, window_bounds = array<i64: 3200, 768>}, {pipeline_mode = #tpu.pipeline_mode<synchronous>, transform_indices = @transform_5, window_bounds = array<i64: 1, 768>}, {pipeline_mode = #tpu.pipeline_mode<synchronous>, transform_indices = @transform_6, window_bounds = array<i64: 768, 128>}, {pipeline_mode = #tpu.pipeline_mode<synchronous>, transform_indices = @transform_7, window_bounds = array<i64: 1, 128>}, {transform_indices = @transform_8, window_bounds = array<i64: 8, 128>}]} {
    %c0 = arith.constant 0 : index
    %c0_0 = arith.constant 0 : index
    %0 = vector.load %arg1[%c0, %c0_0] : memref<2368x16xbf16, #tpu.memory_space<vmem>>, vector<2368x16xbf16>
    %c0_1 = arith.constant 0 : index
    %c0_2 = arith.constant 0 : index
    %1 = vector.load %arg2[%c0_1, %c0_2] : memref<200x2368xbf16, #tpu.memory_space<vmem>>, vector<200x2368xbf16>
    %cst = arith.constant dense<0.000000e+00> : vector<200x16xf32>
    %2 = tpu.matmul %1, %0, %cst {dimension_numbers = #tpu.dot_dimension_numbers<[1], [0], [0], [1], [0, 0, 1, 1], [], []>} : vector<200x2368xbf16>, vector<2368x16xbf16>, vector<200x16xf32> -> vector<200x16xf32>
    %3 = arith.truncf %2 : vector<200x16xf32> to vector<200x16xbf16>
    %c0_3 = arith.constant 0 : index
    %c0_4 = arith.constant 0 : index
    %4 = vector.load %arg3[%c0_3, %c0_4] : memref<16x128xbf16, #tpu.memory_space<vmem>>, vector<16x128xbf16>
    %cst_5 = arith.constant dense<0.000000e+00> : vector<200x128xf32>
    %5 = tpu.matmul %3, %4, %cst_5 {dimension_numbers = #tpu.dot_dimension_numbers<[1], [0], [0], [1], [0, 0, 1, 1], [], []>} : vector<200x16xbf16>, vector<16x128xbf16>, vector<200x128xf32> -> vector<200x128xf32>
    %c0_6 = arith.constant 0 : index
    %c0_7 = arith.constant 0 : index
    %6 = vector.load %arg4[%c0_6, %c0_7] : memref<1x128xf32, #tpu.memory_space<vmem>>, vector<1x128xf32>
    %7 = vector.broadcast %6 : vector<1x128xf32> to vector<200x128xf32>
    %8 = arith.addf %5, %7 : vector<200x128xf32>
    %cst_8 = arith.constant 0.000000e+00 : f32
    %9 = vector.broadcast %cst_8 : f32 to vector<200x128xf32>
    %10 = arith.maximumf %8, %9 : vector<200x128xf32>
    %11 = vector.extract_strided_slice %10 {offsets = [0, 0], sizes = [8, 128], strides = [1, 1]} : vector<200x128xf32> to vector<8x128xf32>
    %c0_9 = arith.constant 0 : index
    %c0_10 = arith.constant 0 : index
    %12 = vector.load %arg10[%c0_9, %c0_10] : memref<8x3200xf32, #tpu.memory_space<vmem>>, vector<8x128xf32>
    tpu.vector_store %arg10[%c0_9, %c0_10], %11 {strides = array<i32>} : memref<8x3200xf32, #tpu.memory_space<vmem>>, vector<8x128xf32>,
    %13 = vector.extract_strided_slice %10 {offsets = [8, 0], sizes = [8, 128], strides = [1, 1]} : vector<200x128xf32> to vector<8x128xf32>
    %c0_11 = arith.constant 0 : index
    %c128 = arith.constant 128 : index
    %14 = vector.load %arg10[%c0_11, %c128] : memref<8x3200xf32, #tpu.memory_space<vmem>>, vector<8x128xf32>
    tpu.vector_store %arg10[%c0_11, %c128], %13 {strides = array<i32>} : memref<8x3200xf32, #tpu.memory_space<vmem>>, vector<8x128xf32>,
    %15 = vector.extract_strided_slice %10 {offsets = [16, 0], sizes = [8, 128], strides = [1, 1]} : vector<200x128xf32> to vector<8x128xf32>
    %c0_12 = arith.constant 0 : index
    %c256 = arith.constant 256 : index
    %16 = vector.load %arg10[%c0_12, %c256] : memref<8x3200xf32, #tpu.memory_space<vmem>>, vector<8x128xf32>
    tpu.vector_store %arg10[%c0_12, %c256], %15 {strides = array<i32>} : memref<8x3200xf32, #tpu.memory_space<vmem>>, vector<8x128xf32>,
    %17 = vector.extract_strided_slice %10 {offsets = [24, 0], sizes = [8, 128], strides = [1, 1]} : vector<200x128xf32> to vector<8x128xf32>
    %c0_13 = arith.constant 0 : index
    %c384 = arith.constant 384 : index
    %18 = vector.load %arg10[%c0_13, %c384] : memref<8x3200xf32, #tpu.memory_space<vmem>>, vector<8x128xf32>
    tpu.vector_store %arg10[%c0_13, %c384], %17 {strides = array<i32>} : memref<8x3200xf32, #tpu.memory_space<vmem>>, vector<8x128xf32>,
    %19 = vector.extract_strided_slice %10 {offsets = [32, 0], sizes = [8, 128], strides = [1, 1]} : vector<200x128xf32> to vector<8x128xf32>
    %c0_14 = arith.constant 0 : index
    %c512 = arith.constant 512 : index
    %20 = vector.load %arg10[%c0_14, %c512] : memref<8x3200xf32, #tpu.memory_space<vmem>>, vector<8x128xf32>
    tpu.vector_store %arg10[%c0_14, %c512], %19 {strides = array<i32>} : memref<8x3200xf32, #tpu.memory_space<vmem>>, vector<8x128xf32>,
    %21 = vector.extract_strided_slice %10 {offsets = [40, 0], sizes = [8, 128], strides = [1, 1]} : vector<200x128xf32> to vector<8x128xf32>
    %c0_15 = arith.constant 0 : index
    %c640 = arith.constant 640 : index
    %22 = vector.load %arg10[%c0_15, %c640] : memref<8x3200xf32, #tpu.memory_space<vmem>>, vector<8x128xf32>
    tpu.vector_store %arg10[%c0_15, %c640], %21 {strides = array<i32>} : memref<8x3200xf32, #tpu.memory_space<vmem>>, vector<8x128xf32>,
    %23 = vector.extract_strided_slice %10 {offsets = [48, 0], sizes = [8, 128], strides = [1, 1]} : vector<200x128xf32> to vector<8x128xf32>
    %c0_16 = arith.constant 0 : index
    %c768 = arith.constant 768 : index
    %24 = vector.load %arg10[%c0_16, %c768] : memref<8x3200xf32, #tpu.memory_space<vmem>>, vector<8x128xf32>
    tpu.vector_store %arg10[%c0_16, %c768], %23 {strides = array<i32>} : memref<8x3200xf32, #tpu.memory_space<vmem>>, vector<8x128xf32>,
    %25 = vector.extract_strided_slice %10 {offsets = [56, 0], sizes = [8, 128], strides = [1, 1]} : vector<200x128xf32> to vector<8x128xf32>
    %c0_17 = arith.constant 0 : index
    %c896 = arith.constant 896 : index
    %26 = vector.load %arg10[%c0_17, %c896] : memref<8x3200xf32, #tpu.memory_space<vmem>>, vector<8x128xf32>
    tpu.vector_store %arg10[%c0_17, %c896], %25 {strides = array<i32>} : memref<8x3200xf32, #tpu.memory_space<vmem>>, vector<8x128xf32>,
    %27 = vector.extract_strided_slice %10 {offsets = [64, 0], sizes = [8, 128], strides = [1, 1]} : vector<200x128xf32> to vector<8x128xf32>
    %c0_18 = arith.constant 0 : index
    %c1024 = arith.constant 1024 : index
    %28 = vector.load %arg10[%c0_18, %c1024] : memref<8x3200xf32, #tpu.memory_space<vmem>>, vector<8x128xf32>
    tpu.vector_store %arg10[%c0_18, %c1024], %27 {strides = array<i32>} : memref<8x3200xf32, #tpu.memory_space<vmem>>, vector<8x128xf32>,
    %29 = vector.extract_strided_slice %10 {offsets = [72, 0], sizes = [8, 128], strides = [1, 1]} : vector<200x128xf32> to vector<8x128xf32>
    %c0_19 = arith.constant 0 : index
    %c1152 = arith.constant 1152 : index
    %30 = vector.load %arg10[%c0_19, %c1152] : memref<8x3200xf32, #tpu.memory_space<vmem>>, vector<8x128xf32>
    tpu.vector_store %arg10[%c0_19, %c1152], %29 {strides = array<i32>} : memref<8x3200xf32, #tpu.memory_space<vmem>>, vector<8x128xf32>,
    %31 = vector.extract_strided_slice %10 {offsets = [80, 0], sizes = [8, 128], strides = [1, 1]} : vector<200x128xf32> to vector<8x128xf32>
    %c0_20 = arith.constant 0 : index
    %c1280 = arith.constant 1280 : index
    %32 = vector.load %arg10[%c0_20, %c1280] : memref<8x3200xf32, #tpu.memory_space<vmem>>, vector<8x128xf32>
    tpu.vector_store %arg10[%c0_20, %c1280], %31 {strides = array<i32>} : memref<8x3200xf32, #tpu.memory_space<vmem>>, vector<8x128xf32>,
    %33 = vector.extract_strided_slice %10 {offsets = [88, 0], sizes = [8, 128], strides = [1, 1]} : vector<200x128xf32> to vector<8x128xf32>
    %c0_21 = arith.constant 0 : index
    %c1408 = arith.constant 1408 : index
    %34 = vector.load %arg10[%c0_21, %c1408] : memref<8x3200xf32, #tpu.memory_space<vmem>>, vector<8x128xf32>
    tpu.vector_store %arg10[%c0_21, %c1408], %33 {strides = array<i32>} : memref<8x3200xf32, #tpu.memory_space<vmem>>, vector<8x128xf32>,
    %35 = vector.extract_strided_slice %10 {offsets = [96, 0], sizes = [8, 128], strides = [1, 1]} : vector<200x128xf32> to vector<8x128xf32>
    %c0_22 = arith.constant 0 : index
    %c1536 = arith.constant 1536 : index
    %36 = vector.load %arg10[%c0_22, %c1536] : memref<8x3200xf32, #tpu.memory_space<vmem>>, vector<8x128xf32>
    tpu.vector_store %arg10[%c0_22, %c1536], %35 {strides = array<i32>} : memref<8x3200xf32, #tpu.memory_space<vmem>>, vector<8x128xf32>,
    %37 = vector.extract_strided_slice %10 {offsets = [104, 0], sizes = [8, 128], strides = [1, 1]} : vector<200x128xf32> to vector<8x128xf32>
    %c0_23 = arith.constant 0 : index
    %c1664 = arith.constant 1664 : index
    %38 = vector.load %arg10[%c0_23, %c1664] : memref<8x3200xf32, #tpu.memory_space<vmem>>, vector<8x128xf32>
    tpu.vector_store %arg10[%c0_23, %c1664], %37 {strides = array<i32>} : memref<8x3200xf32, #tpu.memory_space<vmem>>, vector<8x128xf32>,
    %39 = vector.extract_strided_slice %10 {offsets = [112, 0], sizes = [8, 128], strides = [1, 1]} : vector<200x128xf32> to vector<8x128xf32>
    %c0_24 = arith.constant 0 : index
    %c1792 = arith.constant 1792 : index
    %40 = vector.load %arg10[%c0_24, %c1792] : memref<8x3200xf32, #tpu.memory_space<vmem>>, vector<8x128xf32>
    tpu.vector_store %arg10[%c0_24, %c1792], %39 {strides = array<i32>} : memref<8x3200xf32, #tpu.memory_space<vmem>>, vector<8x128xf32>,
    %41 = vector.extract_strided_slice %10 {offsets = [120, 0], sizes = [8, 128], strides = [1, 1]} : vector<200x128xf32> to vector<8x128xf32>
    %c0_25 = arith.constant 0 : index
    %c1920 = arith.constant 1920 : index
    %42 = vector.load %arg10[%c0_25, %c1920] : memref<8x3200xf32, #tpu.memory_space<vmem>>, vector<8x128xf32>
    tpu.vector_store %arg10[%c0_25, %c1920], %41 {strides = array<i32>} : memref<8x3200xf32, #tpu.memory_space<vmem>>, vector<8x128xf32>,
    %43 = vector.extract_strided_slice %10 {offsets = [128, 0], sizes = [8, 128], strides = [1, 1]} : vector<200x128xf32> to vector<8x128xf32>
    %c0_26 = arith.constant 0 : index
    %c2048 = arith.constant 2048 : index
    %44 = vector.load %arg10[%c0_26, %c2048] : memref<8x3200xf32, #tpu.memory_space<vmem>>, vector<8x128xf32>
    tpu.vector_store %arg10[%c0_26, %c2048], %43 {strides = array<i32>} : memref<8x3200xf32, #tpu.memory_space<vmem>>, vector<8x128xf32>,
    %45 = vector.extract_strided_slice %10 {offsets = [136, 0], sizes = [8, 128], strides = [1, 1]} : vector<200x128xf32> to vector<8x128xf32>
    %c0_27 = arith.constant 0 : index
    %c2176 = arith.constant 2176 : index
    %46 = vector.load %arg10[%c0_27, %c2176] : memref<8x3200xf32, #tpu.memory_space<vmem>>, vector<8x128xf32>
    tpu.vector_store %arg10[%c0_27, %c2176], %45 {strides = array<i32>} : memref<8x3200xf32, #tpu.memory_space<vmem>>, vector<8x128xf32>,
    %47 = vector.extract_strided_slice %10 {offsets = [144, 0], sizes = [8, 128], strides = [1, 1]} : vector<200x128xf32> to vector<8x128xf32>
    %c0_28 = arith.constant 0 : index
    %c2304 = arith.constant 2304 : index
    %48 = vector.load %arg10[%c0_28, %c2304] : memref<8x3200xf32, #tpu.memory_space<vmem>>, vector<8x128xf32>
    tpu.vector_store %arg10[%c0_28, %c2304], %47 {strides = array<i32>} : memref<8x3200xf32, #tpu.memory_space<vmem>>, vector<8x128xf32>,
    %49 = vector.extract_strided_slice %10 {offsets = [152, 0], sizes = [8, 128], strides = [1, 1]} : vector<200x128xf32> to vector<8x128xf32>
    %c0_29 = arith.constant 0 : index
    %c2432 = arith.constant 2432 : index
    %50 = vector.load %arg10[%c0_29, %c2432] : memref<8x3200xf32, #tpu.memory_space<vmem>>, vector<8x128xf32>
    tpu.vector_store %arg10[%c0_29, %c2432], %49 {strides = array<i32>} : memref<8x3200xf32, #tpu.memory_space<vmem>>, vector<8x128xf32>,
    %51 = vector.extract_strided_slice %10 {offsets = [160, 0], sizes = [8, 128], strides = [1, 1]} : vector<200x128xf32> to vector<8x128xf32>
    %c0_30 = arith.constant 0 : index
    %c2560 = arith.constant 2560 : index
    %52 = vector.load %arg10[%c0_30, %c2560] : memref<8x3200xf32, #tpu.memory_space<vmem>>, vector<8x128xf32>
    tpu.vector_store %arg10[%c0_30, %c2560], %51 {strides = array<i32>} : memref<8x3200xf32, #tpu.memory_space<vmem>>, vector<8x128xf32>,
    %53 = vector.extract_strided_slice %10 {offsets = [168, 0], sizes = [8, 128], strides = [1, 1]} : vector<200x128xf32> to vector<8x128xf32>
    %c0_31 = arith.constant 0 : index
    %c2688 = arith.constant 2688 : index
    %54 = vector.load %arg10[%c0_31, %c2688] : memref<8x3200xf32, #tpu.memory_space<vmem>>, vector<8x128xf32>
    tpu.vector_store %arg10[%c0_31, %c2688], %53 {strides = array<i32>} : memref<8x3200xf32, #tpu.memory_space<vmem>>, vector<8x128xf32>,
    %55 = vector.extract_strided_slice %10 {offsets = [176, 0], sizes = [8, 128], strides = [1, 1]} : vector<200x128xf32> to vector<8x128xf32>
    %c0_32 = arith.constant 0 : index
    %c2816 = arith.constant 2816 : index
    %56 = vector.load %arg10[%c0_32, %c2816] : memref<8x3200xf32, #tpu.memory_space<vmem>>, vector<8x128xf32>
    tpu.vector_store %arg10[%c0_32, %c2816], %55 {strides = array<i32>} : memref<8x3200xf32, #tpu.memory_space<vmem>>, vector<8x128xf32>,
    %57 = vector.extract_strided_slice %10 {offsets = [184, 0], sizes = [8, 128], strides = [1, 1]} : vector<200x128xf32> to vector<8x128xf32>
    %c0_33 = arith.constant 0 : index
    %c2944 = arith.constant 2944 : index
    %58 = vector.load %arg10[%c0_33, %c2944] : memref<8x3200xf32, #tpu.memory_space<vmem>>, vector<8x128xf32>
    tpu.vector_store %arg10[%c0_33, %c2944], %57 {strides = array<i32>} : memref<8x3200xf32, #tpu.memory_space<vmem>>, vector<8x128xf32>,
    %59 = vector.extract_strided_slice %10 {offsets = [192, 0], sizes = [8, 128], strides = [1, 1]} : vector<200x128xf32> to vector<8x128xf32>
    %c0_34 = arith.constant 0 : index
    %c3072 = arith.constant 3072 : index
    %60 = vector.load %arg10[%c0_34, %c3072] : memref<8x3200xf32, #tpu.memory_space<vmem>>, vector<8x128xf32>
    tpu.vector_store %arg10[%c0_34, %c3072], %59 {strides = array<i32>} : memref<8x3200xf32, #tpu.memory_space<vmem>>, vector<8x128xf32>,
    %c0_35 = arith.constant 0 : index
    %c0_36 = arith.constant 0 : index
    %61 = vector.load %arg10[%c0_35, %c0_36] : memref<8x3200xf32, #tpu.memory_space<vmem>>, vector<8x3200xf32>
    %62 = arith.truncf %61 : vector<8x3200xf32> to vector<8x3200xbf16>
    %c0_37 = arith.constant 0 : index
    %c0_38 = arith.constant 0 : index
    %63 = vector.load %arg5[%c0_37, %c0_38] : memref<3200x768xbf16, #tpu.memory_space<vmem>>, vector<3200x768xbf16>
    %cst_39 = arith.constant dense<0.000000e+00> : vector<8x768xf32>
    %64 = tpu.matmul %62, %63, %cst_39 {dimension_numbers = #tpu.dot_dimension_numbers<[1], [0], [0], [1], [0, 0, 1, 1], [], []>} : vector<8x3200xbf16>, vector<3200x768xbf16>, vector<8x768xf32> -> vector<8x768xf32>
    %c0_40 = arith.constant 0 : index
    %c0_41 = arith.constant 0 : index
    %65 = vector.load %arg6[%c0_40, %c0_41] : memref<1x768xf32, #tpu.memory_space<vmem>>, vector<1x768xf32>
    %66 = vector.broadcast %65 : vector<1x768xf32> to vector<8x768xf32>
    %67 = arith.addf %64, %66 : vector<8x768xf32>
    %cst_42 = arith.constant 0.000000e+00 : f32
    %68 = vector.broadcast %cst_42 : f32 to vector<8x768xf32>
    %69 = arith.maximumf %67, %68 : vector<8x768xf32>
    %70 = arith.truncf %69 : vector<8x768xf32> to vector<8x768xbf16>
    %c0_43 = arith.constant 0 : index
    %c0_44 = arith.constant 0 : index
    %71 = vector.load %arg7[%c0_43, %c0_44] : memref<768x128xbf16, #tpu.memory_space<vmem>>, vector<768x128xbf16>
    %cst_45 = arith.constant dense<0.000000e+00> : vector<8x128xf32>
    %72 = tpu.matmul %70, %71, %cst_45 {dimension_numbers = #tpu.dot_dimension_numbers<[1], [0], [0], [1], [0, 0, 1, 1], [], []>} : vector<8x768xbf16>, vector<768x128xbf16>, vector<8x128xf32> -> vector<8x128xf32>
    %c0_46 = arith.constant 0 : index
    %c0_47 = arith.constant 0 : index
    %73 = vector.load %arg8[%c0_46, %c0_47] : memref<1x128xf32, #tpu.memory_space<vmem>>, vector<1x128xf32>
    %74 = vector.broadcast %73 : vector<1x128xf32> to vector<8x128xf32>
    %75 = arith.addf %72, %74 : vector<8x128xf32>
    %c0_48 = arith.constant 0 : index
    %c0_49 = arith.constant 0 : index
    %76 = vector.load %arg9[%c0_48, %c0_49] : memref<8x128xf32, #tpu.memory_space<vmem>>, vector<8x128xf32>
    tpu.vector_store %arg9[%c0_48, %c0_49], %75 {strides = array<i32>} : memref<8x128xf32, #tpu.memory_space<vmem>>, vector<8x128xf32>,
    return
  }
  func.func @transform_0(%arg0: i32) -> (i32, i32) {
    %c0_i32 = arith.constant 0 : i32
    %c0_i32_0 = arith.constant 0 : i32
    return %arg0, %c0_i32 : i32, i32
  }
  func.func @transform_1(%arg0: i32) -> (i32, i32) {
    %c0_i32 = arith.constant 0 : i32
    %c0_i32_0 = arith.constant 0 : i32
    %c0_i32_1 = arith.constant 0 : i32
    return %c0_i32, %c0_i32_0 : i32, i32
  }
  func.func @transform_2(%arg0: i32) -> (i32, i32) {
    %c0_i32 = arith.constant 0 : i32
    %c0_i32_0 = arith.constant 0 : i32
    %c0_i32_1 = arith.constant 0 : i32
    return %c0_i32, %c0_i32_0 : i32, i32
  }
  func.func @transform_3(%arg0: i32) -> (i32, i32) {
    %c0_i32 = arith.constant 0 : i32
    %c0_i32_0 = arith.constant 0 : i32
    %c0_i32_1 = arith.constant 0 : i32
    return %c0_i32, %c0_i32_0 : i32, i32
  }
  func.func @transform_4(%arg0: i32) -> (i32, i32) {
    %c0_i32 = arith.constant 0 : i32
    %c0_i32_0 = arith.constant 0 : i32
    %c0_i32_1 = arith.constant 0 : i32
    return %c0_i32, %c0_i32_0 : i32, i32
  }
  func.func @transform_5(%arg0: i32) -> (i32, i32) {
    %c0_i32 = arith.constant 0 : i32
    %c0_i32_0 = arith.constant 0 : i32
    %c0_i32_1 = arith.constant 0 : i32
    return %c0_i32, %c0_i32_0 : i32, i32
  }
  func.func @transform_6(%arg0: i32) -> (i32, i32) {
    %c0_i32 = arith.constant 0 : i32
    %c0_i32_0 = arith.constant 0 : i32
    %c0_i32_1 = arith.constant 0 : i32
    return %c0_i32, %c0_i32_0 : i32, i32
  }
  func.func @transform_7(%arg0: i32) -> (i32, i32) {
    %c0_i32 = arith.constant 0 : i32
    %c0_i32_0 = arith.constant 0 : i32
    %c0_i32_1 = arith.constant 0 : i32
    return %c0_i32, %c0_i32_0 : i32, i32
  }
  func.func @transform_8(%arg0: i32) -> (i32, i32) {
    %c0_i32 = arith.constant 0 : i32
    %c0_i32_0 = arith.constant 0 : i32
    return %arg0, %c0_i32 : i32, i32
  }
}

</mosaic_0001>

<bundles_post_ra>
// kernel: tpu_custom_call.1
= control target key start
LH: loop header
LB: loop body
LE: loop exit
PB: predicated region body
PF: predicated region fallthrough
CT: control target
= control target key end

     0   :  { %13 = vsyncpa [#allocation4], 0  ;;  %s21053_s0 = inlined_call_operand.vmem [shape: bf16[4736,16], index: 0, kind: input, shape index: {}]   ;;  %s21054_s1 = inlined_call_operand.hbm [shape: bf16[200,2368], index: 1, kind: input, shape index: {}]   ;;  %s21055_s2 = inlined_call_operand.hbm [shape: bf16[16,128], index: 2, kind: input, shape index: {}]   ;;  %s21056_s3 = inlined_call_operand.hbm [shape: f32[1,128], index: 3, kind: input, shape index: {}]   ;;  %s21057_s4 = inlined_call_operand.hbm [shape: bf16[3200,768], index: 4, kind: input, shape index: {}]   ;;  %s21058_s5 = inlined_call_operand.hbm [shape: f32[1,768], index: 5, kind: input, shape index: {}]   ;;  %s21059_s6 = inlined_call_operand.hbm [shape: bf16[768,128], index: 6, kind: input, shape index: {}]   ;;  %s21060_s7 = inlined_call_operand.hbm [shape: f32[1,128], index: 7, kind: input, shape index: {}]   ;;  %s21061_s8 = inlined_call_operand.hbm [shape: f32[16,128], index: 8, kind: output, shape index: {}]  }
   0x1   :  { %14 = vsyncpa [#allocation7], 0 }
   0x2   :  { %15 = vsyncpa [#allocation10], 0 }
   0x3   :  { %16 = vsyncpa [#allocation13], 0 }
   0x4   :  { %17 = vsyncpa [#allocation5], 0 }
   0x5   :  { %19 = vsyncpa [#allocation5 + $0x1], 0  ;;  %s19805_s27 = smov 0   ;;  %s19807_s28 = smov 0  }
   0x6   :  { %s19809_s29 = smov 0   ;;  %s19811_s30 = smov 0  }
   0x7 LB: > { %s19826_s9 = sadd.s32 4294967295, %s19741_s30   ;;  %s14244_s10 = sadd.s32 4294967294, %s19741_s30   ;;  %s19741_s30 = sphi %s19811_s30, %s21090_s30   ;;  %s19737_s29 = sphi %s19809_s29, %s21089_s29   ;;  %s19733_s28 = sphi %s19807_s28, %s21088_s28   ;;  %s19729_s27 = sphi %s19805_s27, %s21087_s27  }
   0x8   : > { %s19830_s11 = sadd.s32 1, %s19741_s30   ;;  %s205_s12 = sadd.s32 1, %s19737_s29 }
   0x9   : > { %s202_s13 = ssub.s32 %s19741_s30, %s19830_s11  ;;  %p215_p0 = scmp.ne.s32.totalorder %s19737_s29, %s19733_s28 }
   0xa   : > { %p203_p1 = scmp.eq.s32.totalorder %s202_s13, 0  ;;  %p216_p2 = scmp.eq.s32.totalorder %s19826_s9, 1 }
   0xb   : > { %p221_p3 = scmp.ne.s32.totalorder %s19733_s28, %s19729_s27  ;;  %p222_p4 = scmp.eq.s32.totalorder %s14244_s10, 1 }
   0xc   : > { %s19841_s14 = scalar_select %p203_p1, %s19737_s29, %s205_s12  }
   0xd   : > { %p19843_p5 = por %p216_p2, %p215_p0  ;;  %p19847_p6 = por %p222_p4, %p221_p3 }
   0xe   : > { %21067 = sst [smem:[#allocation21_spill]] %s19841_s14  ;;  %p14245_p7 = scmp.ge.s32.totalorder %s19741_s30, 1 }
   0xf   : > { %s21068_s15 = scalar_select %p19843_p5, 1, 0 }
  0x10   : > { %s21069_s16 = scalar_select %p19847_p6, 1, 0 }
  0x11   : > { %p229_p8 = scmp.lt.s32.totalorder %s19741_s30, 3  ;;  %p21064_p9 = scmp.eq.s32.totalorder %s19826_s9, 0 }
  0x12   : > { %s19743_s18 = smov [#allocation6]   ;;  %s19744_s21 = smov [#allocation9]  }
  0x13   : > { %p19854_p10 = pnand %p14245_p7, %p229_p8  ;;  %s254_s19 = sshll.u32 %s19743_s18, 4  ;;  %s255_s19 = int_to_ptr.vmem [resolvable:$true] %s254_s19 }
  0x14   : > { %s278_s22 = sshll.u32 %s19744_s21, 4  ;;  %s19494_s24 = scalar_lea.vmem %s255_s19, 128  ;;  %s279_s22 = int_to_ptr.vmem [resolvable:$true] %s278_s22 }
  0x15   : > { %s21070_s17 = scalar_select %p19854_p10, 1, 0 }
  0x16   : > { %p17035_p11 = pneg %p19854_p10  ;;  %p19495_p0 = scmp.ne.s32.totalorder %s255_s19, %s19494_s24 }
  0x17   : > { %p19502_p3 = scmp.lt.s32.totalorder %s255_s19, %s255_s19  ;;  %p19503_p4 = scmp.lt.s32.totalorder %s19494_s24, %s19494_s24 }
  0x18   : > { %p19862_p12 = pnand %p21064_p9, %p17035_p11 }
  0x19   : > { %p19504_p7 = por %p19503_p4, %p19502_p3 }
  0x1a   : > { %p19868_p13 = pneg %p19862_p12 }
  0x1c   : > { %p19497_p1 = pnand %p19495_p0, %p19868_p13 }
  0x1e   : > { %p19498_p2 = pneg %p19497_p1 }
  0x20   : > { %p19505_p8 = pnand %p19504_p7, %p19498_p2 }
  0x22   : > { %19508 = shalt.err (!%p19505_p8)
}
  0x23   : > { %s21062_s25 = smov 64   ;;  %s21063_s26 = smov 4  }
  0x24   : > { %17041 = dma.hbm_to_vmem [thread:$0]  (!%p19862_p12), %s21055_s2, 128, %s255_s19, [#allocation7], %s21062_s25, %s21062_s25, %s21063_s26  }
  0x25   : > { %s19520_s13 = scalar_lea.vmem %s279_s22, 153600  ;;  %p19528_p3 = scmp.lt.s32.totalorder %s279_s22, %s279_s22 }
  0x26   : > { %p19521_p11 = scmp.ne.s32.totalorder %s279_s22, %s19520_s13  ;;  %p19529_p2 = scmp.lt.s32.totalorder %s19520_s13, %s19520_s13 }
  0x28   : > { %p19523_p0 = pnand %p19521_p11, %p19868_p13  ;;  %p19530_p4 = por %p19529_p2, %p19528_p3 }
  0x2a   : > { %p19524_p1 = pneg %p19523_p0 }
  0x2c   : > { %p19531_p7 = pnand %p19530_p4, %p19524_p1 }
  0x2e   : > { %19534 = shalt.err (!%p19531_p7)
}
  0x2f   : > { %s19747_s18 = smov 384   ;;  %s19748_s21 = smov 24  }
  0x30   : > { %17047 = dma.hbm_to_vmem [thread:$0]  (!%p19862_p12), %s21057_s4, 153600, %s279_s22, [#allocation10], %s19747_s18, %s19747_s18, %s19748_s21  }
  0x31   : > { %s19749_s19 = smov [#allocation12]   ;;  %s19750_s12 = smov [#allocation3]  }
  0x32   : > { %s302_s10 = sshll.u32 %s19749_s19, 4  ;;  %s241_s25 = sshll.u32 %s19750_s12, 4  ;;  %s303_s10 = int_to_ptr.vmem [resolvable:$true] %s302_s10  ;;  %s242_s25 = int_to_ptr.vmem [resolvable:$true] %s241_s25 }
  0x33   : > { %s19546_s26 = scalar_lea.vmem %s303_s10, 6144  ;;  %p19554_p1 = scmp.lt.s32.totalorder %s303_s10, %s303_s10 }
  0x34   : > { %p19547_p8 = scmp.ne.s32.totalorder %s303_s10, %s19546_s26  ;;  %p19555_p3 = scmp.lt.s32.totalorder %s19546_s26, %s19546_s26 }
  0x36   : > { %p19549_p11 = pnand %p19547_p8, %p19868_p13  ;;  %p19556_p2 = por %p19555_p3, %p19554_p1 }
  0x38   : > { %p19550_p0 = pneg %p19549_p11 }
  0x3a   : > { %p19557_p4 = pnand %p19556_p2, %p19550_p0 }
  0x3c   : > { %19560 = shalt.err (!%p19557_p4)
}
  0x3d   : > { %s21073_s14 = smov 4   ;;  %s21074_s22 = smov 64  }
  0x3e   : > { %17053 = dma.hbm_to_vmem [thread:$0]  (!%p19862_p12), %s21059_s6, 6144, %s303_s10, [#allocation13], %s21074_s22, %s21074_s22, %s21073_s14  }
  0x3f   : > { %s19572_s21 = scalar_lea.vmem %s242_s25, 30400  ;;  %p19580_p9 = scmp.lt.s32.totalorder %s242_s25, %s242_s25 }
  0x40   : > { %p19573_p7 = scmp.ne.s32.totalorder %s242_s25, %s19572_s21  ;;  %p19581_p6 = scmp.lt.s32.totalorder %s19572_s21, %s19572_s21 }
  0x42   : > { %p19575_p8 = pnand %p19573_p7, %p19868_p13  ;;  %p19582_p1 = por %p19581_p6, %p19580_p9 }
  0x44   : > { %p19576_p11 = pneg %p19575_p8 }
  0x46   : > { %p19583_p0 = pnand %p19582_p1, %p19576_p11 }
  0x48   : > { %19586 = shalt.err (!%p19583_p0)
}
  0x49   : > { %s19751_s26 = smov 1216   ;;  %s19752_s24 = smov 76  }
  0x4a   : > { %17038 = dma.hbm_to_vmem [thread:$0]  (!%p19862_p12), %s21054_s1, 30400, %s242_s25, [#allocation4], %s19751_s26, %s19751_s26, %s19752_s24  }
  0x4b   : > { %s19753_s10 = smov [#allocation8]   ;;  %s19754_s22 = smov [#allocation11]  }
  0x4c   : > { %s268_s14 = sshll.u32 %s19753_s10, 4  ;;  %s292_s13 = sshll.u32 %s19754_s22, 4  ;;  %s269_s14 = int_to_ptr.vmem [resolvable:$true] %s268_s14  ;;  %s293_s13 = int_to_ptr.vmem [resolvable:$true] %s292_s13 }
  0x4d   : > { %s19598_s18 = scalar_lea.vmem %s269_s14, 16  ;;  %s19605_s21 = scalar_lea.vmem %s269_s14, 32 }
  0x4e   : > { %p19599_p3 = scmp.ne.s32.totalorder %s269_s14, %s19598_s18  ;;  %p19606_p2 = scmp.lt.s32.totalorder %s269_s14, %s269_s14 }
  0x4f   : > { %p19607_p4 = scmp.lt.s32.totalorder %s19605_s21, %s19598_s18 }
  0x50   : > { %p19601_p6 = pnand %p19599_p3, %p19868_p13 }
  0x51   : > { %p19608_p7 = por %p19607_p4, %p19606_p2 }
  0x52   : > { %p19602_p9 = pneg %p19601_p6 }
  0x54   : > { %p19609_p8 = pnand %p19608_p7, %p19602_p9 }
  0x56   : > { %19612 = shalt.err (!%p19609_p8)
}
  0x57   : > { %17044 = dma.hbm_to_vmem [thread:$0]  (!%p19862_p12), %s21056_s3, 16, %s269_s14, [#allocation7]  }
  0x58   : > { %s19624_s24 = scalar_lea.vmem %s293_s13, 96  ;;  %p19632_p3 = scmp.lt.s32.totalorder %s293_s13, %s293_s13 }
  0x59   : > { %p19625_p11 = scmp.ne.s32.totalorder %s293_s13, %s19624_s24  ;;  %p19633_p6 = scmp.lt.s32.totalorder %s19624_s24, %s19624_s24 }
  0x5b   : > { %p19627_p1 = pnand %p19625_p11, %p19868_p13  ;;  %p19634_p5 = por %p19633_p6, %p19632_p3 }
  0x5d   : > { %p19628_p0 = pneg %p19627_p1 }
  0x5f   : > { %p19635_p10 = pnand %p19634_p5, %p19628_p0 }
  0x61   : > { %19638 = shalt.err (!%p19635_p10)
}
  0x62   : > { %17050 = dma.hbm_to_vmem [thread:$0]  (!%p19862_p12), %s21058_s5, 96, %s293_s13, [#allocation10]  }
  0x63   : > { %s19755_s10 = smov [#allocation14]  }
  0x64   : > { %s316_s22 = sshll.u32 %s19755_s10, 4  ;;  %s317_s22 = int_to_ptr.vmem [resolvable:$true] %s316_s22 }
  0x65   : > { %s19650_s14 = scalar_lea.vmem %s317_s22, 16  ;;  %s19657_s18 = scalar_lea.vmem %s317_s22, 32 }
  0x66   : > { %p19651_p9 = scmp.ne.s32.totalorder %s317_s22, %s19650_s14  ;;  %p19658_p7 = scmp.lt.s32.totalorder %s317_s22, %s317_s22 }
  0x67   : > { %p19659_p8 = scmp.lt.s32.totalorder %s19657_s18, %s19650_s14 }
  0x68   : > { %p19653_p2 = pnand %p19651_p9, %p19868_p13 }
  0x69   : > { %p19660_p5 = por %p19659_p8, %p19658_p7 }
  0x6a   : > { %p19654_p4 = pneg %p19653_p2 }
  0x6c   : > { %p19661_p10 = pnand %p19660_p5, %p19654_p4 }
  0x6e   : > { %19664 = shalt.err (!%p19661_p10)
}
  0x6f   : > { %17056 = dma.hbm_to_vmem [thread:$0]  (!%p19862_p12), %s21060_s7, 16, %s317_s22, [#allocation13]  }
  0x70   : > { %p21075_p11 = scmp.ne.s32.totalorder %s21070_s17, 0 }
  0x71   : > { %p21076_p1 = scmp.eq.s32.totalorder (!%p21075_p11), %s19826_s9, 0 }
  0x72   : > { %338 = sbr.rel (%p21075_p11) target bundleno = 2695 (0xa87), region = 52 }
  0x77   : > { %19708 = dma.done.wait (%p21076_p1), [#allocation4], 30400   ;;  %p21077_p13 = pmov %p21076_p1 }
  0x78   : > { %p21078_p0 = pmov %p21076_p1 }
  0x79   : > { %19710 = vsyncadd (%p21077_p13), [#allocation4], 4294936896 }
  0x7a   : > { %19712 = dma.done.wait (%p21078_p0), [#allocation7], 144   ;;  %p21079_p3 = pmov %p21078_p0 }
  0x7b   : > { %p21080_p6 = pmov %p21078_p0 }
  0x7c   : > { %19714 = vsyncadd (%p21079_p3), [#allocation7], 4294967152 }
  0x7d   : > { %19716 = dma.done.wait (%p21080_p6), [#allocation10], 153696   ;;  %p21081_p12 = pmov %p21078_p0 }
  0x7e   : > { %p21082_p9 = pmov %p21078_p0 }
  0x7f   : > { %19718 = vsyncadd (%p21081_p12), [#allocation10], 4294813600 }
  0x80   : > { %19720 = dma.done.wait (%p21082_p9), [#allocation13], 6160   ;;  %p21083_p2 = pmov %p21078_p0 }
  0x81   : > { %s396_s17 = smul.u32 296, %s19826_s9  ;;  %v17156_v30 = vld [vmem:[#allocation3] ss:$76 sps:$4 sm:$0xff]   ;;  %v17158_v33 = vld [vmem:[#allocation3 + $0x4] ss:$76 sps:$4 sm:$0xff]   ;;  %vm19757_vm0 = vmmov 0  }
  0x82   : > { %19722 = vsyncadd (%p21083_p2), [#allocation13], 4294961136  ;;  %v17159_v34 = vld [vmem:[#allocation3 + $0x8] ss:$76 sps:$4 sm:$0xff]   ;;  %v17161_v35 = vld [vmem:[#allocation3 + $0xc] ss:$76 sps:$4 sm:$0xff]   ;;  %3115 = vmatprep.mubr.bf16.mxu0 %v17158_v33 }
  0x83   : > { %p397_p4 = scmp.lt.s32.totalorder %s396_s17, 591  ;;  %3251 = vmatprep.mubr.bf16.mxu1 %v17161_v35  ;;  %v17164_v38 = vld [vmem:[#allocation3 + $0x9c] ss:$76 sps:$4 sm:$0xff]   ;;  %v17166_v39 = vld [vmem:[#allocation3 + $0xa4] ss:$76 sps:$4 sm:$0xff]   ;;  %vm3043_vm1 = vcmask 523264  }
  0x84   : > { %v17168_v40 = vld [vmem:[#allocation3 + $0x98] ss:$76 sps:$4 sm:$0xff]   ;;  %v17169_v41 = vld [vmem:[#allocation3 + $0xa0] ss:$76 sps:$4 sm:$0xff]   ;;  %v17174_v45 = vld [vmem:[#allocation3 + $0x13c] ss:$76 sps:$4 sm:$0xff]  }
  0x85   : > { %s21092_s17 = smov (!%p397_p4, %s396_s17), 591  ;;  %v17172_v44 = vld [vmem:[#allocation3 + $0x134] ss:$76 sps:$4 sm:$0xff]   ;;  %v17176_v46 = vld [vmem:[#allocation3 + $0x130] ss:$76 sps:$4 sm:$0xff]   ;;  %vm4471_vm2 = vcmask 130048  }
  0x86   : > { %s14263_s20 = sshll.u32 %s21092_s17, 2  ;;  %v17177_v47 = vld [vmem:[#allocation3 + $0x138] ss:$76 sps:$4 sm:$0xff]   ;;  %v17180_v51 = vld [vmem:[#allocation3 + $0x1d4] ss:$76 sps:$4 sm:$0xff]   ;;  %s393_s24 = sand.u32 1, %s19733_s28  }
  0x87   : > { %s19949_s26 = scalar_lea.vmem %s21053_s0, %s14263_s20  ;;  %v17178_v50 = vld [vmem:[#allocation3 + $0x1cc] ss:$76 sps:$4 sm:$0xff]   ;;  %v17182_v52 = vld [vmem:[#allocation3 + $0x1c8] ss:$76 sps:$4 sm:$0xff]   ;;  %v17183_v55 = vld [vmem:[#allocation3 + $0x1d0] ss:$76 sps:$4 sm:$0xff]  }
  0x88   : > { %v17124_v0 = vld [vmem:[%s19949_s26 + $0x78] sm:$0xff]   ;;  %v17128_v4 = vld [vmem:[%s19949_s26 + $0x70] sm:$0xff]   ;;  %v17132_v8 = vld [vmem:[%s19949_s26 + $0x68] sm:$0xff]   ;;  %s14262_s19 = sshll.u32 %s393_s24, 3  ;;  %s15937_s12 = sshll.u32 %s19826_s9, 7 }
  0x89   : > { %v17125_v1 = vld [vmem:[%s19949_s26 + $0xf8] sm:$0xff]   ;;  %15940 = vmatprep.subr.bf16.mxu0 %v17124_v0  ;;  %v17129_v5 = vld [vmem:[%s19949_s26 + $0xf0] sm:$0xff]   ;;  %v17133_v9 = vld [vmem:[%s19949_s26 + $0xe8] sm:$0xff]   ;;  %s395_s10 = scalar_lea.vmem [#allocation15], %s14262_s19  ;;  %s21018_s21 = scalar_lea.hbm %s21061_s8, %s15937_s12 }
  0x8a   : > { %v17126_v2 = vld [vmem:[%s19949_s26 + $0x38] sm:$0xff]   ;;  %16034 = vmatprep.subr.bf16.mxu1 %v17125_v1  ;;  %v17130_v6 = vld [vmem:[%s19949_s26 + $0x30] sm:$0xff]   ;;  %v17134_v10 = vld [vmem:[%s19949_s26 + $0x28] sm:$0xff]   ;;  %s14116_s22 = sshll.u32 %s395_s10, 4  ;;  %s14103_s25 = scalar_lea.sflag [#allocation5], %s393_s24  ;;  %s14117_s22 = int_to_ptr.vmem [resolvable:$true] %s14116_s22 }
  0x8b   : > { %v17127_v3 = vld [vmem:[%s19949_s26 + $0xb8] sm:$0xff]   ;;  %15941 = vmatpush3.bf16.msra.mxu0 %v17126_v2  ;;  %v17131_v7 = vld [vmem:[%s19949_s26 + $0xb0] sm:$0xff]   ;;  %v17135_v11 = vld [vmem:[%s19949_s26 + $0xa8] sm:$0xff]   ;;  %s19665_s17 = scalar_lea.vmem %s14117_s22, 128  ;;  %p21084_p8 = scmp.ne.s32.totalorder %s21068_s15, 0 }
  0x8c   : > { %16035 = vmatpush3.bf16.msra.mxu1 %v17127_v3  ;;  %15942 = vmatprep.subr.bf16.mxu0 %v17128_v4  ;;  %v17136_v12 = vld [vmem:[%s19949_s26 + $0x60] sm:$0xff]   ;;  %v17140_v16 = vld [vmem:[%s19949_s26 + $0x58] sm:$0xff]   ;;  %v17144_v20 = vld [vmem:[%s19949_s26 + $0x50] sm:$0xff]   ;;  %p19666_p7 = scmp.ne.s32.totalorder %s14117_s22, %s19665_s17  ;;  %s19759_s9 = smov [#allocation15]  }
  0x8d   : > { %16036 = vmatprep.subr.bf16.mxu1 %v17129_v5  ;;  %v17137_v13 = vld [vmem:[%s19949_s26 + $0xe0] sm:$0xff]   ;;  %v17141_v17 = vld [vmem:[%s19949_s26 + $0xd8] sm:$0xff]   ;;  %v17145_v21 = vld [vmem:[%s19949_s26 + $0xd0] sm:$0xff]   ;;  %s19669_s20 = sshll.u32 %s19759_s9, 4  ;;  %s19670_s20 = int_to_ptr.vmem [resolvable:$false] %s19669_s20 }
  0x8e   : > { %v17138_v14 = vld [vmem:[%s19949_s26 + $0x20] sm:$0xff]   ;;  %v17142_v18 = vld [vmem:[%s19949_s26 + $0x18] sm:$0xff]   ;;  %v17146_v22 = vld [vmem:[%s19949_s26 + $0x10] sm:$0xff]   ;;  %p19667_p5 = pnand %p19666_p7, %p21084_p8  ;;  %s19671_s23 = scalar_lea.vmem %s19670_s20, 256 }
  0x8f   : > { %15943 = vmatpush3.bf16.msra.mxu0 %v17130_v6  ;;  %v17139_v15 = vld [vmem:[%s19949_s26 + $0xa0] sm:$0xff]   ;;  %v17143_v19 = vld [vmem:[%s19949_s26 + $0x98] sm:$0xff]   ;;  %v17147_v23 = vld [vmem:[%s19949_s26 + $0x90] sm:$0xff]   ;;  %p19672_p11 = scmp.lt.s32.totalorder %s14117_s22, %s19670_s20  ;;  %p19673_p1 = scmp.lt.s32.totalorder %s19671_s23, %s19665_s17 }
  0x90   : > { %16037 = vmatpush3.bf16.msra.mxu1 %v17131_v7  ;;  %15944 = vmatprep.subr.bf16.mxu0 %v17132_v8  ;;  %v17148_v24 = vld [vmem:[%s19949_s26 + $0x48] sm:$0xff]   ;;  %v17152_v28 = vld [vmem:[%s19949_s26 + $0x40] sm:$0xff]   ;;  %v17162_v36 = vld [vmem:[%s19949_s26 + $0x178] sm:$0xff]   ;;  %p19668_p10 = pneg %p19667_p5 }
  0x91   : > { %16038 = vmatprep.subr.bf16.mxu1 %v17133_v9  ;;  %v17149_v25 = vld [vmem:[%s19949_s26 + $0xc8] sm:$0xff]   ;;  %v17153_v29 = vld [vmem:[%s19949_s26 + $0xc0] sm:$0xff]   ;;  %v17163_v37 = vld [vmem:[%s19949_s26 + $0x138] sm:$0xff]   ;;  %p19674_p13 = por %p19673_p1, %p19672_p11 }
  0x92   : > { %v17150_v26 = vld [vmem:[%s19949_s26 + $0x8] sm:$0xff]   ;;  %v17154_v31 = vld [vmem:[%s19949_s26] sm:$0xff]   ;;  %v17170_v42 = vld [vmem:[%s19949_s26 + $0x170] sm:$0xff]  }
  0x93   : > { %15945 = vmatpush3.bf16.msra.mxu0 %v17134_v10  ;;  %v17151_v27 = vld [vmem:[%s19949_s26 + $0x88] sm:$0xff]   ;;  %v17155_v32 = vld [vmem:[%s19949_s26 + $0x80] sm:$0xff]   ;;  %v17171_v43 = vld [vmem:[%s19949_s26 + $0x130] sm:$0xff]   ;;  %p19675_p0 = pnand %p19674_p13, %p19668_p10 }
  0x94   : > { %16039 = vmatpush3.bf16.msra.mxu1 %v17135_v11  ;;  %15946 = vmatprep.subr.bf16.mxu0 %v17136_v12  ;;  %v17184_v48 = vld [vmem:[%s19949_s26 + $0x168] sm:$0xff]   ;;  %v17196_v53 = vld [vmem:[%s19949_s26 + $0x160] sm:$0xff]   ;;  %v17206_v58 = vld [vmem:[%s19949_s26 + $0x158] sm:$0xff]  }
  0x95   : > { %16040 = vmatprep.subr.bf16.mxu1 %v17137_v13  ;;  %v17185_v49 = vld [vmem:[%s19949_s26 + $0x128] sm:$0xff]   ;;  %v17199_v54 = vld [vmem:[%s19949_s26 + $0x120] sm:$0xff]   ;;  %v17207_v59 = vld [vmem:[%s19949_s26 + $0x118] sm:$0xff]  }
  0x96   : > { %v17186_v56 = vld [vmem:[#allocation3 + $0x264] ss:$76 sps:$4 sm:$0xff]   ;;  %v17188_v57 = vld [vmem:[#allocation3 + $0x26c] ss:$76 sps:$4 sm:$0xff]   ;;  %v17191_v61 = vld [vmem:[#allocation3 + $0x268] ss:$76 sps:$4 sm:$0xff]  }
  0x97   : > { %15947 = vmatpush3.bf16.msra.mxu0 %v17138_v14  ;;  %v17190_v60 = vld [vmem:[#allocation3 + $0x260] ss:$76 sps:$4 sm:$0xff]   ;;  %v17192_v62 = vld [vmem:[#allocation3 + $0x2fc] ss:$76 sps:$4 sm:$0xff]   ;;  %v17194_v63 = vld [vmem:[#allocation3 + $0x304] ss:$76 sps:$4 sm:$0xff]  }
  0x98   : > { %16041 = vmatpush3.bf16.msra.mxu1 %v17139_v15  ;;  %15948 = vmatprep.subr.bf16.mxu0 %v17140_v16  ;;  %v17220_v0 = vld [vmem:[%s19949_s26 + $0x150] sm:$0xff]   ;;  %v17197_v2 = vld [vmem:[#allocation3 + $0x2f8] ss:$76 sps:$4 sm:$0xff]   ;;  %v17198_v3 = vld [vmem:[#allocation3 + $0x300] ss:$76 sps:$4 sm:$0xff]  }
  0x99   : > { %16042 = vmatprep.subr.bf16.mxu1 %v17141_v17  ;;  %v17221_v1 = vld [vmem:[%s19949_s26 + $0x110] sm:$0xff]   ;;  %v17228_v5 = vld [vmem:[%s19949_s26 + $0x1f8] sm:$0xff]   ;;  %v17230_v8 = vld [vmem:[%s19949_s26 + $0x148] sm:$0xff]  }
  0x9a   : > { %v17200_v4 = vld [vmem:[#allocation3 + $0x394] ss:$76 sps:$4 sm:$0xff]   ;;  %v17202_v6 = vld [vmem:[#allocation3 + $0x39c] ss:$76 sps:$4 sm:$0xff]   ;;  %v17205_v13 = vld [vmem:[#allocation3 + $0x398] ss:$76 sps:$4 sm:$0xff]  }
  0x9b   : > { %15949 = vmatpush3.bf16.msra.mxu0 %v17142_v18  ;;  %v17229_v7 = vld [vmem:[%s19949_s26 + $0x1b8] sm:$0xff]   ;;  %v17231_v9 = vld [vmem:[%s19949_s26 + $0x1f0] sm:$0xff]   ;;  %v17236_v10 = vld [vmem:[%s19949_s26 + $0x108] sm:$0xff]  }
  0x9c   : > { %16043 = vmatpush3.bf16.msra.mxu1 %v17143_v19  ;;  %15950 = vmatprep.subr.bf16.mxu0 %v17144_v20  ;;  %v17204_v11 = vld [vmem:[#allocation3 + $0x390] ss:$76 sps:$4 sm:$0xff]   ;;  %v17208_v14 = vld [vmem:[#allocation3 + $0x42c] ss:$76 sps:$4 sm:$0xff]   ;;  %v17210_v15 = vld [vmem:[#allocation3 + $0x434] ss:$76 sps:$4 sm:$0xff]  }
  0x9d   : > { %16044 = vmatprep.subr.bf16.mxu1 %v17145_v21  ;;  %v17237_v12 = vld [vmem:[%s19949_s26 + $0x1b0] sm:$0xff]   ;;  %v17240_v16 = vld [vmem:[%s19949_s26 + $0x1e8] sm:$0xff]   ;;  %v17242_v18 = vld [vmem:[%s19949_s26 + $0x1e0] sm:$0xff]  }
  0x9e   : > { %v17241_v17 = vld [vmem:[%s19949_s26 + $0x1a8] sm:$0xff]   ;;  %v17247_v19 = vld [vmem:[%s19949_s26 + $0x1a0] sm:$0xff]   ;;  %v17250_v21 = vld [vmem:[%s19949_s26 + $0x1d8] sm:$0xff]  }
  0x9f   : > { %15951 = vmatpush3.bf16.msra.mxu0 %v17146_v22  ;;  %v17212_v20 = vld [vmem:[#allocation3 + $0x428] ss:$76 sps:$4 sm:$0xff]   ;;  %v17213_v22 = vld [vmem:[#allocation3 + $0x430] ss:$76 sps:$4 sm:$0xff]  }
  0xa0   : > { %16045 = vmatpush3.bf16.msra.mxu1 %v17147_v23  ;;  %15952 = vmatprep.subr.bf16.mxu0 %v17148_v24  ;;  %v17214_v23 = vld [vmem:[#allocation3 + $0x4c4] ss:$76 sps:$4 sm:$0xff]   ;;  %v17222_v33 = vld [vmem:[#allocation3 + $0x55c] ss:$76 sps:$4 sm:$0xff]  }
  0xa1   : > { %16046 = vmatprep.subr.bf16.mxu1 %v17149_v25  ;;  %v17251_v24 = vld [vmem:[%s19949_s26 + $0x140] sm:$0xff]   ;;  %v17216_v25 = vld [vmem:[#allocation3 + $0x4cc] ss:$76 sps:$4 sm:$0xff]  }
  0xa2   : > { %v17224_v35 = vld [vmem:[#allocation3 + $0x564] ss:$76 sps:$4 sm:$0xff]  }
  0xa3   : > { %15953 = vmatpush3.bf16.msra.mxu0 %v17150_v26  ;;  %v17252_v26 = vld [vmem:[%s19949_s26 + $0x198] sm:$0xff]  }
  0xa4   : > { %16047 = vmatpush3.bf16.msra.mxu1 %v17151_v27  ;;  %15954 = vmatprep.subr.bf16.mxu0 %v17152_v28  ;;  %v17253_v27 = vld [vmem:[%s19949_s26 + $0x100] sm:$0xff]   ;;  %v17254_v28 = vld [vmem:[%s19949_s26 + $0x1d0] sm:$0xff]  }
  0xa5   : > { %16048 = vmatprep.subr.bf16.mxu1 %v17153_v29  ;;  %v17257_v29 = vld [vmem:[%s19949_s26 + $0x190] sm:$0xff]  }
  0xa7   : > { %15955 = vmatpush3.bf16.msra.mxu0 %v17154_v31  ;;  %v17218_v31 = vld [vmem:[#allocation3 + $0x4c0] ss:$76 sps:$4 sm:$0xff]  }
  0xa8   : > { %16049 = vmatpush3.bf16.msra.mxu1 %v17155_v32  ;;  %16128 = vmatprep.subr.bf16.mxu0 %v17162_v36  ;;  %v17219_v32 = vld [vmem:[#allocation3 + $0x4c8] ss:$76 sps:$4 sm:$0xff]   ;;  %v17262_v36 = vld [vmem:[%s19949_s26 + $0x1c0] sm:$0xff]  }
  0xa9   : > { %16222 = vmatprep.subr.bf16.mxu1 %v17228_v5  ;;  %v17277_v5 = vld [vmem:[#allocation3 + $0xb0] ss:$76 sps:$4 sm:$0xff]  }
  0xaa   : > { %3116 = vmatmul.mubr.bf16.vlgmr.msra.gmra.mxu0 %v17156_v30  ;;  %v17260_v30 = vld [vmem:[%s19949_s26 + $0x1c8] sm:$0xff]  }
  0xab   : > { %3252 = vmatmul.mubr.bf16.vlgmr.msra.gmra.mxu1 %v17159_v34  ;;  %16129 = vmatpush3.bf16.msra.mxu0 %v17163_v37  ;;  %v17261_v34 = vld [vmem:[%s19949_s26 + $0x188] sm:$0xff]   ;;  %v17267_v37 = vld [vmem:[%s19949_s26 + $0x278] sm:$0xff]  }
  0xac   : > { %3123 = vmatprep.mubr.bf16.mxu0 %v17164_v38  ;;  %3259 = vmatprep.mubr.bf16.mxu1 %v17166_v39  ;;  %v17266_v38 = vld [vmem:[%s19949_s26 + $0x180] sm:$0xff]  }
  0xad   : > { %16130 = vmatprep.subr.bf16.mxu0 %v17170_v42  ;;  %16223 = vmatpush3.bf16.msra.mxu1 %v17229_v7  ;;  %v17226_v39 = vld [vmem:[#allocation3 + $0x558] ss:$76 sps:$4 sm:$0xff]   ;;  %v17234_v42 = vld [vmem:[#allocation3 + $0x5fc] ss:$76 sps:$4 sm:$0xff]   ;;  %v17343_v7 = vld [vmem:[%s19949_s26 + $0x2b0] sm:$0xff]  }
  0xae   : > { %16224 = vmatprep.subr.bf16.mxu1 %v17231_v9  ;;  %v17348_v9 = vld [vmem:[%s19949_s26 + $0x2e8] sm:$0xff]  }
  0xaf   : > { %16131 = vmatpush3.bf16.msra.mxu0 %v17171_v43  ;;  %v17238_v43 = vld [vmem:[#allocation3 + $0x5f0] ss:$76 sps:$4 sm:$0xff]  }
  0xb0   : > { %16132 = vmatprep.subr.bf16.mxu0 %v17184_v48  ;;  %v940_v48 = vld [vmem:[#allocation3 + $0x728] sm:$0xff] }
  0xb1   : > { %16225 = vmatpush3.bf16.msra.mxu1 %v17237_v12  ;;  %v17349_v12 = vld [vmem:[%s19949_s26 + $0x2a8] sm:$0xff]  }
  0xb2   : > { %3124 = vmatmul.mubr.bf16.gmra.mxu0 %v17168_v40  ;;  %16226 = vmatprep.subr.bf16.mxu1 %v17240_v16  ;;  %v17227_v40 = vld [vmem:[#allocation3 + $0x560] ss:$76 sps:$4 sm:$0xff]   ;;  %v17314_v16 = vld [vmem:[%s19949_s26 + $0x258] sm:$0xff]  }
  0xb3   : > { %3260 = vmatmul.mubr.bf16.gmra.mxu1 %v17169_v41  ;;  %3131 = vmatprep.mubr.bf16.mxu0 %v17172_v44  ;;  %v17232_v41 = vld [vmem:[#allocation3 + $0x5f4] ss:$76 sps:$4 sm:$0xff]   ;;  %v17239_v44 = vld [vmem:[#allocation3 + $0x5f8] ss:$76 sps:$4 sm:$0xff]  }
  0xb4   : > { %3267 = vmatprep.mubr.bf16.mxu1 %v17174_v45  ;;  %16133 = vmatpush3.bf16.msra.mxu0 %v17185_v49  ;;  %v17243_v45 = vld [vmem:[#allocation3 + $0x68c] ss:$76 sps:$4 sm:$0xff]   ;;  %v17248_v49 = vld [vmem:[#allocation3 + $0x688] ss:$76 sps:$4 sm:$0xff]  }
  0xb5   : > { %16134 = vmatprep.subr.bf16.mxu0 %v17196_v53  ;;  %16227 = vmatpush3.bf16.msra.mxu1 %v17241_v17  ;;  %v17285_v17 = vld [vmem:[#allocation3 + $0x148] ss:$76 sps:$4 sm:$0xff]  }
  0xb6   : > { %16228 = vmatprep.subr.bf16.mxu1 %v17242_v18  ;;  %v17286_v18 = vld [vmem:[#allocation3 + $0x1dc] ss:$76 sps:$4 sm:$0xff]  }
  0xb8   : > { %16135 = vmatpush3.bf16.msra.mxu0 %v17199_v54  ;;  %v14494_v54 = vcombine.low %v940_v48, %v940_v48 }
  0xb9   : > { %16136 = vmatprep.subr.bf16.mxu0 %v17206_v58  ;;  %16229 = vmatpush3.bf16.msra.mxu1 %v17247_v19  ;;  %v17268_v58 = vld [vmem:[#allocation3 + $0x18] ss:$76 sps:$4 sm:$0xff]  }
  0xba   : > { %3132 = vmatmul.mubr.bf16.gmra.mxu0 %v17176_v46  ;;  %16230 = vmatprep.subr.bf16.mxu1 %v17250_v21  ;;  %v17245_v46 = vld [vmem:[#allocation3 + $0x694] ss:$76 sps:$4 sm:$0xff]   ;;  %v17289_v21 = vld [vmem:[#allocation3 + $0x1e4] ss:$76 sps:$4 sm:$0xff]  }
  0xbb   : > { %3268 = vmatmul.mubr.bf16.gmra.mxu1 %v17177_v47  ;;  %3139 = vmatprep.mubr.bf16.mxu0 %v17178_v50  ;;  %v939_v47 = vld [vmem:[#allocation3 + $0x720] sm:$0xff]  ;;  %v17249_v50 = vld [vmem:[#allocation3 + $0x690] ss:$76 sps:$4 sm:$0xff]  }
  0xbc   : > { %3275 = vmatprep.mubr.bf16.mxu1 %v17180_v51  ;;  %16137 = vmatpush3.bf16.msra.mxu0 %v17207_v59  ;;  %v14493_v51 = vcombine.high %v939_v47, %v939_v47  ;;  %v14492_v53 = vcombine.low %v939_v47, %v939_v47  ;;  %v17271_v59 = vld [vmem:[%s19949_s26 + $0x238] sm:$0xff]   ;;  %v17353_v19 = vld [vmem:[%s19949_s26 + $0x2a0] sm:$0xff]  }
  0xbd   : > { %16138 = vmatprep.subr.bf16.mxu0 %v17220_v0  ;;  %16231 = vmatpush3.bf16.msra.mxu1 %v17252_v26  ;;  %v17337_v0 = vld [vmem:[%s19949_s26 + $0x2b8] sm:$0xff]   ;;  %v17329_v26 = vld [vmem:[%s19949_s26 + $0x210] sm:$0xff]  }
  0xbe   : > { %16232 = vmatprep.subr.bf16.mxu1 %v17254_v28  ;;  %v17338_v28 = vld [vmem:[%s19949_s26 + $0x248] sm:$0xff]   ;;  %v17308_v47 = vld [vmem:[#allocation3 + $0x3a4] ss:$76 sps:$4 sm:$0xff]  }
  0xc0   : > { %16139 = vmatpush3.bf16.msra.mxu0 %v17221_v1  ;;  %v17339_v1 = vld [vmem:[%s19949_s26 + $0x2f0] sm:$0xff]  }
  0xc1   : > { %16140 = vmatprep.subr.bf16.mxu0 %v17230_v8  ;;  %16233 = vmatpush3.bf16.msra.mxu1 %v17257_v29  ;;  %v17283_v8 = vld [vmem:[#allocation3 + $0x14c] ss:$76 sps:$4 sm:$0xff]  }
  0xc2   : > { %3140 = vmatmul.mubr.bf16.gmra.mxu0 %v17182_v52  ;;  %16234 = vmatprep.subr.bf16.mxu1 %v17260_v30  ;;  %v14495_v52 = vcombine.high %v940_v48, %v940_v48  ;;  %v17291_v29 = vld [vmem:[#allocation3 + $0x1e0] ss:$76 sps:$4 sm:$0xff]  }
  0xc3   : > { %3276 = vmatmul.mubr.bf16.gmra.mxu1 %v17183_v55  ;;  %3147 = vmatprep.mubr.bf16.mxu0 %v17186_v56  ;;  %v17265_v55 = vld [vmem:[#allocation3 + $0x14] ss:$76 sps:$4 sm:$0xff]   ;;  %v17270_v56 = vld [vmem:[#allocation3 + $0x1c] ss:$76 sps:$4 sm:$0xff]   ;;  %v17311_v48 = vld [vmem:[#allocation3 + $0x3ac] ss:$76 sps:$4 sm:$0xff]  }
  0xc4   : > { %3283 = vmatprep.mubr.bf16.mxu1 %v17188_v57  ;;  %16141 = vmatpush3.bf16.msra.mxu0 %v17236_v10  ;;  %v17263_v57 = vld [vmem:[#allocation3 + $0x10] ss:$76 sps:$4 sm:$0xff]   ;;  %v17293_v10 = vld [vmem:[%s19949_s26 + $0x228] sm:$0xff]   ;;  %v17294_v30 = vld [vmem:[#allocation3 + $0x274] ss:$76 sps:$4 sm:$0xff]  }
  0xc5   : > { %16142 = vmatprep.subr.bf16.mxu0 %v17251_v24  ;;  %16235 = vmatpush3.bf16.msra.mxu1 %v17261_v34  ;;  %v17360_v24 = vld [vmem:[%s19949_s26 + $0x298] sm:$0xff]   ;;  %v17342_v34 = vld [vmem:[%s19949_s26 + $0x208] sm:$0xff]  }
  0xc6   : > { %16236 = vmatprep.subr.bf16.mxu1 %v17262_v36  ;;  %v17369_v36 = vld [vmem:[%s19949_s26 + $0x288] sm:$0xff]  }
  0xc8   : > { %16143 = vmatpush3.bf16.msra.mxu0 %v17253_v27  ;;  %v17288_v27 = vld [vmem:[#allocation3 + $0x1d8] ss:$76 sps:$4 sm:$0xff]  }
  0xc9   : > { %16316 = vmatprep.subr.bf16.mxu0 %v17267_v37  ;;  %16237 = vmatpush3.bf16.msra.mxu1 %v17266_v38  ;;  %v17370_v37 = vld [vmem:[%s19949_s26 + $0x2c0] sm:$0xff]  }
  0xca   : > { %3148 = vmatmul.mubr.bf16.gmra.mxu0 %v17190_v60  ;;  %v17272_v60 = vld [vmem:[#allocation3 + $0xac] ss:$76 sps:$4 sm:$0xff]   ;;  %v17361_v38 = vld [vmem:[%s19949_s26 + $0x200] sm:$0xff]  }
  0xcb   : > { %3284 = vmatmul.mubr.bf16.gmra.mxu1 %v17191_v61  ;;  %3155 = vmatprep.mubr.bf16.mxu0 %v17192_v62  ;;  %v17336_v61 = vld [vmem:[%s19949_s26 + $0x2f8] sm:$0xff]   ;;  %v17275_v62 = vld [vmem:[#allocation3 + $0xb4] ss:$76 sps:$4 sm:$0xff]  }
  0xcc   : > { %3291 = vmatprep.mubr.bf16.mxu1 %v17194_v63  ;;  %v17278_v63 = vld [vmem:[%s19949_s26 + $0x270] sm:$0xff]   ;;  %16410 = vmatprep.subr.bf16.mxu1 %v17336_v61 }
  0xcd   : > { %v17333_v61 = vld [vmem:[#allocation3 + $0x574] ss:$76 sps:$4 sm:$0xff]  }
  0xd2   : > { %3156 = vmatmul.mubr.bf16.gmra.mxu0 %v17197_v2  ;;  %v17279_v2 = vld [vmem:[%s19949_s26 + $0x230] sm:$0xff]  }
  0xd3   : > { %3292 = vmatmul.mubr.bf16.gmra.mxu1 %v17198_v3  ;;  %3163 = vmatprep.mubr.bf16.mxu0 %v17200_v4  ;;  %v17274_v3 = vld [vmem:[#allocation3 + $0xa8] ss:$76 sps:$4 sm:$0xff]  }
  0xd4   : > { %3299 = vmatprep.mubr.bf16.mxu1 %v17202_v6  ;;  %v17292_v4 = vld [vmem:[%s19949_s26 + $0x268] sm:$0xff]   ;;  %v17280_v6 = vld [vmem:[#allocation3 + $0x144] ss:$76 sps:$4 sm:$0xff]  }
  0xda   : > { %3164 = vmatmul.mubr.bf16.gmra.mxu0 %v17204_v11  ;;  %v17302_v11 = vld [vmem:[%s19949_s26 + $0x260] sm:$0xff]  }
  0xdb   : > { %3300 = vmatmul.mubr.bf16.gmra.mxu1 %v17205_v13  ;;  %3171 = vmatprep.mubr.bf16.mxu0 %v17208_v14  ;;  %v17350_v13 = vld [vmem:[%s19949_s26 + $0x2e0] sm:$0xff]  }
  0xdc   : > { %3307 = vmatprep.mubr.bf16.mxu1 %v17210_v15  ;;  %v17282_v14 = vld [vmem:[#allocation3 + $0x140] ss:$76 sps:$4 sm:$0xff]  }
  0xdd   : > { %v17304_v15 = vld [vmem:[%s19949_s26 + $0x220] sm:$0xff]  }
  0xe2   : > { %3172 = vmatmul.mubr.bf16.gmra.mxu0 %v17212_v20  ;;  %v17358_v20 = vld [vmem:[%s19949_s26 + $0x2d8] sm:$0xff]  }
  0xe3   : > { %3308 = vmatmul.mubr.bf16.gmra.mxu1 %v17213_v22  ;;  %3179 = vmatprep.mubr.bf16.mxu0 %v17214_v23  ;;  %v17315_v22 = vld [vmem:[%s19949_s26 + $0x218] sm:$0xff]   ;;  %v17327_v23 = vld [vmem:[%s19949_s26 + $0x250] sm:$0xff]  }
  0xe4   : > { %3315 = vmatprep.mubr.bf16.mxu1 %v17216_v25  ;;  %v17362_v25 = vld [vmem:[%s19949_s26 + $0x2d0] sm:$0xff]  }
  0xea   : > { %3180 = vmatmul.mubr.bf16.gmra.mxu0 %v17218_v31  ;;  %v17364_v31 = vld [vmem:[%s19949_s26 + $0x290] sm:$0xff]  }
  0xeb   : > { %3316 = vmatmul.mubr.bf16.gmra.mxu1 %v17219_v32  ;;  %3187 = vmatprep.mubr.bf16.mxu0 %v17222_v33  ;;  %v17368_v32 = vld [vmem:[%s19949_s26 + $0x2c8] sm:$0xff]  }
  0xec   : > { %3323 = vmatprep.mubr.bf16.mxu1 %v17224_v35  ;;  %v17297_v33 = vld [vmem:[#allocation3 + $0x27c] ss:$76 sps:$4 sm:$0xff]   ;;  %v17359_v35 = vld [vmem:[%s19949_s26 + $0x240] sm:$0xff]  }
  0xf2   : > { %3188 = vmatmul.mubr.bf16.gmra.mxu0 %v17226_v39  ;;  %v17374_v39 = vld [vmem:[%s19949_s26 + $0x280] sm:$0xff]  }
  0xf3   : > { %3324 = vmatmul.mubr.bf16.gmra.mxu1 %v17227_v40  ;;  %3195 = vmatprep.mubr.bf16.mxu0 %v17232_v41  ;;  %v17375_v40 = vld [vmem:[%s19949_s26 + $0x378] sm:$0xff]  }
  0xf4   : > { %3331 = vmatprep.mubr.bf16.mxu1 %v17234_v42  ;;  %v17296_v41 = vld [vmem:[#allocation3 + $0x270] ss:$76 sps:$4 sm:$0xff]   ;;  %v17299_v42 = vld [vmem:[#allocation3 + $0x278] ss:$76 sps:$4 sm:$0xff]  }
  0xfa   : > { %3196 = vmatmul.mubr.bf16.gmra.mxu0 %v17238_v43  ;;  %v17300_v43 = vld [vmem:[#allocation3 + $0x30c] ss:$76 sps:$4 sm:$0xff]  }
  0xfb   : > { %3332 = vmatmul.mubr.bf16.gmra.mxu1 %v17239_v44  ;;  %3203 = vmatprep.mubr.bf16.mxu0 %v17243_v45  ;;  %v17305_v44 = vld [vmem:[#allocation3 + $0x314] ss:$76 sps:$4 sm:$0xff]  }
  0xfc   : > { %3339 = vmatprep.mubr.bf16.mxu1 %v17245_v46  ;;  %v17303_v45 = vld [vmem:[#allocation3 + $0x308] ss:$76 sps:$4 sm:$0xff]   ;;  %v17307_v46 = vld [vmem:[#allocation3 + $0x310] ss:$76 sps:$4 sm:$0xff]  }
 0x102   : > { %3204 = vmatmul.mubr.bf16.gmra.mxu0 %v17248_v49  ;;  %v17310_v49 = vld [vmem:[#allocation3 + $0x3a0] ss:$76 sps:$4 sm:$0xff]  }
 0x103   : > { %3340 = vmatmul.mubr.bf16.gmra.mxu1 %v17249_v50  ;;  %3211 = vmatprep.mubr.bf16.mxu0 %v14493_v51  ;;  %v17313_v50 = vld [vmem:[#allocation3 + $0x3a8] ss:$76 sps:$4 sm:$0xff]  }
 0x104   : > { %3347 = vmatprep.mubr.bf16.mxu1 %v14495_v52  ;;  %v17316_v51 = vld [vmem:[#allocation3 + $0x43c] ss:$76 sps:$4 sm:$0xff]   ;;  %v17319_v52 = vld [vmem:[#allocation3 + $0x444] ss:$76 sps:$4 sm:$0xff]  }
 0x10a   : > { %3212 = vmatmul.mubr.bf16.gmra.mxu0 %v14492_v53  ;;  %v17318_v53 = vld [vmem:[#allocation3 + $0x438] ss:$76 sps:$4 sm:$0xff]  }
 0x10b   : > { %3348 = vmatmul.mubr.bf16.gmra.mxu1 %v14494_v54  ;;  %3387 = vmatprep.mubr.bf16.mxu0 %v17265_v55  ;;  %v17321_v54 = vld [vmem:[#allocation3 + $0x440] ss:$76 sps:$4 sm:$0xff]  }
 0x10c   : > { %3523 = vmatprep.mubr.bf16.mxu1 %v17270_v56  ;;  %v17322_v55 = vld [vmem:[#allocation3 + $0x4d4] ss:$76 sps:$4 sm:$0xff]   ;;  %v17325_v56 = vld [vmem:[#allocation3 + $0x4dc] ss:$76 sps:$4 sm:$0xff]  }
 0x112   : > { %3388 = vmatmul.mubr.bf16.vlgmr.msra.gmra.mxu0 %v17263_v57  ;;  %v17324_v57 = vld [vmem:[#allocation3 + $0x4d0] ss:$76 sps:$4 sm:$0xff]  }
 0x113   : > { %16317 = vmatpush3.bf16.msra.mxu0 %v17271_v59  ;;  %3524 = vmatmul.mubr.bf16.vlgmr.msra.gmra.mxu1 %v17268_v58  ;;  %v17328_v58 = vld [vmem:[#allocation3 + $0x4d8] ss:$76 sps:$4 sm:$0xff]  }
 0x114   : > { %3395 = vmatprep.mubr.bf16.mxu0 %v17272_v60  ;;  %3531 = vmatprep.mubr.bf16.mxu1 %v17275_v62  ;;  %v17444_v59 = vld [vmem:[%s19949_s26 + $0x3f8] sm:$0xff]   ;;  %v17332_v62 = vld [vmem:[#allocation3 + $0x568] ss:$76 sps:$4 sm:$0xff]  }
 0x115   : > { %16318 = vmatprep.subr.bf16.mxu0 %v17278_v63  ;;  %16411 = vmatpush3.bf16.msra.mxu1 %v17337_v0  ;;  %v17330_v60 = vld [vmem:[#allocation3 + $0x56c] ss:$76 sps:$4 sm:$0xff]   ;;  %v17335_v63 = vld [vmem:[#allocation3 + $0x570] ss:$76 sps:$4 sm:$0xff]  }
 0x116   : > { %16412 = vmatprep.subr.bf16.mxu1 %v17339_v1  ;;  %v17340_v0 = vld [vmem:[#allocation3 + $0x604] ss:$76 sps:$4 sm:$0xff]   ;;  %v17345_v1 = vld [vmem:[#allocation3 + $0x60c] ss:$76 sps:$4 sm:$0xff]  }
 0x117   : > { %16319 = vmatpush3.bf16.msra.mxu0 %v17279_v2  ;;  %v17344_v2 = vld [vmem:[#allocation3 + $0x600] ss:$76 sps:$4 sm:$0xff]  }
 0x118   : > { %16320 = vmatprep.subr.bf16.mxu0 %v17292_v4  ;;  %v17351_v4 = vld [vmem:[#allocation3 + $0x69c] ss:$76 sps:$4 sm:$0xff]  }
 0x119   : > { %16413 = vmatpush3.bf16.msra.mxu1 %v17343_v7  ;;  %v942_v7 = vld [vmem:[#allocation3 + $0x738] sm:$0xff] }
 0x11a   : > { %3396 = vmatmul.mubr.bf16.gmra.mxu0 %v17274_v3  ;;  %16414 = vmatprep.subr.bf16.mxu1 %v17348_v9  ;;  %v17347_v3 = vld [vmem:[#allocation3 + $0x608] ss:$76 sps:$4 sm:$0xff]   ;;  %v17357_v9 = vld [vmem:[#allocation3 + $0x6a0] ss:$76 sps:$4 sm:$0xff]  }
 0x11b   : > { %3532 = vmatmul.mubr.bf16.gmra.mxu1 %v17277_v5  ;;  %3403 = vmatprep.mubr.bf16.mxu0 %v17280_v6  ;;  %v17355_v5 = vld [vmem:[#allocation3 + $0x6a4] ss:$76 sps:$4 sm:$0xff]  }
 0x11c   : > { %3539 = vmatprep.mubr.bf16.mxu1 %v17283_v8  ;;  %16321 = vmatpush3.bf16.msra.mxu0 %v17293_v10  ;;  %v941_v6 = vld [vmem:[#allocation3 + $0x730] sm:$0xff]  ;;  %v17354_v8 = vld [vmem:[#allocation3 + $0x698] ss:$76 sps:$4 sm:$0xff]  }
 0x11d   : > { %16322 = vmatprep.subr.bf16.mxu0 %v17302_v11  ;;  %16415 = vmatpush3.bf16.msra.mxu1 %v17349_v12  ;;  %v14497_v10 = vcombine.high %v941_v6, %v941_v6  ;;  %v14499_v11 = vcombine.high %v942_v7, %v942_v7 }
 0x11e   : > { %16416 = vmatprep.subr.bf16.mxu1 %v17350_v13 }
 0x120   : > { %16323 = vmatpush3.bf16.msra.mxu0 %v17304_v15 }
 0x121   : > { %16324 = vmatprep.subr.bf16.mxu0 %v17314_v16  ;;  %16417 = vmatpush3.bf16.msra.mxu1 %v17353_v19  ;;  %v14496_v19 = vcombine.low %v941_v6, %v941_v6 }
 0x122   : > { %3404 = vmatmul.mubr.bf16.gmra.mxu0 %v17282_v14  ;;  %16418 = vmatprep.subr.bf16.mxu1 %v17358_v20  ;;  %v17373_v20 = vld [vmem:[#allocation3 + $0x24] ss:$76 sps:$4 sm:$0xff]  }
 0x123   : > { %3540 = vmatmul.mubr.bf16.gmra.mxu1 %v17285_v17  ;;  %3411 = vmatprep.mubr.bf16.mxu0 %v17286_v18 }
 0x124   : > { %3547 = vmatprep.mubr.bf16.mxu1 %v17289_v21  ;;  %16325 = vmatpush3.bf16.msra.mxu0 %v17315_v22  ;;  %v14498_v22 = vcombine.low %v942_v7, %v942_v7  ;;  %v17411_v7 = vld [vmem:[%s19949_s26 + $0x360] sm:$0xff]  }
 0x125   : > { %16326 = vmatprep.subr.bf16.mxu0 %v17327_v23  ;;  %16419 = vmatpush3.bf16.msra.mxu1 %v17360_v24  ;;  %v17378_v23 = vld [vmem:[#allocation3 + $0x2c] ss:$76 sps:$4 sm:$0xff]  }
 0x126   : > { %16420 = vmatprep.subr.bf16.mxu1 %v17362_v25 }
 0x128   : > { %16327 = vmatpush3.bf16.msra.mxu0 %v17329_v26 }
 0x129   : > { %16328 = vmatprep.subr.bf16.mxu0 %v17338_v28  ;;  %16421 = vmatpush3.bf16.msra.mxu1 %v17364_v31 }
 0x12a   : > { %3412 = vmatmul.mubr.bf16.gmra.mxu0 %v17288_v27  ;;  %16422 = vmatprep.subr.bf16.mxu1 %v17368_v32 }
 0x12b   : > { %3548 = vmatmul.mubr.bf16.gmra.mxu1 %v17291_v29  ;;  %3419 = vmatprep.mubr.bf16.mxu0 %v17294_v30 }
 0x12c   : > { %3555 = vmatprep.mubr.bf16.mxu1 %v17297_v33  ;;  %16329 = vmatpush3.bf16.msra.mxu0 %v17342_v34  ;;  %v17371_v33 = vld [vmem:[#allocation3 + $0x20] ss:$76 sps:$4 sm:$0xff]  }
 0x12d   : > { %16330 = vmatprep.subr.bf16.mxu0 %v17359_v35  ;;  %16423 = vmatpush3.bf16.msra.mxu1 %v17369_v36  ;;  %v17376_v36 = vld [vmem:[#allocation3 + $0x28] ss:$76 sps:$4 sm:$0xff]  }
 0x12e   : > { %16424 = vmatprep.subr.bf16.mxu1 %v17370_v37  ;;  %v17379_v37 = vld [vmem:[%s19949_s26 + $0x338] sm:$0xff]  }
 0x130   : > { %16331 = vmatpush3.bf16.msra.mxu0 %v17361_v38 }
 0x131   : > { %16425 = vmatpush3.bf16.msra.mxu1 %v17374_v39  ;;  %16504 = vmatprep.subr.bf16.mxu0 %v17375_v40  ;;  %v17380_v40 = vld [vmem:[#allocation3 + $0xbc] ss:$76 sps:$4 sm:$0xff]  }
 0x132   : > { %3420 = vmatmul.mubr.bf16.gmra.mxu0 %v17296_v41  ;;  %16598 = vmatprep.subr.bf16.mxu1 %v17444_v59  ;;  %v17383_v41 = vld [vmem:[#allocation3 + $0xc4] ss:$76 sps:$4 sm:$0xff]   ;;  %v17456_v59 = vld [vmem:[%s19949_s26 + $0x3e8] sm:$0xff]  }
 0x133   : > { %3556 = vmatmul.mubr.bf16.gmra.mxu1 %v17299_v42  ;;  %3427 = vmatprep.mubr.bf16.mxu0 %v17300_v43 }
 0x134   : > { %3563 = vmatprep.mubr.bf16.mxu1 %v17305_v44 }
 0x13a   : > { %3428 = vmatmul.mubr.bf16.gmra.mxu0 %v17303_v45  ;;  %v17386_v45 = vld [vmem:[%s19949_s26 + $0x370] sm:$0xff]  }
 0x13b   : > { %3564 = vmatmul.mubr.bf16.gmra.mxu1 %v17307_v46  ;;  %3435 = vmatprep.mubr.bf16.mxu0 %v17308_v47 }
 0x13c   : > { %3571 = vmatprep.mubr.bf16.mxu1 %v17311_v48  ;;  %v17387_v48 = vld [vmem:[%s19949_s26 + $0x330] sm:$0xff]  }
 0x142   : > { %3436 = vmatmul.mubr.bf16.gmra.mxu0 %v17310_v49  ;;  %v17445_v49 = vld [vmem:[%s19949_s26 + $0x3b8] sm:$0xff]  }
 0x143   : > { %3572 = vmatmul.mubr.bf16.gmra.mxu1 %v17313_v50  ;;  %3443 = vmatprep.mubr.bf16.mxu0 %v17316_v51 }
 0x144   : > { %3579 = vmatprep.mubr.bf16.mxu1 %v17319_v52  ;;  %v17400_v52 = vld [vmem:[%s19949_s26 + $0x368] sm:$0xff]  }
 0x14a   : > { %3444 = vmatmul.mubr.bf16.gmra.mxu0 %v17318_v53  ;;  %v17447_v53 = vld [vmem:[%s19949_s26 + $0x3f0] sm:$0xff]  }
 0x14b   : > { %3580 = vmatmul.mubr.bf16.gmra.mxu1 %v17321_v54  ;;  %3451 = vmatprep.mubr.bf16.mxu0 %v17322_v55  ;;  %v17452_v55 = vld [vmem:[%s19949_s26 + $0x3b0] sm:$0xff]  }
 0x14c   : > { %3587 = vmatprep.mubr.bf16.mxu1 %v17325_v56 }
 0x152   : > { %3452 = vmatmul.mubr.bf16.gmra.mxu0 %v17324_v57 }
 0x153   : > { %3588 = vmatmul.mubr.bf16.gmra.mxu1 %v17328_v58  ;;  %3459 = vmatprep.mubr.bf16.mxu0 %v17330_v60  ;;  %v17382_v58 = vld [vmem:[#allocation3 + $0xb8] ss:$76 sps:$4 sm:$0xff]  }
 0x154   : > { %3595 = vmatprep.mubr.bf16.mxu1 %v17333_v61 }
 0x15a   : > { %3460 = vmatmul.mubr.bf16.gmra.mxu0 %v17332_v62  ;;  %v17385_v62 = vld [vmem:[#allocation3 + $0xc0] ss:$76 sps:$4 sm:$0xff]  }
 0x15b   : > { %3596 = vmatmul.mubr.bf16.gmra.mxu1 %v17335_v63  ;;  %3467 = vmatprep.mubr.bf16.mxu0 %v17340_v0  ;;  %v17390_v63 = vld [vmem:[#allocation3 + $0x154] ss:$76 sps:$4 sm:$0xff]  }
 0x15c   : > { %3603 = vmatprep.mubr.bf16.mxu1 %v17345_v1 }
 0x162   : > { %3468 = vmatmul.mubr.bf16.gmra.mxu0 %v17344_v2 }
 0x163   : > { %3604 = vmatmul.mubr.bf16.gmra.mxu1 %v17347_v3  ;;  %3475 = vmatprep.mubr.bf16.mxu0 %v17351_v4  ;;  %v17393_v3 = vld [vmem:[#allocation3 + $0x15c] ss:$76 sps:$4 sm:$0xff]  }
 0x164   : > { %3611 = vmatprep.mubr.bf16.mxu1 %v17355_v5  ;;  %v17401_v4 = vld [vmem:[%s19949_s26 + $0x328] sm:$0xff]  }
 0x16a   : > { %v15956_v12 = vpop.f32.mrf.mxu0  ;;  %3476 = vmatmul.mubr.bf16.gmra.mxu0 %v17354_v8 }
 0x16b   : > { %v16050_v13 = vpop.f32.mrf.mxu1  ;;  %3612 = vmatmul.mubr.bf16.gmra.mxu1 %v17357_v9  ;;  %3483 = vmatprep.mubr.bf16.mxu0 %v14497_v10  ;;  %v17457_v10 = vld [vmem:[%s19949_s26 + $0x3a8] sm:$0xff]  }
 0x16c   : > { %v15957_v14 = vpop.f32.mrf.mxu0  ;;  %3619 = vmatprep.mubr.bf16.mxu1 %v14499_v11 }
 0x16d   : > { %v15958_v15 = vadd.f32 %v15957_v14, %v15956_v12  ;;  %v16051_v16 = vpop.f32.mrf.mxu1  ;;  %v17458_v14 = vld [vmem:[%s19949_s26 + $0x3e0] sm:$0xff]  }
 0x16e   : > { %v16052_v17 = vadd.f32 %v16051_v16, %v16050_v13  ;;  %v15959_v18 = vpop.f32.mrf.mxu0  ;;  %v17412_v13 = vld [vmem:[%s19949_s26 + $0x320] sm:$0xff]   ;;  %v17422_v16 = vld [vmem:[%s19949_s26 + $0x358] sm:$0xff]  }
 0x16f   : > { %v16053_v21 = vpop.f32.mrf.mxu1 }
 0x170   : > { %v20049_v24 = vadd.f32 %v16052_v17, %v15958_v15  ;;  %v15960_v25 = vpop.f32.mrf.mxu0  ;;  %v17462_v17 = vld [vmem:[%s19949_s26 + $0x3a0] sm:$0xff]  }
 0x171   : > { %v15961_v26 = vadd.f32 %v15960_v25, %v15959_v18  ;;  %v16054_v27 = vpop.f32.mrf.mxu1  ;;  %v17391_v25 = vld [vmem:[#allocation3 + $0x158] ss:$76 sps:$4 sm:$0xff]  }
 0x172   : > { %v16055_v28 = vadd.f32 %v16054_v27, %v16053_v21  ;;  %v15962_v29 = vpop.f32.mrf.mxu0  ;;  %3484 = vmatmul.mubr.bf16.gmra.mxu0 %v14496_v19  ;;  %v17466_v21 = vld [vmem:[%s19949_s26 + $0x3d8] sm:$0xff]  }
 0x173   : > { %v16056_v30 = vpop.f32.mrf.mxu1  ;;  %3620 = vmatmul.mubr.bf16.gmra.mxu1 %v14498_v22  ;;  %3659 = vmatprep.mubr.bf16.mxu0 %v17373_v20  ;;  %v17388_v20 = vld [vmem:[#allocation3 + $0x150] ss:$76 sps:$4 sm:$0xff]  }
 0x174   : > { %v20051_v31 = vadd.f32 %v16055_v28, %v15961_v26  ;;  %v15963_v32 = vpop.f32.mrf.mxu0  ;;  %3795 = vmatprep.mubr.bf16.mxu1 %v17378_v23  ;;  %v17396_v26 = vld [vmem:[#allocation3 + $0x1ec] ss:$76 sps:$4 sm:$0xff]  }
 0x175   : > { %v15964_v34 = vadd.f32 %v15963_v32, %v15962_v29  ;;  %v16057_v35 = vpop.f32.mrf.mxu1  ;;  %v17399_v29 = vld [vmem:[#allocation3 + $0x1f4] ss:$76 sps:$4 sm:$0xff]  }
 0x176   : > { %v16058_v38 = vadd.f32 %v16057_v35, %v16056_v30  ;;  %v15965_v39 = vpop.f32.mrf.mxu0  ;;  %v17423_v30 = vld [vmem:[%s19949_s26 + $0x318] sm:$0xff]   ;;  %v17436_v35 = vld [vmem:[%s19949_s26 + $0x350] sm:$0xff]  }
 0x177   : > { %v16059_v42 = vpop.f32.mrf.mxu1 }
 0x178   : > { %v20054_v43 = vadd.f32 %v16058_v38, %v15964_v34  ;;  %v15966_v44 = vpop.f32.mrf.mxu0  ;;  %v17468_v38 = vld [vmem:[%s19949_s26 + $0x398] sm:$0xff]  }
 0x179   : > { %v15967_v46 = vadd.f32 %v15966_v44, %v15965_v39  ;;  %v16060_v47 = vpop.f32.mrf.mxu1 }
 0x17a   : > { %v16061_v50 = vadd.f32 %v16060_v47, %v16059_v42  ;;  %v15968_v51 = vpop.f32.mrf.mxu0  ;;  %3660 = vmatmul.mubr.bf16.vlgmr.msra.gmra.mxu0 %v17371_v33  ;;  %v17470_v42 = vld [vmem:[%s19949_s26 + $0x3d0] sm:$0xff]  }
 0x17b   : > { %v16062_v54 = vpop.f32.mrf.mxu1  ;;  %16505 = vmatpush3.bf16.msra.mxu0 %v17379_v37  ;;  %3796 = vmatmul.mubr.bf16.vlgmr.msra.gmra.mxu1 %v17376_v36 }
 0x17c   : > { %v20062_v56 = vadd.f32 %v16061_v50, %v15967_v46  ;;  %v15969_v57 = vpop.f32.mrf.mxu0  ;;  %3667 = vmatprep.mubr.bf16.mxu0 %v17380_v40  ;;  %3803 = vmatprep.mubr.bf16.mxu1 %v17383_v41  ;;  %v17437_v41 = vld [vmem:[%s19949_s26 + $0x310] sm:$0xff]  }
 0x17d   : > { %v15970_v60 = vadd.f32 %v15969_v57, %v15968_v51  ;;  %v16063_v61 = vpop.f32.mrf.mxu1  ;;  %16506 = vmatprep.subr.bf16.mxu0 %v17386_v45  ;;  %16599 = vmatpush3.bf16.msra.mxu1 %v17445_v49  ;;  %v17446_v45 = vld [vmem:[%s19949_s26 + $0x348] sm:$0xff]   ;;  %v17473_v46 = vld [vmem:[%s19949_s26 + $0x390] sm:$0xff]  }
 0x17e   : > { %v16064_v0 = vadd.f32 %v16063_v61, %v16062_v54  ;;  %v15971_v1 = vpop.f32.mrf.mxu0  ;;  %16600 = vmatprep.subr.bf16.mxu1 %v17447_v53  ;;  %v17394_v49 = vld [vmem:[#allocation3 + $0x1e8] ss:$76 sps:$4 sm:$0xff]   ;;  %v17404_v53 = vld [vmem:[#allocation3 + $0x284] ss:$76 sps:$4 sm:$0xff]  }
 0x17f   : > { %v16065_v2 = vpop.f32.mrf.mxu1  ;;  %16507 = vmatpush3.bf16.msra.mxu0 %v17387_v48  ;;  %v17476_v54 = vld [vmem:[%s19949_s26 + $0x3c8] sm:$0xff]  }
 0x180   : > { %v20066_v5 = vadd.f32 %v16064_v0, %v15970_v60  ;;  %v15972_v6 = vpop.f32.mrf.mxu0  ;;  %16508 = vmatprep.subr.bf16.mxu0 %v17400_v52  ;;  %v17397_v52 = vld [vmem:[#allocation3 + $0x1f0] ss:$76 sps:$4 sm:$0xff]  }
 0x181   : > { %v15973_v8 = vadd.f32 %v15972_v6, %v15971_v1  ;;  %v16066_v9 = vpop.f32.mrf.mxu1  ;;  %16601 = vmatpush3.bf16.msra.mxu1 %v17452_v55  ;;  %v17469_v6 = vld [vmem:[%s19949_s26 + $0x300] sm:$0xff]  }
 0x182   : > { %v16067_v11 = vadd.f32 %v16066_v9, %v16065_v2  ;;  %v15974_v12 = vpop.f32.mrf.mxu0  ;;  %3668 = vmatmul.mubr.bf16.gmra.mxu0 %v17382_v58  ;;  %16602 = vmatprep.subr.bf16.mxu1 %v17456_v59  ;;  %v17407_v58 = vld [vmem:[#allocation3 + $0x28c] ss:$76 sps:$4 sm:$0xff]   ;;  %v17482_v9 = vld [vmem:[%s19949_s26 + $0x380] sm:$0xff]  }
 0x183   : > { %v16068_v15 = vpop.f32.mrf.mxu1  ;;  %3804 = vmatmul.mubr.bf16.gmra.mxu1 %v17385_v62  ;;  %3675 = vmatprep.mubr.bf16.mxu0 %v17390_v63  ;;  %v17451_v59 = vld [vmem:[%s19949_s26 + $0x308] sm:$0xff]   ;;  %v17467_v63 = vld [vmem:[%s19949_s26 + $0x340] sm:$0xff]  }
 0x184   : > { %v20074_v18 = vadd.f32 %v16067_v11, %v15973_v8  ;;  %v15975_v19 = vpop.f32.mrf.mxu0  ;;  %3811 = vmatprep.mubr.bf16.mxu1 %v17393_v3  ;;  %16509 = vmatpush3.bf16.msra.mxu0 %v17401_v4  ;;  %v17477_v2 = vld [vmem:[%s19949_s26 + $0x388] sm:$0xff]  }
 0x185   : > { %v15976_v22 = vadd.f32 %v15975_v19, %v15974_v12  ;;  %v16069_v23 = vpop.f32.mrf.mxu1  ;;  %16510 = vmatprep.subr.bf16.mxu0 %v17411_v7  ;;  %16603 = vmatpush3.bf16.msra.mxu1 %v17457_v10  ;;  %v17478_v7 = vld [vmem:[%s19949_s26 + $0x3c0] sm:$0xff]   ;;  %v17483_v10 = vld [vmem:[%s19949_s26 + $0x478] sm:$0xff]  }
 0x186   : > { %v16070_v27 = vadd.f32 %v16069_v23, %v16068_v15  ;;  %v15977_v28 = vpop.f32.mrf.mxu0  ;;  %16604 = vmatprep.subr.bf16.mxu1 %v17458_v14 }
 0x187   : > { %v16071_v32 = vpop.f32.mrf.mxu1 }
 0x188   : > { %v20078_v33 = vadd.f32 %v16070_v27, %v15976_v22  ;;  %v15978_v34 = vpop.f32.mrf.mxu0  ;;  %16511 = vmatpush3.bf16.msra.mxu0 %v17412_v13  ;;  %v17402_v13 = vld [vmem:[#allocation3 + $0x280] ss:$76 sps:$4 sm:$0xff]  }
 0x189   : > { %v15979_v36 = vadd.f32 %v15978_v34, %v15977_v28  ;;  %v16072_v37 = vpop.f32.mrf.mxu1  ;;  %16512 = vmatprep.subr.bf16.mxu0 %v17422_v16  ;;  %16605 = vmatpush3.bf16.msra.mxu1 %v17462_v17  ;;  %v17405_v16 = vld [vmem:[#allocation3 + $0x288] ss:$76 sps:$4 sm:$0xff]  }
 0x18a   : > { %v16073_v39 = vadd.f32 %v16072_v37, %v16071_v32  ;;  %v15980_v40 = vpop.f32.mrf.mxu0  ;;  %3676 = vmatmul.mubr.bf16.gmra.mxu0 %v17388_v20  ;;  %16606 = vmatprep.subr.bf16.mxu1 %v17466_v21  ;;  %v17410_v17 = vld [vmem:[#allocation3 + $0x31c] ss:$76 sps:$4 sm:$0xff]  }
 0x18b   : > { %v16074_v44 = vpop.f32.mrf.mxu1  ;;  %3812 = vmatmul.mubr.bf16.gmra.mxu1 %v17391_v25  ;;  %3683 = vmatprep.mubr.bf16.mxu0 %v17396_v26  ;;  %v17415_v25 = vld [vmem:[#allocation3 + $0x324] ss:$76 sps:$4 sm:$0xff]  }
 0x18c   : > { %v20086_v47 = vadd.f32 %v16073_v39, %v15979_v36  ;;  %v15981_v48 = vpop.f32.mrf.mxu0  ;;  %3819 = vmatprep.mubr.bf16.mxu1 %v17399_v29  ;;  %16513 = vmatpush3.bf16.msra.mxu0 %v17423_v30  ;;  %v17418_v39 = vld [vmem:[#allocation3 + $0x3b4] ss:$76 sps:$4 sm:$0xff]  }
 0x18d   : > { %v15982_v50 = vadd.f32 %v15981_v48, %v15980_v40  ;;  %v16075_v51 = vpop.f32.mrf.mxu1  ;;  %16514 = vmatprep.subr.bf16.mxu0 %v17436_v35  ;;  %16607 = vmatpush3.bf16.msra.mxu1 %v17468_v38  ;;  %v17408_v35 = vld [vmem:[#allocation3 + $0x318] ss:$76 sps:$4 sm:$0xff]   ;;  %v17413_v38 = vld [vmem:[#allocation3 + $0x320] ss:$76 sps:$4 sm:$0xff]  }
 0x18e   : > { %v16076_v55 = vadd.f32 %v16075_v51, %v16074_v44  ;;  %v15983_v57 = vpop.f32.mrf.mxu0  ;;  %16608 = vmatprep.subr.bf16.mxu1 %v17470_v42 }
 0x18f   : > { %v16077_v60 = vpop.f32.mrf.mxu1 }
 0x190   : > { %v20090_v61 = vadd.f32 %v16076_v55, %v15982_v50  ;;  %v15984_v62 = vpop.f32.mrf.mxu0  ;;  %16515 = vmatpush3.bf16.msra.mxu0 %v17437_v41  ;;  %v17416_v55 = vld [vmem:[#allocation3 + $0x3b0] ss:$76 sps:$4 sm:$0xff]  }
 0x191   : > { %v15985_v0 = vadd.f32 %v15984_v62, %v15983_v57  ;;  %v16078_v1 = vpop.f32.mrf.mxu1  ;;  %16516 = vmatprep.subr.bf16.mxu0 %v17446_v45  ;;  %16609 = vmatpush3.bf16.msra.mxu1 %v17473_v46  ;;  %v17421_v46 = vld [vmem:[#allocation3 + $0x3bc] ss:$76 sps:$4 sm:$0xff]  }
 0x192   : > { %v16079_v3 = vadd.f32 %v16078_v1, %v16077_v60  ;;  %v15986_v4 = vpop.f32.mrf.mxu0  ;;  %3684 = vmatmul.mubr.bf16.gmra.mxu0 %v17394_v49  ;;  %16610 = vmatprep.subr.bf16.mxu1 %v17476_v54 }
 0x193   : > { %v16080_v8 = vpop.f32.mrf.mxu1  ;;  %3820 = vmatmul.mubr.bf16.gmra.mxu1 %v17397_v52  ;;  %3691 = vmatprep.mubr.bf16.mxu0 %v17404_v53 }
 0x194   : > { %v20098_v11 = vadd.f32 %v16079_v3, %v15985_v0  ;;  %v15987_v12 = vpop.f32.mrf.mxu0  ;;  %3827 = vmatprep.mubr.bf16.mxu1 %v17407_v58  ;;  %16517 = vmatpush3.bf16.msra.mxu0 %v17451_v59  ;;  %v17419_v59 = vld [vmem:[#allocation3 + $0x3b8] ss:$76 sps:$4 sm:$0xff]   ;;  %v17429_v3 = vld [vmem:[#allocation3 + $0x454] ss:$76 sps:$4 sm:$0xff]  }
 0x195   : > { %v15988_v14 = vadd.f32 %v15987_v12, %v15986_v4  ;;  %v16081_v15 = vpop.f32.mrf.mxu1  ;;  %16518 = vmatprep.subr.bf16.mxu0 %v17467_v63  ;;  %16611 = vmatpush3.bf16.msra.mxu1 %v17477_v2  ;;  %v17426_v0 = vld [vmem:[#allocation3 + $0x44c] ss:$76 sps:$4 sm:$0xff]  }
 0x196   : > { %v16082_v19 = vadd.f32 %v16081_v15, %v16080_v8  ;;  %v15989_v20 = vpop.f32.mrf.mxu0  ;;  %16612 = vmatprep.subr.bf16.mxu1 %v17478_v7 }
 0x197   : > { %v16083_v21 = vpop.f32.mrf.mxu1 }
 0x198   : > { %v20100_v22 = vadd.f32 %v16082_v19, %v15988_v14  ;;  %v15990_v23 = vpop.f32.mrf.mxu0  ;;  %16519 = vmatpush3.bf16.msra.mxu0 %v17469_v6 }
 0x199   : > { %v15991_v26 = vadd.f32 %v15990_v23, %v15989_v20  ;;  %v16084_v27 = vpop.f32.mrf.mxu1  ;;  %16613 = vmatpush3.bf16.msra.mxu1 %v17482_v9  ;;  %16692 = vmatprep.subr.bf16.mxu0 %v17483_v10 }
 0x19a   : > { %v16085_v28 = vadd.f32 %v16084_v27, %v16083_v21  ;;  %v15992_v29 = vpop.f32.mrf.mxu0  ;;  %3692 = vmatmul.mubr.bf16.gmra.mxu0 %v17402_v13  ;;  %v17424_v13 = vld [vmem:[#allocation3 + $0x448] ss:$76 sps:$4 sm:$0xff]  }
 0x19b   : > { %v16086_v30 = vpop.f32.mrf.mxu1  ;;  %3828 = vmatmul.mubr.bf16.gmra.mxu1 %v17405_v16  ;;  %3699 = vmatprep.mubr.bf16.mxu0 %v17410_v17  ;;  %v17427_v16 = vld [vmem:[#allocation3 + $0x450] ss:$76 sps:$4 sm:$0xff]  }
 0x19c   : > { %v20102_v32 = vadd.f32 %v16085_v28, %v15991_v26  ;;  %v15993_v34 = vpop.f32.mrf.mxu0  ;;  %3835 = vmatprep.mubr.bf16.mxu1 %v17415_v25  ;;  %v17432_v17 = vld [vmem:[#allocation3 + $0x4e4] ss:$76 sps:$4 sm:$0xff]   ;;  %v17435_v26 = vld [vmem:[#allocation3 + $0x4ec] ss:$76 sps:$4 sm:$0xff]  }
 0x19d   : > { %v15994_v36 = vadd.f32 %v15993_v34, %v15992_v29  ;;  %v16087_v37 = vpop.f32.mrf.mxu1 }
 0x19e   : > { %v16088_v40 = vadd.f32 %v16087_v37, %v16086_v30  ;;  %v15995_v41 = vpop.f32.mrf.mxu0  ;;  %v17430_v37 = vld [vmem:[#allocation3 + $0x4e0] ss:$76 sps:$4 sm:$0xff]  }
 0x19f   : > { %v16089_v42 = vpop.f32.mrf.mxu1 }
 0x1a0   : > { %v20104_v44 = vadd.f32 %v16088_v40, %v15994_v36  ;;  %v15996_v45 = vpop.f32.mrf.mxu0  ;;  %v17433_v40 = vld [vmem:[#allocation3 + $0x4e8] ss:$76 sps:$4 sm:$0xff]  }
 0x1a1   : > { %v15997_v48 = vadd.f32 %v15996_v45, %v15995_v41  ;;  %v16090_v49 = vpop.f32.mrf.mxu1  ;;  %v17440_v41 = vld [vmem:[#allocation3 + $0x57c] ss:$76 sps:$4 sm:$0xff]  }
 0x1a2   : > { %v16091_v50 = vadd.f32 %v16090_v49, %v16089_v42  ;;  %v15998_v51 = vpop.f32.mrf.mxu0  ;;  %3700 = vmatmul.mubr.bf16.gmra.mxu0 %v17408_v35 }
 0x1a3   : > { %v16092_v52 = vpop.f32.mrf.mxu1  ;;  %3836 = vmatmul.mubr.bf16.gmra.mxu1 %v17413_v38  ;;  %3707 = vmatprep.mubr.bf16.mxu0 %v17418_v39 }
 0x1a4   : > { %v20106_v53 = vadd.f32 %v16091_v50, %v15997_v48  ;;  %v15999_v54 = vpop.f32.mrf.mxu0  ;;  %3843 = vmatprep.mubr.bf16.mxu1 %v17421_v46  ;;  %v17443_v50 = vld [vmem:[#allocation3 + $0x584] ss:$76 sps:$4 sm:$0xff]  }
 0x1a5   : > { %v16000_v57 = vadd.f32 %v15999_v54, %v15998_v51  ;;  %v16093_v58 = vpop.f32.mrf.mxu1 }
 0x1a6   : > { %v16094_v60 = vadd.f32 %v16093_v58, %v16092_v52  ;;  %v16001_v62 = vpop.f32.mrf.mxu0 }
 0x1a7   : > { %v16095_v63 = vpop.f32.mrf.mxu1 }
 0x1a8   : > { %v20108_v1 = vadd.f32 %v16094_v60, %v16000_v57  ;;  %v16002_v2 = vpop.f32.mrf.mxu0  ;;  %v17438_v60 = vld [vmem:[#allocation3 + $0x578] ss:$76 sps:$4 sm:$0xff]  }
 0x1a9   : > { %v16003_v4 = vadd.f32 %v16002_v2, %v16001_v62  ;;  %v16096_v6 = vpop.f32.mrf.mxu1 }
 0x1aa   : > { %v16097_v7 = vadd.f32 %v16096_v6, %v16095_v63  ;;  %v16004_v8 = vpop.f32.mrf.mxu0  ;;  %3708 = vmatmul.mubr.bf16.gmra.mxu0 %v17416_v55  ;;  %v17450_v6 = vld [vmem:[#allocation3 + $0x614] ss:$76 sps:$4 sm:$0xff]  }
 0x1ab   : > { %v16098_v9 = vpop.f32.mrf.mxu1  ;;  %3844 = vmatmul.mubr.bf16.gmra.mxu1 %v17419_v59  ;;  %3715 = vmatprep.mubr.bf16.mxu0 %v17426_v0  ;;  %v17441_v0 = vld [vmem:[#allocation3 + $0x580] ss:$76 sps:$4 sm:$0xff]  }
 0x1ac   : > { %v20110_v10 = vadd.f32 %v16097_v7, %v16003_v4  ;;  %v16005_v12 = vpop.f32.mrf.mxu0  ;;  %3851 = vmatprep.mubr.bf16.mxu1 %v17429_v3  ;;  %v17455_v7 = vld [vmem:[#allocation3 + $0x61c] ss:$76 sps:$4 sm:$0xff]  }
 0x1ad   : > { %v16006_v14 = vadd.f32 %v16005_v12, %v16004_v8  ;;  %v16099_v15 = vpop.f32.mrf.mxu1 }
 0x1ae   : > { %v16100_v19 = vadd.f32 %v16099_v15, %v16098_v9  ;;  %v16007_v20 = vpop.f32.mrf.mxu0 }
 0x1af   : > { %v16101_v21 = vpop.f32.mrf.mxu1 }
 0x1b0   : > { %v20112_v23 = vadd.f32 %v16100_v19, %v16006_v14  ;;  %v16008_v25 = vpop.f32.mrf.mxu0 }
 0x1b1   : > { %v16009_v27 = vadd.f32 %v16008_v25, %v16007_v20  ;;  %v16102_v28 = vpop.f32.mrf.mxu1  ;;  %v17448_v20 = vld [vmem:[#allocation3 + $0x610] ss:$76 sps:$4 sm:$0xff]  }
 0x1b2   : > { %v16103_v29 = vadd.f32 %v16102_v28, %v16101_v21  ;;  %v16010_v30 = vpop.f32.mrf.mxu0  ;;  %3716 = vmatmul.mubr.bf16.gmra.mxu0 %v17424_v13 }
 0x1b3   : > { %v16104_v34 = vpop.f32.mrf.mxu1  ;;  %3852 = vmatmul.mubr.bf16.gmra.mxu1 %v17427_v16  ;;  %3723 = vmatprep.mubr.bf16.mxu0 %v17432_v17 }
 0x1b4   : > { %v20114_v35 = vadd.f32 %v16103_v29, %v16009_v27  ;;  %v16011_v36 = vpop.f32.mrf.mxu0  ;;  %3859 = vmatprep.mubr.bf16.mxu1 %v17435_v26  ;;  %v17453_v26 = vld [vmem:[#allocation3 + $0x618] ss:$76 sps:$4 sm:$0xff]  }
 0x1b5   : > { %v16012_v38 = vadd.f32 %v16011_v36, %v16010_v30  ;;  %v16105_v39 = vpop.f32.mrf.mxu1  ;;  %v17461_v27 = vld [vmem:[#allocation3 + $0x6ac] ss:$76 sps:$4 sm:$0xff]  }
 0x1b6   : > { %v16106_v42 = vadd.f32 %v16105_v39, %v16104_v34  ;;  %v16013_v45 = vpop.f32.mrf.mxu0 }
 0x1b7   : > { %v16107_v46 = vpop.f32.mrf.mxu1 }
 0x1b8   : > { %v20116_v48 = vadd.f32 %v16106_v42, %v16012_v38  ;;  %v16014_v49 = vpop.f32.mrf.mxu0 }
 0x1b9   : > { %v16015_v51 = vadd.f32 %v16014_v49, %v16013_v45  ;;  %v16108_v52 = vpop.f32.mrf.mxu1  ;;  %v943_v45 = vld [vmem:[#allocation3 + $0x740] sm:$0xff] }
 0x1ba   : > { %v16109_v54 = vadd.f32 %v16108_v52, %v16107_v46  ;;  %v16016_v55 = vpop.f32.mrf.mxu0  ;;  %3724 = vmatmul.mubr.bf16.gmra.mxu0 %v17430_v37  ;;  %v17465_v37 = vld [vmem:[#allocation3 + $0x6b4] ss:$76 sps:$4 sm:$0xff]   ;;  %v944_v52 = vld [vmem:[#allocation3 + $0x748] sm:$0xff] }
 0x1bb   : > { %v16110_v57 = vpop.f32.mrf.mxu1  ;;  %3860 = vmatmul.mubr.bf16.gmra.mxu1 %v17433_v40  ;;  %3731 = vmatprep.mubr.bf16.mxu0 %v17440_v41  ;;  %v19756_v40 = vmov 0.0  }
 0x1bc   : > { %v20118_v58 = vadd.f32 %v16109_v54, %v16015_v51  ;;  %v16017_v59 = vpop.f32.mrf.mxu0  ;;  %3867 = vmatprep.mubr.bf16.mxu1 %v17443_v50  ;;  %16997 = vmatprep.subr.bf16.mxu1 %v19756_v40  ;;  %v17459_v51 = vld [vmem:[#allocation3 + $0x6a8] ss:$76 sps:$4 sm:$0xff]  }
 0x1bd   : > { %v16018_v62 = vadd.f32 %v16017_v59, %v16016_v55  ;;  %v16111_v63 = vpop.f32.mrf.mxu1 }
 0x1be   : > { %v16112_v2 = vadd.f32 %v16111_v63, %v16110_v57  ;;  %v16019_v3 = vpop.f32.mrf.mxu0  ;;  %v17463_v57 = vld [vmem:[#allocation3 + $0x6b0] ss:$76 sps:$4 sm:$0xff]   ;;  %v14501_v63 = vcombine.high %v943_v45, %v943_v45 }
 0x1bf   : > { %v16113_v4 = vpop.f32.mrf.mxu1 }
 0x1c0   : > { %v20120_v8 = vadd.f32 %v16112_v2, %v16018_v62  ;;  %v16020_v9 = vpop.f32.mrf.mxu0 }
 0x1c1   : > { %v16021_v12 = vadd.f32 %v16020_v9, %v16019_v3  ;;  %v16114_v13 = vpop.f32.mrf.mxu1  ;;  %v14503_v3 = vcombine.high %v944_v52, %v944_v52 }
 0x1c2   : > { %v16115_v14 = vadd.f32 %v16114_v13, %v16113_v4  ;;  %v16022_v15 = vpop.f32.mrf.mxu0  ;;  %3732 = vmatmul.mubr.bf16.gmra.mxu0 %v17438_v60 }
 0x1c3   : > { %v16116_v16 = vpop.f32.mrf.mxu1  ;;  %3868 = vmatmul.mubr.bf16.gmra.mxu1 %v17441_v0  ;;  %3739 = vmatprep.mubr.bf16.mxu0 %v17450_v6 }
 0x1c4   : > { %v20122_v17 = vadd.f32 %v16115_v14, %v16021_v12  ;;  %v16023_v19 = vpop.f32.mrf.mxu0  ;;  %3875 = vmatprep.mubr.bf16.mxu1 %v17455_v7 }
 0x1c5   : > { %v16024_v21 = vadd.f32 %v16023_v19, %v16022_v15  ;;  %v16117_v25 = vpop.f32.mrf.mxu1 }
 0x1c6   : > { %v16118_v28 = vadd.f32 %v16117_v25, %v16116_v16  ;;  %v16025_v29 = vpop.f32.mrf.mxu0  ;;  %v14500_v16 = vcombine.low %v943_v45, %v943_v45  ;;  %v17481_v25 = vld [vmem:[#allocation3 + $0x34] ss:$76 sps:$4 sm:$0xff]  }
 0x1c7   : > { %v16119_v30 = vpop.f32.mrf.mxu1 }
 0x1c8   : > { %v20124_v34 = vadd.f32 %v16118_v28, %v16024_v21  ;;  %v16026_v36 = vpop.f32.mrf.mxu0  ;;  %v14502_v21 = vcombine.low %v944_v52, %v944_v52 }
 0x1c9   : > { %v16027_v38 = vadd.f32 %v16026_v36, %v16025_v29  ;;  %v16120_v39 = vpop.f32.mrf.mxu1 }
 0x1ca   : > { %v16121_v41 = vadd.f32 %v16120_v39, %v16119_v30  ;;  %v16028_v42 = vpop.f32.mrf.mxu0  ;;  %3740 = vmatmul.mubr.bf16.gmra.mxu0 %v17448_v20 }
 0x1cb   : > { %v16122_v46 = vpop.f32.mrf.mxu1  ;;  %3876 = vmatmul.mubr.bf16.gmra.mxu1 %v17453_v26  ;;  %3747 = vmatprep.mubr.bf16.mxu0 %v17461_v27  ;;  %v17486_v27 = vld [vmem:[#allocation3 + $0x3c] ss:$76 sps:$4 sm:$0xff]  }
 0x1cc   : > { %v20127_v49 = vadd.f32 %v16121_v41, %v16027_v38  ;;  %v16029_v50 = vpop.f32.mrf.mxu0  ;;  %3883 = vmatprep.mubr.bf16.mxu1 %v17465_v37  ;;  %v17479_v41 = vld [vmem:[#allocation3 + $0x30] ss:$76 sps:$4 sm:$0xff]  }
 0x1cd   : > { %v16030_v54 = vadd.f32 %v16029_v50, %v16028_v42  ;;  %v16123_v55 = vpop.f32.mrf.mxu1  ;;  %v17484_v50 = vld [vmem:[#allocation3 + $0x38] ss:$76 sps:$4 sm:$0xff]  }
 0x1ce   : > { %v16124_v59 = vadd.f32 %v16123_v55, %v16122_v46  ;;  %v16031_v60 = vpop.f32.mrf.mxu0  ;;  %v17490_v55 = vld [vmem:[#allocation3 + $0xcc] ss:$76 sps:$4 sm:$0xff]  }
 0x1cf   : > { %v16125_v62 = vpop.f32.mrf.mxu1 }
 0x1d0   : > { %v20129_v0 = vadd.f32 %v16124_v59, %v16030_v54  ;;  %v16032_v2 = vpop.f32.mrf.mxu0  ;;  %v17493_v59 = vld [vmem:[#allocation3 + $0xd4] ss:$76 sps:$4 sm:$0xff]  }
 0x1d1   : > { %v16126_v4 = vpop.f32.mrf.mxu1  ;;  %v17494_v62 = vld [vmem:[%s19949_s26 + $0x470] sm:$0xff]  }
 0x1d2   : > { %v16144_v6 = vpop.f32.mrf.mxu0  ;;  %3748 = vmatmul.mubr.bf16.gmra.mxu0 %v17459_v51  ;;  %v17487_v51 = vld [vmem:[%s19949_s26 + $0x438] sm:$0xff]   ;;  %v17495_v4 = vld [vmem:[%s19949_s26 + $0x430] sm:$0xff]  }
 0x1d3   : > { %v16238_v7 = vpop.f32.mrf.mxu1  ;;  %3884 = vmatmul.mubr.bf16.gmra.mxu1 %v17463_v57  ;;  %3755 = vmatprep.mubr.bf16.mxu0 %v14501_v63 }
 0x1d4   : > { %v16145_v9 = vpop.f32.mrf.mxu0  ;;  %3891 = vmatprep.mubr.bf16.mxu1 %v14503_v3 }
 0x1d5   : > { %v16146_v12 = vadd.f32 %v16145_v9, %v16144_v6  ;;  %v16239_v13 = vpop.f32.mrf.mxu1  ;;  %v17575_v6 = vld [vmem:[%s19949_s26 + $0x498] sm:$0xff]  }
 0x1d6   : > { %v16147_v14 = vpop.f32.mrf.mxu0  ;;  %v16240_v15 = vadd.f32 %v16239_v13, %v16238_v7 }
 0x1d7   : > { %v3390_v19 = vadd.f32 %v16146_v12, %v20049_v24  ;;  %v16241_v20 = vpop.f32.mrf.mxu1  ;;  %v17508_v12 = vld [vmem:[%s19949_s26 + $0x468] sm:$0xff]  }
 0x1d8   : > { %v16148_v26 = vpop.f32.mrf.mxu0 }
 0x1d9   : > { %v20132_v28 = vadd.f32 %v16240_v15, %v3390_v19  ;;  %v16149_v29 = vadd.f32 %v16148_v26, %v16147_v14  ;;  %v16242_v30 = vpop.f32.mrf.mxu1  ;;  %v17498_v26 = vld [vmem:[#allocation3 + $0x164] ss:$76 sps:$4 sm:$0xff]  }
 0x1da   : > { %v16150_v36 = vpop.f32.mrf.mxu0  ;;  %v16243_v37 = vadd.f32 %v16242_v30, %v16241_v20  ;;  %3756 = vmatmul.mubr.bf16.gmra.mxu0 %v14500_v16  ;;  %v17488_v16 = vld [vmem:[#allocation3 + $0xc8] ss:$76 sps:$4 sm:$0xff]  }
 0x1db   : > { %v3393_v38 = vadd.f32 %v16149_v29, %v20051_v31  ;;  %v16244_v39 = vpop.f32.mrf.mxu1  ;;  %3892 = vmatmul.mubr.bf16.gmra.mxu1 %v14502_v21  ;;  %3931 = vmatprep.mubr.bf16.mxu0 %v17481_v25  ;;  %v17491_v25 = vld [vmem:[#allocation3 + $0xd0] ss:$76 sps:$4 sm:$0xff]   ;;  %v17501_v29 = vld [vmem:[#allocation3 + $0x16c] ss:$76 sps:$4 sm:$0xff]  }
 0x1dc   : > { %v16151_v24 = vpop.f32.mrf.mxu0  ;;  %4067 = vmatprep.mubr.bf16.mxu1 %v17486_v27 }
 0x1dd   : > { %v20135_v42 = vadd.f32 %v16243_v37, %v3393_v38  ;;  %v16152_v45 = vadd.f32 %v16151_v24, %v16150_v36  ;;  %v16245_v46 = vpop.f32.mrf.mxu1  ;;  %v17509_v37 = vld [vmem:[%s19949_s26 + $0x428] sm:$0xff]  }
 0x1de   : > { %v16153_v52 = vpop.f32.mrf.mxu0  ;;  %v16246_v54 = vadd.f32 %v16245_v46, %v16244_v39  ;;  %v17519_v39 = vld [vmem:[%s19949_s26 + $0x460] sm:$0xff]   ;;  %v17580_v46 = vld [vmem:[%s19949_s26 + $0x488] sm:$0xff]  }
 0x1df   : > { %v3398_v31 = vadd.f32 %v16152_v45, %v20054_v43  ;;  %v16247_v57 = vpop.f32.mrf.mxu1  ;;  %v17576_v43 = vld [vmem:[%s19949_s26 + $0x490] sm:$0xff]  }
 0x1e0   : > { %v16154_v60 = vpop.f32.mrf.mxu0 }
 0x1e1   : > { %v20140_v63 = vadd.f32 %v16246_v54, %v3398_v31  ;;  %v16155_v2 = vadd.f32 %v16154_v60, %v16153_v52  ;;  %v16248_v3 = vpop.f32.mrf.mxu1  ;;  %v17520_v52 = vld [vmem:[%s19949_s26 + $0x420] sm:$0xff]  }
 0x1e2   : > { %v16156_v7 = vpop.f32.mrf.mxu0  ;;  %v16249_v9 = vadd.f32 %v16248_v3, %v16247_v57  ;;  %3932 = vmatmul.mubr.bf16.vlgmr.msra.gmra.mxu0 %v17479_v41  ;;  %v17581_v31 = vld [vmem:[%s19949_s26 + $0x480] sm:$0xff]   ;;  %v17499_v3 = vld [vmem:[#allocation3 + $0x168] ss:$76 sps:$4 sm:$0xff]  }
 0x1e3   : > { %v3401_v13 = vadd.f32 %v16155_v2, %v20062_v56  ;;  %16693 = vmatpush3.bf16.msra.mxu0 %v17487_v51  ;;  %v16250_v14 = vpop.f32.mrf.mxu1  ;;  %4068 = vmatmul.mubr.bf16.vlgmr.msra.gmra.mxu1 %v17484_v50 }
 0x1e4   : > { %v16157_v15 = vpop.f32.mrf.mxu0  ;;  %3939 = vmatprep.mubr.bf16.mxu0 %v17490_v55  ;;  %4075 = vmatprep.mubr.bf16.mxu1 %v17493_v59  ;;  %v17530_v55 = vld [vmem:[%s19949_s26 + $0x458] sm:$0xff]   ;;  %v17496_v59 = vld [vmem:[#allocation3 + $0x160] ss:$76 sps:$4 sm:$0xff]  }
 0x1e5   : > { %v20147_v19 = vadd.f32 %v16249_v9, %v3401_v13  ;;  %v16158_v20 = vadd.f32 %v16157_v15, %v16156_v7  ;;  %v16251_v21 = vpop.f32.mrf.mxu1  ;;  %16694 = vmatprep.subr.bf16.mxu0 %v17494_v62  ;;  %17001 = vmatpush3.bf16.msra.mxu1 %v17575_v6 }
 0x1e6   : > { %v16159_v56 = vpop.f32.mrf.mxu0  ;;  %v16252_v27 = vadd.f32 %v16251_v21, %v16250_v14  ;;  %16998 = vmatprep.subr.bf16.mxu1 %v19756_v40  ;;  %v17531_v14 = vld [vmem:[%s19949_s26 + $0x418] sm:$0xff]  }
 0x1e7   : > { %v3406_v30 = vadd.f32 %v16158_v20, %v20066_v5  ;;  %v16253_v36 = vpop.f32.mrf.mxu1  ;;  %16695 = vmatpush3.bf16.msra.mxu0 %v17495_v4  ;;  %v17504_v4 = vld [vmem:[#allocation3 + $0x1fc] ss:$76 sps:$4 sm:$0xff]   ;;  %v17544_v20 = vld [vmem:[%s19949_s26 + $0x450] sm:$0xff]  }
 0x1e8   : > { %v16160_v38 = vpop.f32.mrf.mxu0  ;;  %16696 = vmatprep.subr.bf16.mxu0 %v17508_v12  ;;  %v17507_v12 = vld [vmem:[#allocation3 + $0x204] ss:$76 sps:$4 sm:$0xff]  }
 0x1e9   : > { %v20153_v24 = vadd.f32 %v16252_v27, %v3406_v30  ;;  %v16161_v41 = vadd.f32 %v16160_v38, %v16159_v56  ;;  %v16254_v45 = vpop.f32.mrf.mxu1  ;;  %17002 = vmatpush3.bf16.msra.mxu1 %v17576_v43  ;;  %v17552_v27 = vld [vmem:[%s19949_s26 + $0x448] sm:$0xff]   ;;  %v17502_v30 = vld [vmem:[#allocation3 + $0x1f8] ss:$76 sps:$4 sm:$0xff]  }
 0x1ea   : > { %v16162_v50 = vpop.f32.mrf.mxu0  ;;  %v16255_v51 = vadd.f32 %v16254_v45, %v16253_v36  ;;  %3940 = vmatmul.mubr.bf16.gmra.mxu0 %v17488_v16  ;;  %16999 = vmatprep.subr.bf16.mxu1 %v19756_v40 }
 0x1eb   : > { %v3409_v5 = vadd.f32 %v16161_v41, %v20074_v18  ;;  %v16256_v54 = vpop.f32.mrf.mxu1  ;;  %4076 = vmatmul.mubr.bf16.gmra.mxu1 %v17491_v25  ;;  %3947 = vmatprep.mubr.bf16.mxu0 %v17498_v26  ;;  %v17545_v26 = vld [vmem:[%s19949_s26 + $0x410] sm:$0xff]  }
 0x1ec   : > { %v16163_v57 = vpop.f32.mrf.mxu0  ;;  %4083 = vmatprep.mubr.bf16.mxu1 %v17501_v29  ;;  %16697 = vmatpush3.bf16.msra.mxu0 %v17509_v37  ;;  %v17512_v41 = vld [vmem:[#allocation3 + $0x294] ss:$76 sps:$4 sm:$0xff]  }
 0x1ed   : > { %v20161_v60 = vadd.f32 %v16255_v51, %v3409_v5  ;;  %v16164_v62 = vadd.f32 %v16163_v57, %v16162_v50  ;;  %v16257_v2 = vpop.f32.mrf.mxu1  ;;  %16698 = vmatprep.subr.bf16.mxu0 %v17519_v39  ;;  %17003 = vmatpush3.bf16.msra.mxu1 %v17580_v46  ;;  %v17505_v39 = vld [vmem:[#allocation3 + $0x200] ss:$76 sps:$4 sm:$0xff]   ;;  %v17515_v51 = vld [vmem:[#allocation3 + $0x29c] ss:$76 sps:$4 sm:$0xff]  }
 0x1ee   : > { %v16165_v18 = vpop.f32.mrf.mxu0  ;;  %v16258_v6 = vadd.f32 %v16257_v2, %v16256_v54  ;;  %17000 = vmatprep.subr.bf16.mxu1 %v19756_v40  ;;  %v17556_v5 = vld [vmem:[%s19949_s26 + $0x408] sm:$0xff]   ;;  %v17566_v57 = vld [vmem:[%s19949_s26 + $0x440] sm:$0xff]  }
 0x1ef   : > { %v3414_v7 = vadd.f32 %v16164_v62, %v20078_v33  ;;  %v16259_v9 = vpop.f32.mrf.mxu1  ;;  %v17567_v2 = vld [vmem:[%s19949_s26 + $0x400] sm:$0xff]  }
 0x1f0   : > { %v16166_v13 = vpop.f32.mrf.mxu0  ;;  %16699 = vmatpush3.bf16.msra.mxu0 %v17520_v52 }
 0x1f1   : > { %v20166_v43 = vadd.f32 %v16258_v6, %v3414_v7  ;;  %v16167_v15 = vadd.f32 %v16166_v13, %v16165_v18  ;;  %v16260_v16 = vpop.f32.mrf.mxu1  ;;  %16700 = vmatprep.subr.bf16.mxu0 %v17530_v55  ;;  %17004 = vmatpush3.bf16.msra.mxu1 %v17581_v31  ;;  %v17510_v18 = vld [vmem:[#allocation3 + $0x290] ss:$76 sps:$4 sm:$0xff]  }
 0x1f2   : > { %v16168_v21 = vpop.f32.mrf.mxu0  ;;  %v16261_v25 = vadd.f32 %v16260_v16, %v16259_v9  ;;  %3948 = vmatmul.mubr.bf16.gmra.mxu0 %v17496_v59 }
 0x1f3   : > { %v3417_v56 = vadd.f32 %v16167_v15, %v20086_v47  ;;  %v16262_v33 = vpop.f32.mrf.mxu1  ;;  %4084 = vmatmul.mubr.bf16.gmra.mxu1 %v17499_v3  ;;  %3955 = vmatprep.mubr.bf16.mxu0 %v17504_v4 }
 0x1f4   : > { %v16169_v29 = vpop.f32.mrf.mxu0  ;;  %4091 = vmatprep.mubr.bf16.mxu1 %v17507_v12  ;;  %16701 = vmatpush3.bf16.msra.mxu0 %v17531_v14  ;;  %v17513_v12 = vld [vmem:[#allocation3 + $0x298] ss:$76 sps:$4 sm:$0xff]  }
 0x1f5   : > { %v20172_v36 = vadd.f32 %v16261_v25, %v3417_v56  ;;  %v16170_v37 = vadd.f32 %v16169_v29, %v16168_v21  ;;  %v16263_v38 = vpop.f32.mrf.mxu1  ;;  %16702 = vmatprep.subr.bf16.mxu0 %v17544_v20  ;;  %v17518_v20 = vld [vmem:[#allocation3 + $0x32c] ss:$76 sps:$4 sm:$0xff]   ;;  %v17523_v21 = vld [vmem:[#allocation3 + $0x334] ss:$76 sps:$4 sm:$0xff]  }
 0x1f6   : > { %v16171_v45 = vpop.f32.mrf.mxu0  ;;  %v16264_v47 = vadd.f32 %v16263_v38, %v16262_v33 }
 0x1f7   : > { %v3422_v46 = vadd.f32 %v16170_v37, %v20090_v61  ;;  %v16265_v50 = vpop.f32.mrf.mxu1  ;;  %v17516_v37 = vld [vmem:[#allocation3 + $0x328] ss:$76 sps:$4 sm:$0xff]  }
 0x1f8   : > { %v16172_v52 = vpop.f32.mrf.mxu0  ;;  %16703 = vmatpush3.bf16.msra.mxu0 %v17545_v26 }
 0x1f9   : > { %v20176_v54 = vadd.f32 %v16264_v47, %v3422_v46  ;;  %v16173_v55 = vadd.f32 %v16172_v52, %v16171_v45  ;;  %v16266_v31 = vpop.f32.mrf.mxu1  ;;  %16704 = vmatprep.subr.bf16.mxu0 %v17552_v27  ;;  %v17521_v45 = vld [vmem:[#allocation3 + $0x330] ss:$76 sps:$4 sm:$0xff]  }
 0x1fa   : > { %v16174_v59 = vpop.f32.mrf.mxu0  ;;  %v16267_v62 = vadd.f32 %v16266_v31, %v16265_v50  ;;  %3956 = vmatmul.mubr.bf16.gmra.mxu0 %v17502_v30  ;;  %v17526_v52 = vld [vmem:[#allocation3 + $0x3c4] ss:$76 sps:$4 sm:$0xff]  }
 0x1fb   : > { %v3425_v3 = vadd.f32 %v16173_v55, %v20098_v11  ;;  %v16268_v4 = vpop.f32.mrf.mxu1  ;;  %4092 = vmatmul.mubr.bf16.gmra.mxu1 %v17505_v39  ;;  %3963 = vmatprep.mubr.bf16.mxu0 %v17512_v41  ;;  %v17529_v55 = vld [vmem:[#allocation3 + $0x3cc] ss:$76 sps:$4 sm:$0xff]  }
 0x1fc   : > { %v16175_v61 = vpop.f32.mrf.mxu0  ;;  %4099 = vmatprep.mubr.bf16.mxu1 %v17515_v51  ;;  %16705 = vmatpush3.bf16.msra.mxu0 %v17556_v5 }
 0x1fd   : > { %v20181_v6 = vadd.f32 %v16267_v62, %v3425_v3  ;;  %v16176_v7 = vadd.f32 %v16175_v61, %v16174_v59  ;;  %v16269_v9 = vpop.f32.mrf.mxu1  ;;  %16706 = vmatprep.subr.bf16.mxu0 %v17566_v57  ;;  %v17524_v61 = vld [vmem:[#allocation3 + $0x3c0] ss:$76 sps:$4 sm:$0xff]  }
 0x1fe   : > { %v16177_v13 = vpop.f32.mrf.mxu0  ;;  %v16270_v14 = vadd.f32 %v16269_v9, %v16268_v4  ;;  %v17527_v9 = vld [vmem:[#allocation3 + $0x3c8] ss:$76 sps:$4 sm:$0xff]  }
 0x1ff   : > { %v3430_v15 = vadd.f32 %v16176_v7, %v20100_v22  ;;  %v16271_v16 = vpop.f32.mrf.mxu1 }
 0x200   : > { %v16178_v11 = vpop.f32.mrf.mxu0  ;;  %16707 = vmatpush3.bf16.msra.mxu0 %v17567_v2 }
 0x201   : > { %v20184_v25 = vadd.f32 %v16270_v14, %v3430_v15  ;;  %v16179_v26 = vadd.f32 %v16178_v11, %v16177_v13  ;;  %v16272_v56 = vpop.f32.mrf.mxu1  ;;  %16883 = vmatprep.subr.bf16.mxu0 %v19756_v40  ;;  %v17537_v11 = vld [vmem:[#allocation3 + $0x464] ss:$76 sps:$4 sm:$0xff]  }
 0x202   : > { %v16180_v33 = vpop.f32.mrf.mxu0  ;;  %v16273_v27 = vadd.f32 %v16272_v56, %v16271_v16  ;;  %3964 = vmatmul.mubr.bf16.gmra.mxu0 %v17510_v18  ;;  %v17534_v16 = vld [vmem:[#allocation3 + $0x45c] ss:$76 sps:$4 sm:$0xff]  }
 0x203   : > { %v3433_v29 = vadd.f32 %v16179_v26, %v20102_v32  ;;  %v16274_v30 = vpop.f32.mrf.mxu1  ;;  %4100 = vmatmul.mubr.bf16.gmra.mxu1 %v17513_v12  ;;  %3971 = vmatprep.mubr.bf16.mxu0 %v17518_v20 }
 0x204   : > { %v16181_v22 = vpop.f32.mrf.mxu0  ;;  %4107 = vmatprep.mubr.bf16.mxu1 %v17523_v21 }
 0x205   : > { %v20188_v38 = vadd.f32 %v16273_v27, %v3433_v29  ;;  %v16182_v39 = vadd.f32 %v16181_v22, %v16180_v33  ;;  %v16275_v41 = vpop.f32.mrf.mxu1  ;;  %v17532_v22 = vld [vmem:[#allocation3 + $0x458] ss:$76 sps:$4 sm:$0xff]  }
 0x206   : > { %v16183_v47 = vpop.f32.mrf.mxu0  ;;  %v16276_v46 = vadd.f32 %v16275_v41, %v16274_v30  ;;  %v17535_v41 = vld [vmem:[#allocation3 + $0x460] ss:$76 sps:$4 sm:$0xff]  }
 0x207   : > { %v3438_v50 = vadd.f32 %v16182_v39, %v20104_v44  ;;  %v16277_v51 = vpop.f32.mrf.mxu1 }
 0x208   : > { %v16184_v5 = vpop.f32.mrf.mxu0 }
 0x209   : > { %v20191_v32 = vadd.f32 %v16276_v46, %v3438_v50  ;;  %v16185_v31 = vadd.f32 %v16184_v5, %v16183_v47  ;;  %v16278_v57 = vpop.f32.mrf.mxu1  ;;  %v17543_v5 = vld [vmem:[#allocation3 + $0x4fc] ss:$76 sps:$4 sm:$0xff]  }
 0x20a   : > { %v16186_v59 = vpop.f32.mrf.mxu0  ;;  %v16279_v62 = vadd.f32 %v16278_v57, %v16277_v51  ;;  %3972 = vmatmul.mubr.bf16.gmra.mxu0 %v17516_v37  ;;  %v17540_v51 = vld [vmem:[#allocation3 + $0x4f4] ss:$76 sps:$4 sm:$0xff]  }
 0x20b   : > { %v3441_v2 = vadd.f32 %v16185_v31, %v20106_v53  ;;  %v16280_v3 = vpop.f32.mrf.mxu1  ;;  %4108 = vmatmul.mubr.bf16.gmra.mxu1 %v17521_v45  ;;  %3979 = vmatprep.mubr.bf16.mxu0 %v17526_v52 }
 0x20c   : > { %v16187_v4 = vpop.f32.mrf.mxu0  ;;  %4115 = vmatprep.mubr.bf16.mxu1 %v17529_v55 }
 0x20d   : > { %v20194_v44 = vadd.f32 %v16279_v62, %v3441_v2  ;;  %v16188_v18 = vadd.f32 %v16187_v4, %v16186_v59  ;;  %v16281_v7 = vpop.f32.mrf.mxu1  ;;  %v17538_v4 = vld [vmem:[#allocation3 + $0x4f0] ss:$76 sps:$4 sm:$0xff]  }
 0x20e   : > { %v16189_v12 = vpop.f32.mrf.mxu0  ;;  %v16282_v13 = vadd.f32 %v16281_v7, %v16280_v3  ;;  %v17541_v7 = vld [vmem:[#allocation3 + $0x4f8] ss:$76 sps:$4 sm:$0xff]  }
 0x20f   : > { %v3446_v14 = vadd.f32 %v16188_v18, %v20108_v1  ;;  %v16283_v15 = vpop.f32.mrf.mxu1 }
 0x210   : > { %v16190_v20 = vpop.f32.mrf.mxu0 }
 0x211   : > { %v20197_v53 = vadd.f32 %v16282_v13, %v3446_v14  ;;  %v16191_v21 = vadd.f32 %v16190_v20, %v16189_v12  ;;  %v16284_v26 = vpop.f32.mrf.mxu1  ;;  %v17551_v20 = vld [vmem:[#allocation3 + $0x594] ss:$76 sps:$4 sm:$0xff]  }
 0x212   : > { %v16192_v56 = vpop.f32.mrf.mxu0  ;;  %v16285_v33 = vadd.f32 %v16284_v26, %v16283_v15  ;;  %3980 = vmatmul.mubr.bf16.gmra.mxu0 %v17524_v61  ;;  %v17548_v15 = vld [vmem:[#allocation3 + $0x58c] ss:$76 sps:$4 sm:$0xff]  }
 0x213   : > { %v3449_v27 = vadd.f32 %v16191_v21, %v20110_v10  ;;  %v16286_v29 = vpop.f32.mrf.mxu1  ;;  %4116 = vmatmul.mubr.bf16.gmra.mxu1 %v17527_v9  ;;  %3987 = vmatprep.mubr.bf16.mxu0 %v17534_v16 }
 0x214   : > { %v16193_v30 = vpop.f32.mrf.mxu0  ;;  %4123 = vmatprep.mubr.bf16.mxu1 %v17537_v11 }
 0x215   : > { %v20200_v1 = vadd.f32 %v16285_v33, %v3449_v27  ;;  %v16194_v37 = vadd.f32 %v16193_v30, %v16192_v56  ;;  %v16287_v39 = vpop.f32.mrf.mxu1  ;;  %v17546_v30 = vld [vmem:[#allocation3 + $0x588] ss:$76 sps:$4 sm:$0xff]  }
 0x216   : > { %v16195_v45 = vpop.f32.mrf.mxu0  ;;  %v16288_v47 = vadd.f32 %v16287_v39, %v16286_v29  ;;  %v17549_v39 = vld [vmem:[#allocation3 + $0x590] ss:$76 sps:$4 sm:$0xff]  }
 0x217   : > { %v3454_v46 = vadd.f32 %v16194_v37, %v20112_v23  ;;  %v16289_v50 = vpop.f32.mrf.mxu1 }
 0x218   : > { %v16196_v52 = vpop.f32.mrf.mxu0 }
 0x219   : > { %v20203_v10 = vadd.f32 %v16288_v47, %v3454_v46  ;;  %v16197_v55 = vadd.f32 %v16196_v52, %v16195_v45  ;;  %v16290_v31 = vpop.f32.mrf.mxu1 }
 0x21a   : > { %v16198_v57 = vpop.f32.mrf.mxu0  ;;  %v16291_v59 = vadd.f32 %v16290_v31, %v16289_v50  ;;  %3988 = vmatmul.mubr.bf16.gmra.mxu0 %v17532_v22  ;;  %v17555_v50 = vld [vmem:[#allocation3 + $0x624] ss:$76 sps:$4 sm:$0xff]  }
 0x21b   : > { %v3457_v62 = vadd.f32 %v16197_v55, %v20114_v35  ;;  %v16292_v2 = vpop.f32.mrf.mxu1  ;;  %4124 = vmatmul.mubr.bf16.gmra.mxu1 %v17535_v41  ;;  %3995 = vmatprep.mubr.bf16.mxu0 %v17540_v51  ;;  %v17559_v51 = vld [vmem:[#allocation3 + $0x62c] ss:$76 sps:$4 sm:$0xff]  }
 0x21c   : > { %v16199_v3 = vpop.f32.mrf.mxu0  ;;  %4131 = vmatprep.mubr.bf16.mxu1 %v17543_v5 }
 0x21d   : > { %v20206_v23 = vadd.f32 %v16291_v59, %v3457_v62  ;;  %v16200_v61 = vadd.f32 %v16199_v3, %v16198_v57  ;;  %v16293_v18 = vpop.f32.mrf.mxu1  ;;  %v17553_v3 = vld [vmem:[#allocation3 + $0x620] ss:$76 sps:$4 sm:$0xff]  }
 0x21e   : > { %v16201_v9 = vpop.f32.mrf.mxu0  ;;  %v16294_v12 = vadd.f32 %v16293_v18, %v16292_v2  ;;  %v17557_v18 = vld [vmem:[#allocation3 + $0x628] ss:$76 sps:$4 sm:$0xff]  }
 0x21f   : > { %v3462_v13 = vadd.f32 %v16200_v61, %v20116_v48  ;;  %v16295_v14 = vpop.f32.mrf.mxu1 }
 0x220   : > { %v16202_v16 = vpop.f32.mrf.mxu0 }
 0x221   : > { %v20209_v35 = vadd.f32 %v16294_v12, %v3462_v13  ;;  %v16203_v11 = vadd.f32 %v16202_v16, %v16201_v9  ;;  %v16296_v21 = vpop.f32.mrf.mxu1 }
 0x222   : > { %v16204_v26 = vpop.f32.mrf.mxu0  ;;  %v16297_v56 = vadd.f32 %v16296_v21, %v16295_v14  ;;  %3996 = vmatmul.mubr.bf16.gmra.mxu0 %v17538_v4 }
 0x223   : > { %v3465_v33 = vadd.f32 %v16203_v11, %v20118_v58  ;;  %v16298_v27 = vpop.f32.mrf.mxu1  ;;  %4132 = vmatmul.mubr.bf16.gmra.mxu1 %v17541_v7  ;;  %4003 = vmatprep.mubr.bf16.mxu0 %v17548_v15  ;;  %v17562_v7 = vld [vmem:[#allocation3 + $0x6bc] ss:$76 sps:$4 sm:$0xff]   ;;  %v17565_v15 = vld [vmem:[#allocation3 + $0x6c4] ss:$76 sps:$4 sm:$0xff]  }
 0x224   : > { %v16205_v29 = vpop.f32.mrf.mxu0  ;;  %4139 = vmatprep.mubr.bf16.mxu1 %v17551_v20 }
 0x225   : > { %v20212_v48 = vadd.f32 %v16297_v56, %v3465_v33  ;;  %v16206_v22 = vadd.f32 %v16205_v29, %v16204_v26  ;;  %v16299_v37 = vpop.f32.mrf.mxu1  ;;  %v945_v56 = vld [vmem:[#allocation3 + $0x750] sm:$0xff]  ;;  %v946_v29 = vld [vmem:[#allocation3 + $0x758] sm:$0xff] }
 0x226   : > { %v16207_v41 = vpop.f32.mrf.mxu0  ;;  %v16300_v45 = vadd.f32 %v16299_v37, %v16298_v27 }
 0x227   : > { %v3470_v47 = vadd.f32 %v16206_v22, %v20120_v8  ;;  %v16301_v46 = vpop.f32.mrf.mxu1  ;;  %v17560_v22 = vld [vmem:[#allocation3 + $0x6b8] ss:$76 sps:$4 sm:$0xff]  }
 0x228   : > { %v16208_v52 = vpop.f32.mrf.mxu0 }
 0x229   : > { %v20215_v58 = vadd.f32 %v16300_v45, %v3470_v47  ;;  %v16209_v5 = vadd.f32 %v16208_v52, %v16207_v41  ;;  %v16302_v55 = vpop.f32.mrf.mxu1  ;;  %v17563_v41 = vld [vmem:[#allocation3 + $0x6c0] ss:$76 sps:$4 sm:$0xff]  }
 0x22a   : > { %v16210_v31 = vpop.f32.mrf.mxu0  ;;  %v16303_v57 = vadd.f32 %v16302_v55, %v16301_v46  ;;  %4004 = vmatmul.mubr.bf16.gmra.mxu0 %v17546_v30 }
 0x22b   : > { %v3473_v59 = vadd.f32 %v16209_v5, %v20122_v17  ;;  %v16304_v62 = vpop.f32.mrf.mxu1  ;;  %4140 = vmatmul.mubr.bf16.gmra.mxu1 %v17549_v39  ;;  %4011 = vmatprep.mubr.bf16.mxu0 %v17555_v50 }
 0x22c   : > { %v16211_v2 = vpop.f32.mrf.mxu0  ;;  %4147 = vmatprep.mubr.bf16.mxu1 %v17559_v51  ;;  %v14505_v51 = vcombine.high %v945_v56, %v945_v56 }
 0x22d   : > { %v20218_v8 = vadd.f32 %v16303_v57, %v3473_v59  ;;  %v16212_v4 = vadd.f32 %v16211_v2, %v16210_v31  ;;  %v16305_v61 = vpop.f32.mrf.mxu1 }
 0x22e   : > { %v16213_v9 = vpop.f32.mrf.mxu0  ;;  %v16306_v12 = vadd.f32 %v16305_v61, %v16304_v62 }
 0x22f   : > { %v3478_v13 = vadd.f32 %v16212_v4, %v20124_v34  ;;  %v16307_v14 = vpop.f32.mrf.mxu1 }
 0x230   : > { %v16214_v16 = vpop.f32.mrf.mxu0 }
 0x231   : > { %v20221_v17 = vadd.f32 %v16306_v12, %v3478_v13  ;;  %v16215_v20 = vadd.f32 %v16214_v16, %v16213_v9  ;;  %v16308_v11 = vpop.f32.mrf.mxu1  ;;  %v14506_v9 = vcombine.low %v946_v29, %v946_v29 }
 0x232   : > { %v16216_v21 = vpop.f32.mrf.mxu0  ;;  %v16309_v26 = vadd.f32 %v16308_v11, %v16307_v14  ;;  %4012 = vmatmul.mubr.bf16.gmra.mxu0 %v17553_v3  ;;  %v17574_v3 = vld [vmem:[#allocation3 + $0x44] ss:$76 sps:$4 sm:$0xff]  }
 0x233   : > { %v3481_v33 = vadd.f32 %v16215_v20, %v20127_v49  ;;  %v16310_v27 = vpop.f32.mrf.mxu1  ;;  %4148 = vmatmul.mubr.bf16.gmra.mxu1 %v17557_v18  ;;  %4019 = vmatprep.mubr.bf16.mxu0 %v17562_v7  ;;  %v14507_v49 = vcombine.high %v946_v29, %v946_v29  ;;  %v17579_v29 = vld [vmem:[#allocation3 + $0xdc] ss:$76 sps:$4 sm:$0xff]  }
 0x234   : > { %v16217_v30 = vpop.f32.mrf.mxu0  ;;  %4155 = vmatprep.mubr.bf16.mxu1 %v17565_v15 }
 0x235   : > { %v20224_v34 = vadd.f32 %v16309_v26, %v3481_v33  ;;  %v16218_v37 = vadd.f32 %v16217_v30, %v16216_v21  ;;  %v16311_v39 = vpop.f32.mrf.mxu1  ;;  %v17572_v33 = vld [vmem:[#allocation3 + $0x40] ss:$76 sps:$4 sm:$0xff]  }
 0x236   : > { %v16219_v45 = vpop.f32.mrf.mxu0  ;;  %v16312_v47 = vadd.f32 %v16311_v39, %v16310_v27 }
 0x237   : > { %v3486_v46 = vadd.f32 %v16218_v37, %v20129_v0  ;;  %v16313_v50 = vpop.f32.mrf.mxu1  ;;  %v14504_v0 = vcombine.low %v945_v56, %v945_v56  ;;  %v17582_v37 = vld [vmem:[#allocation3 + $0xe0] ss:$76 sps:$4 sm:$0xff]  }
 0x238   : > { %v16220_v52 = vpop.f32.mrf.mxu0 }
 0x239   : > { %v20227_v5 = vadd.f32 %v16312_v47, %v3486_v46  ;;  %v16314_v55 = vpop.f32.mrf.mxu1 }
 0x23a   : > { %v16332_v31 = vpop.f32.mrf.mxu0  ;;  %4020 = vmatmul.mubr.bf16.gmra.mxu0 %v17560_v22 }
 0x23b   : > { %v16426_v57 = vpop.f32.mrf.mxu1  ;;  %4156 = vmatmul.mubr.bf16.gmra.mxu1 %v17563_v41  ;;  %4027 = vmatprep.mubr.bf16.mxu0 %v14505_v51 }
 0x23c   : > { %v16333_v59 = vpop.f32.mrf.mxu0  ;;  %4163 = vmatprep.mubr.bf16.mxu1 %v14507_v49  ;;  %v19476_v49 = vld [vmem:[%s19949_s26 + $0x498] sm:$0xff]  }
 0x23d   : > { %v16334_v62 = vadd.f32 %v16333_v59, %v16332_v31  ;;  %v16427_v2 = vpop.f32.mrf.mxu1 }
 0x23e   : > { %v16335_v4 = vpop.f32.mrf.mxu0  ;;  %v16428_v61 = vadd.f32 %v16427_v2, %v16426_v57  ;;  %v17577_v57 = vld [vmem:[#allocation3 + $0xd8] ss:$76 sps:$4 sm:$0xff]   ;;  %v17585_v2 = vld [vmem:[#allocation3 + $0x174] ss:$76 sps:$4 sm:$0xff]  }
 0x23f   : > { %v3662_v18 = vadd.f32 %v16334_v62, %v20132_v28  ;;  %v16429_v7 = vpop.f32.mrf.mxu1 }
 0x240   : > { %v16336_v12 = vpop.f32.mrf.mxu0 }
 0x241   : > { %v20230_v13 = vadd.f32 %v16428_v61, %v3662_v18  ;;  %v16337_v14 = vadd.f32 %v16336_v12, %v16335_v4  ;;  %v16430_v15 = vpop.f32.mrf.mxu1  ;;  %v17586_v4 = vld [vmem:[#allocation3 + $0x178] ss:$76 sps:$4 sm:$0xff]   ;;  %v19477_v18 = vld [vmem:[%s19949_s26 + $0x490] sm:$0xff]  }
 0x242   : > { %v16338_v16 = vpop.f32.mrf.mxu0  ;;  %v16431_v20 = vadd.f32 %v16430_v15, %v16429_v7  ;;  %4028 = vmatmul.mubr.bf16.gmra.mxu0 %v14504_v0 }
 0x243   : > { %v3665_v11 = vadd.f32 %v16337_v14, %v20135_v42  ;;  %v16432_v21 = vpop.f32.mrf.mxu1  ;;  %4164 = vmatmul.mubr.bf16.gmra.mxu1 %v14506_v9  ;;  %4203 = vmatprep.mubr.bf16.mxu0 %v17574_v3 }
 0x244   : > { %v16339_v26 = vpop.f32.mrf.mxu0  ;;  %16895 = vmatprep.mubr.msk.bf16.mxu1 %vm19757_vm0, %v19756_v40 }
 0x245   : > { %v20235_v28 = vadd.f32 %v16431_v20, %v3665_v11  ;;  %v16340_v56 = vadd.f32 %v16339_v26, %v16338_v16  ;;  %v16433_v27 = vpop.f32.mrf.mxu1  ;;  %v17583_v26 = vld [vmem:[#allocation3 + $0x170] ss:$76 sps:$4 sm:$0xff]  }
 0x246   : > { %v16341_v30 = vpop.f32.mrf.mxu0  ;;  %v16434_v22 = vadd.f32 %v16433_v27, %v16432_v21  ;;  %v19478_v21 = vld [vmem:[%s19949_s26 + $0x488] sm:$0xff]  }
 0x247   : > { %v3670_v42 = vadd.f32 %v16340_v56, %v20140_v63  ;;  %v16435_v39 = vpop.f32.mrf.mxu1 }
 0x248   : > { %v16342_v41 = vpop.f32.mrf.mxu0 }
 0x249   : > { %v20238_v45 = vadd.f32 %v16434_v22, %v3670_v42  ;;  %v16343_v47 = vadd.f32 %v16342_v41, %v16341_v30  ;;  %v16436_v46 = vpop.f32.mrf.mxu1  ;;  %v17590_v22 = vld [vmem:[#allocation3 + $0x210] ss:$76 sps:$4 sm:$0xff]  }
 0x24a   : > { %v16344_v50 = vpop.f32.mrf.mxu0  ;;  %v16437_v51 = vadd.f32 %v16436_v46, %v16435_v39  ;;  %4204 = vmatmul.mubr.bf16.vlgmr.msra.gmra.mxu0 %v17572_v33  ;;  %v19479_v39 = vld [vmem:[%s19949_s26 + $0x480] sm:$0xff]  }
 0x24b   : > { %v3673_v52 = vadd.f32 %v16343_v47, %v20147_v19  ;;  %16884 = vmatpush3.bf16.msra.mxu0 %v19476_v49  ;;  %v16438_v55 = vpop.f32.mrf.mxu1  ;;  %4211 = vmatprep.mubr.bf16.mxu0 %v17579_v29  ;;  %v17589_v29 = vld [vmem:[#allocation3 + $0x20c] ss:$76 sps:$4 sm:$0xff]  }
 0x24c   : > { %v16345_v31 = vpop.f32.mrf.mxu0  ;;  %16896 = vmatmul.mubr.msk.bf16.vlgmr.msra.gmra.mxu1 %vm3043_vm1, %v17582_v37  ;;  %16885 = vmatprep.subr.bf16.mxu0 %v19756_v40 }
 0x24d   : > { %v20244_v63 = vadd.f32 %v16437_v51, %v3673_v52  ;;  %v16346_v59 = vadd.f32 %v16345_v31, %v16344_v50  ;;  %v16439_v62 = vpop.f32.mrf.mxu1  ;;  %16899 = vmatprep.mubr.msk.bf16.mxu1 %vm19757_vm0, %v19756_v40 }
 0x24e   : > { %v16347_v19 = vpop.f32.mrf.mxu0  ;;  %v16440_v3 = vadd.f32 %v16439_v62, %v16438_v55 }
 0x24f   : > { %v3678_v61 = vadd.f32 %v16346_v59, %v20153_v24  ;;  %v16441_v0 = vpop.f32.mrf.mxu1  ;;  %16886 = vmatpush3.bf16.msra.mxu0 %v19477_v18 }
 0x250   : > { %v16348_v7 = vpop.f32.mrf.mxu0  ;;  %16887 = vmatprep.subr.bf16.mxu0 %v19756_v40 }
 0x251   : > { %v20251_v9 = vadd.f32 %v16440_v3, %v3678_v61  ;;  %v16349_v12 = vadd.f32 %v16348_v7, %v16347_v19  ;;  %v16442_v14 = vpop.f32.mrf.mxu1 }
 0x252   : > { %v16350_v15 = vpop.f32.mrf.mxu0  ;;  %v16443_v16 = vadd.f32 %v16442_v14, %v16441_v0  ;;  %4212 = vmatmul.mubr.bf16.gmra.mxu0 %v17577_v57  ;;  %v17587_v57 = vld [vmem:[#allocation3 + $0x208] ss:$76 sps:$4 sm:$0xff]  }
 0x253   : > { %v3681_v20 = vadd.f32 %v16349_v12, %v20161_v60  ;;  %v16444_v11 = vpop.f32.mrf.mxu1  ;;  %4219 = vmatprep.mubr.bf16.mxu0 %v17585_v2  ;;  %16888 = vmatpush3.bf16.msra.mxu0 %v19478_v21  ;;  %v17593_v2 = vld [vmem:[#allocation3 + $0x2a4] ss:$76 sps:$4 sm:$0xff]   ;;  %v17591_v21 = vld [vmem:[#allocation3 + $0x2a0] ss:$76 sps:$4 sm:$0xff]  }
 0x254   : > { %v16351_v24 = vpop.f32.mrf.mxu0  ;;  %16900 = vmatmul.mubr.msk.bf16.gmra.mxu1 %vm3043_vm1, %v17586_v4  ;;  %16889 = vmatprep.subr.bf16.mxu0 %v19756_v40  ;;  %v17594_v4 = vld [vmem:[#allocation3 + $0x2a8] ss:$76 sps:$4 sm:$0xff]  }
 0x255   : > { %v20257_v33 = vadd.f32 %v16443_v16, %v3681_v20  ;;  %v16352_v56 = vadd.f32 %v16351_v24, %v16350_v15  ;;  %v16445_v27 = vpop.f32.mrf.mxu1  ;;  %16903 = vmatprep.mubr.msk.bf16.mxu1 %vm19757_vm0, %v19756_v40 }
 0x256   : > { %v16353_v60 = vpop.f32.mrf.mxu0  ;;  %v16446_v30 = vadd.f32 %v16445_v27, %v16444_v11 }
 0x257   : > { %v3686_v37 = vadd.f32 %v16352_v56, %v20166_v43  ;;  %v16447_v42 = vpop.f32.mrf.mxu1  ;;  %16890 = vmatpush3.bf16.msra.mxu0 %v19479_v39  ;;  %v17597_v56 = vld [vmem:[#allocation3 + $0x33c] ss:$76 sps:$4 sm:$0xff]  }
 0x258   : > { %v16354_v41 = vpop.f32.mrf.mxu0  ;;  %16943 = vmatprep.subr.bf16.mxu0 %v19756_v40 }
 0x259   : > { %v20264_v47 = vadd.f32 %v16446_v30, %v3686_v37  ;;  %v16355_v46 = vadd.f32 %v16354_v41, %v16353_v60  ;;  %v16448_v50 = vpop.f32.mrf.mxu1  ;;  %v17598_v60 = vld [vmem:[#allocation3 + $0x340] ss:$76 sps:$4 sm:$0xff]  }
 0x25a   : > { %v16356_v51 = vpop.f32.mrf.mxu0  ;;  %v16449_v52 = vadd.f32 %v16448_v50, %v16447_v42  ;;  %4220 = vmatmul.mubr.bf16.gmra.mxu0 %v17583_v26 }
 0x25b   : > { %v3689_v49 = vadd.f32 %v16355_v46, %v20172_v36  ;;  %v16450_v55 = vpop.f32.mrf.mxu1  ;;  %4227 = vmatprep.mubr.bf16.mxu0 %v17589_v29 }
 0x25c   : > { %v16357_v31 = vpop.f32.mrf.mxu0  ;;  %16904 = vmatmul.mubr.msk.bf16.gmra.mxu1 %vm3043_vm1, %v17590_v22 }
 0x25d   : > { %v20268_v43 = vadd.f32 %v16449_v52, %v3689_v49  ;;  %v16358_v59 = vadd.f32 %v16357_v31, %v16356_v51  ;;  %v16451_v62 = vpop.f32.mrf.mxu1  ;;  %16907 = vmatprep.mubr.msk.bf16.mxu1 %vm19757_vm0, %v19756_v40  ;;  %v17595_v49 = vld [vmem:[#allocation3 + $0x338] ss:$76 sps:$4 sm:$0xff]  }
 0x25e   : > { %v16359_v19 = vpop.f32.mrf.mxu0  ;;  %v16452_v3 = vadd.f32 %v16451_v62, %v16450_v55 }
 0x25f   : > { %v3694_v61 = vadd.f32 %v16358_v59, %v20176_v54  ;;  %v16453_v36 = vpop.f32.mrf.mxu1 }
 0x260   : > { %v16360_v0 = vpop.f32.mrf.mxu0 }
 0x261   : > { %v20273_v18 = vadd.f32 %v16452_v3, %v3694_v61  ;;  %v16361_v7 = vadd.f32 %v16360_v0, %v16359_v19  ;;  %v16454_v12 = vpop.f32.mrf.mxu1 }
 0x262   : > { %v16362_v14 = vpop.f32.mrf.mxu0  ;;  %v16455_v15 = vadd.f32 %v16454_v12, %v16453_v36  ;;  %4228 = vmatmul.mubr.bf16.gmra.mxu0 %v17587_v57  ;;  %v17601_v57 = vld [vmem:[#allocation3 + $0x3d4] ss:$76 sps:$4 sm:$0xff]  }
 0x263   : > { %v3697_v16 = vadd.f32 %v16361_v7, %v20181_v6  ;;  %v16456_v20 = vpop.f32.mrf.mxu1  ;;  %4235 = vmatprep.mubr.bf16.mxu0 %v17593_v2  ;;  %v17602_v2 = vld [vmem:[#allocation3 + $0x3d8] ss:$76 sps:$4 sm:$0xff]  }
 0x264   : > { %v16363_v11 = vpop.f32.mrf.mxu0  ;;  %16908 = vmatmul.mubr.msk.bf16.gmra.mxu1 %vm3043_vm1, %v17594_v4 }
 0x265   : > { %v20277_v24 = vadd.f32 %v16455_v15, %v3697_v16  ;;  %v16364_v54 = vadd.f32 %v16363_v11, %v16362_v14  ;;  %v16457_v26 = vpop.f32.mrf.mxu1  ;;  %16911 = vmatprep.mubr.msk.bf16.mxu1 %vm19757_vm0, %v19756_v40  ;;  %v17599_v16 = vld [vmem:[#allocation3 + $0x3d0] ss:$76 sps:$4 sm:$0xff]  }
 0x266   : > { %v16365_v27 = vpop.f32.mrf.mxu0  ;;  %v16458_v29 = vadd.f32 %v16457_v26, %v16456_v20 }
 0x267   : > { %v3702_v30 = vadd.f32 %v16364_v54, %v20184_v25  ;;  %v16459_v6 = vpop.f32.mrf.mxu1 }
 0x268   : > { %v16366_v22 = vpop.f32.mrf.mxu0 }
 0x269   : > { %v20282_v37 = vadd.f32 %v16458_v29, %v3702_v30  ;;  %v16367_v42 = vadd.f32 %v16366_v22, %v16365_v27  ;;  %v16460_v39 = vpop.f32.mrf.mxu1 }
 0x26a   : > { %v16368_v41 = vpop.f32.mrf.mxu0  ;;  %v16461_v46 = vadd.f32 %v16460_v39, %v16459_v6  ;;  %4236 = vmatmul.mubr.bf16.gmra.mxu0 %v17591_v21  ;;  %v17605_v21 = vld [vmem:[#allocation3 + $0x46c] ss:$76 sps:$4 sm:$0xff]  }
 0x26b   : > { %v3705_v50 = vadd.f32 %v16367_v42, %v20188_v38  ;;  %v16462_v51 = vpop.f32.mrf.mxu1  ;;  %4243 = vmatprep.mubr.bf16.mxu0 %v17597_v56  ;;  %v17606_v56 = vld [vmem:[#allocation3 + $0x470] ss:$76 sps:$4 sm:$0xff]  }
 0x26c   : > { %v16369_v52 = vpop.f32.mrf.mxu0  ;;  %16912 = vmatmul.mubr.msk.bf16.gmra.mxu1 %vm3043_vm1, %v17598_v60 }
 0x26d   : > { %v20286_v55 = vadd.f32 %v16461_v46, %v3705_v50  ;;  %v16370_v25 = vadd.f32 %v16369_v52, %v16368_v41  ;;  %v16463_v31 = vpop.f32.mrf.mxu1  ;;  %16915 = vmatprep.mubr.msk.bf16.mxu1 %vm19757_vm0, %v19756_v40  ;;  %v17603_v50 = vld [vmem:[#allocation3 + $0x468] ss:$76 sps:$4 sm:$0xff]  }
 0x26e   : > { %v16371_v59 = vpop.f32.mrf.mxu0  ;;  %v16464_v62 = vadd.f32 %v16463_v31, %v16462_v51 }
 0x26f   : > { %v3710_v19 = vadd.f32 %v16370_v25, %v20191_v32  ;;  %v16465_v38 = vpop.f32.mrf.mxu1 }
 0x270   : > { %v16372_v3 = vpop.f32.mrf.mxu0 }
 0x271   : > { %v20291_v4 = vadd.f32 %v16464_v62, %v3710_v19  ;;  %v16373_v61 = vadd.f32 %v16372_v3, %v16371_v59  ;;  %v16466_v36 = vpop.f32.mrf.mxu1 }
 0x272   : > { %v16374_v0 = vpop.f32.mrf.mxu0  ;;  %v16467_v7 = vadd.f32 %v16466_v36, %v16465_v38  ;;  %4244 = vmatmul.mubr.bf16.gmra.mxu0 %v17595_v49  ;;  %v17609_v49 = vld [vmem:[#allocation3 + $0x504] ss:$76 sps:$4 sm:$0xff]  }
 0x273   : > { %v3713_v12 = vadd.f32 %v16373_v61, %v20194_v44  ;;  %v16468_v14 = vpop.f32.mrf.mxu1  ;;  %4251 = vmatprep.mubr.bf16.mxu0 %v17601_v57  ;;  %v17610_v57 = vld [vmem:[#allocation3 + $0x508] ss:$76 sps:$4 sm:$0xff]  }
 0x274   : > { %v16375_v15 = vpop.f32.mrf.mxu0  ;;  %16916 = vmatmul.mubr.msk.bf16.gmra.mxu1 %vm3043_vm1, %v17602_v2 }
 0x275   : > { %v20295_v20 = vadd.f32 %v16467_v7, %v3713_v12  ;;  %v16376_v32 = vadd.f32 %v16375_v15, %v16374_v0  ;;  %v16469_v11 = vpop.f32.mrf.mxu1  ;;  %16919 = vmatprep.mubr.msk.bf16.mxu1 %vm19757_vm0, %v19756_v40  ;;  %v17607_v12 = vld [vmem:[#allocation3 + $0x500] ss:$76 sps:$4 sm:$0xff]  }
 0x276   : > { %v16377_v54 = vpop.f32.mrf.mxu0  ;;  %v16470_v26 = vadd.f32 %v16469_v11, %v16468_v14 }
 0x277   : > { %v3718_v27 = vadd.f32 %v16376_v32, %v20197_v53  ;;  %v16471_v44 = vpop.f32.mrf.mxu1 }
 0x278   : > { %v16378_v29 = vpop.f32.mrf.mxu0 }
 0x279   : > { %v20300_v60 = vadd.f32 %v16470_v26, %v3718_v27  ;;  %v16379_v30 = vadd.f32 %v16378_v29, %v16377_v54  ;;  %v16472_v6 = vpop.f32.mrf.mxu1 }
 0x27a   : > { %v16380_v22 = vpop.f32.mrf.mxu0  ;;  %v16473_v42 = vadd.f32 %v16472_v6, %v16471_v44  ;;  %4252 = vmatmul.mubr.bf16.gmra.mxu0 %v17599_v16  ;;  %v17613_v16 = vld [vmem:[#allocation3 + $0x59c] ss:$76 sps:$4 sm:$0xff]  }
 0x27b   : > { %v3721_v39 = vadd.f32 %v16379_v30, %v20200_v1  ;;  %v16474_v41 = vpop.f32.mrf.mxu1  ;;  %4259 = vmatprep.mubr.bf16.mxu0 %v17605_v21  ;;  %v17614_v21 = vld [vmem:[#allocation3 + $0x5a0] ss:$76 sps:$4 sm:$0xff]  }
 0x27c   : > { %v16381_v46 = vpop.f32.mrf.mxu0  ;;  %16920 = vmatmul.mubr.msk.bf16.gmra.mxu1 %vm3043_vm1, %v17606_v56 }
 0x27d   : > { %v20304_v51 = vadd.f32 %v16473_v42, %v3721_v39  ;;  %v16382_v53 = vadd.f32 %v16381_v46, %v16380_v22  ;;  %v16475_v52 = vpop.f32.mrf.mxu1  ;;  %16923 = vmatprep.mubr.msk.bf16.mxu1 %vm19757_vm0, %v19756_v40  ;;  %v17611_v39 = vld [vmem:[#allocation3 + $0x598] ss:$76 sps:$4 sm:$0xff]  }
 0x27e   : > { %v16383_v25 = vpop.f32.mrf.mxu0  ;;  %v16476_v31 = vadd.f32 %v16475_v52, %v16474_v41 }
 0x27f   : > { %v3726_v59 = vadd.f32 %v16382_v53, %v20203_v10  ;;  %v16477_v1 = vpop.f32.mrf.mxu1 }
 0x280   : > { %v16384_v62 = vpop.f32.mrf.mxu0 }
 0x281   : > { %v20309_v2 = vadd.f32 %v16476_v31, %v3726_v59  ;;  %v16385_v19 = vadd.f32 %v16384_v62, %v16383_v25  ;;  %v16478_v38 = vpop.f32.mrf.mxu1 }
 0x282   : > { %v16386_v3 = vpop.f32.mrf.mxu0  ;;  %v16479_v61 = vadd.f32 %v16478_v38, %v16477_v1  ;;  %4260 = vmatmul.mubr.bf16.gmra.mxu0 %v17603_v50  ;;  %v17617_v50 = vld [vmem:[#allocation3 + $0x634] ss:$76 sps:$4 sm:$0xff]  }
 0x283   : > { %v3729_v36 = vadd.f32 %v16385_v19, %v20206_v23  ;;  %v16480_v0 = vpop.f32.mrf.mxu1  ;;  %4267 = vmatprep.mubr.bf16.mxu0 %v17609_v49  ;;  %v17618_v49 = vld [vmem:[#allocation3 + $0x638] ss:$76 sps:$4 sm:$0xff]  }
 0x284   : > { %v16387_v7 = vpop.f32.mrf.mxu0  ;;  %16924 = vmatmul.mubr.msk.bf16.gmra.mxu1 %vm3043_vm1, %v17610_v57 }
 0x285   : > { %v20313_v14 = vadd.f32 %v16479_v61, %v3729_v36  ;;  %v16388_v10 = vadd.f32 %v16387_v7, %v16386_v3  ;;  %v16481_v15 = vpop.f32.mrf.mxu1  ;;  %16927 = vmatprep.mubr.msk.bf16.mxu1 %vm19757_vm0, %v19756_v40  ;;  %v17615_v36 = vld [vmem:[#allocation3 + $0x630] ss:$76 sps:$4 sm:$0xff]  }
 0x286   : > { %v16389_v32 = vpop.f32.mrf.mxu0  ;;  %v16482_v11 = vadd.f32 %v16481_v15, %v16480_v0 }
 0x287   : > { %v3734_v54 = vadd.f32 %v16388_v10, %v20209_v35  ;;  %v16483_v23 = vpop.f32.mrf.mxu1 }
 0x288   : > { %v16390_v26 = vpop.f32.mrf.mxu0 }
 0x289   : > { %v20318_v56 = vadd.f32 %v16482_v11, %v3734_v54  ;;  %v16391_v27 = vadd.f32 %v16390_v26, %v16389_v32  ;;  %v16484_v44 = vpop.f32.mrf.mxu1 }
 0x28a   : > { %v16392_v29 = vpop.f32.mrf.mxu0  ;;  %v16485_v30 = vadd.f32 %v16484_v44, %v16483_v23  ;;  %4268 = vmatmul.mubr.bf16.gmra.mxu0 %v17607_v12  ;;  %v17621_v12 = vld [vmem:[#allocation3 + $0x6cc] ss:$76 sps:$4 sm:$0xff]   ;;  %v947_v44 = vld [vmem:[#allocation3 + $0x760] sm:$0xff] }
 0x28b   : > { %v3737_v6 = vadd.f32 %v16391_v27, %v20212_v48  ;;  %v16486_v22 = vpop.f32.mrf.mxu1  ;;  %4275 = vmatprep.mubr.bf16.mxu0 %v17613_v16  ;;  %v17622_v16 = vld [vmem:[#allocation3 + $0x6d0] ss:$76 sps:$4 sm:$0xff]  }
 0x28c   : > { %v16393_v42 = vpop.f32.mrf.mxu0  ;;  %16928 = vmatmul.mubr.msk.bf16.gmra.mxu1 %vm3043_vm1, %v17614_v21 }
 0x28d   : > { %v20322_v41 = vadd.f32 %v16485_v30, %v3737_v6  ;;  %v16394_v35 = vadd.f32 %v16393_v42, %v16392_v29  ;;  %v16487_v46 = vpop.f32.mrf.mxu1  ;;  %16931 = vmatprep.mubr.msk.bf16.mxu1 %vm19757_vm0, %v19756_v40 }
 0x28e   : > { %v16395_v53 = vpop.f32.mrf.mxu0  ;;  %v16488_v52 = vadd.f32 %v16487_v46, %v16486_v22  ;;  %v17619_v22 = vld [vmem:[#allocation3 + $0x6c8] ss:$76 sps:$4 sm:$0xff]  }
 0x28f   : > { %v3742_v25 = vadd.f32 %v16394_v35, %v20215_v58  ;;  %v16489_v48 = vpop.f32.mrf.mxu1 }
 0x290   : > { %v16396_v31 = vpop.f32.mrf.mxu0 }
 0x291   : > { %v20327_v57 = vadd.f32 %v16488_v52, %v3742_v25  ;;  %v16397_v59 = vadd.f32 %v16396_v31, %v16395_v53  ;;  %v16490_v1 = vpop.f32.mrf.mxu1 }
 0x292   : > { %v16398_v62 = vpop.f32.mrf.mxu0  ;;  %v16491_v19 = vadd.f32 %v16490_v1, %v16489_v48  ;;  %4276 = vmatmul.mubr.bf16.gmra.mxu0 %v17611_v39 }
 0x293   : > { %v3745_v38 = vadd.f32 %v16397_v59, %v20218_v8  ;;  %v16492_v3 = vpop.f32.mrf.mxu1  ;;  %4283 = vmatprep.mubr.bf16.mxu0 %v17617_v50  ;;  %v17625_v50 = vld [vmem:[#allocation3 + $0x768] ss:$0 sps:$4 sm:$0xff]  }
 0x294   : > { %v16399_v61 = vpop.f32.mrf.mxu0  ;;  %16932 = vmatmul.mubr.msk.bf16.gmra.mxu1 %vm3043_vm1, %v17618_v49 }
 0x295   : > { %v20331_v0 = vadd.f32 %v16491_v19, %v3745_v38  ;;  %v16400_v58 = vadd.f32 %v16399_v61, %v16398_v62  ;;  %v16493_v7 = vpop.f32.mrf.mxu1  ;;  %16935 = vmatprep.mubr.msk.bf16.mxu1 %vm19757_vm0, %v19756_v40  ;;  %v14508_v61 = vcombine.low %v947_v44, %v947_v44 }
 0x296   : > { %v16401_v10 = vpop.f32.mrf.mxu0  ;;  %v16494_v15 = vadd.f32 %v16493_v7, %v16492_v3 }
 0x297   : > { %v3750_v32 = vadd.f32 %v16400_v58, %v20221_v17  ;;  %v16495_v8 = vpop.f32.mrf.mxu1 }
 0x298   : > { %v16402_v11 = vpop.f32.mrf.mxu0 }
 0x299   : > { %v20336_v21 = vadd.f32 %v16494_v15, %v3750_v32  ;;  %v16403_v54 = vadd.f32 %v16402_v11, %v16401_v10  ;;  %v16496_v23 = vpop.f32.mrf.mxu1 }
 0x29a   : > { %v16404_v26 = vpop.f32.mrf.mxu0  ;;  %v16497_v27 = vadd.f32 %v16496_v23, %v16495_v8  ;;  %4284 = vmatmul.mubr.bf16.gmra.mxu0 %v17615_v36 }
 0x29b   : > { %v3753_v29 = vadd.f32 %v16403_v54, %v20224_v34  ;;  %v16498_v30 = vpop.f32.mrf.mxu1  ;;  %4291 = vmatprep.mubr.bf16.mxu0 %v17621_v12  ;;  %v14509_v34 = vcombine.high %v947_v44, %v947_v44  ;;  %v17626_v54 = vld [vmem:[#allocation3 + $0x48] ss:$76 sps:$4 sm:$0xff]  }
 0x29c   : > { %v16405_v6 = vpop.f32.mrf.mxu0  ;;  %16936 = vmatmul.mubr.msk.bf16.gmra.mxu1 %vm3043_vm1, %v17622_v16 }
 0x29d   : > { %v20340_v42 = vadd.f32 %v16497_v27, %v3753_v29  ;;  %v16406_v17 = vadd.f32 %v16405_v6, %v16404_v26  ;;  %v16499_v39 = vpop.f32.mrf.mxu1  ;;  %16939 = vmatprep.mubr.msk.bf16.mxu1 %vm19757_vm0, %v19756_v40 }
 0x29e   : > { %v16407_v35 = vpop.f32.mrf.mxu0  ;;  %v16500_v46 = vadd.f32 %v16499_v39, %v16498_v30 }
 0x29f   : > { %v3758_v53 = vadd.f32 %v16406_v17, %v20227_v5  ;;  %v16501_v52 = vpop.f32.mrf.mxu1 }
 0x2a0   : > { %v16408_v49 = vpop.f32.mrf.mxu0 }
 0x2a1   : > { %v20345_v25 = vadd.f32 %v16500_v46, %v3758_v53  ;;  %v16502_v48 = vpop.f32.mrf.mxu1 }
 0x2a2   : > { %v16520_v31 = vpop.f32.mrf.mxu0  ;;  %4292 = vmatmul.mubr.bf16.gmra.mxu0 %v17619_v22 }
 0x2a3   : > { %v16614_v59 = vpop.f32.mrf.mxu1  ;;  %4299 = vmatprep.mubr.bf16.mxu0 %v14509_v34 }
 0x2a4   : > { %v16521_v1 = vpop.f32.mrf.mxu0  ;;  %16940 = vmatmul.mubr.msk.bf16.gmra.mxu1 %vm3043_vm1, %v17625_v50 }
 0x2a5   : > { %v16522_v62 = vadd.f32 %v16521_v1, %v16520_v31  ;;  %v16615_v19 = vpop.f32.mrf.mxu1 }
 0x2a6   : > { %v16523_v38 = vpop.f32.mrf.mxu0  ;;  %v16616_v3 = vadd.f32 %v16615_v19, %v16614_v59 }
 0x2a7   : > { %v3934_v5 = vadd.f32 %v16522_v62, %v20230_v13  ;;  %v16617_v36 = vpop.f32.mrf.mxu1 }
 0x2a8   : > { %v16524_v58 = vpop.f32.mrf.mxu0 }
 0x2a9   : > { %v20349_v7 = vadd.f32 %v16616_v3, %v3934_v5  ;;  %v16525_v12 = vadd.f32 %v16524_v58, %v16523_v38  ;;  %v16618_v10 = vpop.f32.mrf.mxu1 }
 0x2aa   : > { %v16526_v15 = vpop.f32.mrf.mxu0  ;;  %v16619_v16 = vadd.f32 %v16618_v10, %v16617_v36  ;;  %4300 = vmatmul.mubr.bf16.gmra.mxu0 %v14508_v61 }
 0x2ab   : > { %v3937_v32 = vadd.f32 %v16525_v12, %v20235_v28  ;;  %v16620_v8 = vpop.f32.mrf.mxu1  ;;  %16891 = vmatprep.mubr.msk.bf16.mxu0 %vm19757_vm0, %v19756_v40 }
 0x2ac   : > { %v16527_v11 = vpop.f32.mrf.mxu0 }
 0x2ad   : > { %v20354_v23 = vadd.f32 %v16619_v16, %v3937_v32  ;;  %v16528_v13 = vadd.f32 %v16527_v11, %v16526_v15  ;;  %v16621_v26 = vpop.f32.mrf.mxu1 }
 0x2ae   : > { %v16529_v27 = vpop.f32.mrf.mxu0  ;;  %v16622_v44 = vadd.f32 %v16621_v26, %v16620_v8 }
 0x2af   : > { %v3942_v29 = vadd.f32 %v16528_v13, %v20238_v45  ;;  %v16623_v30 = vpop.f32.mrf.mxu1 }
 0x2b0   : > { %v16530_v6 = vpop.f32.mrf.mxu0 }
 0x2b1   : > { %v20357_v22 = vadd.f32 %v16622_v44, %v3942_v29  ;;  %v16531_v17 = vadd.f32 %v16530_v6, %v16529_v27  ;;  %v16624_v28 = vpop.f32.mrf.mxu1 }
 0x2b2   : > { %v16532_v39 = vpop.f32.mrf.mxu0  ;;  %v16625_v35 = vadd.f32 %v16624_v28, %v16623_v30  ;;  %16892 = vmatmul.mubr.msk.bf16.vlgmr.msra.gmra.mxu0 %vm3043_vm1, %v17626_v54 }
 0x2b3   : > { %v3945_v46 = vadd.f32 %v16531_v17, %v20244_v63  ;;  %v16626_v50 = vpop.f32.mrf.mxu1  ;;  %16945 = vmatprep.mubr.msk.bf16.mxu0 %vm19757_vm0, %v19756_v40 }
 0x2b4   : > { %v16533_v53 = vpop.f32.mrf.mxu0 }
 0x2b5   : > { %v20363_v52 = vadd.f32 %v16625_v35, %v3945_v46  ;;  %v16534_v45 = vadd.f32 %v16533_v53, %v16532_v39  ;;  %v16627_v34 = vpop.f32.mrf.mxu1 }
 0x2b6   : > { %v16535_v49 = vpop.f32.mrf.mxu0  ;;  %v16628_v48 = vadd.f32 %v16627_v34, %v16626_v50 }
 0x2b7   : > { %v3950_v31 = vadd.f32 %v16534_v45, %v20251_v9  ;;  %v16629_v59 = vpop.f32.mrf.mxu1 }
 0x2b8   : > { %v16536_v1 = vpop.f32.mrf.mxu0 }
 0x2b9   : > { %v20366_v62 = vadd.f32 %v16628_v48, %v3950_v31  ;;  %v16537_v19 = vadd.f32 %v16536_v1, %v16535_v49  ;;  %v16630_v38 = vpop.f32.mrf.mxu1 }
 0x2ba   : > { %v16538_v63 = vpop.f32.mrf.mxu0  ;;  %v16631_v3 = vadd.f32 %v16630_v38, %v16629_v59 }
 0x2bb   : > { %v3953_v61 = vadd.f32 %v16537_v19, %v20257_v33  ;;  %v16632_v5 = vpop.f32.mrf.mxu1 }
 0x2bc   : > { %v16539_v36 = vpop.f32.mrf.mxu0 }
 0x2bd   : > { %v20369_v58 = vadd.f32 %v16631_v3, %v3953_v61  ;;  %v16540_v12 = vadd.f32 %v16539_v36, %v16538_v63  ;;  %v16633_v10 = vpop.f32.mrf.mxu1 }
 0x2be   : > { %v16541_v15 = vpop.f32.mrf.mxu0  ;;  %v16634_v16 = vadd.f32 %v16633_v10, %v16632_v5 }
 0x2bf   : > { %v3958_v9 = vadd.f32 %v16540_v12, %v20264_v47  ;;  %v16635_v32 = vpop.f32.mrf.mxu1 }
 0x2c0   : > { %v16542_v8 = vpop.f32.mrf.mxu0 }
 0x2c1   : > { %v20372_v11 = vadd.f32 %v16634_v16, %v3958_v9  ;;  %v16543_v54 = vadd.f32 %v16542_v8, %v16541_v15  ;;  %v16636_v13 = vpop.f32.mrf.mxu1 }
 0x2c2   : > { %v16544_v26 = vpop.f32.mrf.mxu0  ;;  %v16637_v27 = vadd.f32 %v16636_v13, %v16635_v32 }
 0x2c3   : > { %v3961_v33 = vadd.f32 %v16543_v54, %v20268_v43  ;;  %v16638_v44 = vpop.f32.mrf.mxu1 }
 0x2c4   : > { %v16545_v29 = vpop.f32.mrf.mxu0 }
 0x2c5   : > { %v20375_v30 = vadd.f32 %v16637_v27, %v3961_v33  ;;  %v16546_v6 = vadd.f32 %v16545_v29, %v16544_v26  ;;  %v16639_v17 = vpop.f32.mrf.mxu1 }
 0x2c6   : > { %v16547_v28 = vpop.f32.mrf.mxu0  ;;  %v16640_v39 = vadd.f32 %v16639_v17, %v16638_v44 }
 0x2c7   : > { %v3966_v47 = vadd.f32 %v16546_v6, %v20273_v18  ;;  %v16641_v35 = vpop.f32.mrf.mxu1 }
 0x2c8   : > { %v16548_v46 = vpop.f32.mrf.mxu0 }
 0x2c9   : > { %v20378_v50 = vadd.f32 %v16640_v39, %v3966_v47  ;;  %v16549_v53 = vadd.f32 %v16548_v46, %v16547_v28  ;;  %v16642_v45 = vpop.f32.mrf.mxu1 }
 0x2ca   : > { %v16550_v34 = vpop.f32.mrf.mxu0  ;;  %v16643_v49 = vadd.f32 %v16642_v45, %v16641_v35 }
 0x2cb   : > { %v3969_v43 = vadd.f32 %v16549_v53, %v20277_v24  ;;  %v16644_v48 = vpop.f32.mrf.mxu1 }
 0x2cc   : > { %v16551_v31 = vpop.f32.mrf.mxu0 }
 0x2cd   : > { %v20381_v59 = vadd.f32 %v16643_v49, %v3969_v43  ;;  %v16552_v1 = vadd.f32 %v16551_v31, %v16550_v34  ;;  %v16645_v19 = vpop.f32.mrf.mxu1 }
 0x2ce   : > { %v16553_v38 = vpop.f32.mrf.mxu0  ;;  %v16646_v63 = vadd.f32 %v16645_v19, %v16644_v48 }
 0x2cf   : > { %v3974_v18 = vadd.f32 %v16552_v1, %v20282_v37  ;;  %v16647_v3 = vpop.f32.mrf.mxu1 }
 0x2d0   : > { %v16554_v61 = vpop.f32.mrf.mxu0 }
 0x2d1   : > { %v20384_v5 = vadd.f32 %v16646_v63, %v3974_v18  ;;  %v16555_v36 = vadd.f32 %v16554_v61, %v16553_v38  ;;  %v16648_v12 = vpop.f32.mrf.mxu1 }
 0x2d2   : > { %v16556_v10 = vpop.f32.mrf.mxu0  ;;  %v16649_v15 = vadd.f32 %v16648_v12, %v16647_v3 }
 0x2d3   : > { %v3977_v24 = vadd.f32 %v16555_v36, %v20286_v55  ;;  %v16650_v16 = vpop.f32.mrf.mxu1 }
 0x2d4   : > { %v16557_v9 = vpop.f32.mrf.mxu0 }
 0x2d5   : > { %v20387_v32 = vadd.f32 %v16649_v15, %v3977_v24  ;;  %v16558_v8 = vadd.f32 %v16557_v9, %v16556_v10  ;;  %v16651_v54 = vpop.f32.mrf.mxu1 }
 0x2d6   : > { %v16559_v13 = vpop.f32.mrf.mxu0  ;;  %v16652_v26 = vadd.f32 %v16651_v54, %v16650_v16 }
 0x2d7   : > { %v3982_v37 = vadd.f32 %v16558_v8, %v20291_v4  ;;  %v16653_v27 = vpop.f32.mrf.mxu1 }
 0x2d8   : > { %v16560_v33 = vpop.f32.mrf.mxu0 }
 0x2d9   : > { %v20390_v44 = vadd.f32 %v16652_v26, %v3982_v37  ;;  %v16561_v29 = vadd.f32 %v16560_v33, %v16559_v13  ;;  %v16654_v6 = vpop.f32.mrf.mxu1 }
 0x2da   : > { %v16562_v17 = vpop.f32.mrf.mxu0  ;;  %v16655_v28 = vadd.f32 %v16654_v6, %v16653_v27 }
 0x2db   : > { %v3985_v55 = vadd.f32 %v16561_v29, %v20295_v20  ;;  %v16656_v39 = vpop.f32.mrf.mxu1 }
 0x2dc   : > { %v16563_v47 = vpop.f32.mrf.mxu0 }
 0x2dd   : > { %v20393_v35 = vadd.f32 %v16655_v28, %v3985_v55  ;;  %v16564_v46 = vadd.f32 %v16563_v47, %v16562_v17  ;;  %v16657_v53 = vpop.f32.mrf.mxu1 }
 0x2de   : > { %v16565_v45 = vpop.f32.mrf.mxu0  ;;  %v16658_v34 = vadd.f32 %v16657_v53, %v16656_v39 }
 0x2df   : > { %v3990_v4 = vadd.f32 %v16564_v46, %v20300_v60  ;;  %v16659_v49 = vpop.f32.mrf.mxu1 }
 0x2e0   : > { %v16566_v43 = vpop.f32.mrf.mxu0 }
 0x2e1   : > { %v20396_v48 = vadd.f32 %v16658_v34, %v3990_v4  ;;  %v16567_v31 = vadd.f32 %v16566_v43, %v16565_v45  ;;  %v16660_v1 = vpop.f32.mrf.mxu1 }
 0x2e2   : > { %v16568_v19 = vpop.f32.mrf.mxu0  ;;  %v16661_v38 = vadd.f32 %v16660_v1, %v16659_v49  ;;  %v17627_v49 = vld [vmem:[#allocation6] sm:$0xff]  }
 0x2e3   : > { %v3993_v20 = vadd.f32 %v16567_v31, %v20304_v51  ;;  %v16662_v63 = vpop.f32.mrf.mxu1  ;;  %16944 = vmatpush3.bf16.msra.mxu0 %v17627_v49 }
 0x2e4   : > { %v16569_v18 = vpop.f32.mrf.mxu0 }
 0x2e5   : > { %v20399_v3 = vadd.f32 %v16661_v38, %v3993_v20  ;;  %v16570_v61 = vadd.f32 %v16569_v18, %v16568_v19  ;;  %v16663_v36 = vpop.f32.mrf.mxu1 }
 0x2e6   : > { %v16571_v12 = vpop.f32.mrf.mxu0  ;;  %v16664_v10 = vadd.f32 %v16663_v36, %v16662_v63 }
 0x2e7   : > { %v3998_v60 = vadd.f32 %v16570_v61, %v20309_v2  ;;  %v16665_v15 = vpop.f32.mrf.mxu1 }
 0x2e8   : > { %v16572_v24 = vpop.f32.mrf.mxu0 }
 0x2e9   : > { %v20402_v16 = vadd.f32 %v16664_v10, %v3998_v60  ;;  %v16573_v9 = vadd.f32 %v16572_v24, %v16571_v12  ;;  %v16666_v8 = vpop.f32.mrf.mxu1 }
 0x2ea   : > { %v16574_v54 = vpop.f32.mrf.mxu0  ;;  %v16667_v13 = vadd.f32 %v16666_v8, %v16665_v15 }
 0x2eb   : > { %v4001_v51 = vadd.f32 %v16573_v9, %v20313_v14  ;;  %v16668_v26 = vpop.f32.mrf.mxu1 }
 0x2ec   : > { %v16575_v37 = vpop.f32.mrf.mxu0 }
 0x2ed   : > { %v20405_v27 = vadd.f32 %v16667_v13, %v4001_v51  ;;  %v16576_v33 = vadd.f32 %v16575_v37, %v16574_v54  ;;  %v16669_v29 = vpop.f32.mrf.mxu1 }
 0x2ee   : > { %v16577_v6 = vpop.f32.mrf.mxu0  ;;  %v16670_v17 = vadd.f32 %v16669_v29, %v16668_v26 }
 0x2ef   : > { %v4006_v2 = vadd.f32 %v16576_v33, %v20318_v56  ;;  %v16671_v28 = vpop.f32.mrf.mxu1 }
 0x2f0   : > { %v16578_v55 = vpop.f32.mrf.mxu0 }
 0x2f1   : > { %v20408_v39 = vadd.f32 %v16670_v17, %v4006_v2  ;;  %v16579_v47 = vadd.f32 %v16578_v55, %v16577_v6  ;;  %v16672_v46 = vpop.f32.mrf.mxu1 }
 0x2f2   : > { %v16580_v53 = vpop.f32.mrf.mxu0  ;;  %v16673_v45 = vadd.f32 %v16672_v46, %v16671_v28 }
 0x2f3   : > { %v4009_v14 = vadd.f32 %v16579_v47, %v20322_v41  ;;  %v16674_v34 = vpop.f32.mrf.mxu1 }
 0x2f4   : > { %v16581_v4 = vpop.f32.mrf.mxu0 }
 0x2f5   : > { %v20411_v43 = vadd.f32 %v16673_v45, %v4009_v14  ;;  %v16582_v31 = vadd.f32 %v16581_v4, %v16580_v53  ;;  %v16675_v1 = vpop.f32.mrf.mxu1 }
 0x2f6   : > { %v16583_v19 = vpop.f32.mrf.mxu0  ;;  %v16676_v38 = vadd.f32 %v16675_v1, %v16674_v34 }
 0x2f7   : > { %v4014_v56 = vadd.f32 %v16582_v31, %v20327_v57  ;;  %v16677_v20 = vpop.f32.mrf.mxu1 }
 0x2f8   : > { %v16584_v63 = vpop.f32.mrf.mxu0 }
 0x2f9   : > { %v20414_v18 = vadd.f32 %v16676_v38, %v4014_v56  ;;  %v16585_v61 = vadd.f32 %v16584_v63, %v16583_v19  ;;  %v16678_v36 = vpop.f32.mrf.mxu1 }
 0x2fa   : > { %v16586_v12 = vpop.f32.mrf.mxu0  ;;  %v16679_v41 = vadd.f32 %v16678_v36, %v16677_v20 }
 0x2fb   : > { %v4017_v10 = vadd.f32 %v16585_v61, %v20331_v0  ;;  %v16680_v60 = vpop.f32.mrf.mxu1 }
 0x2fc   : > { %v16587_v15 = vpop.f32.mrf.mxu0 }
 0x2fd   : > { %v20417_v24 = vadd.f32 %v16679_v41, %v4017_v10  ;;  %v16588_v9 = vadd.f32 %v16587_v15, %v16586_v12  ;;  %v16681_v8 = vpop.f32.mrf.mxu1 }
 0x2fe   : > { %v16589_v54 = vpop.f32.mrf.mxu0  ;;  %v16682_v13 = vadd.f32 %v16681_v8, %v16680_v60 }
 0x2ff   : > { %v4022_v57 = vadd.f32 %v16588_v9, %v20336_v21  ;;  %v16683_v51 = vpop.f32.mrf.mxu1 }
 0x300   : > { %v16590_v26 = vpop.f32.mrf.mxu0 }
 0x301   : > { %v20420_v37 = vadd.f32 %v16682_v13, %v4022_v57  ;;  %v16591_v33 = vadd.f32 %v16590_v26, %v16589_v54  ;;  %v16684_v29 = vpop.f32.mrf.mxu1 }
 0x302   : > { %v16592_v6 = vpop.f32.mrf.mxu0  ;;  %v16685_v17 = vadd.f32 %v16684_v29, %v16683_v51 }
 0x303   : > { %v4025_v0 = vadd.f32 %v16591_v33, %v20340_v42  ;;  %v16686_v2 = vpop.f32.mrf.mxu1 }
 0x304   : > { %v16593_v28 = vpop.f32.mrf.mxu0 }
 0x305   : > { %v20423_v55 = vadd.f32 %v16685_v17, %v4025_v0  ;;  %v16594_v47 = vadd.f32 %v16593_v28, %v16592_v6  ;;  %v16687_v46 = vpop.f32.mrf.mxu1 }
 0x306   : > { %v16595_v53 = vpop.f32.mrf.mxu0  ;;  %v16688_v45 = vadd.f32 %v16687_v46, %v16686_v2 }
 0x307   : > { %v4030_v21 = vadd.f32 %v16594_v47, %v20345_v25  ;;  %v16689_v14 = vpop.f32.mrf.mxu1 }
 0x308   : > { %v16596_v34 = vpop.f32.mrf.mxu0 }
 0x309   : > { %v20426_v4 = vadd.f32 %v16688_v45, %v4030_v21  ;;  %v16690_v49 = vpop.f32.mrf.mxu1 }
 0x30a   : > { %v16708_v31 = vpop.f32.mrf.mxu0 }
 0x30c   : > { %v16709_v1 = vpop.f32.mrf.mxu0  ;;  %v4349_v19 = vpop.f32.mrf.mxu1 }
 0x30d   : > { %v16710_v38 = vadd.f32 %v16709_v1, %v16708_v31 }
 0x30e   : > { %v16711_v42 = vpop.f32.mrf.mxu0  ;;  %v16897_v56 = vpop.f32.mrf.mxu1 }
 0x30f   : > { %v20429_v20 = vadd.f32 %v16710_v38, %v20349_v7 }
 0x310   : > { %v16712_v63 = vpop.f32.mrf.mxu0  ;;  %v4352_v61 = vpop.f32.mrf.mxu1 }
 0x311   : > { %v16713_v36 = vadd.f32 %v16712_v63, %v16711_v42 }
 0x312   : > { %v16714_v12 = vpop.f32.mrf.mxu0  ;;  %v16898_v41 = vpop.f32.mrf.mxu1 }
 0x313   : > { %v20432_v25 = vadd.f32 %v16713_v36, %v20354_v23 }
 0x314   : > { %v16715_v10 = vpop.f32.mrf.mxu0  ;;  %v4357_v60 = vpop.f32.mrf.mxu1 }
 0x315   : > { %v16716_v15 = vadd.f32 %v16715_v10, %v16714_v12 }
 0x316   : > { %v16717_v9 = vpop.f32.mrf.mxu0  ;;  %v16901_v8 = vpop.f32.mrf.mxu1 }
 0x317   : > { %v4214_v54 = vadd.f32 %v16716_v15, %v20357_v22 }
 0x318   : > { %v16718_v13 = vpop.f32.mrf.mxu0  ;;  %v4360_v57 = vpop.f32.mrf.mxu1 }
 0x319   : > { %v16719_v51 = vadd.f32 %v16718_v13, %v16717_v9  ;;  %v20435_v7 = vadd.f32 %v4349_v19, %v4214_v54 }
 0x31a   : > { %v16720_v26 = vpop.f32.mrf.mxu0  ;;  %v16902_v33 = vpop.f32.mrf.mxu1 }
 0x31b   : > { %v4217_v29 = vadd.f32 %v16719_v51, %v20363_v52 }
 0x31c   : > { %v16721_v6 = vpop.f32.mrf.mxu0  ;;  %v4365_v17 = vpop.f32.mrf.mxu1 }
 0x31d   : > { %v16722_v23 = vadd.f32 %v16721_v6, %v16720_v26  ;;  %v20438_v0 = vadd.f32 %v4352_v61, %v4217_v29 }
 0x31e   : > { %v16723_v2 = vpop.f32.mrf.mxu0  ;;  %v16905_v28 = vpop.f32.mrf.mxu1 }
 0x31f   : > { %v4444_v47 = vpack.c.bf16 %v20438_v0, %v20435_v7  ;;  %v4222_v22 = vadd.f32 %v16722_v23, %v20366_v62  ;;  %v17685_v7 = vld [vmem:[#allocation9 + $0x210] ss:$24 sps:$4 sm:$0xff]   ;;  %v17693_v0 = vld [vmem:[#allocation9 + $0x1e4] ss:$24 sps:$4 sm:$0xff]  }
 0x320   : > { %v16724_v46 = vpop.f32.mrf.mxu0  ;;  %v4368_v53 = vpop.f32.mrf.mxu1 }
 0x321   : > { %v16725_v45 = vadd.f32 %v16724_v46, %v16723_v2  ;;  %v20443_v21 = vadd.f32 %v4357_v60, %v4222_v22 }
 0x322   : > { %v16726_v14 = vpop.f32.mrf.mxu0  ;;  %v16906_v34 = vpop.f32.mrf.mxu1 }
 0x323   : > { %v4225_v52 = vadd.f32 %v16725_v45, %v20369_v58 }
 0x324   : > { %v16727_v49 = vpop.f32.mrf.mxu0  ;;  %v4373_v31 = vpop.f32.mrf.mxu1 }
 0x325   : > { %v16728_v1 = vadd.f32 %v16727_v49, %v16726_v14  ;;  %v20446_v19 = vadd.f32 %v4360_v57, %v4225_v52 }
 0x326   : > { %v16729_v38 = vpop.f32.mrf.mxu0  ;;  %v16909_v42 = vpop.f32.mrf.mxu1 }
 0x327   : > { %v4445_v56 = vpack.c.bf16 %v20446_v19, %v20443_v21  ;;  %v4230_v62 = vadd.f32 %v16728_v1, %v20372_v11  ;;  %v17688_v21 = vld [vmem:[#allocation9 + $0x600] ss:$24 sps:$4 sm:$0xff]   ;;  %v17696_v19 = vld [vmem:[#allocation9 + $0x8d4] ss:$24 sps:$4 sm:$0xff]  }
 0x328   : > { %v16730_v63 = vpop.f32.mrf.mxu0  ;;  %v4376_v61 = vpop.f32.mrf.mxu1 }
 0x329   : > { %v16731_v36 = vadd.f32 %v16730_v63, %v16729_v38  ;;  %v20451_v12 = vadd.f32 %v4365_v17, %v4230_v62 }
 0x32a   : > { %v16732_v41 = vpop.f32.mrf.mxu0  ;;  %v16910_v10 = vpop.f32.mrf.mxu1 }
 0x32b   : > { %v4233_v58 = vadd.f32 %v16731_v36, %v20375_v30 }
 0x32c   : > { %v16733_v60 = vpop.f32.mrf.mxu0  ;;  %v4381_v15 = vpop.f32.mrf.mxu1 }
 0x32d   : > { %v16734_v9 = vadd.f32 %v16733_v60, %v16732_v41  ;;  %v20454_v8 = vadd.f32 %v4368_v53, %v4233_v58 }
 0x32e   : > { %v16735_v54 = vpop.f32.mrf.mxu0  ;;  %v16913_v13 = vpop.f32.mrf.mxu1 }
 0x32f   : > { %v4446_v57 = vpack.c.bf16 %v20454_v8, %v20451_v12  ;;  %v4238_v11 = vadd.f32 %v16734_v9, %v20378_v50  ;;  %v17697_v12 = vld [vmem:[#allocation9 + $0x8a0] ss:$24 sps:$4 sm:$0xff]   ;;  %v17702_v8 = vld [vmem:[#allocation9 + $0x1b4] ss:$24 sps:$4 sm:$0xff]  }
 0x330   : > { %v16736_v51 = vpop.f32.mrf.mxu0  ;;  %v4384_v26 = vpop.f32.mrf.mxu1 }
 0x331   : > { %v16737_v33 = vadd.f32 %v16736_v51, %v16735_v54  ;;  %v20459_v29 = vadd.f32 %v4373_v31, %v4238_v11 }
 0x332   : > { %v16738_v6 = vpop.f32.mrf.mxu0  ;;  %v16914_v17 = vpop.f32.mrf.mxu1 }
 0x333   : > { %v4241_v30 = vadd.f32 %v16737_v33, %v20381_v59 }
 0x334   : > { %v16739_v23 = vpop.f32.mrf.mxu0  ;;  %v4389_v2 = vpop.f32.mrf.mxu1 }
 0x335   : > { %v16740_v28 = vadd.f32 %v16739_v23, %v16738_v6  ;;  %v20462_v22 = vadd.f32 %v4376_v61, %v4241_v30 }
 0x336   : > { %v16741_v46 = vpop.f32.mrf.mxu0  ;;  %v16917_v53 = vpop.f32.mrf.mxu1 }
 0x337   : > { %v4447_v45 = vpack.c.bf16 %v20462_v22, %v20459_v29  ;;  %v4246_v50 = vadd.f32 %v16740_v28, %v20384_v5  ;;  %v17700_v29 = vld [vmem:[#allocation9 + $0x1b0] ss:$24 sps:$4 sm:$0xff]  }
 0x338   : > { %v16742_v14 = vpop.f32.mrf.mxu0  ;;  %v4392_v34 = vpop.f32.mrf.mxu1  ;;  %v17703_v22 = vld [vmem:[#allocation9 + $0x870] ss:$24 sps:$4 sm:$0xff]  }
 0x339   : > { %v16743_v52 = vadd.f32 %v16742_v14, %v16741_v46  ;;  %v20467_v49 = vadd.f32 %v4381_v15, %v4246_v50 }
 0x33a   : > { %v16744_v31 = vpop.f32.mrf.mxu0  ;;  %v16918_v1 = vpop.f32.mrf.mxu1 }
 0x33b   : > { %v4249_v59 = vadd.f32 %v16743_v52, %v20387_v32 }
 0x33c   : > { %v16745_v38 = vpop.f32.mrf.mxu0  ;;  %v4397_v42 = vpop.f32.mrf.mxu1 }
 0x33d   : > { %v16746_v62 = vadd.f32 %v16745_v38, %v16744_v31  ;;  %v20470_v63 = vadd.f32 %v4384_v26, %v4249_v59 }
 0x33e   : > { %v16747_v61 = vpop.f32.mrf.mxu0  ;;  %v16921_v36 = vpop.f32.mrf.mxu1 }
 0x33f   : > { %v4448_v41 = vpack.c.bf16 %v20470_v63, %v20467_v49  ;;  %v4254_v5 = vadd.f32 %v16746_v62, %v20390_v44  ;;  %v17711_v49 = vld [vmem:[#allocation9 + $0x844] ss:$24 sps:$4 sm:$0xff]   ;;  %v17706_v63 = vld [vmem:[#allocation9 + $0x180] ss:$24 sps:$4 sm:$0xff]  }
 0x340   : > { %v16748_v10 = vpop.f32.mrf.mxu0  ;;  %v4400_v58 = vpop.f32.mrf.mxu1 }
 0x341   : > { %v16749_v60 = vadd.f32 %v16748_v10, %v16747_v61  ;;  %v20475_v15 = vadd.f32 %v4389_v2, %v4254_v5 }
 0x342   : > { %v16750_v9 = vpop.f32.mrf.mxu0  ;;  %v16922_v54 = vpop.f32.mrf.mxu1 }
 0x343   : > { %v4257_v32 = vadd.f32 %v16749_v60, %v20393_v35 }
 0x344   : > { %v16751_v13 = vpop.f32.mrf.mxu0  ;;  %v4405_v11 = vpop.f32.mrf.mxu1 }
 0x345   : > { %v16752_v51 = vadd.f32 %v16751_v13, %v16750_v9  ;;  %v20478_v26 = vadd.f32 %v4392_v34, %v4257_v32 }
 0x346   : > { %v16753_v33 = vpop.f32.mrf.mxu0  ;;  %v16925_v6 = vpop.f32.mrf.mxu1 }
 0x347   : > { %v4449_v17 = vpack.c.bf16 %v20478_v26, %v20475_v15  ;;  %v4262_v44 = vadd.f32 %v16752_v51, %v20396_v48  ;;  %v17714_v15 = vld [vmem:[#allocation9 + $0x454] ss:$24 sps:$4 sm:$0xff]  }
 0x348   : > { %v16754_v30 = vpop.f32.mrf.mxu0  ;;  %v4408_v23 = vpop.f32.mrf.mxu1  ;;  %v17717_v26 = vld [vmem:[#allocation9 + $0x814] ss:$24 sps:$4 sm:$0xff]  }
 0x349   : > { %v16755_v2 = vadd.f32 %v16754_v30, %v16753_v33  ;;  %v20483_v28 = vadd.f32 %v4397_v42, %v4262_v44 }
 0x34a   : > { %v16756_v46 = vpop.f32.mrf.mxu0  ;;  %v16926_v53 = vpop.f32.mrf.mxu1 }
 0x34b   : > { %v4265_v35 = vadd.f32 %v16755_v2, %v20399_v3  ;;  %v17628_v2 = vld [vmem:[#allocation9 + $0x150] ss:$24 sps:$4 sm:$0xff]  }
 0x34c   : > { %v16757_v50 = vpop.f32.mrf.mxu0  ;;  %v4413_v14 = vpop.f32.mrf.mxu1 }
 0x34d   : > { %v16758_v34 = vadd.f32 %v16757_v50, %v16756_v46  ;;  %v20486_v52 = vadd.f32 %v4400_v58, %v4265_v35  ;;  %v17630_v46 = vld [vmem:[#allocation9 + $0x154] ss:$24 sps:$4 sm:$0xff]   ;;  %v17633_v35 = vld [vmem:[#allocation9 + $0x124] ss:$24 sps:$4 sm:$0xff]  }
 0x34e   : > { %v16759_v31 = vpop.f32.mrf.mxu0  ;;  %v16929_v1 = vpop.f32.mrf.mxu1  ;;  %11979 = vmatprep.subr.bf16.mxu1 %v17630_v46  ;;  %v17642_v46 = vld [vmem:[#allocation9 + $0x94] ss:$24 sps:$4 sm:$0xff]  }
 0x34f   : > { %v4450_v59 = vpack.c.bf16 %v20486_v52, %v20483_v28  ;;  %v4270_v48 = vadd.f32 %v16758_v34, %v20402_v16  ;;  %11980 = vmatpush1.bf16.msra.mxu1 %v17628_v2  ;;  %v17631_v1 = vld [vmem:[#allocation9 + $0x120] ss:$24 sps:$4 sm:$0xff]   ;;  %v17723_v28 = vld [vmem:[#allocation9 + $0x7e4] ss:$24 sps:$4 sm:$0xff]  }
 0x350   : > { %v16760_v38 = vpop.f32.mrf.mxu0  ;;  %v4416_v62 = vpop.f32.mrf.mxu1  ;;  %11981 = vmatprep.subr.bf16.mxu1 %v17633_v35  ;;  %v17721_v52 = vld [vmem:[#allocation9 + $0x7e0] ss:$24 sps:$4 sm:$0xff]  }
 0x351   : > { %v16761_v42 = vadd.f32 %v16760_v38, %v16759_v31  ;;  %v20491_v61 = vadd.f32 %v4405_v11, %v4270_v48 }
 0x352   : > { %v16762_v36 = vpop.f32.mrf.mxu0  ;;  %v16930_v5 = vpop.f32.mrf.mxu1 }
 0x353   : > { %v4273_v3 = vadd.f32 %v16761_v42, %v20405_v27  ;;  %11982 = vmatpush1.bf16.msra.mxu1 %v17631_v1 }
 0x354   : > { %v16763_v10 = vpop.f32.mrf.mxu0  ;;  %v4421_v60 = vpop.f32.mrf.mxu1 }
 0x355   : > { %v16764_v58 = vadd.f32 %v16763_v10, %v16762_v36  ;;  %v20494_v9 = vadd.f32 %v4408_v23, %v4273_v3  ;;  %v17654_v36 = vld [vmem:[#allocation9 + $0x754] ss:$24 sps:$4 sm:$0xff]  }
 0x356   : > { %v16765_v54 = vpop.f32.mrf.mxu0  ;;  %v16933_v32 = vpop.f32.mrf.mxu1  ;;  %12061 = vmatprep.subr.bf16.mxu0 %v17654_v36 }
 0x357   : > { %v4451_v13 = vpack.c.bf16 %v20494_v9, %v20491_v61  ;;  %v4278_v16 = vadd.f32 %v16764_v58, %v20408_v39  ;;  %v17634_v58 = vld [vmem:[#allocation9 + $0xf0] ss:$24 sps:$4 sm:$0xff]   ;;  %v17639_v32 = vld [vmem:[#allocation9 + $0xc4] ss:$24 sps:$4 sm:$0xff]  }
 0x358   : > { %v16766_v51 = vpop.f32.mrf.mxu0  ;;  %v4424_v33 = vpop.f32.mrf.mxu1  ;;  %v17727_v61 = vld [vmem:[#allocation9 + $0x7b0] ss:$24 sps:$4 sm:$0xff]   ;;  %v17735_v9 = vld [vmem:[#allocation9 + $0x784] ss:$24 sps:$4 sm:$0xff]  }
 0x359   : > { %v16767_v11 = vadd.f32 %v16766_v51, %v16765_v54  ;;  %v20499_v6 = vadd.f32 %v4413_v14, %v4278_v16 }
 0x35a   : > { %v16768_v44 = vpop.f32.mrf.mxu0  ;;  %v16934_v30 = vpop.f32.mrf.mxu1 }
 0x35b   : > { %v4281_v27 = vadd.f32 %v16767_v11, %v20411_v43  ;;  %v17636_v43 = vld [vmem:[#allocation9 + $0xf4] ss:$24 sps:$4 sm:$0xff]   ;;  %v17637_v30 = vld [vmem:[#allocation9 + $0xc0] ss:$24 sps:$4 sm:$0xff]  }
 0x35c   : > { %v16769_v23 = vpop.f32.mrf.mxu0  ;;  %v4429_v53 = vpop.f32.mrf.mxu1  ;;  %11983 = vmatprep.subr.bf16.mxu1 %v17636_v43 }
 0x35d   : > { %v16770_v50 = vadd.f32 %v16769_v23, %v16768_v44  ;;  %v20502_v34 = vadd.f32 %v4416_v62, %v4281_v27  ;;  %11984 = vmatpush1.bf16.msra.mxu1 %v17634_v58 }
 0x35e   : > { %v16771_v31 = vpop.f32.mrf.mxu0  ;;  %v16937_v39 = vpop.f32.mrf.mxu1  ;;  %11985 = vmatprep.subr.bf16.mxu1 %v17639_v32  ;;  %v17651_v32 = vld [vmem:[#allocation9 + $0x4] ss:$24 sps:$4 sm:$0xff]  }
 0x35f   : > { %v4452_v14 = vpack.c.bf16 %v20502_v34, %v20499_v6  ;;  %v4286_v48 = vadd.f32 %v16770_v50, %v20414_v18  ;;  %v17741_v6 = vld [vmem:[#allocation9 + $0xd54] ss:$24 sps:$4 sm:$0xff]  }
 0x360   : > { %v16772_v38 = vpop.f32.mrf.mxu0  ;;  %v4432_v42 = vpop.f32.mrf.mxu1 }
 0x361   : > { %v16773_v5 = vadd.f32 %v16772_v38, %v16771_v31  ;;  %v20507_v3 = vadd.f32 %v4421_v60, %v4286_v48  ;;  %11986 = vmatpush1.bf16.msra.mxu1 %v17637_v30  ;;  %v17645_v48 = vld [vmem:[#allocation9 + $0x64] ss:$24 sps:$4 sm:$0xff]   ;;  %v17643_v38 = vld [vmem:[#allocation9 + $0x60] ss:$24 sps:$4 sm:$0xff]  }
 0x362   : > { %v16774_v62 = vpop.f32.mrf.mxu0  ;;  %v16938_v10 = vpop.f32.mrf.mxu1  ;;  %11987 = vmatprep.subr.bf16.mxu1 %v17642_v46  ;;  %v17660_v46 = vld [vmem:[#allocation9 + $0x724] ss:$24 sps:$4 sm:$0xff]  }
 0x363   : > { %v4289_v54 = vadd.f32 %v16773_v5, %v20417_v24 }
 0x364   : > { %v16775_v16 = vpop.f32.mrf.mxu0  ;;  %v4437_v51 = vpop.f32.mrf.mxu1 }
 0x365   : > { %v16776_v18 = vadd.f32 %v16775_v16, %v16774_v62  ;;  %v20510_v11 = vadd.f32 %v4424_v33, %v4289_v54  ;;  %v17640_v33 = vld [vmem:[#allocation9 + $0x90] ss:$24 sps:$4 sm:$0xff]  }
 0x366   : > { %v16777_v44 = vpop.f32.mrf.mxu0  ;;  %v16941_v27 = vpop.f32.mrf.mxu1  ;;  %11988 = vmatpush1.bf16.msra.mxu1 %v17640_v33  ;;  %v17646_v54 = vld [vmem:[#allocation9 + $0x30] ss:$24 sps:$4 sm:$0xff]   ;;  %v17666_v33 = vld [vmem:[#allocation9 + $0x6f4] ss:$24 sps:$4 sm:$0xff]  }
 0x367   : > { %v4453_v60 = vpack.c.bf16 %v20510_v11, %v20507_v3  ;;  %v4294_v2 = vadd.f32 %v16776_v18, %v20420_v37  ;;  %v17648_v37 = vld [vmem:[#allocation9 + $0x34] ss:$24 sps:$4 sm:$0xff]   ;;  %11989 = vmatprep.subr.bf16.mxu1 %v17645_v48  ;;  %v17649_v18 = vld [vmem:[#allocation9] ss:$24 sps:$4 sm:$0xff]   ;;  %v17652_v27 = vld [vmem:[#allocation9 + $0x750] ss:$24 sps:$4 sm:$0xff]  }
 0x368   : > { %v16778_v23 = vpop.f32.mrf.mxu0  ;;  %v4440_v24 = vpop.f32.mrf.mxu1  ;;  %v17670_v48 = vld [vmem:[#allocation9 + $0x270] ss:$24 sps:$4 sm:$0xff]  }
 0x369   : > { %v16779_v35 = vadd.f32 %v16778_v23, %v16777_v44  ;;  %v20515_v50 = vadd.f32 %v4429_v53, %v4294_v2  ;;  %v17657_v44 = vld [vmem:[#allocation9 + $0x2d4] ss:$24 sps:$4 sm:$0xff]   ;;  %v17655_v24 = vld [vmem:[#allocation9 + $0x2d0] ss:$24 sps:$4 sm:$0xff]  }
 0x36a   : > { %v16780_v31 = vpop.f32.mrf.mxu0  ;;  %v16942_v39 = vpop.f32.mrf.mxu1  ;;  %11990 = vmatpush1.bf16.msra.mxu1 %v17643_v38  ;;  %v17667_v38 = vld [vmem:[#allocation9 + $0x6c0] ss:$24 sps:$4 sm:$0xff]  }
 0x36b   : > { %v4297_v1 = vadd.f32 %v16779_v35, %v20423_v55  ;;  %11991 = vmatprep.subr.bf16.mxu1 %v17648_v37  ;;  %v17663_v35 = vld [vmem:[#allocation9 + $0x2a4] ss:$24 sps:$4 sm:$0xff]   ;;  %v17664_v39 = vld [vmem:[#allocation9 + $0x6f0] ss:$24 sps:$4 sm:$0xff]   ;;  %v17676_v37 = vld [vmem:[#allocation9 + $0x240] ss:$24 sps:$4 sm:$0xff]  }
 0x36c   : > { %v16781_v43 = vpop.f32.mrf.mxu0 }
 0x36d   : > { %v16782_v36 = vadd.f32 %v16781_v43, %v16780_v31  ;;  %v20518_v5 = vadd.f32 %v4432_v42, %v4297_v1  ;;  %v17658_v31 = vld [vmem:[#allocation9 + $0x720] ss:$24 sps:$4 sm:$0xff]   ;;  %v17669_v1 = vld [vmem:[#allocation9 + $0x6c4] ss:$24 sps:$4 sm:$0xff]  }
 0x36e   : > { %v16783_v62 = vpop.f32.mrf.mxu0  ;;  %11992 = vmatpush1.bf16.msra.mxu1 %v17646_v54  ;;  %v17678_v43 = vld [vmem:[#allocation9 + $0x244] ss:$24 sps:$4 sm:$0xff]   ;;  %v17684_v54 = vld [vmem:[#allocation9 + $0x634] ss:$24 sps:$4 sm:$0xff]  }
 0x36f   : > { %v4454_v53 = vpack.c.bf16 %v20518_v5, %v20515_v50  ;;  %v4302_v10 = vadd.f32 %v16782_v36, %v20426_v4  ;;  %11993 = vmatprep.subr.bf16.mxu1 %v17651_v32  ;;  %v17675_v36 = vld [vmem:[#allocation9 + $0x694] ss:$24 sps:$4 sm:$0xff]   ;;  %v17691_v32 = vld [vmem:[#allocation9 + $0x1e0] ss:$24 sps:$4 sm:$0xff]  }
 0x370   : > { %v16784_v58 = vpop.f32.mrf.mxu0  ;;  %v17687_v62 = vld [vmem:[#allocation9 + $0x214] ss:$24 sps:$4 sm:$0xff]  }
 0x371   : > { %v20523_v55 = vadd.f32 %v4437_v51, %v4302_v10  ;;  %v17673_v10 = vld [vmem:[#allocation9 + $0x690] ss:$24 sps:$4 sm:$0xff]   ;;  %v17681_v58 = vld [vmem:[#allocation9 + $0x664] ss:$24 sps:$4 sm:$0xff]  }
 0x372   : > { %v4341_v16 = vpop.f32.mrf.mxu0  ;;  %11994 = vmatpush1.bf16.msra.mxu1 %v17649_v18  ;;  %v17699_v18 = vld [vmem:[#allocation9 + $0x8a4] ss:$24 sps:$4 sm:$0xff]  }
 0x373   : > { %v4342_v2 = vadd.f32 %v4341_v16, %v20429_v20  ;;  %11995 = vmatprep.subr.bf16.mxu1 %v17657_v44  ;;  %v17661_v20 = vld [vmem:[#allocation9 + $0x2a0] ss:$24 sps:$4 sm:$0xff]   ;;  %v17682_v16 = vld [vmem:[#allocation9 + $0x630] ss:$24 sps:$4 sm:$0xff]   ;;  %v4455_v34 = vpack.c.bf16 %v20523_v55, %v20523_v55 }
 0x374   : > { %v16893_v42 = vpop.f32.mrf.mxu0 }
 0x375   : > { %v17690_v42 = vld [vmem:[#allocation9 + $0x604] ss:$24 sps:$4 sm:$0xff]  }
 0x376   : > { %v4344_v30 = vpop.f32.mrf.mxu0  ;;  %11996 = vmatpush2.bf16.msra.mxu1 %v17655_v24 }
 0x377   : > { %v4345_v4 = vadd.f32 %v4344_v30, %v20432_v25  ;;  %11997 = vmatprep.subr.bf16.mxu1 %v17663_v35  ;;  %v17672_v25 = vld [vmem:[#allocation9 + $0x274] ss:$24 sps:$4 sm:$0xff]  }
 0x378   : > { %v16894_v23 = vpop.f32.mrf.mxu0 }
 0x379   : > { %v4443_v51 = vpack.c.bf16 %v4345_v4, %v4342_v2  ;;  %v17712_v2 = vld [vmem:[#allocation9 + $0x450] ss:$24 sps:$4 sm:$0xff]  }
 0x37a   : > { %11998 = vmatpush2.bf16.msra.mxu1 %v17661_v20 }
 0x37b   : > { %16946 = vmatmul.mubr.msk.bf16.vlgmr.msra.gmra.mxu0 %vm4471_vm2, %v4443_v51  ;;  %11999 = vmatprep.subr.bf16.mxu1 %v17672_v25  ;;  %v17718_v51 = vld [vmem:[#allocation9 + $0x420] ss:$24 sps:$4 sm:$0xff]  }
 0x37c   : > { %16949 = vmatprep.mubr.msk.bf16.mxu0 %vm19757_vm0, %v19756_v40  ;;  %12062 = vmatpush1.bf16.msra.mxu0 %v17652_v27 }
 0x37d   : > { %12063 = vmatprep.subr.bf16.mxu0 %v17660_v46  ;;  %v17720_v46 = vld [vmem:[#allocation9 + $0x424] ss:$24 sps:$4 sm:$0xff]  }
 0x37e   : > { %12000 = vmatpush2.bf16.msra.mxu1 %v17670_v48 }
 0x37f   : > { %12001 = vmatprep.subr.bf16.mxu1 %v17678_v43  ;;  %v17732_v43 = vld [vmem:[#allocation9 + $0x3c4] ss:$24 sps:$4 sm:$0xff]  }
 0x380   : > { %12064 = vmatpush1.bf16.msra.mxu0 %v17658_v31  ;;  %v17726_v31 = vld [vmem:[#allocation9 + $0x3f4] ss:$24 sps:$4 sm:$0xff]  }
 0x381   : > { %12065 = vmatprep.subr.bf16.mxu0 %v17666_v33 }
 0x382   : > { %12002 = vmatpush2.bf16.msra.mxu1 %v17676_v37  ;;  %v17730_v37 = vld [vmem:[#allocation9 + $0x3c0] ss:$24 sps:$4 sm:$0xff]  }
 0x383   : > { %16950 = vmatmul.mubr.msk.bf16.gmra.mxu0 %vm4471_vm2, %v4444_v47  ;;  %12003 = vmatprep.subr.bf16.mxu1 %v17687_v62  ;;  %v17679_v47 = vld [vmem:[#allocation9 + $0x660] ss:$24 sps:$4 sm:$0xff]  }
 0x384   : > { %16953 = vmatprep.mubr.msk.bf16.mxu0 %vm19757_vm0, %v19756_v40  ;;  %12066 = vmatpush1.bf16.msra.mxu0 %v17664_v39  ;;  %v17724_v39 = vld [vmem:[#allocation9 + $0x3f0] ss:$24 sps:$4 sm:$0xff]  }
 0x385   : > { %12067 = vmatprep.subr.bf16.mxu0 %v17669_v1 }
 0x386   : > { %12004 = vmatpush2.bf16.msra.mxu1 %v17685_v7 }
 0x387   : > { %12005 = vmatprep.subr.bf16.mxu1 %v17693_v0 }
 0x388   : > { %12068 = vmatpush1.bf16.msra.mxu0 %v17667_v38 }
 0x389   : > { %12069 = vmatprep.subr.bf16.mxu0 %v17675_v36 }
 0x38a   : > { %12006 = vmatpush2.bf16.msra.mxu1 %v17691_v32  ;;  %v17739_v32 = vld [vmem:[#allocation9 + $0xd50] ss:$24 sps:$4 sm:$0xff]  }
 0x38b   : > { %16954 = vmatmul.mubr.msk.bf16.gmra.mxu0 %vm4471_vm2, %v4445_v56  ;;  %v17694_v56 = vld [vmem:[#allocation9 + $0x8d0] ss:$24 sps:$4 sm:$0xff]   ;;  %12007 = vmatprep.subr.bf16.mxu1 %v17702_v8 }
 0x38c   : > { %16957 = vmatprep.mubr.msk.bf16.mxu0 %vm19757_vm0, %v19756_v40  ;;  %12070 = vmatpush1.bf16.msra.mxu0 %v17673_v10 }
 0x38d   : > { %12071 = vmatprep.subr.bf16.mxu0 %v17681_v58  ;;  %v17738_v58 = vld [vmem:[#allocation9 + $0x394] ss:$24 sps:$4 sm:$0xff]  }
 0x38e   : > { %12008 = vmatpush2.bf16.msra.mxu1 %v17700_v29  ;;  %v17753_v29 = vld [vmem:[#allocation9 + $0xcf4] ss:$24 sps:$4 sm:$0xff]  }
 0x390   : > { %12072 = vmatpush1.bf16.msra.mxu0 %v17679_v47 }
 0x391   : > { %12073 = vmatprep.subr.bf16.mxu0 %v17684_v54  ;;  %v17736_v54 = vld [vmem:[#allocation9 + $0x390] ss:$24 sps:$4 sm:$0xff]  }
 0x393   : > { %16958 = vmatmul.mubr.msk.bf16.gmra.mxu0 %vm4471_vm2, %v4446_v57  ;;  %v17705_v57 = vld [vmem:[#allocation9 + $0x874] ss:$24 sps:$4 sm:$0xff]  }
 0x394   : > { %16961 = vmatprep.mubr.msk.bf16.mxu0 %vm19757_vm0, %v19756_v40  ;;  %12074 = vmatpush1.bf16.msra.mxu0 %v17682_v16 }
 0x395   : > { %12075 = vmatprep.subr.bf16.mxu0 %v17690_v42 }
 0x398   : > { %12076 = vmatpush1.bf16.msra.mxu0 %v17688_v21  ;;  %v17744_v21 = vld [vmem:[#allocation9 + $0x364] ss:$24 sps:$4 sm:$0xff]  }
 0x399   : > { %12077 = vmatprep.subr.bf16.mxu0 %v17696_v19  ;;  %v17747_v19 = vld [vmem:[#allocation9 + $0xd24] ss:$24 sps:$4 sm:$0xff]  }
 0x39b   : > { %16962 = vmatmul.mubr.msk.bf16.gmra.mxu0 %vm4471_vm2, %v4447_v45  ;;  %v17708_v45 = vld [vmem:[#allocation9 + $0x184] ss:$24 sps:$4 sm:$0xff]  }
 0x39c   : > { %16965 = vmatprep.mubr.msk.bf16.mxu0 %vm19757_vm0, %v19756_v40  ;;  %12078 = vmatpush2.bf16.msra.mxu0 %v17694_v56 }
 0x39d   : > { %12079 = vmatprep.subr.bf16.mxu0 %v17699_v18  ;;  %12009 = vmatprep.subr.bf16.mxu1 %v17708_v45  ;;  %v17742_v18 = vld [vmem:[#allocation9 + $0x360] ss:$24 sps:$4 sm:$0xff]   ;;  %v17748_v45 = vld [vmem:[#allocation9 + $0x330] ss:$24 sps:$4 sm:$0xff]  }
 0x39e   : > { %12010 = vmatpush2.bf16.msra.mxu1 %v17706_v63 }
 0x39f   : > { %12020 = vmatprep.subr.bf16.mxu1 %v17714_v15  ;;  %v17759_v15 = vld [vmem:[#allocation9 + $0xcc4] ss:$24 sps:$4 sm:$0xff]  }
 0x3a0   : > { %12080 = vmatpush2.bf16.msra.mxu0 %v17697_v12  ;;  %v17745_v12 = vld [vmem:[#allocation9 + $0xd20] ss:$24 sps:$4 sm:$0xff]  }
 0x3a1   : > { %12081 = vmatprep.subr.bf16.mxu0 %v17705_v57  ;;  %v17750_v57 = vld [vmem:[#allocation9 + $0x334] ss:$24 sps:$4 sm:$0xff]  }
 0x3a3   : > { %16966 = vmatmul.mubr.msk.bf16.gmra.mxu0 %vm4471_vm2, %v4448_v41  ;;  %v17709_v41 = vld [vmem:[#allocation9 + $0x840] ss:$24 sps:$4 sm:$0xff]  }
 0x3a4   : > { %16969 = vmatprep.mubr.msk.bf16.mxu0 %vm19757_vm0, %v19756_v40  ;;  %12082 = vmatpush2.bf16.msra.mxu0 %v17703_v22 }
 0x3a5   : > { %12083 = vmatprep.subr.bf16.mxu0 %v17711_v49  ;;  %v17751_v49 = vld [vmem:[#allocation9 + $0xcf0] ss:$24 sps:$4 sm:$0xff]  }
 0x3a8   : > { %12084 = vmatpush2.bf16.msra.mxu0 %v17709_v41  ;;  %v17756_v41 = vld [vmem:[#allocation9 + $0x304] ss:$24 sps:$4 sm:$0xff]  }
 0x3a9   : > { %12085 = vmatprep.subr.bf16.mxu0 %v17717_v26 }
 0x3ab   : > { %16970 = vmatmul.mubr.msk.bf16.gmra.mxu0 %vm4471_vm2, %v4449_v17  ;;  %v17715_v17 = vld [vmem:[#allocation9 + $0x810] ss:$24 sps:$4 sm:$0xff]  }
 0x3ac   : > { %16973 = vmatprep.mubr.msk.bf16.mxu0 %vm19757_vm0, %v19756_v40  ;;  %12086 = vmatpush2.bf16.msra.mxu0 %v17715_v17 }
 0x3ad   : > { %12087 = vmatprep.subr.bf16.mxu0 %v17723_v28  ;;  %v17754_v28 = vld [vmem:[#allocation9 + $0x300] ss:$24 sps:$4 sm:$0xff]  }
 0x3b0   : > { %12088 = vmatpush2.bf16.msra.mxu0 %v17721_v52  ;;  %v17757_v52 = vld [vmem:[#allocation9 + $0xcc0] ss:$24 sps:$4 sm:$0xff]  }
 0x3b3   : > { %16974 = vmatmul.mubr.msk.bf16.gmra.mxu0 %vm4471_vm2, %v4450_v59  ;;  %v17729_v59 = vld [vmem:[#allocation9 + $0x7b4] ss:$24 sps:$4 sm:$0xff]  }
 0x3b4   : > { %16977 = vmatprep.mubr.msk.bf16.mxu0 %vm19757_vm0, %v19756_v40  ;;  %12089 = vmatprep.subr.bf16.mxu0 %v17729_v59 }
 0x3b5   : > { %12090 = vmatpush2.bf16.msra.mxu0 %v17727_v61  ;;  %v17762_v61 = vld [vmem:[#allocation9 + $0x5d4] ss:$24 sps:$4 sm:$0xff]  }
 0x3b6   : > { %12091 = vmatprep.subr.bf16.mxu0 %v17735_v9  ;;  %v17765_v9 = vld [vmem:[#allocation9 + $0xc94] ss:$24 sps:$4 sm:$0xff]  }
 0x3bb   : > { %16978 = vmatmul.mubr.msk.bf16.gmra.mxu0 %vm4471_vm2, %v4451_v13  ;;  %v17733_v13 = vld [vmem:[#allocation9 + $0x780] ss:$24 sps:$4 sm:$0xff]  }
 0x3bc   : > { %16981 = vmatprep.mubr.msk.bf16.mxu0 %vm19757_vm0, %v19756_v40  ;;  %12092 = vmatpush2.bf16.msra.mxu0 %v17733_v13 }
 0x3bd   : > { %12143 = vmatprep.subr.bf16.mxu0 %v17741_v6 }
 0x3c3   : > { %16982 = vmatmul.mubr.msk.bf16.gmra.mxu0 %vm4471_vm2, %v4452_v14  ;;  %v20599_v14 = vld [vmem:[#allocation8] ss:$0 sm:$0xff] }
 0x3c4   : > { %16985 = vmatprep.mubr.msk.bf16.mxu0 %vm19757_vm0, %v19756_v40 }
 0x3cb   : > { %16986 = vmatmul.mubr.msk.bf16.gmra.mxu0 %vm4471_vm2, %v4453_v60 }
 0x3cc   : > { %16989 = vmatprep.mubr.msk.bf16.mxu0 %vm19757_vm0, %v19756_v40 }
 0x3d3   : > { %16990 = vmatmul.mubr.msk.bf16.gmra.mxu0 %vm4471_vm2, %v4454_v53 }
 0x3d4   : > { %16993 = vmatprep.mubr.msk.bf16.mxu0 %vm19757_vm0, %v19756_v40 }
 0x3db   : > { %16994 = vmatmul.mubr.msk.bf16.gmra.mxu0 %vm4471_vm2, %v4455_v34 }
 0x43b   : > { %v4545_v3 = vpop.f32.mrf.mxu0 }
 0x43c   : > { %v4546_v11 = vadd.f32 %v20599_v14, %v4545_v3  ;;  %v17760_v3 = vld [vmem:[#allocation9 + $0x5d0] ss:$24 sps:$4 sm:$0xff]  }
 0x43d   : > { %v16947_v60 = vpop.f32.mrf.mxu0 }
 0x43e   : > { %v4647_v53 = vmax.f32 %v4546_v11, 0.0  ;;  %v17763_v11 = vld [vmem:[#allocation9 + $0xc90] ss:$24 sps:$4 sm:$0xff]  }
 0x43f   : > { %v4548_v50 = vpop.f32.mrf.mxu0 }
 0x440   : > { %v4549_v5 = vadd.f32 %v20599_v14, %v4548_v50  ;;  %v20607_v55 = vpack.c.bf16 %v4647_v53, %v4647_v53  ;;  %v17768_v50 = vld [vmem:[#allocation9 + $0x5a4] ss:$24 sps:$4 sm:$0xff]  }
 0x441   : > { %v16948_v44 = vpop.f32.mrf.mxu0 }
 0x442   : > { %v4648_v40 = vmax.f32 %v4549_v5, 0.0  ;;  %v17771_v5 = vld [vmem:[#allocation9 + $0xc64] ss:$24 sps:$4 sm:$0xff]   ;;  %v17766_v44 = vld [vmem:[#allocation9 + $0x5a0] ss:$24 sps:$4 sm:$0xff]  }
 0x443   : > { %v20603_v30 = vpop.f32.mrf.mxu0 }
 0x444   : > { %v20605_v27 = vpack.c.bf16 %v4648_v40, %v4648_v40  ;;  %v17769_v40 = vld [vmem:[#allocation9 + $0xc60] ss:$24 sps:$4 sm:$0xff]  }
 0x445   : > { %v16951_v4 = vpop.f32.mrf.mxu0 }
 0x446   : > { %12011 = vmatprep.mubr.bf16.mxu1 %v20605_v27  ;;  %v17774_v4 = vld [vmem:[#allocation9 + $0x574] ss:$24 sps:$4 sm:$0xff]  }
 0x447   : > { %v4556_v23 = vpop.f32.mrf.mxu0  ;;  %12012 = vmatmul.mubr.bf16.vlgmr.msra.gmra.mxu1 %v20607_v55 }
 0x448   : > { %v4557_v24 = vadd.f32 %v20599_v14, %v4556_v23  ;;  %12021 = vmatpush1.bf16.msra.mxu1 %v17712_v2 }
 0x449   : > { %v16952_v35 = vpop.f32.mrf.mxu0  ;;  %12022 = vmatprep.subr.bf16.mxu1 %v17720_v46  ;;  %v17777_v46 = vld [vmem:[#allocation9 + $0xc34] ss:$24 sps:$4 sm:$0xff]  }
 0x44a   : > { %v4650_v33 = vmax.f32 %v4557_v24, 0.0  ;;  %v17772_v24 = vld [vmem:[#allocation9 + $0x570] ss:$24 sps:$4 sm:$0xff]  }
 0x44b   : > { %v4561_v20 = vpop.f32.mrf.mxu0 }
 0x44c   : > { %v20612_v25 = vpack.c.bf16 %v4650_v33, %v4650_v33  ;;  %12023 = vmatpush1.bf16.msra.mxu1 %v17718_v51  ;;  %v4562_v1 = vadd.f32 %v20599_v14, %v4561_v20  ;;  %v17775_v51 = vld [vmem:[#allocation9 + $0xc30] ss:$24 sps:$4 sm:$0xff]   ;;  %v17783_v33 = vld [vmem:[#allocation9 + $0xc04] ss:$24 sps:$4 sm:$0xff]  }
 0x44d   : > { %v16955_v48 = vpop.f32.mrf.mxu0  ;;  %12024 = vmatprep.subr.bf16.mxu1 %v17726_v31  ;;  %v17780_v31 = vld [vmem:[#allocation9 + $0x544] ss:$24 sps:$4 sm:$0xff]  }
 0x44e   : > { %12052 = vmatprep.mubr.bf16.mxu1 %v20612_v25  ;;  %v4651_v62 = vmax.f32 %v4562_v1, 0.0  ;;  %v17781_v1 = vld [vmem:[#allocation9 + $0xc00] ss:$24 sps:$4 sm:$0xff]  }
 0x44f   : > { %v4564_v38 = vpop.f32.mrf.mxu0 }
 0x450   : > { %v4565_v36 = vadd.f32 %v20599_v14, %v4564_v38  ;;  %12025 = vmatpush1.bf16.msra.mxu1 %v17724_v39  ;;  %v20621_v16 = vpack.c.bf16 %v4651_v62, %v4651_v62  ;;  %v17778_v39 = vld [vmem:[#allocation9 + $0x540] ss:$24 sps:$4 sm:$0xff]   ;;  %v17789_v38 = vld [vmem:[#allocation9 + $0xed4] ss:$24 sps:$4 sm:$0xff]   ;;  %v17787_v62 = vld [vmem:[#allocation9 + $0xed0] ss:$24 sps:$4 sm:$0xff]  }
 0x451   : > { %v16956_v10 = vpop.f32.mrf.mxu0  ;;  %12026 = vmatprep.subr.bf16.mxu1 %v17732_v43  ;;  %v17786_v43 = vld [vmem:[#allocation9 + $0x514] ss:$24 sps:$4 sm:$0xff]  }
 0x452   : > { %v4652_v7 = vmax.f32 %v4565_v36, 0.0 }
 0x453   : > { %v20617_v0 = vpop.f32.mrf.mxu0 }
 0x454   : > { %v20619_v47 = vpack.c.bf16 %v4652_v7, %v4652_v7  ;;  %12027 = vmatpush1.bf16.msra.mxu1 %v17730_v37  ;;  %v17784_v37 = vld [vmem:[#allocation9 + $0x510] ss:$24 sps:$4 sm:$0xff]   ;;  %v17795_v7 = vld [vmem:[#allocation9 + $0xea4] ss:$24 sps:$4 sm:$0xff]  }
 0x455   : > { %v16959_v42 = vpop.f32.mrf.mxu0  ;;  %12028 = vmatprep.subr.bf16.mxu1 %v17738_v58  ;;  %v17792_v58 = vld [vmem:[#allocation9 + $0x4e4] ss:$24 sps:$4 sm:$0xff]  }
 0x456   : > { %12093 = vmatprep.mubr.bf16.mxu0 %v20619_v47  ;;  %v17793_v42 = vld [vmem:[#allocation9 + $0xea0] ss:$24 sps:$4 sm:$0xff]  }
 0x457   : > { %v20624_v56 = vpop.f32.mrf.mxu0  ;;  %12094 = vmatmul.mubr.bf16.vlgmr.msra.gmra.mxu0 %v20621_v16 }
 0x458   : > { %12029 = vmatpush1.bf16.msra.mxu1 %v17736_v54  ;;  %12144 = vmatpush1.bf16.msra.mxu0 %v17739_v32  ;;  %v17790_v32 = vld [vmem:[#allocation9 + $0x4e0] ss:$24 sps:$4 sm:$0xff]  }
 0x459   : > { %v16960_v8 = vpop.f32.mrf.mxu0  ;;  %12030 = vmatprep.subr.bf16.mxu1 %v17744_v21  ;;  %12145 = vmatprep.subr.bf16.mxu0 %v17747_v19  ;;  %v17798_v19 = vld [vmem:[#allocation9 + $0x4b4] ss:$24 sps:$4 sm:$0xff]  }
 0x45a   : > { %v17796_v8 = vld [vmem:[#allocation9 + $0x4b0] ss:$24 sps:$4 sm:$0xff]  }
 0x45b   : > { %v20627_v22 = vpop.f32.mrf.mxu0 }
 0x45c   : > { %12031 = vmatpush1.bf16.msra.mxu1 %v17742_v18  ;;  %12146 = vmatpush1.bf16.msra.mxu0 %v17745_v12  ;;  %v17801_v18 = vld [vmem:[#allocation9 + $0xe74] ss:$24 sps:$4 sm:$0xff]  }
 0x45d   : > { %v16963_v63 = vpop.f32.mrf.mxu0  ;;  %12032 = vmatprep.subr.bf16.mxu1 %v17750_v57  ;;  %12147 = vmatprep.subr.bf16.mxu0 %v17753_v29  ;;  %v17799_v57 = vld [vmem:[#allocation9 + $0xe70] ss:$24 sps:$4 sm:$0xff]   ;;  %v4554_v29 = vadd.f32 %v20599_v14, %v20603_v30  ;;  %v17813_v30 = vld [vmem:[#allocation9 + $0xe14] ss:$24 sps:$4 sm:$0xff]  }
 0x45e   : > { %v17807_v63 = vld [vmem:[#allocation9 + $0xe44] ss:$24 sps:$4 sm:$0xff]  }
 0x45f   : > { %v4580_v26 = vpop.f32.mrf.mxu0 }
 0x460   : > { %v4581_v17 = vadd.f32 %v20599_v14, %v4580_v26  ;;  %12033 = vmatpush1.bf16.msra.mxu1 %v17748_v45  ;;  %12148 = vmatpush1.bf16.msra.mxu0 %v17751_v49  ;;  %v17804_v49 = vld [vmem:[#allocation9 + $0x484] ss:$24 sps:$4 sm:$0xff]   ;;  %v17802_v26 = vld [vmem:[#allocation9 + $0x480] ss:$24 sps:$4 sm:$0xff]  }
 0x461   : > { %v16964_v59 = vpop.f32.mrf.mxu0  ;;  %12034 = vmatprep.subr.bf16.mxu1 %v17756_v41  ;;  %12149 = vmatprep.subr.bf16.mxu0 %v17759_v15  ;;  %v4573_v41 = vadd.f32 %v20599_v14, %v20624_v56 }
 0x462   : > { %v4656_v13 = vmax.f32 %v4581_v17, 0.0  ;;  %v17805_v17 = vld [vmem:[#allocation9 + $0xe40] ss:$24 sps:$4 sm:$0xff]   ;;  %v17810_v59 = vld [vmem:[#allocation9 + $0xa54] ss:$24 sps:$4 sm:$0xff]  }
 0x463   : > { %v20630_v6 = vpop.f32.mrf.mxu0 }
 0x464   : > { %v20632_v34 = vpack.c.bf16 %v4656_v13, %v4656_v13  ;;  %12035 = vmatpush1.bf16.msra.mxu1 %v17754_v28  ;;  %12150 = vmatpush1.bf16.msra.mxu0 %v17757_v52  ;;  %v4649_v28 = vmax.f32 %v4554_v29, 0.0  ;;  %v17808_v13 = vld [vmem:[#allocation9 + $0xa50] ss:$24 sps:$4 sm:$0xff]  }
 0x465   : > { %v16967_v60 = vpop.f32.mrf.mxu0  ;;  %12036 = vmatprep.subr.bf16.mxu1 %v17762_v61  ;;  %12151 = vmatprep.subr.bf16.mxu0 %v17765_v9  ;;  %v4654_v61 = vmax.f32 %v4573_v41, 0.0  ;;  %v17841_v41 = vld [vmem:[#allocation9 + $0x1320] ss:$24 sps:$4 sm:$0xff]  }
 0x466   : > { %12175 = vmatprep.mubr.bf16.mxu0 %v20632_v34  ;;  %v17816_v60 = vld [vmem:[#allocation9 + $0xa24] ss:$24 sps:$4 sm:$0xff]  }
 0x467   : > { %v20635_v53 = vpop.f32.mrf.mxu0 }
 0x468   : > { %12037 = vmatpush2.bf16.msra.mxu1 %v17760_v3  ;;  %12152 = vmatpush1.bf16.msra.mxu0 %v17763_v11  ;;  %v20655_v3 = vpack.c.bf16 %v4649_v28, %v4649_v28  ;;  %v17811_v11 = vld [vmem:[#allocation9 + $0xe10] ss:$24 sps:$4 sm:$0xff]  }
 0x469   : > { %v16968_v2 = vpop.f32.mrf.mxu0  ;;  %12038 = vmatprep.subr.bf16.mxu1 %v17768_v50  ;;  %12153 = vmatprep.subr.bf16.mxu0 %v17771_v5  ;;  %v20657_v50 = vpack.c.bf16 %v4654_v61, %v4654_v61  ;;  %v17819_v5 = vld [vmem:[#allocation9 + $0xde4] ss:$24 sps:$4 sm:$0xff]  }
 0x46a   : > { %v17852_v61 = vld [vmem:[#allocation9 + $0x904] ss:$24 sps:$4 sm:$0xff]  }
 0x46b   : > { %v20637_v23 = vpop.f32.mrf.mxu0 }
 0x46c   : > { %12039 = vmatpush2.bf16.msra.mxu1 %v17766_v44  ;;  %12154 = vmatpush1.bf16.msra.mxu0 %v17769_v40  ;;  %v17814_v40 = vld [vmem:[#allocation9 + $0xa20] ss:$24 sps:$4 sm:$0xff]  }
 0x46d   : > { %v16971_v35 = vpop.f32.mrf.mxu0  ;;  %12040 = vmatprep.subr.bf16.mxu1 %v17774_v4  ;;  %12155 = vmatprep.subr.bf16.mxu0 %v17777_v46  ;;  %v17817_v4 = vld [vmem:[#allocation9 + $0xde0] ss:$24 sps:$4 sm:$0xff]   ;;  %v17822_v46 = vld [vmem:[#allocation9 + $0x9f4] ss:$24 sps:$4 sm:$0xff]  }
 0x46e   : > { %v17820_v35 = vld [vmem:[#allocation9 + $0x9f0] ss:$24 sps:$4 sm:$0xff]  }
 0x46f   : > { %v20639_v20 = vpop.f32.mrf.mxu0 }
 0x470   : > { %12041 = vmatpush2.bf16.msra.mxu1 %v17772_v24  ;;  %12156 = vmatpush1.bf16.msra.mxu0 %v17775_v51  ;;  %v17825_v24 = vld [vmem:[#allocation9 + $0xdb4] ss:$24 sps:$4 sm:$0xff]  }
 0x471   : > { %v16972_v48 = vpop.f32.mrf.mxu0  ;;  %12042 = vmatprep.subr.bf16.mxu1 %v17780_v31  ;;  %12157 = vmatprep.subr.bf16.mxu0 %v17783_v33  ;;  %v17823_v33 = vld [vmem:[#allocation9 + $0xdb0] ss:$24 sps:$4 sm:$0xff]  }
 0x472   : > { %v17831_v48 = vld [vmem:[#allocation9 + $0xd84] ss:$24 sps:$4 sm:$0xff]  }
 0x473   : > { %v20641_v36 = vpop.f32.mrf.mxu0 }
 0x474   : > { %12043 = vmatpush2.bf16.msra.mxu1 %v17778_v39  ;;  %12158 = vmatpush1.bf16.msra.mxu0 %v17781_v1  ;;  %v17828_v39 = vld [vmem:[#allocation9 + $0x9c4] ss:$24 sps:$4 sm:$0xff]   ;;  %v4578_v1 = vadd.f32 %v20599_v14, %v20627_v22  ;;  %v17832_v22 = vld [vmem:[#allocation9 + $0x990] ss:$24 sps:$4 sm:$0xff]  }
 0x475   : > { %v16975_v10 = vpop.f32.mrf.mxu0  ;;  %12044 = vmatprep.subr.bf16.mxu1 %v17786_v43  ;;  %12159 = vmatprep.subr.bf16.mxu0 %v17789_v38  ;;  %v4597_v43 = vadd.f32 %v20599_v14, %v20639_v20  ;;  %v17835_v20 = vld [vmem:[#allocation9 + $0x1350] ss:$24 sps:$4 sm:$0xff]  }
 0x476   : > { %v17829_v10 = vld [vmem:[#allocation9 + $0xd80] ss:$24 sps:$4 sm:$0xff]  }
 0x477   : > { %v20643_v54 = vpop.f32.mrf.mxu0 }
 0x478   : > { %12045 = vmatpush2.bf16.msra.mxu1 %v17784_v37  ;;  %12160 = vmatpush2.bf16.msra.mxu0 %v17787_v62  ;;  %v17826_v37 = vld [vmem:[#allocation9 + $0x9c0] ss:$24 sps:$4 sm:$0xff]  }
 0x479   : > { %v16976_v21 = vpop.f32.mrf.mxu0  ;;  %12046 = vmatprep.subr.bf16.mxu1 %v17792_v58  ;;  %12161 = vmatprep.subr.bf16.mxu0 %v17795_v7  ;;  %v17834_v58 = vld [vmem:[#allocation9 + $0x994] ss:$24 sps:$4 sm:$0xff]   ;;  %v4655_v7 = vmax.f32 %v4578_v1, 0.0 }
 0x47a   : > { %v17873_v1 = vld [vmem:[#allocation9 + $0x1234] ss:$24 sps:$4 sm:$0xff]  }
 0x47b   : > { %v20645_v12 = vpop.f32.mrf.mxu0 }
 0x47c   : > { %12047 = vmatpush2.bf16.msra.mxu1 %v17790_v32  ;;  %12162 = vmatpush2.bf16.msra.mxu0 %v17793_v42  ;;  %v17837_v32 = vld [vmem:[#allocation9 + $0x1354] ss:$24 sps:$4 sm:$0xff]   ;;  %v4660_v42 = vmax.f32 %v4597_v43, 0.0  ;;  %v17871_v43 = vld [vmem:[#allocation9 + $0x1230] ss:$24 sps:$4 sm:$0xff]  }
 0x47d   : > { %v16979_v45 = vpop.f32.mrf.mxu0  ;;  %12048 = vmatprep.subr.bf16.mxu1 %v17798_v19  ;;  %12163 = vmatprep.subr.bf16.mxu0 %v17801_v18  ;;  %v20673_v18 = vpack.c.bf16 %v4655_v7, %v4655_v7  ;;  %v17882_v7 = vld [vmem:[#allocation9 + $0xb14] ss:$24 sps:$4 sm:$0xff]  }
 0x47e   : > { %v20675_v29 = vpack.c.bf16 %v4660_v42, %v4660_v42  ;;  %v17880_v42 = vld [vmem:[#allocation9 + $0xb10] ss:$24 sps:$4 sm:$0xff]  }
 0x47f   : > { %v20651_v15 = vpop.f32.mrf.mxu0 }
 0x480   : > { %12049 = vmatpush2.bf16.msra.mxu1 %v17796_v8  ;;  %12164 = vmatpush2.bf16.msra.mxu0 %v17799_v57  ;;  %v17840_v8 = vld [vmem:[#allocation9 + $0x964] ss:$24 sps:$4 sm:$0xff]  }
 0x481   : > { %v16980_v52 = vpop.f32.mrf.mxu0  ;;  %12050 = vmatprep.subr.bf16.mxu1 %v17804_v49  ;;  %12165 = vmatprep.subr.bf16.mxu0 %v17807_v63  ;;  %v17843_v57 = vld [vmem:[#allocation9 + $0x1324] ss:$24 sps:$4 sm:$0xff]   ;;  %v17838_v49 = vld [vmem:[#allocation9 + $0x960] ss:$24 sps:$4 sm:$0xff]  }
 0x482   : > { %v17844_v52 = vld [vmem:[#allocation9 + $0x930] ss:$24 sps:$4 sm:$0xff]  }
 0x483   : > { %v20653_v9 = vpop.f32.mrf.mxu0 }
 0x484   : > { %12051 = vmatpush2.bf16.msra.mxu1 %v17802_v26  ;;  %12166 = vmatpush2.bf16.msra.mxu0 %v17805_v17  ;;  %v17846_v26 = vld [vmem:[#allocation9 + $0x934] ss:$24 sps:$4 sm:$0xff]  }
 0x485   : > { %v16983_v56 = vpop.f32.mrf.mxu0  ;;  %12102 = vmatprep.subr.bf16.mxu1 %v17810_v59  ;;  %12167 = vmatprep.subr.bf16.mxu0 %v17813_v30  ;;  %v17849_v17 = vld [vmem:[#allocation9 + $0x12f4] ss:$24 sps:$4 sm:$0xff]   ;;  %v17847_v30 = vld [vmem:[#allocation9 + $0x12f0] ss:$24 sps:$4 sm:$0xff]  }
 0x487   : > { %12053 = vmatmul.mubr.bf16.vlgmr.msra.gmra.mxu1 %v20655_v3  ;;  %v20660_v44 = vpop.f32.mrf.mxu0 }
 0x488   : > { %12103 = vmatpush1.bf16.msra.mxu1 %v17808_v13  ;;  %12134 = vmatprep.mubr.bf16.mxu1 %v20657_v50  ;;  %v17855_v13 = vld [vmem:[#allocation9 + $0x12c4] ss:$24 sps:$4 sm:$0xff]  }
 0x489   : > { %12168 = vmatpush2.bf16.msra.mxu0 %v17811_v11  ;;  %v16984_v2 = vpop.f32.mrf.mxu0  ;;  %12104 = vmatprep.subr.bf16.mxu1 %v17816_v60  ;;  %v17850_v11 = vld [vmem:[#allocation9 + $0x900] ss:$24 sps:$4 sm:$0xff]  }
 0x48a   : > { %12169 = vmatprep.subr.bf16.mxu0 %v17819_v5  ;;  %v17853_v5 = vld [vmem:[#allocation9 + $0x12c0] ss:$24 sps:$4 sm:$0xff]   ;;  %v17861_v2 = vld [vmem:[#allocation9 + $0x1294] ss:$24 sps:$4 sm:$0xff]  }
 0x48b   : > { %v20663_v51 = vpop.f32.mrf.mxu0 }
 0x48c   : > { %12105 = vmatpush1.bf16.msra.mxu1 %v17814_v40  ;;  %v17858_v40 = vld [vmem:[#allocation9 + $0xbd4] ss:$24 sps:$4 sm:$0xff]  }
 0x48d   : > { %12170 = vmatpush2.bf16.msra.mxu0 %v17817_v4  ;;  %v16987_v31 = vpop.f32.mrf.mxu0  ;;  %12106 = vmatprep.subr.bf16.mxu1 %v17822_v46  ;;  %v17856_v4 = vld [vmem:[#allocation9 + $0xbd0] ss:$24 sps:$4 sm:$0xff]  }
 0x48e   : > { %12171 = vmatprep.subr.bf16.mxu0 %v17825_v24  ;;  %v17859_v46 = vld [vmem:[#allocation9 + $0x1290] ss:$24 sps:$4 sm:$0xff]   ;;  %v17864_v24 = vld [vmem:[#allocation9 + $0xba4] ss:$24 sps:$4 sm:$0xff]   ;;  %v17862_v31 = vld [vmem:[#allocation9 + $0xba0] ss:$24 sps:$4 sm:$0xff]  }
 0x48f   : > { %v20669_v38 = vpop.f32.mrf.mxu0 }
 0x490   : > { %12107 = vmatpush1.bf16.msra.mxu1 %v17820_v35  ;;  %v17867_v35 = vld [vmem:[#allocation9 + $0x1264] ss:$24 sps:$4 sm:$0xff]  }
 0x491   : > { %12172 = vmatpush2.bf16.msra.mxu0 %v17823_v33  ;;  %v16988_v62 = vpop.f32.mrf.mxu0  ;;  %12108 = vmatprep.subr.bf16.mxu1 %v17828_v39  ;;  %v17865_v33 = vld [vmem:[#allocation9 + $0x1260] ss:$24 sps:$4 sm:$0xff]   ;;  %v17870_v39 = vld [vmem:[#allocation9 + $0xb74] ss:$24 sps:$4 sm:$0xff]  }
 0x492   : > { %12173 = vmatprep.subr.bf16.mxu0 %v17831_v48  ;;  %v17868_v48 = vld [vmem:[#allocation9 + $0xb70] ss:$24 sps:$4 sm:$0xff]   ;;  %v17879_v62 = vld [vmem:[#allocation9 + $0x1204] ss:$24 sps:$4 sm:$0xff]  }
 0x493   : > { %v20671_v21 = vpop.f32.mrf.mxu0 }
 0x494   : > { %12109 = vmatpush1.bf16.msra.mxu1 %v17826_v37  ;;  %v17876_v37 = vld [vmem:[#allocation9 + $0xb44] ss:$24 sps:$4 sm:$0xff]  }
 0x495   : > { %12174 = vmatpush2.bf16.msra.mxu0 %v17829_v10  ;;  %v16991_v19 = vpop.f32.mrf.mxu0  ;;  %12110 = vmatprep.subr.bf16.mxu1 %v17834_v58  ;;  %v17874_v10 = vld [vmem:[#allocation9 + $0xb40] ss:$24 sps:$4 sm:$0xff]  }
 0x496   : > { %12225 = vmatprep.subr.bf16.mxu0 %v17837_v32  ;;  %v17877_v58 = vld [vmem:[#allocation9 + $0x1200] ss:$24 sps:$4 sm:$0xff]   ;;  %v17885_v32 = vld [vmem:[#allocation9 + $0x14d4] ss:$24 sps:$4 sm:$0xff]   ;;  %v17888_v19 = vld [vmem:[#allocation9 + $0xae4] ss:$24 sps:$4 sm:$0xff]  }
 0x497   : > { %v20677_v45 = vpop.f32.mrf.mxu0 }
 0x498   : > { %12176 = vmatmul.mubr.bf16.vlgmr.msra.gmra.mxu0 %v20673_v18  ;;  %12111 = vmatpush1.bf16.msra.mxu1 %v17832_v22  ;;  %v17883_v22 = vld [vmem:[#allocation9 + $0x14d0] ss:$24 sps:$4 sm:$0xff]  }
 0x499   : > { %12226 = vmatpush1.bf16.msra.mxu0 %v17835_v20  ;;  %12257 = vmatprep.mubr.bf16.mxu0 %v20675_v29  ;;  %v16992_v63 = vpop.f32.mrf.mxu0  ;;  %v17891_v20 = vld [vmem:[#allocation9 + $0x14a4] ss:$24 sps:$4 sm:$0xff]  }
 0x49a   : > { %12112 = vmatprep.subr.bf16.mxu1 %v17840_v8  ;;  %12227 = vmatprep.subr.bf16.mxu0 %v17843_v57  ;;  %v17886_v8 = vld [vmem:[#allocation9 + $0xae0] ss:$24 sps:$4 sm:$0xff]   ;;  %v17897_v63 = vld [vmem:[#allocation9 + $0x1474] ss:$24 sps:$4 sm:$0xff]  }
 0x49b   : > { %v20681_v28 = vpop.f32.mrf.mxu0  ;;  %v17889_v57 = vld [vmem:[#allocation9 + $0x14a0] ss:$24 sps:$4 sm:$0xff]  }
 0x49c   : > { %12113 = vmatpush1.bf16.msra.mxu1 %v17838_v49  ;;  %v17894_v49 = vld [vmem:[#allocation9 + $0xab4] ss:$24 sps:$4 sm:$0xff]  }
 0x49d   : > { %12228 = vmatpush1.bf16.msra.mxu0 %v17841_v41  ;;  %v16995_v59 = vpop.f32.mrf.mxu0  ;;  %12114 = vmatprep.subr.bf16.mxu1 %v17846_v26  ;;  %v17892_v41 = vld [vmem:[#allocation9 + $0xab0] ss:$24 sps:$4 sm:$0xff]   ;;  %v4570_v26 = vadd.f32 %v20599_v14, %v20617_v0 }
 0x49e   : > { %12229 = vmatprep.subr.bf16.mxu0 %v17849_v17  ;;  %v17895_v17 = vld [vmem:[#allocation9 + $0x1470] ss:$24 sps:$4 sm:$0xff]   ;;  %v4589_v59 = vadd.f32 %v20599_v14, %v20635_v53  ;;  %v17912_v53 = vld [vmem:[#allocation9 + $0x1024] ss:$24 sps:$4 sm:$0xff]  }
 0x49f   : > { %v4644_v56 = vpop.f32.mrf.mxu0  ;;  %v17904_v0 = vld [vmem:[#allocation9 + $0x1050] ss:$24 sps:$4 sm:$0xff]  }
 0x4a0   : > { %12115 = vmatpush1.bf16.msra.mxu1 %v17844_v52  ;;  %v17900_v52 = vld [vmem:[#allocation9 + $0xa84] ss:$24 sps:$4 sm:$0xff]   ;;  %v17901_v56 = vld [vmem:[#allocation9 + $0x1440] ss:$24 sps:$4 sm:$0xff]  }
 0x4a1   : > { %12230 = vmatpush1.bf16.msra.mxu0 %v17847_v30  ;;  %v16996_v60 = vpop.f32.mrf.mxu0  ;;  %12116 = vmatprep.subr.bf16.mxu1 %v17852_v61  ;;  %v17903_v30 = vld [vmem:[#allocation9 + $0x1444] ss:$24 sps:$4 sm:$0xff]   ;;  %v17898_v61 = vld [vmem:[#allocation9 + $0xa80] ss:$24 sps:$4 sm:$0xff]  }
 0x4a2   : > { %12231 = vmatprep.subr.bf16.mxu0 %v17855_v13  ;;  %v4653_v13 = vmax.f32 %v4570_v26, 0.0  ;;  %v4658_v60 = vmax.f32 %v4589_v59, 0.0  ;;  %v17945_v26 = vld [vmem:[#allocation9 + $0x18f4] ss:$24 sps:$4 sm:$0xff]   ;;  %v17948_v59 = vld [vmem:[#allocation9 + $0xf04] ss:$24 sps:$4 sm:$0xff]  }
 0x4a4   : > { %12117 = vmatpush1.bf16.msra.mxu1 %v17850_v11  ;;  %v17906_v11 = vld [vmem:[#allocation9 + $0x1054] ss:$24 sps:$4 sm:$0xff]  }
 0x4a5   : > { %12232 = vmatpush1.bf16.msra.mxu0 %v17853_v5  ;;  %12118 = vmatprep.subr.bf16.mxu1 %v17858_v40  ;;  %v17909_v5 = vld [vmem:[#allocation9 + $0x1414] ss:$24 sps:$4 sm:$0xff]   ;;  %v20687_v40 = vpack.c.bf16 %v4653_v13, %v4653_v13  ;;  %v17949_v13 = vld [vmem:[#allocation9 + $0x18c0] ss:$24 sps:$4 sm:$0xff]  }
 0x4a6   : > { %12233 = vmatprep.subr.bf16.mxu0 %v17861_v2  ;;  %v17907_v2 = vld [vmem:[#allocation9 + $0x1410] ss:$24 sps:$4 sm:$0xff]  }
 0x4a8   : > { %12119 = vmatpush2.bf16.msra.mxu1 %v17856_v4  ;;  %v20689_v4 = vpack.c.bf16 %v4658_v60, %v4658_v60  ;;  %v17952_v60 = vld [vmem:[#allocation9 + $0x11d0] ss:$24 sps:$4 sm:$0xff]  }
 0x4a9   : > { %12234 = vmatpush1.bf16.msra.mxu0 %v17859_v46  ;;  %12120 = vmatprep.subr.bf16.mxu1 %v17864_v24  ;;  %v17915_v46 = vld [vmem:[#allocation9 + $0x13e4] ss:$24 sps:$4 sm:$0xff]   ;;  %v17910_v24 = vld [vmem:[#allocation9 + $0x1020] ss:$24 sps:$4 sm:$0xff]  }
 0x4aa   : > { %12235 = vmatprep.subr.bf16.mxu0 %v17867_v35  ;;  %v17913_v35 = vld [vmem:[#allocation9 + $0x13e0] ss:$24 sps:$4 sm:$0xff]  }
 0x4ac   : > { %12121 = vmatpush2.bf16.msra.mxu1 %v17862_v31  ;;  %v17918_v31 = vld [vmem:[#allocation9 + $0xff4] ss:$24 sps:$4 sm:$0xff]  }
 0x4ad   : > { %12236 = vmatpush1.bf16.msra.mxu0 %v17865_v33  ;;  %12122 = vmatprep.subr.bf16.mxu1 %v17870_v39  ;;  %v17921_v33 = vld [vmem:[#allocation9 + $0x13b4] ss:$24 sps:$4 sm:$0xff]   ;;  %v17916_v39 = vld [vmem:[#allocation9 + $0xff0] ss:$24 sps:$4 sm:$0xff]  }
 0x4ae   : > { %12237 = vmatprep.subr.bf16.mxu0 %v17873_v1  ;;  %v17919_v1 = vld [vmem:[#allocation9 + $0x13b0] ss:$24 sps:$4 sm:$0xff]  }
 0x4b0   : > { %12123 = vmatpush2.bf16.msra.mxu1 %v17868_v48  ;;  %v17924_v48 = vld [vmem:[#allocation9 + $0xfc4] ss:$24 sps:$4 sm:$0xff]  }
 0x4b1   : > { %12238 = vmatpush1.bf16.msra.mxu0 %v17871_v43  ;;  %12124 = vmatprep.subr.bf16.mxu1 %v17876_v37  ;;  %v4594_v43 = vadd.f32 %v20599_v14, %v20637_v23  ;;  %v17927_v37 = vld [vmem:[#allocation9 + $0x1384] ss:$24 sps:$4 sm:$0xff]   ;;  %v17931_v23 = vld [vmem:[#allocation9 + $0x1950] ss:$24 sps:$4 sm:$0xff]  }
 0x4b2   : > { %12239 = vmatprep.subr.bf16.mxu0 %v17879_v62  ;;  %v4613_v62 = vadd.f32 %v20599_v14, %v20651_v15  ;;  %v17939_v15 = vld [vmem:[#allocation9 + $0x1924] ss:$24 sps:$4 sm:$0xff]  }
 0x4b4   : > { %12125 = vmatpush2.bf16.msra.mxu1 %v17874_v10  ;;  %v17922_v10 = vld [vmem:[#allocation9 + $0xfc0] ss:$24 sps:$4 sm:$0xff]  }
 0x4b5   : > { %12240 = vmatpush1.bf16.msra.mxu0 %v17877_v58  ;;  %12126 = vmatprep.subr.bf16.mxu1 %v17882_v7  ;;  %v17925_v58 = vld [vmem:[#allocation9 + $0x1380] ss:$24 sps:$4 sm:$0xff]   ;;  %v17930_v7 = vld [vmem:[#allocation9 + $0xf94] ss:$24 sps:$4 sm:$0xff]  }
 0x4b6   : > { %12241 = vmatprep.subr.bf16.mxu0 %v17885_v32  ;;  %v4659_v32 = vmax.f32 %v4594_v43, 0.0  ;;  %v17973_v43 = vld [vmem:[#allocation9 + $0x1800] ss:$24 sps:$4 sm:$0xff]  }
 0x4b8   : > { %12127 = vmatpush2.bf16.msra.mxu1 %v17880_v42  ;;  %v17933_v42 = vld [vmem:[#allocation9 + $0x1954] ss:$24 sps:$4 sm:$0xff]  }
 0x4b9   : > { %12242 = vmatpush2.bf16.msra.mxu0 %v17883_v22  ;;  %12128 = vmatprep.subr.bf16.mxu1 %v17888_v19  ;;  %v4664_v22 = vmax.f32 %v4613_v62, 0.0  ;;  %v17928_v19 = vld [vmem:[#allocation9 + $0xf90] ss:$24 sps:$4 sm:$0xff]   ;;  %v17981_v62 = vld [vmem:[#allocation9 + $0x1ad4] ss:$24 sps:$4 sm:$0xff]  }
 0x4ba   : > { %12243 = vmatprep.subr.bf16.mxu0 %v17891_v20  ;;  %v20697_v20 = vpack.c.bf16 %v4659_v32, %v4659_v32  ;;  %v17987_v32 = vld [vmem:[#allocation9 + $0x1aa4] ss:$24 sps:$4 sm:$0xff]  }
 0x4bc   : > { %12129 = vmatpush2.bf16.msra.mxu1 %v17886_v8  ;;  %v17936_v8 = vld [vmem:[#allocation9 + $0xf64] ss:$24 sps:$4 sm:$0xff]  }
 0x4bd   : > { %12244 = vmatpush2.bf16.msra.mxu0 %v17889_v57  ;;  %12130 = vmatprep.subr.bf16.mxu1 %v17894_v49  ;;  %v20699_v57 = vpack.c.bf16 %v4664_v22, %v4664_v22  ;;  %v17934_v49 = vld [vmem:[#allocation9 + $0xf60] ss:$24 sps:$4 sm:$0xff]  }
 0x4be   : > { %12245 = vmatprep.subr.bf16.mxu0 %v17897_v63  ;;  %v17937_v63 = vld [vmem:[#allocation9 + $0x1920] ss:$24 sps:$4 sm:$0xff]  }
 0x4bf   : > { %v17985_v22 = vld [vmem:[#allocation9 + $0x1aa0] ss:$24 sps:$4 sm:$0xff]  }
 0x4c0   : > { %12131 = vmatpush2.bf16.msra.mxu1 %v17892_v41  ;;  %v17942_v41 = vld [vmem:[#allocation9 + $0xf34] ss:$24 sps:$4 sm:$0xff]  }
 0x4c1   : > { %12246 = vmatpush2.bf16.msra.mxu0 %v17895_v17  ;;  %12132 = vmatprep.subr.bf16.mxu1 %v17900_v52  ;;  %v17940_v17 = vld [vmem:[#allocation9 + $0xf30] ss:$24 sps:$4 sm:$0xff]  }
 0x4c2   : > { %12247 = vmatprep.subr.bf16.mxu0 %v17903_v30  ;;  %v17943_v52 = vld [vmem:[#allocation9 + $0x18f0] ss:$24 sps:$4 sm:$0xff]   ;;  %v17951_v30 = vld [vmem:[#allocation9 + $0x18c4] ss:$24 sps:$4 sm:$0xff]  }
 0x4c4   : > { %12133 = vmatpush2.bf16.msra.mxu1 %v17898_v61  ;;  %v17946_v61 = vld [vmem:[#allocation9 + $0xf00] ss:$24 sps:$4 sm:$0xff]  }
 0x4c5   : > { %12248 = vmatpush2.bf16.msra.mxu0 %v17901_v56  ;;  %12184 = vmatprep.subr.bf16.mxu1 %v17906_v11  ;;  %v17954_v56 = vld [vmem:[#allocation9 + $0x11d4] ss:$24 sps:$4 sm:$0xff]  }
 0x4c6   : > { %12249 = vmatprep.subr.bf16.mxu0 %v17909_v5  ;;  %v17957_v11 = vld [vmem:[#allocation9 + $0x1894] ss:$24 sps:$4 sm:$0xff]   ;;  %v17955_v5 = vld [vmem:[#allocation9 + $0x1890] ss:$24 sps:$4 sm:$0xff]  }
 0x4c7   : > { %12135 = vmatmul.mubr.bf16.vlgmr.msra.gmra.mxu1 %v20687_v40 }
 0x4c8   : > { %12185 = vmatpush1.bf16.msra.mxu1 %v17904_v0  ;;  %12216 = vmatprep.mubr.bf16.mxu1 %v20689_v4  ;;  %v17960_v0 = vld [vmem:[#allocation9 + $0x11a4] ss:$24 sps:$4 sm:$0xff]  }
 0x4c9   : > { %12250 = vmatpush2.bf16.msra.mxu0 %v17907_v2  ;;  %12186 = vmatprep.subr.bf16.mxu1 %v17912_v53  ;;  %v17963_v2 = vld [vmem:[#allocation9 + $0x1864] ss:$24 sps:$4 sm:$0xff]   ;;  %v17958_v53 = vld [vmem:[#allocation9 + $0x11a0] ss:$24 sps:$4 sm:$0xff]  }
 0x4ca   : > { %12251 = vmatprep.subr.bf16.mxu0 %v17915_v46  ;;  %v17961_v46 = vld [vmem:[#allocation9 + $0x1860] ss:$24 sps:$4 sm:$0xff]  }
 0x4cc   : > { %12187 = vmatpush1.bf16.msra.mxu1 %v17910_v24  ;;  %v17966_v24 = vld [vmem:[#allocation9 + $0x1174] ss:$24 sps:$4 sm:$0xff]  }
 0x4cd   : > { %12252 = vmatpush2.bf16.msra.mxu0 %v17913_v35  ;;  %12188 = vmatprep.subr.bf16.mxu1 %v17918_v31  ;;  %v17969_v35 = vld [vmem:[#allocation9 + $0x1834] ss:$24 sps:$4 sm:$0xff]   ;;  %v17964_v31 = vld [vmem:[#allocation9 + $0x1170] ss:$24 sps:$4 sm:$0xff]  }
 0x4ce   : > { %12253 = vmatprep.subr.bf16.mxu0 %v17921_v33  ;;  %v17967_v33 = vld [vmem:[#allocation9 + $0x1830] ss:$24 sps:$4 sm:$0xff]  }
 0x4d0   : > { %12189 = vmatpush1.bf16.msra.mxu1 %v17916_v39  ;;  %v17972_v39 = vld [vmem:[#allocation9 + $0x1144] ss:$24 sps:$4 sm:$0xff]  }
 0x4d1   : > { %12254 = vmatpush2.bf16.msra.mxu0 %v17919_v1  ;;  %12190 = vmatprep.subr.bf16.mxu1 %v17924_v48  ;;  %v17975_v1 = vld [vmem:[#allocation9 + $0x1804] ss:$24 sps:$4 sm:$0xff]   ;;  %v17970_v48 = vld [vmem:[#allocation9 + $0x1140] ss:$24 sps:$4 sm:$0xff]  }
 0x4d2   : > { %12255 = vmatprep.subr.bf16.mxu0 %v17927_v37  ;;  %v17978_v37 = vld [vmem:[#allocation9 + $0x1114] ss:$24 sps:$4 sm:$0xff]  }
 0x4d4   : > { %12191 = vmatpush1.bf16.msra.mxu1 %v17922_v10  ;;  %v17976_v10 = vld [vmem:[#allocation9 + $0x1110] ss:$24 sps:$4 sm:$0xff]  }
 0x4d5   : > { %12256 = vmatpush2.bf16.msra.mxu0 %v17925_v58  ;;  %12192 = vmatprep.subr.bf16.mxu1 %v17930_v7  ;;  %v17979_v58 = vld [vmem:[#allocation9 + $0x1ad0] ss:$24 sps:$4 sm:$0xff]   ;;  %v17984_v7 = vld [vmem:[#allocation9 + $0x10e4] ss:$24 sps:$4 sm:$0xff]  }
 0x4d6   : > { %12307 = vmatprep.subr.bf16.mxu0 %v17933_v42  ;;  %v17982_v42 = vld [vmem:[#allocation9 + $0x10e0] ss:$24 sps:$4 sm:$0xff]  }
 0x4d8   : > { %12258 = vmatmul.mubr.bf16.vlgmr.msra.gmra.mxu0 %v20697_v20  ;;  %12193 = vmatpush1.bf16.msra.mxu1 %v17928_v19  ;;  %v17990_v19 = vld [vmem:[#allocation9 + $0x10b4] ss:$24 sps:$4 sm:$0xff]  }
 0x4d9   : > { %12308 = vmatpush1.bf16.msra.mxu0 %v17931_v23  ;;  %12339 = vmatprep.mubr.bf16.mxu0 %v20699_v57  ;;  %v17993_v23 = vld [vmem:[#allocation9 + $0x1a74] ss:$24 sps:$4 sm:$0xff]  }
 0x4da   : > { %12194 = vmatprep.subr.bf16.mxu1 %v17936_v8  ;;  %12309 = vmatprep.subr.bf16.mxu0 %v17939_v15  ;;  %v17988_v8 = vld [vmem:[#allocation9 + $0x10b0] ss:$24 sps:$4 sm:$0xff]   ;;  %v4586_v15 = vadd.f32 %v20599_v14, %v20630_v6 }
 0x4db   : > { %v18000_v6 = vld [vmem:[#allocation9 + $0x1650] ss:$24 sps:$4 sm:$0xff]  }
 0x4dc   : > { %12195 = vmatpush1.bf16.msra.mxu1 %v17934_v49  ;;  %v17991_v49 = vld [vmem:[#allocation9 + $0x1a70] ss:$24 sps:$4 sm:$0xff]  }
 0x4dd   : > { %12310 = vmatpush1.bf16.msra.mxu0 %v17937_v63  ;;  %12196 = vmatprep.subr.bf16.mxu1 %v17942_v41  ;;  %v17996_v63 = vld [vmem:[#allocation9 + $0x1084] ss:$24 sps:$4 sm:$0xff]   ;;  %v4605_v41 = vadd.f32 %v20599_v14, %v20643_v54 }
 0x4de   : > { %12311 = vmatprep.subr.bf16.mxu0 %v17945_v26  ;;  %v17999_v26 = vld [vmem:[#allocation9 + $0x1a44] ss:$24 sps:$4 sm:$0xff]  }
 0x4df   : > { %v18008_v54 = vld [vmem:[#allocation9 + $0x1624] ss:$24 sps:$4 sm:$0xff]  }
 0x4e0   : > { %12197 = vmatpush1.bf16.msra.mxu1 %v17940_v17  ;;  %v17994_v17 = vld [vmem:[#allocation9 + $0x1080] ss:$24 sps:$4 sm:$0xff]  }
 0x4e1   : > { %12312 = vmatpush1.bf16.msra.mxu0 %v17943_v52  ;;  %12198 = vmatprep.subr.bf16.mxu1 %v17948_v59  ;;  %v4657_v52 = vmax.f32 %v4586_v15, 0.0  ;;  %v17997_v59 = vld [vmem:[#allocation9 + $0x1a40] ss:$24 sps:$4 sm:$0xff]  }
 0x4e2   : > { %12313 = vmatprep.subr.bf16.mxu0 %v17951_v30  ;;  %v18002_v30 = vld [vmem:[#allocation9 + $0x1654] ss:$24 sps:$4 sm:$0xff]  }
 0x4e4   : > { %12199 = vmatpush1.bf16.msra.mxu1 %v17946_v61  ;;  %v4662_v61 = vmax.f32 %v4605_v41, 0.0  ;;  %v18033_v41 = vld [vmem:[#allocation9 + $0x1f20] ss:$24 sps:$4 sm:$0xff]  }
 0x4e5   : > { %12314 = vmatpush1.bf16.msra.mxu0 %v17949_v13  ;;  %12200 = vmatprep.subr.bf16.mxu1 %v17954_v56  ;;  %v18005_v13 = vld [vmem:[#allocation9 + $0x1a14] ss:$24 sps:$4 sm:$0xff]   ;;  %v20707_v56 = vpack.c.bf16 %v4657_v52, %v4657_v52 }
 0x4e6   : > { %12315 = vmatprep.subr.bf16.mxu0 %v17957_v11  ;;  %v18003_v11 = vld [vmem:[#allocation9 + $0x1a10] ss:$24 sps:$4 sm:$0xff]  }
 0x4e8   : > { %12201 = vmatpush2.bf16.msra.mxu1 %v17952_v60  ;;  %v20709_v60 = vpack.c.bf16 %v4662_v61, %v4662_v61  ;;  %v18039_v61 = vld [vmem:[#allocation9 + $0x1ef0] ss:$24 sps:$4 sm:$0xff]  }
 0x4e9   : > { %12316 = vmatpush1.bf16.msra.mxu0 %v17955_v5  ;;  %12202 = vmatprep.subr.bf16.mxu1 %v17960_v0  ;;  %v18011_v5 = vld [vmem:[#allocation9 + $0x19e4] ss:$24 sps:$4 sm:$0xff]  }
 0x4ea   : > { %12317 = vmatprep.subr.bf16.mxu0 %v17963_v2  ;;  %v18006_v2 = vld [vmem:[#allocation9 + $0x1620] ss:$24 sps:$4 sm:$0xff]  }
 0x4ec   : > { %12203 = vmatpush2.bf16.msra.mxu1 %v17958_v53 }
 0x4ed   : > { %12318 = vmatpush1.bf16.msra.mxu0 %v17961_v46  ;;  %12204 = vmatprep.subr.bf16.mxu1 %v17966_v24  ;;  %v18009_v46 = vld [vmem:[#allocation9 + $0x19e0] ss:$24 sps:$4 sm:$0xff]   ;;  %v18014_v24 = vld [vmem:[#allocation9 + $0x15f4] ss:$24 sps:$4 sm:$0xff]  }
 0x4ee   : > { %12319 = vmatprep.subr.bf16.mxu0 %v17969_v35  ;;  %v18017_v35 = vld [vmem:[#allocation9 + $0x19b4] ss:$24 sps:$4 sm:$0xff]  }
 0x4f0   : > { %12205 = vmatpush2.bf16.msra.mxu1 %v17964_v31 }
 0x4f1   : > { %12320 = vmatpush1.bf16.msra.mxu0 %v17967_v33  ;;  %12206 = vmatprep.subr.bf16.mxu1 %v17972_v39  ;;  %v18012_v33 = vld [vmem:[#allocation9 + $0x15f0] ss:$24 sps:$4 sm:$0xff]  }
 0x4f2   : > { %12321 = vmatprep.subr.bf16.mxu0 %v17975_v1  ;;  %v18015_v1 = vld [vmem:[#allocation9 + $0x19b0] ss:$24 sps:$4 sm:$0xff]  }
 0x4f4   : > { %12207 = vmatpush2.bf16.msra.mxu1 %v17970_v48  ;;  %v18020_v48 = vld [vmem:[#allocation9 + $0x15c4] ss:$24 sps:$4 sm:$0xff]  }
 0x4f5   : > { %12322 = vmatpush1.bf16.msra.mxu0 %v17973_v43  ;;  %12208 = vmatprep.subr.bf16.mxu1 %v17978_v37  ;;  %v4610_v43 = vadd.f32 %v20599_v14, %v20645_v12  ;;  %v18023_v37 = vld [vmem:[#allocation9 + $0x1984] ss:$24 sps:$4 sm:$0xff]   ;;  %v18027_v12 = vld [vmem:[#allocation9 + $0x1f50] ss:$24 sps:$4 sm:$0xff]  }
 0x4f6   : > { %12323 = vmatprep.subr.bf16.mxu0 %v17981_v62  ;;  %v4629_v62 = vadd.f32 %v20599_v14, %v20669_v38  ;;  %v18035_v14 = vld [vmem:[#allocation9 + $0x1f24] ss:$24 sps:$4 sm:$0xff]  }
 0x4f8   : > { %12209 = vmatpush2.bf16.msra.mxu1 %v17976_v10  ;;  %v18018_v10 = vld [vmem:[#allocation9 + $0x15c0] ss:$24 sps:$4 sm:$0xff]  }
 0x4f9   : > { %12324 = vmatpush2.bf16.msra.mxu0 %v17979_v58  ;;  %12210 = vmatprep.subr.bf16.mxu1 %v17984_v7  ;;  %v18021_v58 = vld [vmem:[#allocation9 + $0x1980] ss:$24 sps:$4 sm:$0xff]   ;;  %v18026_v7 = vld [vmem:[#allocation9 + $0x1594] ss:$24 sps:$4 sm:$0xff]  }
 0x4fa   : > { %12325 = vmatprep.subr.bf16.mxu0 %v17987_v32  ;;  %v4663_v32 = vmax.f32 %v4610_v43, 0.0  ;;  %v18060_v43 = vld [vmem:[#allocation9 + $0x1770] ss:$24 sps:$4 sm:$0xff]  }
 0x4fc   : > { %12211 = vmatpush2.bf16.msra.mxu1 %v17982_v42  ;;  %v18029_v42 = vld [vmem:[#allocation9 + $0x1f54] ss:$24 sps:$4 sm:$0xff]  }
 0x4fd   : > { %12326 = vmatpush2.bf16.msra.mxu0 %v17985_v22  ;;  %12212 = vmatprep.subr.bf16.mxu1 %v17990_v19  ;;  %v4668_v22 = vmax.f32 %v4629_v62, 0.0  ;;  %v18024_v19 = vld [vmem:[#allocation9 + $0x1590] ss:$24 sps:$4 sm:$0xff]   ;;  %v18068_v62 = vld [vmem:[#allocation9 + $0x1744] ss:$24 sps:$4 sm:$0xff]  }
 0x4fe   : > { %12327 = vmatprep.subr.bf16.mxu0 %v17993_v23  ;;  %v20721_v23 = vpack.c.bf16 %v4663_v32, %v4663_v32  ;;  %v18074_v32 = vld [vmem:[#allocation9 + $0x1714] ss:$24 sps:$4 sm:$0xff]  }
 0x4ff   : > { %v20723_v38 = vpack.c.bf16 %v4668_v22, %v4668_v22  ;;  %v18072_v22 = vld [vmem:[#allocation9 + $0x1710] ss:$24 sps:$4 sm:$0xff]  }
 0x500   : > { %12213 = vmatpush2.bf16.msra.mxu1 %v17988_v8  ;;  %v18032_v8 = vld [vmem:[#allocation9 + $0x1564] ss:$24 sps:$4 sm:$0xff]  }
 0x501   : > { %12328 = vmatpush2.bf16.msra.mxu0 %v17991_v49  ;;  %12214 = vmatprep.subr.bf16.mxu1 %v17996_v63  ;;  %v18030_v49 = vld [vmem:[#allocation9 + $0x1560] ss:$24 sps:$4 sm:$0xff]  }
 0x502   : > { %12329 = vmatprep.subr.bf16.mxu0 %v17999_v26  ;;  %v18038_v26 = vld [vmem:[#allocation9 + $0x1534] ss:$24 sps:$4 sm:$0xff]  }
 0x504   : > { %12215 = vmatpush2.bf16.msra.mxu1 %v17994_v17  ;;  %v18041_v17 = vld [vmem:[#allocation9 + $0x1ef4] ss:$24 sps:$4 sm:$0xff]  }
 0x505   : > { %12330 = vmatpush2.bf16.msra.mxu0 %v17997_v59  ;;  %12266 = vmatprep.subr.bf16.mxu1 %v18002_v30  ;;  %v18036_v59 = vld [vmem:[#allocation9 + $0x1530] ss:$24 sps:$4 sm:$0xff]  }
 0x506   : > { %12331 = vmatprep.subr.bf16.mxu0 %v18005_v13  ;;  %v18044_v13 = vld [vmem:[#allocation9 + $0x1504] ss:$24 sps:$4 sm:$0xff]  }
 0x507   : > { %12217 = vmatmul.mubr.bf16.vlgmr.msra.gmra.mxu1 %v20707_v56  ;;  %v20712_v0 = vpop.f32.mrf.mxu1 }
 0x508   : > { %12267 = vmatpush1.bf16.msra.mxu1 %v18000_v6  ;;  %12298 = vmatprep.mubr.bf16.mxu1 %v20709_v60  ;;  %v18047_v6 = vld [vmem:[#allocation9 + $0x1ec4] ss:$24 sps:$4 sm:$0xff]  }
 0x509   : > { %12332 = vmatpush2.bf16.msra.mxu0 %v18003_v11  ;;  %v20715_v53 = vpop.f32.mrf.mxu1  ;;  %12268 = vmatprep.subr.bf16.mxu1 %v18008_v54  ;;  %v18042_v11 = vld [vmem:[#allocation9 + $0x1500] ss:$24 sps:$4 sm:$0xff]  }
 0x50a   : > { %12333 = vmatprep.subr.bf16.mxu0 %v18011_v5  ;;  %v18045_v54 = vld [vmem:[#allocation9 + $0x1ec0] ss:$24 sps:$4 sm:$0xff]   ;;  %v18050_v5 = vld [vmem:[#allocation9 + $0x17d4] ss:$24 sps:$4 sm:$0xff]  }
 0x50b   : > { %v12017_v31 = vpop.f32.mrf.mxu1 }
 0x50c   : > { %12269 = vmatpush1.bf16.msra.mxu1 %v18006_v2  ;;  %v18053_v2 = vld [vmem:[#allocation9 + $0x1e94] ss:$24 sps:$4 sm:$0xff]   ;;  %v18059_v31 = vld [vmem:[#allocation9 + $0x1e64] ss:$24 sps:$4 sm:$0xff]  }
 0x50d   : > { %12334 = vmatpush2.bf16.msra.mxu0 %v18009_v46  ;;  %v12018_v39 = vpop.f32.mrf.mxu1  ;;  %12270 = vmatprep.subr.bf16.mxu1 %v18014_v24  ;;  %v18048_v46 = vld [vmem:[#allocation9 + $0x17d0] ss:$24 sps:$4 sm:$0xff]  }
 0x50e   : > { %12335 = vmatprep.subr.bf16.mxu0 %v18017_v35  ;;  %v18051_v24 = vld [vmem:[#allocation9 + $0x1e90] ss:$24 sps:$4 sm:$0xff]   ;;  %v18056_v35 = vld [vmem:[#allocation9 + $0x17a4] ss:$24 sps:$4 sm:$0xff]   ;;  %v18057_v39 = vld [vmem:[#allocation9 + $0x1e60] ss:$24 sps:$4 sm:$0xff]  }
 0x510   : > { %12271 = vmatpush1.bf16.msra.mxu1 %v18012_v33  ;;  %v18054_v33 = vld [vmem:[#allocation9 + $0x17a0] ss:$24 sps:$4 sm:$0xff]  }
 0x511   : > { %12336 = vmatpush2.bf16.msra.mxu0 %v18015_v1  ;;  %12272 = vmatprep.subr.bf16.mxu1 %v18020_v48  ;;  %v18062_v1 = vld [vmem:[#allocation9 + $0x1774] ss:$24 sps:$4 sm:$0xff]  }
 0x512   : > { %12337 = vmatprep.subr.bf16.mxu0 %v18023_v37  ;;  %v18065_v48 = vld [vmem:[#allocation9 + $0x1e34] ss:$24 sps:$4 sm:$0xff]   ;;  %v18063_v37 = vld [vmem:[#allocation9 + $0x1e30] ss:$24 sps:$4 sm:$0xff]  }
 0x514   : > { %12273 = vmatpush1.bf16.msra.mxu1 %v18018_v10  ;;  %v18071_v10 = vld [vmem:[#allocation9 + $0x1e04] ss:$24 sps:$4 sm:$0xff]  }
 0x515   : > { %12338 = vmatpush2.bf16.msra.mxu0 %v18021_v58  ;;  %12274 = vmatprep.subr.bf16.mxu1 %v18026_v7  ;;  %v18066_v58 = vld [vmem:[#allocation9 + $0x1740] ss:$24 sps:$4 sm:$0xff]  }
 0x516   : > { %12389 = vmatprep.subr.bf16.mxu0 %v18029_v42  ;;  %v18069_v7 = vld [vmem:[#allocation9 + $0x1e00] ss:$24 sps:$4 sm:$0xff]   ;;  %v18077_v42 = vld [vmem:[#allocation9 + $0x20d4] ss:$24 sps:$4 sm:$0xff]  }
 0x517   : > { %v20725_v15 = vpop.f32.mrf.mxu0 }
 0x518   : > { %12340 = vmatmul.mubr.bf16.vlgmr.msra.gmra.mxu0 %v20721_v23  ;;  %12275 = vmatpush1.bf16.msra.mxu1 %v18024_v19  ;;  %v18075_v19 = vld [vmem:[#allocation9 + $0x20d0] ss:$24 sps:$4 sm:$0xff]  }
 0x519   : > { %12390 = vmatpush1.bf16.msra.mxu0 %v18027_v12  ;;  %12421 = vmatprep.mubr.bf16.mxu0 %v20723_v38  ;;  %v20729_v63 = vpop.f32.mrf.mxu0  ;;  %v18080_v12 = vld [vmem:[#allocation9 + $0x16e4] ss:$24 sps:$4 sm:$0xff]  }
 0x51a   : > { %12276 = vmatprep.subr.bf16.mxu1 %v18032_v8  ;;  %12391 = vmatprep.subr.bf16.mxu0 %v18035_v14  ;;  %v5949_v8 = vlaneseq  ;;  %v18083_v14 = vld [vmem:[#allocation9 + $0x20a4] ss:$24 sps:$4 sm:$0xff]  }
 0x51b   : > { %v12099_v52 = vpop.f32.mrf.mxu0 }
 0x51c   : > { %12277 = vmatpush1.bf16.msra.mxu1 %v18030_v49  ;;  %v18078_v49 = vld [vmem:[#allocation9 + $0x16e0] ss:$24 sps:$4 sm:$0xff]   ;;  %v18089_v52 = vld [vmem:[#allocation9 + $0x2074] ss:$24 sps:$4 sm:$0xff]  }
 0x51d   : > { %12392 = vmatpush1.bf16.msra.mxu0 %v18033_v41  ;;  %v12100_v30 = vpop.f32.mrf.mxu0  ;;  %12278 = vmatprep.subr.bf16.mxu1 %v18038_v26  ;;  %v18081_v41 = vld [vmem:[#allocation9 + $0x20a0] ss:$24 sps:$4 sm:$0xff]   ;;  %v18086_v26 = vld [vmem:[#allocation9 + $0x16b4] ss:$24 sps:$4 sm:$0xff]  }
 0x51e   : > { %12393 = vmatprep.subr.bf16.mxu0 %v18041_v17  ;;  %v20731_v17 = vshrl.u32 %v5949_v8, 7  ;;  %v20733_v30 = vld [vmem:[#allocation8] ss:$0 sm:$0xff]  ;;  %v18105_v8 = vld [vmem:[#allocation9 + $0x1fe0] ss:$24 sps:$4 sm:$0xff]  }
 0x520   : > { %12279 = vmatpush1.bf16.msra.mxu1 %v18036_v59  ;;  %v18084_v59 = vld [vmem:[#allocation9 + $0x16b0] ss:$24 sps:$4 sm:$0xff]  }
 0x521   : > { %12394 = vmatpush1.bf16.msra.mxu0 %v18039_v61  ;;  %12280 = vmatprep.subr.bf16.mxu1 %v18044_v13  ;;  %v4602_v61 = vadd.f32 %v20733_v30, %v20641_v36  ;;  %v18087_v13 = vld [vmem:[#allocation9 + $0x2070] ss:$24 sps:$4 sm:$0xff]   ;;  %v18093_v36 = vld [vmem:[#allocation9 + $0x2040] ss:$24 sps:$4 sm:$0xff]  }
 0x522   : > { %12395 = vmatprep.subr.bf16.mxu0 %v18047_v6  ;;  %v18092_v6 = vld [vmem:[#allocation9 + $0x1684] ss:$24 sps:$4 sm:$0xff]  }
 0x524   : > { %12281 = vmatpush1.bf16.msra.mxu1 %v18042_v11  ;;  %v4621_v11 = vadd.f32 %v20733_v30, %v20660_v44  ;;  %v18096_v44 = vld [vmem:[#allocation9 + $0x1c50] ss:$24 sps:$4 sm:$0xff]  }
 0x525   : > { %12396 = vmatpush1.bf16.msra.mxu0 %v18045_v54  ;;  %12282 = vmatprep.subr.bf16.mxu1 %v18050_v5  ;;  %v5951_v54 = vsub.s32 0, %v20731_v17  ;;  %v18095_v5 = vld [vmem:[#allocation9 + $0x2044] ss:$24 sps:$4 sm:$0xff]  }
 0x526   : > { %12397 = vmatprep.subr.bf16.mxu0 %v18053_v2  ;;  %v5947_v2 = vld [vmem:[#allocation11] sm:$0x3f] }
 0x528   : > { %12283 = vmatpush2.bf16.msra.mxu1 %v18048_v46  ;;  %v5955_v46 = vsub.s32 1, %v20731_v17 }
 0x529   : > { %12398 = vmatpush1.bf16.msra.mxu0 %v18051_v24  ;;  %12284 = vmatprep.subr.bf16.mxu1 %v18056_v35  ;;  %v18090_v24 = vld [vmem:[#allocation9 + $0x1680] ss:$24 sps:$4 sm:$0xff]   ;;  %v4661_v35 = vmax.f32 %v4602_v61, 0.0  ;;  %v18111_v61 = vld [vmem:[#allocation9 + $0x1fb0] ss:$24 sps:$4 sm:$0xff]  }
 0x52a   : > { %12399 = vmatprep.subr.bf16.mxu0 %v18059_v31  ;;  %v18098_v31 = vld [vmem:[#allocation9 + $0x1c54] ss:$24 sps:$4 sm:$0xff]  }
 0x52c   : > { %12285 = vmatpush2.bf16.msra.mxu1 %v18054_v33  ;;  %v4666_v33 = vmax.f32 %v4621_v11, 0.0  ;;  %v18119_v11 = vld [vmem:[#allocation9 + $0x1f84] ss:$24 sps:$4 sm:$0xff]  }
 0x52d   : > { %12400 = vmatpush1.bf16.msra.mxu0 %v18057_v39  ;;  %12286 = vmatprep.subr.bf16.mxu1 %v18062_v1  ;;  %v5952_v39 = vrot.slane %v5947_v2, %v5951_v54  ;;  %v18101_v1 = vld [vmem:[#allocation9 + $0x2014] ss:$24 sps:$4 sm:$0xff]   ;;  %v18114_v54 = vld [vmem:[#allocation9 + $0x1bc0] ss:$24 sps:$4 sm:$0xff]  }
 0x52e   : > { %12401 = vmatprep.subr.bf16.mxu0 %v18065_v48  ;;  %v5956_v48 = vrot.slane %v5947_v2, %v5955_v46  ;;  %v18120_v46 = vld [vmem:[#allocation9 + $0x1b90] ss:$24 sps:$4 sm:$0xff]  }
 0x530   : > { %12287 = vmatpush2.bf16.msra.mxu1 %v18060_v43  ;;  %v20741_v43 = vpack.c.bf16 %v4661_v35, %v4661_v35  ;;  %v18128_v35 = vld [vmem:[#allocation9 + $0x1b64] ss:$24 sps:$4 sm:$0xff]  }
 0x531   : > { %12402 = vmatpush1.bf16.msra.mxu0 %v18063_v37  ;;  %12288 = vmatprep.subr.bf16.mxu1 %v18068_v62  ;;  %v18099_v37 = vld [vmem:[#allocation9 + $0x2010] ss:$24 sps:$4 sm:$0xff]   ;;  %v18104_v62 = vld [vmem:[#allocation9 + $0x1c24] ss:$24 sps:$4 sm:$0xff]  }
 0x532   : > { %12403 = vmatprep.subr.bf16.mxu0 %v18071_v10  ;;  %v20743_v10 = vpack.c.bf16 %v4666_v33, %v4666_v33  ;;  %v18126_v33 = vld [vmem:[#allocation9 + $0x1b60] ss:$24 sps:$4 sm:$0xff]  }
 0x534   : > { %12289 = vmatpush2.bf16.msra.mxu1 %v18066_v58  ;;  %v12014_v58 = vadd.f32 %v20712_v0, %v5952_v39  ;;  %v18113_v0 = vld [vmem:[#allocation9 + $0x1fb4] ss:$24 sps:$4 sm:$0xff]   ;;  %v18129_v39 = vld [vmem:[#allocation9 + $0x2520] ss:$24 sps:$4 sm:$0xff]  }
 0x535   : > { %12404 = vmatpush1.bf16.msra.mxu0 %v18069_v7  ;;  %12290 = vmatprep.subr.bf16.mxu1 %v18074_v32  ;;  %v18107_v7 = vld [vmem:[#allocation9 + $0x1fe4] ss:$24 sps:$4 sm:$0xff]  }
 0x536   : > { %12405 = vmatprep.subr.bf16.mxu0 %v18077_v42  ;;  %v12016_v42 = vadd.f32 %v20715_v53, %v5956_v48 }
 0x538   : > { %12291 = vmatpush2.bf16.msra.mxu1 %v18072_v22 }
 0x539   : > { %12406 = vmatpush2.bf16.msra.mxu0 %v18075_v19  ;;  %12292 = vmatprep.subr.bf16.mxu1 %v18080_v12  ;;  %v18102_v19 = vld [vmem:[#allocation9 + $0x1c20] ss:$24 sps:$4 sm:$0xff]  }
 0x53a   : > { %12407 = vmatprep.subr.bf16.mxu0 %v18083_v14  ;;  %v18110_v14 = vld [vmem:[#allocation9 + $0x1bf4] ss:$24 sps:$4 sm:$0xff]  }
 0x53c   : > { %12293 = vmatpush2.bf16.msra.mxu1 %v18078_v49 }
 0x53d   : > { %12408 = vmatpush2.bf16.msra.mxu0 %v18081_v41  ;;  %12294 = vmatprep.subr.bf16.mxu1 %v18086_v26 }
 0x53e   : > { %12409 = vmatprep.subr.bf16.mxu0 %v18089_v52  ;;  %v18108_v52 = vld [vmem:[#allocation9 + $0x1bf0] ss:$24 sps:$4 sm:$0xff]  }
 0x540   : > { %12295 = vmatpush2.bf16.msra.mxu1 %v18084_v59 }
 0x541   : > { %12410 = vmatpush2.bf16.msra.mxu0 %v18087_v13  ;;  %12296 = vmatprep.subr.bf16.mxu1 %v18092_v6  ;;  %v18116_v13 = vld [vmem:[#allocation9 + $0x1bc4] ss:$24 sps:$4 sm:$0xff]   ;;  %v4626_v6 = vadd.f32 %v20733_v30, %v20663_v51 }
 0x542   : > { %12411 = vmatprep.subr.bf16.mxu0 %v18095_v5  ;;  %v18122_v5 = vld [vmem:[#allocation9 + $0x1b94] ss:$24 sps:$4 sm:$0xff]   ;;  %v18131_v51 = vld [vmem:[#allocation9 + $0x2524] ss:$24 sps:$4 sm:$0xff]  }
 0x543   : > { %v4667_v2 = vmax.f32 %v4626_v6, 0.0  ;;  %v18161_v6 = vld [vmem:[#allocation9 + $0x2434] ss:$24 sps:$4 sm:$0xff]  }
 0x544   : > { %12297 = vmatpush2.bf16.msra.mxu1 %v18090_v24  ;;  %v18123_v24 = vld [vmem:[#allocation9 + $0x2550] ss:$24 sps:$4 sm:$0xff]  }
 0x545   : > { %12412 = vmatpush2.bf16.msra.mxu0 %v18093_v36  ;;  %12348 = vmatprep.subr.bf16.mxu1 %v18098_v31  ;;  %v20757_v36 = vpack.c.bf16 %v4667_v2, %v4667_v2  ;;  %v18167_v2 = vld [vmem:[#allocation9 + $0x2404] ss:$24 sps:$4 sm:$0xff]  }
 0x546   : > { %12413 = vmatprep.subr.bf16.mxu0 %v18101_v1  ;;  %v18134_v1 = vld [vmem:[#allocation9 + $0x1b34] ss:$24 sps:$4 sm:$0xff]  }
 0x547   : > { %v12054_v32 = vpop.f32.mrf.mxu1  ;;  %12299 = vmatmul.mubr.bf16.vlgmr.msra.gmra.mxu1 %v20741_v43 }
 0x548   : > { %v12055_v22 = vadd.f32 %v12054_v32, %v12014_v58  ;;  %12349 = vmatpush1.bf16.msra.mxu1 %v18096_v44  ;;  %12380 = vmatprep.mubr.bf16.mxu1 %v20743_v10  ;;  %v18137_v44 = vld [vmem:[#allocation9 + $0x24f4] ss:$24 sps:$4 sm:$0xff]   ;;  %v18132_v58 = vld [vmem:[#allocation9 + $0x1b30] ss:$24 sps:$4 sm:$0xff]   ;;  %v18140_v32 = vld [vmem:[#allocation9 + $0x1b04] ss:$24 sps:$4 sm:$0xff]  }
 0x549   : > { %12414 = vmatpush2.bf16.msra.mxu0 %v18099_v37  ;;  %v12056_v12 = vpop.f32.mrf.mxu1  ;;  %12350 = vmatprep.subr.bf16.mxu1 %v18104_v62  ;;  %v19758_v37 = vmov 0  }
 0x54a   : > { %v12057_v49 = vadd.f32 %v12056_v12, %v12016_v42  ;;  %12415 = vmatprep.subr.bf16.mxu0 %v18107_v7  ;;  %v20750_v41 = vadd.f32 %v20725_v15, %v12055_v22  ;;  %v18117_v15 = vld [vmem:[#allocation9 + $0x1f80] ss:$24 sps:$4 sm:$0xff]   ;;  %v18135_v7 = vld [vmem:[#allocation9 + $0x24f0] ss:$24 sps:$4 sm:$0xff]   ;;  %v18143_v22 = vld [vmem:[#allocation9 + $0x24c4] ss:$24 sps:$4 sm:$0xff]  }
 0x54b   : > { %v12058_v26 = vpop.f32.mrf.mxu1  ;;  %v18141_v12 = vld [vmem:[#allocation9 + $0x24c0] ss:$24 sps:$4 sm:$0xff]  }
 0x54c   : > { %12351 = vmatpush1.bf16.msra.mxu1 %v18102_v19  ;;  %v20753_v53 = vadd.f32 %v20729_v63, %v12057_v49  ;;  %v18125_v63 = vld [vmem:[#allocation9 + $0x2554] ss:$24 sps:$4 sm:$0xff]   ;;  %v18138_v19 = vld [vmem:[#allocation9 + $0x1b00] ss:$24 sps:$4 sm:$0xff]   ;;  %v18144_v49 = vld [vmem:[#allocation9 + $0x1dd0] ss:$24 sps:$4 sm:$0xff]  }
 0x54d   : > { %12416 = vmatpush2.bf16.msra.mxu0 %v18105_v8  ;;  %v12059_v59 = vpop.f32.mrf.mxu1  ;;  %12352 = vmatprep.subr.bf16.mxu1 %v18110_v14  ;;  %v18146_v8 = vld [vmem:[#allocation9 + $0x1dd4] ss:$24 sps:$4 sm:$0xff]   ;;  %v18152_v26 = vld [vmem:[#allocation9 + $0x1da4] ss:$24 sps:$4 sm:$0xff]  }
 0x54e   : > { %12417 = vmatprep.subr.bf16.mxu0 %v18113_v0  ;;  %v18149_v14 = vld [vmem:[#allocation9 + $0x2494] ss:$24 sps:$4 sm:$0xff]   ;;  %v18147_v0 = vld [vmem:[#allocation9 + $0x2490] ss:$24 sps:$4 sm:$0xff]   ;;  %v18150_v59 = vld [vmem:[#allocation9 + $0x1da0] ss:$24 sps:$4 sm:$0xff]  }
 0x550   : > { %12353 = vmatpush1.bf16.msra.mxu1 %v18108_v52  ;;  %v18155_v52 = vld [vmem:[#allocation9 + $0x2464] ss:$24 sps:$4 sm:$0xff]  }
 0x551   : > { %12418 = vmatpush2.bf16.msra.mxu0 %v18111_v61  ;;  %12354 = vmatprep.subr.bf16.mxu1 %v18116_v13  ;;  %v18153_v61 = vld [vmem:[#allocation9 + $0x2460] ss:$24 sps:$4 sm:$0xff]   ;;  %v18158_v13 = vld [vmem:[#allocation9 + $0x1d74] ss:$24 sps:$4 sm:$0xff]  }
 0x552   : > { %12419 = vmatprep.subr.bf16.mxu0 %v18119_v11  ;;  %v18156_v11 = vld [vmem:[#allocation9 + $0x1d70] ss:$24 sps:$4 sm:$0xff]  }
 0x554   : > { %12355 = vmatpush1.bf16.msra.mxu1 %v18114_v54  ;;  %v18159_v54 = vld [vmem:[#allocation9 + $0x2430] ss:$24 sps:$4 sm:$0xff]  }
 0x555   : > { %12420 = vmatpush2.bf16.msra.mxu0 %v18117_v15  ;;  %12356 = vmatprep.subr.bf16.mxu1 %v18122_v5  ;;  %v18164_v15 = vld [vmem:[#allocation9 + $0x1d44] ss:$24 sps:$4 sm:$0xff]   ;;  %v4642_v5 = vadd.f32 %v20733_v30, %v20681_v28 }
 0x556   : > { %12471 = vmatprep.subr.bf16.mxu0 %v18125_v63  ;;  %v18162_v63 = vld [vmem:[#allocation9 + $0x1d40] ss:$24 sps:$4 sm:$0xff]   ;;  %v18176_v28 = vld [vmem:[#allocation9 + $0x1ce4] ss:$24 sps:$4 sm:$0xff]  }
 0x558   : > { %v20759_v31 = vpop.f32.mrf.mxu0  ;;  %12422 = vmatmul.mubr.bf16.vlgmr.msra.gmra.mxu0 %v20757_v36  ;;  %12357 = vmatpush1.bf16.msra.mxu1 %v18120_v46  ;;  %v18165_v46 = vld [vmem:[#allocation9 + $0x2400] ss:$24 sps:$4 sm:$0xff]  }
 0x559   : > { %12472 = vmatpush1.bf16.msra.mxu0 %v18123_v24  ;;  %12358 = vmatprep.subr.bf16.mxu1 %v18128_v35  ;;  %v18170_v24 = vld [vmem:[#allocation9 + $0x1d14] ss:$24 sps:$4 sm:$0xff]   ;;  %v4671_v35 = vmax.f32 %v4642_v5, 0.0 }
 0x55a   : > { %v20762_v48 = vpop.f32.mrf.mxu0  ;;  %12473 = vmatprep.subr.bf16.mxu0 %v18131_v51  ;;  %12503 = vmatprep.mubr.bf16.mxu0 %v19758_v37  ;;  %v18173_v51 = vld [vmem:[#allocation9 + $0x45c] ss:$24 sps:$4 sm:$0xff]  }
 0x55c   : > { %v12181_v62 = vpop.f32.mrf.mxu0  ;;  %12359 = vmatpush1.bf16.msra.mxu1 %v18126_v33  ;;  %v18168_v33 = vld [vmem:[#allocation9 + $0x1d10] ss:$24 sps:$4 sm:$0xff]  }
 0x55d   : > { %12474 = vmatpush1.bf16.msra.mxu0 %v18129_v39  ;;  %12360 = vmatprep.subr.bf16.mxu1 %v18134_v1  ;;  %v18171_v39 = vld [vmem:[#allocation9 + $0x458] ss:$24 sps:$4 sm:$0xff]   ;;  %v20767_v1 = vpack.c.bf16 %v4671_v35, %v4671_v35 }
 0x55e   : > { %v12182_v42 = vpop.f32.mrf.mxu0  ;;  %12475 = vmatprep.subr.bf16.mxu0 %v18137_v44  ;;  %v18179_v44 = vld [vmem:[#allocation9 + $0x42c] ss:$24 sps:$4 sm:$0xff]   ;;  %v18174_v62 = vld [vmem:[#allocation9 + $0x1ce0] ss:$24 sps:$4 sm:$0xff]  }
 0x55f   : > { %v18180_v42 = vld [vmem:[#allocation9 + $0x1cb0] ss:$24 sps:$4 sm:$0xff]  }
 0x560   : > { %12361 = vmatpush1.bf16.msra.mxu1 %v18132_v58  ;;  %v18177_v58 = vld [vmem:[#allocation9 + $0x428] ss:$24 sps:$4 sm:$0xff]  }
 0x561   : > { %12476 = vmatpush1.bf16.msra.mxu0 %v18135_v7  ;;  %12362 = vmatprep.subr.bf16.mxu1 %v18140_v32  ;;  %v18182_v7 = vld [vmem:[#allocation9 + $0x1cb4] ss:$24 sps:$4 sm:$0xff]  }
 0x562   : > { %12477 = vmatprep.subr.bf16.mxu0 %v18143_v22  ;;  %v18185_v32 = vld [vmem:[#allocation9 + $0x3fc] ss:$24 sps:$4 sm:$0xff]   ;;  %v4618_v22 = vadd.f32 %v20733_v30, %v20653_v9  ;;  %v18192_v9 = vld [vmem:[#allocation9 + $0x2250] ss:$24 sps:$4 sm:$0xff]  }
 0x564   : > { %12363 = vmatpush1.bf16.msra.mxu1 %v18138_v19  ;;  %v18183_v19 = vld [vmem:[#allocation9 + $0x3f8] ss:$24 sps:$4 sm:$0xff]  }
 0x565   : > { %12478 = vmatpush1.bf16.msra.mxu0 %v18141_v12  ;;  %12364 = vmatprep.subr.bf16.mxu1 %v18146_v8  ;;  %v18188_v12 = vld [vmem:[#allocation9 + $0x1c84] ss:$24 sps:$4 sm:$0xff]   ;;  %v4637_v8 = vadd.f32 %v20733_v30, %v20677_v45 }
 0x566   : > { %12479 = vmatprep.subr.bf16.mxu0 %v18149_v14  ;;  %v18191_v14 = vld [vmem:[#allocation9 + $0x3cc] ss:$24 sps:$4 sm:$0xff]  }
 0x567   : > { %v18200_v45 = vld [vmem:[#allocation9 + $0x2224] ss:$24 sps:$4 sm:$0xff]  }
 0x568   : > { %12365 = vmatpush2.bf16.msra.mxu1 %v18144_v49  ;;  %v18186_v49 = vld [vmem:[#allocation9 + $0x1c80] ss:$24 sps:$4 sm:$0xff]  }
 0x569   : > { %12480 = vmatpush1.bf16.msra.mxu0 %v18147_v0  ;;  %12366 = vmatprep.subr.bf16.mxu1 %v18152_v26  ;;  %v4665_v0 = vmax.f32 %v4618_v22, 0.0  ;;  %v18189_v26 = vld [vmem:[#allocation9 + $0x3c8] ss:$24 sps:$4 sm:$0xff]  }
 0x56a   : > { %12481 = vmatprep.subr.bf16.mxu0 %v18155_v52  ;;  %v18194_v52 = vld [vmem:[#allocation9 + $0x2254] ss:$24 sps:$4 sm:$0xff]   ;;  %v18216_v22 = vld [vmem:[#allocation9 + $0x2190] ss:$24 sps:$4 sm:$0xff]  }
 0x56c   : > { %12367 = vmatpush2.bf16.msra.mxu1 %v18150_v59  ;;  %v4670_v59 = vmax.f32 %v4637_v8, 0.0 }
 0x56d   : > { %12482 = vmatpush1.bf16.msra.mxu0 %v18153_v61  ;;  %12368 = vmatprep.subr.bf16.mxu1 %v18158_v13  ;;  %v18197_v61 = vld [vmem:[#allocation9 + $0x39c] ss:$24 sps:$4 sm:$0xff]   ;;  %v20775_v13 = vpack.c.bf16 %v4665_v0, %v4665_v0 }
 0x56e   : > { %12483 = vmatprep.subr.bf16.mxu0 %v18161_v6  ;;  %v18195_v6 = vld [vmem:[#allocation9 + $0x398] ss:$24 sps:$4 sm:$0xff]   ;;  %v18230_v0 = vld [vmem:[#allocation9 + $0x2134] ss:$24 sps:$4 sm:$0xff]  }
 0x570   : > { %12369 = vmatpush2.bf16.msra.mxu1 %v18156_v11  ;;  %v20777_v11 = vpack.c.bf16 %v4670_v59, %v4670_v59 }
 0x571   : > { %12484 = vmatpush1.bf16.msra.mxu0 %v18159_v54  ;;  %12370 = vmatprep.subr.bf16.mxu1 %v18164_v15  ;;  %v18203_v54 = vld [vmem:[#allocation9 + $0x36c] ss:$24 sps:$4 sm:$0xff]  }
 0x572   : > { %12485 = vmatprep.subr.bf16.mxu0 %v18167_v2  ;;  %v18198_v2 = vld [vmem:[#allocation9 + $0x2220] ss:$24 sps:$4 sm:$0xff]  }
 0x574   : > { %12371 = vmatpush2.bf16.msra.mxu1 %v18162_v63 }
 0x575   : > { %12486 = vmatpush1.bf16.msra.mxu0 %v18165_v46  ;;  %12372 = vmatprep.subr.bf16.mxu1 %v18170_v24  ;;  %v18201_v46 = vld [vmem:[#allocation9 + $0x368] ss:$24 sps:$4 sm:$0xff]   ;;  %v18206_v24 = vld [vmem:[#allocation9 + $0x21f4] ss:$24 sps:$4 sm:$0xff]  }
 0x576   : > { %12553 = vmatprep.subr.bf16.mxu0 %v18173_v51  ;;  %v18209_v51 = vld [vmem:[#allocation9 + $0x33c] ss:$24 sps:$4 sm:$0xff]  }
 0x578   : > { %12504 = vmatmul.mubr.bf16.vlgmr.msra.gmra.mxu0 %v20767_v1  ;;  %12373 = vmatpush2.bf16.msra.mxu1 %v18168_v33 }
 0x579   : > { %12554 = vmatpush1.bf16.msra.mxu0 %v18171_v39  ;;  %12585 = vmatprep.mubr.bf16.mxu0 %v20612_v25 }
 0x57a   : > { %12374 = vmatprep.subr.bf16.mxu1 %v18176_v28  ;;  %12555 = vmatprep.subr.bf16.mxu0 %v18179_v44  ;;  %v18204_v28 = vld [vmem:[#allocation9 + $0x21f0] ss:$24 sps:$4 sm:$0xff]  }
 0x57c   : > { %12375 = vmatpush2.bf16.msra.mxu1 %v18174_v62  ;;  %v18207_v62 = vld [vmem:[#allocation9 + $0x338] ss:$24 sps:$4 sm:$0xff]  }
 0x57d   : > { %12556 = vmatpush1.bf16.msra.mxu0 %v18177_v58  ;;  %12376 = vmatprep.subr.bf16.mxu1 %v18182_v7  ;;  %v18212_v58 = vld [vmem:[#allocation9 + $0x21c4] ss:$24 sps:$4 sm:$0xff]  }
 0x57e   : > { %12557 = vmatprep.subr.bf16.mxu0 %v18185_v32  ;;  %v18215_v7 = vld [vmem:[#allocation9 + $0x30c] ss:$24 sps:$4 sm:$0xff]   ;;  %v18213_v32 = vld [vmem:[#allocation9 + $0x308] ss:$24 sps:$4 sm:$0xff]  }
 0x580   : > { %12377 = vmatpush2.bf16.msra.mxu1 %v18180_v42  ;;  %v18221_v42 = vld [vmem:[#allocation9 + $0x5dc] ss:$24 sps:$4 sm:$0xff]  }
 0x581   : > { %12558 = vmatpush1.bf16.msra.mxu0 %v18183_v19  ;;  %12378 = vmatprep.subr.bf16.mxu1 %v18188_v12  ;;  %v18224_v19 = vld [vmem:[#allocation9 + $0x2164] ss:$24 sps:$4 sm:$0xff]  }
 0x582   : > { %12559 = vmatprep.subr.bf16.mxu0 %v18191_v14  ;;  %v18227_v12 = vld [vmem:[#allocation9 + $0x5ac] ss:$24 sps:$4 sm:$0xff]   ;;  %v18222_v14 = vld [vmem:[#allocation9 + $0x2160] ss:$24 sps:$4 sm:$0xff]  }
 0x584   : > { %12379 = vmatpush2.bf16.msra.mxu1 %v18186_v49  ;;  %v18225_v49 = vld [vmem:[#allocation9 + $0x5a8] ss:$24 sps:$4 sm:$0xff]  }
 0x585   : > { %12560 = vmatpush1.bf16.msra.mxu0 %v18189_v26  ;;  %12430 = vmatprep.subr.bf16.mxu1 %v18194_v52  ;;  %v18233_v52 = vld [vmem:[#allocation9 + $0x57c] ss:$24 sps:$4 sm:$0xff]  }
 0x586   : > { %12561 = vmatprep.subr.bf16.mxu0 %v18197_v61  ;;  %v18228_v61 = vld [vmem:[#allocation9 + $0x2130] ss:$24 sps:$4 sm:$0xff]  }
 0x587   : > { %v12136_v15 = vpop.f32.mrf.mxu1  ;;  %12381 = vmatmul.mubr.bf16.vlgmr.msra.gmra.mxu1 %v20775_v13 }
 0x588   : > { %v12137_v5 = vadd.f32 %v12136_v15, %v20750_v41  ;;  %12431 = vmatpush1.bf16.msra.mxu1 %v18192_v9  ;;  %12462 = vmatprep.mubr.bf16.mxu1 %v20777_v11  ;;  %v18231_v9 = vld [vmem:[#allocation9 + $0x578] ss:$24 sps:$4 sm:$0xff]  }
 0x589   : > { %12562 = vmatpush1.bf16.msra.mxu0 %v18195_v6  ;;  %v12138_v63 = vpop.f32.mrf.mxu1  ;;  %12432 = vmatprep.subr.bf16.mxu1 %v18200_v45  ;;  %v18236_v6 = vld [vmem:[#allocation9 + $0x2104] ss:$24 sps:$4 sm:$0xff]   ;;  %v18234_v15 = vld [vmem:[#allocation9 + $0x2100] ss:$24 sps:$4 sm:$0xff]  }
 0x58a   : > { %v12139_v35 = vadd.f32 %v12138_v63, %v20753_v53  ;;  %12563 = vmatprep.subr.bf16.mxu0 %v18203_v54  ;;  %v20784_v33 = vadd.f32 %v20759_v31, %v12137_v5  ;;  %v18210_v53 = vld [vmem:[#allocation9 + $0x21c0] ss:$24 sps:$4 sm:$0xff]   ;;  %v18218_v31 = vld [vmem:[#allocation9 + $0x2194] ss:$24 sps:$4 sm:$0xff]  }
 0x58b   : > { %v12140_v39 = vpop.f32.mrf.mxu1  ;;  %v18239_v54 = vld [vmem:[#allocation9 + $0x54c] ss:$24 sps:$4 sm:$0xff]   ;;  %v18237_v5 = vld [vmem:[#allocation9 + $0x548] ss:$24 sps:$4 sm:$0xff]   ;;  %v18245_v63 = vld [vmem:[#allocation9 + $0x51c] ss:$24 sps:$4 sm:$0xff]  }
 0x58c   : > { %12433 = vmatpush1.bf16.msra.mxu1 %v18198_v2  ;;  %v20787_v41 = vadd.f32 %v20762_v48, %v12139_v35  ;;  %v18219_v48 = vld [vmem:[#allocation9 + $0x5d8] ss:$24 sps:$4 sm:$0xff]   ;;  %v18242_v2 = vld [vmem:[#allocation9 + $0x23d4] ss:$24 sps:$4 sm:$0xff]   ;;  %v18248_v35 = vld [vmem:[#allocation9 + $0x23a4] ss:$24 sps:$4 sm:$0xff]  }
 0x58d   : > { %12564 = vmatpush1.bf16.msra.mxu0 %v18201_v46  ;;  %v12141_v44 = vpop.f32.mrf.mxu1  ;;  %12434 = vmatprep.subr.bf16.mxu1 %v18206_v24  ;;  %v18240_v46 = vld [vmem:[#allocation9 + $0x23d0] ss:$24 sps:$4 sm:$0xff]   ;;  %v18246_v39 = vld [vmem:[#allocation9 + $0x23a0] ss:$24 sps:$4 sm:$0xff]  }
 0x58e   : > { %12565 = vmatprep.subr.bf16.mxu0 %v18209_v51  ;;  %v18243_v24 = vld [vmem:[#allocation9 + $0x518] ss:$24 sps:$4 sm:$0xff]   ;;  %v18251_v51 = vld [vmem:[#allocation9 + $0x4ec] ss:$24 sps:$4 sm:$0xff]  }
 0x58f   : > { %v18254_v44 = vld [vmem:[#allocation9 + $0x2374] ss:$24 sps:$4 sm:$0xff]  }
 0x590   : > { %12435 = vmatpush1.bf16.msra.mxu1 %v18204_v28  ;;  %v18249_v28 = vld [vmem:[#allocation9 + $0x4e8] ss:$24 sps:$4 sm:$0xff]  }
 0x591   : > { %12566 = vmatpush1.bf16.msra.mxu0 %v18207_v62  ;;  %12436 = vmatprep.subr.bf16.mxu1 %v18212_v58  ;;  %v18257_v62 = vld [vmem:[#allocation9 + $0x4bc] ss:$24 sps:$4 sm:$0xff]   ;;  %v18252_v58 = vld [vmem:[#allocation9 + $0x2370] ss:$24 sps:$4 sm:$0xff]  }
 0x592   : > { %12567 = vmatprep.subr.bf16.mxu0 %v18215_v7  ;;  %v18255_v7 = vld [vmem:[#allocation9 + $0x4b8] ss:$24 sps:$4 sm:$0xff]  }
 0x594   : > { %12437 = vmatpush1.bf16.msra.mxu1 %v18210_v53  ;;  %v18260_v53 = vld [vmem:[#allocation9 + $0x2344] ss:$24 sps:$4 sm:$0xff]  }
 0x595   : > { %12568 = vmatpush1.bf16.msra.mxu0 %v18213_v32  ;;  %12438 = vmatprep.subr.bf16.mxu1 %v18218_v31  ;;  %v18263_v32 = vld [vmem:[#allocation9 + $0x48c] ss:$24 sps:$4 sm:$0xff]   ;;  %v18258_v31 = vld [vmem:[#allocation9 + $0x2340] ss:$24 sps:$4 sm:$0xff]  }
 0x596   : > { %12569 = vmatprep.subr.bf16.mxu0 %v18221_v42  ;;  %v18261_v42 = vld [vmem:[#allocation9 + $0x488] ss:$24 sps:$4 sm:$0xff]  }
 0x598   : > { %v20789_v8 = vpop.f32.mrf.mxu0  ;;  %12439 = vmatpush1.bf16.msra.mxu1 %v18216_v22  ;;  %v18266_v22 = vld [vmem:[#allocation9 + $0x2314] ss:$24 sps:$4 sm:$0xff]  }
 0x599   : > { %12570 = vmatpush2.bf16.msra.mxu0 %v18219_v48  ;;  %12440 = vmatprep.subr.bf16.mxu1 %v18224_v19  ;;  %v18269_v48 = vld [vmem:[#allocation9 + $0xa5c] ss:$24 sps:$4 sm:$0xff]   ;;  %v18264_v19 = vld [vmem:[#allocation9 + $0x2310] ss:$24 sps:$4 sm:$0xff]  }
 0x59a   : > { %v20791_v26 = vpop.f32.mrf.mxu0  ;;  %12571 = vmatprep.subr.bf16.mxu0 %v18227_v12  ;;  %v18267_v12 = vld [vmem:[#allocation9 + $0xa58] ss:$24 sps:$4 sm:$0xff]  }
 0x59c   : > { %v12263_v59 = vpop.f32.mrf.mxu0  ;;  %12441 = vmatpush1.bf16.msra.mxu1 %v18222_v14  ;;  %v18272_v14 = vld [vmem:[#allocation9 + $0x22e4] ss:$24 sps:$4 sm:$0xff]  }
 0x59d   : > { %12572 = vmatpush2.bf16.msra.mxu0 %v18225_v49  ;;  %12442 = vmatprep.subr.bf16.mxu1 %v18230_v0  ;;  %v18275_v49 = vld [vmem:[#allocation9 + $0xa2c] ss:$24 sps:$4 sm:$0xff]   ;;  %v18270_v0 = vld [vmem:[#allocation9 + $0x22e0] ss:$24 sps:$4 sm:$0xff]  }
 0x59e   : > { %v12264_v45 = vpop.f32.mrf.mxu0  ;;  %12573 = vmatprep.subr.bf16.mxu0 %v18233_v52  ;;  %v18273_v52 = vld [vmem:[#allocation9 + $0xa28] ss:$24 sps:$4 sm:$0xff]   ;;  %v18278_v59 = vld [vmem:[#allocation9 + $0x22b4] ss:$24 sps:$4 sm:$0xff]  }
 0x59f   : > { %v18279_v45 = vld [vmem:[#allocation9 + $0x9f8] ss:$24 sps:$4 sm:$0xff]  }
 0x5a0   : > { %12443 = vmatpush1.bf16.msra.mxu1 %v18228_v61  ;;  %v18281_v61 = vld [vmem:[#allocation9 + $0x9fc] ss:$24 sps:$4 sm:$0xff]  }
 0x5a1   : > { %12574 = vmatpush2.bf16.msra.mxu0 %v18231_v9  ;;  %12444 = vmatprep.subr.bf16.mxu1 %v18236_v6  ;;  %v18276_v9 = vld [vmem:[#allocation9 + $0x22b0] ss:$24 sps:$4 sm:$0xff]   ;;  %v4634_v6 = vadd.f32 %v20733_v30, %v20671_v21  ;;  %v18296_v30 = vld [vmem:[#allocation9 + $0x12c] ss:$24 sps:$4 sm:$0xff]  }
 0x5a2   : > { %12575 = vmatprep.subr.bf16.mxu0 %v18239_v54  ;;  %v18284_v54 = vld [vmem:[#allocation9 + $0x2284] ss:$24 sps:$4 sm:$0xff]   ;;  %v18291_v21 = vld [vmem:[#allocation9 + $0x998] ss:$24 sps:$4 sm:$0xff]  }
 0x5a4   : > { %12445 = vmatpush1.bf16.msra.mxu1 %v18234_v15  ;;  %v18287_v15 = vld [vmem:[#allocation9 + $0x9cc] ss:$24 sps:$4 sm:$0xff]  }
 0x5a5   : > { %12576 = vmatpush2.bf16.msra.mxu0 %v18237_v5  ;;  %12446 = vmatprep.subr.bf16.mxu1 %v18242_v2  ;;  %v18282_v5 = vld [vmem:[#allocation9 + $0x2280] ss:$24 sps:$4 sm:$0xff]   ;;  %v4669_v2 = vmax.f32 %v4634_v6, 0.0 }
 0x5a6   : > { %12577 = vmatprep.subr.bf16.mxu0 %v18245_v63  ;;  %v18285_v63 = vld [vmem:[#allocation9 + $0x9c8] ss:$24 sps:$4 sm:$0xff]  }
 0x5a8   : > { %12447 = vmatpush2.bf16.msra.mxu1 %v18240_v46  ;;  %v18290_v46 = vld [vmem:[#allocation9 + $0x15c] ss:$24 sps:$4 sm:$0xff]  }
 0x5a9   : > { %12578 = vmatpush2.bf16.msra.mxu0 %v18243_v24  ;;  %12448 = vmatprep.subr.bf16.mxu1 %v18248_v35  ;;  %v18293_v24 = vld [vmem:[#allocation9 + $0x99c] ss:$24 sps:$4 sm:$0xff]   ;;  %v18288_v35 = vld [vmem:[#allocation9 + $0x158] ss:$24 sps:$4 sm:$0xff]  }
 0x5aa   : > { %12579 = vmatprep.subr.bf16.mxu0 %v18251_v51  ;;  %v20797_v51 = vpack.c.bf16 %v4669_v2, %v4669_v2  ;;  %v18329_v2 = vld [vmem:[#allocation9 + $0xb7c] ss:$24 sps:$4 sm:$0xff]  }
 0x5ac   : > { %12449 = vmatpush2.bf16.msra.mxu1 %v18246_v39  ;;  %v18299_v39 = vld [vmem:[#allocation9 + $0x96c] ss:$24 sps:$4 sm:$0xff]  }
 0x5ad   : > { %12580 = vmatpush2.bf16.msra.mxu0 %v18249_v28  ;;  %12450 = vmatprep.subr.bf16.mxu1 %v18254_v44 }
 0x5ae   : > { %12581 = vmatprep.subr.bf16.mxu0 %v18257_v62  ;;  %v18294_v62 = vld [vmem:[#allocation9 + $0x128] ss:$24 sps:$4 sm:$0xff]  }
 0x5b0   : > { %12451 = vmatpush2.bf16.msra.mxu1 %v18252_v58 }
 0x5b1   : > { %12582 = vmatpush2.bf16.msra.mxu0 %v18255_v7  ;;  %12452 = vmatprep.subr.bf16.mxu1 %v18260_v53  ;;  %v18297_v7 = vld [vmem:[#allocation9 + $0x968] ss:$24 sps:$4 sm:$0xff]   ;;  %v18302_v53 = vld [vmem:[#allocation9 + $0xfc] ss:$24 sps:$4 sm:$0xff]  }
 0x5b2   : > { %12583 = vmatprep.subr.bf16.mxu0 %v18263_v32 }
 0x5b4   : > { %12453 = vmatpush2.bf16.msra.mxu1 %v18258_v31  ;;  %v18305_v31 = vld [vmem:[#allocation9 + $0x93c] ss:$24 sps:$4 sm:$0xff]  }
 0x5b5   : > { %12584 = vmatpush2.bf16.msra.mxu0 %v18261_v42  ;;  %12454 = vmatprep.subr.bf16.mxu1 %v18266_v22 }
 0x5b6   : > { %12635 = vmatprep.subr.bf16.mxu0 %v18269_v48  ;;  %v18300_v48 = vld [vmem:[#allocation9 + $0xf8] ss:$24 sps:$4 sm:$0xff]  }
 0x5b8   : > { %12586 = vmatmul.mubr.bf16.vlgmr.msra.gmra.mxu0 %v20655_v3  ;;  %12455 = vmatpush2.bf16.msra.mxu1 %v18264_v19 }
 0x5b9   : > { %12636 = vmatpush1.bf16.msra.mxu0 %v18267_v12  ;;  %12667 = vmatprep.mubr.bf16.mxu0 %v20657_v50  ;;  %v18303_v12 = vld [vmem:[#allocation9 + $0x938] ss:$24 sps:$4 sm:$0xff]  }
 0x5ba   : > { %12456 = vmatprep.subr.bf16.mxu1 %v18272_v14  ;;  %12637 = vmatprep.subr.bf16.mxu0 %v18275_v49  ;;  %v18308_v14 = vld [vmem:[#allocation9 + $0xcc] ss:$24 sps:$4 sm:$0xff]  }
 0x5bb   : > { %v18311_v49 = vld [vmem:[#allocation9 + $0x90c] ss:$24 sps:$4 sm:$0xff]  }
 0x5bc   : > { %12457 = vmatpush2.bf16.msra.mxu1 %v18270_v0  ;;  %v18309_v0 = vld [vmem:[#allocation9 + $0x908] ss:$24 sps:$4 sm:$0xff]  }
 0x5bd   : > { %12638 = vmatpush1.bf16.msra.mxu0 %v18273_v52  ;;  %12458 = vmatprep.subr.bf16.mxu1 %v18278_v59  ;;  %v18317_v52 = vld [vmem:[#allocation9 + $0xbdc] ss:$24 sps:$4 sm:$0xff]   ;;  %v18312_v59 = vld [vmem:[#allocation9 + $0x98] ss:$24 sps:$4 sm:$0xff]  }
 0x5be   : > { %12639 = vmatprep.subr.bf16.mxu0 %v18281_v61  ;;  %v18320_v61 = vld [vmem:[#allocation9 + $0x6c] ss:$24 sps:$4 sm:$0xff]  }
 0x5c0   : > { %12459 = vmatpush2.bf16.msra.mxu1 %v18276_v9  ;;  %v18323_v9 = vld [vmem:[#allocation9 + $0xbac] ss:$24 sps:$4 sm:$0xff]  }
 0x5c1   : > { %12640 = vmatpush1.bf16.msra.mxu0 %v18279_v45  ;;  %12460 = vmatprep.subr.bf16.mxu1 %v18284_v54  ;;  %v18318_v45 = vld [vmem:[#allocation9 + $0x68] ss:$24 sps:$4 sm:$0xff]  }
 0x5c2   : > { %12641 = vmatprep.subr.bf16.mxu0 %v18287_v15  ;;  %v18321_v54 = vld [vmem:[#allocation9 + $0xba8] ss:$24 sps:$4 sm:$0xff]   ;;  %v18326_v15 = vld [vmem:[#allocation9 + $0x3c] ss:$24 sps:$4 sm:$0xff]  }
 0x5c4   : > { %12461 = vmatpush2.bf16.msra.mxu1 %v18282_v5 }
 0x5c5   : > { %12642 = vmatpush1.bf16.msra.mxu0 %v18285_v63  ;;  %12512 = vmatprep.subr.bf16.mxu1 %v18290_v46  ;;  %v18324_v46 = vld [vmem:[#allocation9 + $0x38] ss:$24 sps:$4 sm:$0xff]  }
 0x5c6   : > { %12643 = vmatprep.subr.bf16.mxu0 %v18293_v24  ;;  %v18327_v24 = vld [vmem:[#allocation9 + $0xb78] ss:$24 sps:$4 sm:$0xff]  }
 0x5c7   : > { %v12218_v28 = vpop.f32.mrf.mxu1  ;;  %12463 = vmatmul.mubr.bf16.vlgmr.msra.gmra.mxu1 %v20797_v51 }
 0x5c8   : > { %v12219_v44 = vadd.f32 %v12218_v28, %v20784_v33  ;;  %12513 = vmatpush1.bf16.msra.mxu1 %v18288_v35  ;;  %12544 = vmatprep.mubr.bf16.mxu1 %v20605_v27  ;;  %v18332_v35 = vld [vmem:[#allocation9 + $0xc] ss:$24 sps:$4 sm:$0xff]   ;;  %v18333_v28 = vld [vmem:[#allocation9 + $0xb48] ss:$24 sps:$4 sm:$0xff]  }
 0x5c9   : > { %12644 = vmatpush1.bf16.msra.mxu0 %v18291_v21  ;;  %v12220_v58 = vpop.f32.mrf.mxu1  ;;  %12514 = vmatprep.subr.bf16.mxu1 %v18296_v30  ;;  %v18335_v30 = vld [vmem:[#allocation9 + $0xb4c] ss:$24 sps:$4 sm:$0xff]  }
 0x5ca   : > { %v12221_v32 = vadd.f32 %v12220_v58, %v20787_v41  ;;  %12645 = vmatprep.subr.bf16.mxu0 %v18299_v39  ;;  %v20804_v42 = vadd.f32 %v20789_v8, %v12219_v44  ;;  %v18306_v41 = vld [vmem:[#allocation9 + $0xc8] ss:$24 sps:$4 sm:$0xff]   ;;  %v18314_v8 = vld [vmem:[#allocation9 + $0x9c] ss:$24 sps:$4 sm:$0xff]   ;;  %v18336_v58 = vld [vmem:[#allocation9 + $0x2d8] ss:$24 sps:$4 sm:$0xff]  }
 0x5cb   : > { %v12222_v22 = vpop.f32.mrf.mxu1  ;;  %v18330_v39 = vld [vmem:[#allocation9 + $0x8] ss:$24 sps:$4 sm:$0xff]   ;;  %v18338_v44 = vld [vmem:[#allocation9 + $0x2dc] ss:$24 sps:$4 sm:$0xff]  }
 0x5cc   : > { %12515 = vmatpush1.bf16.msra.mxu1 %v18294_v62  ;;  %v20807_v33 = vadd.f32 %v20791_v26, %v12221_v32  ;;  %v18315_v26 = vld [vmem:[#allocation9 + $0xbd8] ss:$24 sps:$4 sm:$0xff]   ;;  %v18341_v62 = vld [vmem:[#allocation9 + $0xb1c] ss:$24 sps:$4 sm:$0xff]   ;;  %v18347_v32 = vld [vmem:[#allocation9 + $0xaec] ss:$24 sps:$4 sm:$0xff]  }
 0x5cd   : > { %12646 = vmatpush1.bf16.msra.mxu0 %v18297_v7  ;;  %v12223_v19 = vpop.f32.mrf.mxu1  ;;  %12516 = vmatprep.subr.bf16.mxu1 %v18302_v53  ;;  %v18339_v7 = vld [vmem:[#allocation9 + $0xb18] ss:$24 sps:$4 sm:$0xff]   ;;  %v18344_v53 = vld [vmem:[#allocation9 + $0x2ac] ss:$24 sps:$4 sm:$0xff]   ;;  %v18345_v22 = vld [vmem:[#allocation9 + $0xae8] ss:$24 sps:$4 sm:$0xff]  }
 0x5ce   : > { %12647 = vmatprep.subr.bf16.mxu0 %v18305_v31  ;;  %v18342_v31 = vld [vmem:[#allocation9 + $0x2a8] ss:$24 sps:$4 sm:$0xff]   ;;  %v18353_v19 = vld [vmem:[#allocation9 + $0xabc] ss:$24 sps:$4 sm:$0xff]  }
 0x5d0   : > { %12517 = vmatpush1.bf16.msra.mxu1 %v18300_v48  ;;  %v18350_v48 = vld [vmem:[#allocation9 + $0x27c] ss:$24 sps:$4 sm:$0xff]  }
 0x5d1   : > { %12648 = vmatpush1.bf16.msra.mxu0 %v18303_v12  ;;  %12518 = vmatprep.subr.bf16.mxu1 %v18308_v14  ;;  %v18348_v12 = vld [vmem:[#allocation9 + $0x278] ss:$24 sps:$4 sm:$0xff]  }
 0x5d2   : > { %12649 = vmatprep.subr.bf16.mxu0 %v18311_v49  ;;  %v18351_v14 = vld [vmem:[#allocation9 + $0xab8] ss:$24 sps:$4 sm:$0xff]   ;;  %v18356_v49 = vld [vmem:[#allocation9 + $0x24c] ss:$24 sps:$4 sm:$0xff]  }
 0x5d4   : > { %12519 = vmatpush1.bf16.msra.mxu1 %v18306_v41  ;;  %v18359_v41 = vld [vmem:[#allocation9 + $0xa8c] ss:$24 sps:$4 sm:$0xff]  }
 0x5d5   : > { %12650 = vmatpush1.bf16.msra.mxu0 %v18309_v0  ;;  %12520 = vmatprep.subr.bf16.mxu1 %v18314_v8  ;;  %v18354_v0 = vld [vmem:[#allocation9 + $0x248] ss:$24 sps:$4 sm:$0xff]  }
 0x5d6   : > { %12651 = vmatprep.subr.bf16.mxu0 %v18317_v52  ;;  %v18357_v8 = vld [vmem:[#allocation9 + $0xa88] ss:$24 sps:$4 sm:$0xff]   ;;  %v18362_v52 = vld [vmem:[#allocation9 + $0x21c] ss:$24 sps:$4 sm:$0xff]  }
 0x5d8   : > { %v20809_v6 = vpop.f32.mrf.mxu0  ;;  %12521 = vmatpush1.bf16.msra.mxu1 %v18312_v59  ;;  %v18365_v59 = vld [vmem:[#allocation9 + $0x105c] ss:$24 sps:$4 sm:$0xff]  }
 0x5d9   : > { %12652 = vmatpush2.bf16.msra.mxu0 %v18315_v26  ;;  %12522 = vmatprep.subr.bf16.mxu1 %v18320_v61  ;;  %v18360_v26 = vld [vmem:[#allocation9 + $0x218] ss:$24 sps:$4 sm:$0xff]  }
 0x5da   : > { %v20811_v5 = vpop.f32.mrf.mxu0  ;;  %12653 = vmatprep.subr.bf16.mxu0 %v18323_v9  ;;  %v18363_v61 = vld [vmem:[#allocation9 + $0x1058] ss:$24 sps:$4 sm:$0xff]   ;;  %v18368_v9 = vld [vmem:[#allocation9 + $0x1ec] ss:$24 sps:$4 sm:$0xff]  }
 0x5dc   : > { %v12345_v63 = vpop.f32.mrf.mxu0  ;;  %12523 = vmatpush1.bf16.msra.mxu1 %v18318_v45  ;;  %v18371_v45 = vld [vmem:[#allocation9 + $0x102c] ss:$24 sps:$4 sm:$0xff]  }
 0x5dd   : > { %12654 = vmatpush2.bf16.msra.mxu0 %v18321_v54  ;;  %12524 = vmatprep.subr.bf16.mxu1 %v18326_v15  ;;  %v18366_v54 = vld [vmem:[#allocation9 + $0x1e8] ss:$24 sps:$4 sm:$0xff]   ;;  %v18377_v63 = vld [vmem:[#allocation9 + $0xffc] ss:$24 sps:$4 sm:$0xff]  }
 0x5de   : > { %v12346_v21 = vpop.f32.mrf.mxu0  ;;  %12655 = vmatprep.subr.bf16.mxu0 %v18329_v2  ;;  %v18369_v15 = vld [vmem:[#allocation9 + $0x1028] ss:$24 sps:$4 sm:$0xff]   ;;  %v18374_v2 = vld [vmem:[#allocation9 + $0x1bc] ss:$24 sps:$4 sm:$0xff]  }
 0x5df   : > { %v18383_v21 = vld [vmem:[#allocation9 + $0xfcc] ss:$24 sps:$4 sm:$0xff]  }
 0x5e0   : > { %12525 = vmatpush1.bf16.msra.mxu1 %v18324_v46  ;;  %v18372_v46 = vld [vmem:[#allocation9 + $0x1b8] ss:$24 sps:$4 sm:$0xff]  }
 0x5e1   : > { %12656 = vmatpush2.bf16.msra.mxu0 %v18327_v24  ;;  %12526 = vmatprep.subr.bf16.mxu1 %v18332_v35  ;;  %v18375_v24 = vld [vmem:[#allocation9 + $0xff8] ss:$24 sps:$4 sm:$0xff]   ;;  %v18380_v35 = vld [vmem:[#allocation9 + $0x18c] ss:$24 sps:$4 sm:$0xff]  }
 0x5e2   : > { %12657 = vmatprep.subr.bf16.mxu0 %v18335_v30  ;;  %v18378_v30 = vld [vmem:[#allocation9 + $0x188] ss:$24 sps:$4 sm:$0xff]  }
 0x5e4   : > { %12527 = vmatpush1.bf16.msra.mxu1 %v18330_v39  ;;  %v18381_v39 = vld [vmem:[#allocation9 + $0xfc8] ss:$24 sps:$4 sm:$0xff]  }
 0x5e5   : > { %12658 = vmatpush2.bf16.msra.mxu0 %v18333_v28  ;;  %12528 = vmatprep.subr.bf16.mxu1 %v18338_v44  ;;  %v18386_v28 = vld [vmem:[#allocation9 + $0x75c] ss:$24 sps:$4 sm:$0xff]  }
 0x5e6   : > { %12659 = vmatprep.subr.bf16.mxu0 %v18341_v62  ;;  %v18389_v44 = vld [vmem:[#allocation9 + $0xf9c] ss:$24 sps:$4 sm:$0xff]   ;;  %v18384_v62 = vld [vmem:[#allocation9 + $0x758] ss:$24 sps:$4 sm:$0xff]  }
 0x5e8   : > { %12529 = vmatpush2.bf16.msra.mxu1 %v18336_v58  ;;  %v18387_v58 = vld [vmem:[#allocation9 + $0xf98] ss:$24 sps:$4 sm:$0xff]  }
 0x5e9   : > { %12660 = vmatpush2.bf16.msra.mxu0 %v18339_v7  ;;  %12530 = vmatprep.subr.bf16.mxu1 %v18344_v53  ;;  %v18392_v7 = vld [vmem:[#allocation9 + $0x72c] ss:$24 sps:$4 sm:$0xff]  }
 0x5ea   : > { %12661 = vmatprep.subr.bf16.mxu0 %v18347_v32  ;;  %v18395_v53 = vld [vmem:[#allocation9 + $0xf6c] ss:$24 sps:$4 sm:$0xff]  }
 0x5ec   : > { %12531 = vmatpush2.bf16.msra.mxu1 %v18342_v31 }
 0x5ed   : > { %12662 = vmatpush2.bf16.msra.mxu0 %v18345_v22  ;;  %12532 = vmatprep.subr.bf16.mxu1 %v18350_v48  ;;  %v18390_v22 = vld [vmem:[#allocation9 + $0x728] ss:$24 sps:$4 sm:$0xff]  }
 0x5ee   : > { %12663 = vmatprep.subr.bf16.mxu0 %v18353_v19  ;;  %v18393_v19 = vld [vmem:[#allocation9 + $0xf68] ss:$24 sps:$4 sm:$0xff]  }
 0x5f0   : > { %12533 = vmatpush2.bf16.msra.mxu1 %v18348_v12  ;;  %v18398_v12 = vld [vmem:[#allocation9 + $0x6fc] ss:$24 sps:$4 sm:$0xff]  }
 0x5f1   : > { %12664 = vmatpush2.bf16.msra.mxu0 %v18351_v14  ;;  %12534 = vmatprep.subr.bf16.mxu1 %v18356_v49  ;;  %v18401_v49 = vld [vmem:[#allocation9 + $0xf3c] ss:$24 sps:$4 sm:$0xff]  }
 0x5f2   : > { %12665 = vmatprep.subr.bf16.mxu0 %v18359_v41 }
 0x5f4   : > { %12535 = vmatpush2.bf16.msra.mxu1 %v18354_v0 }
 0x5f5   : > { %12666 = vmatpush2.bf16.msra.mxu0 %v18357_v8  ;;  %12536 = vmatprep.subr.bf16.mxu1 %v18362_v52  ;;  %v18396_v8 = vld [vmem:[#allocation9 + $0x6f8] ss:$24 sps:$4 sm:$0xff]  }
 0x5f6   : > { %12717 = vmatprep.subr.bf16.mxu0 %v18365_v59  ;;  %v18399_v59 = vld [vmem:[#allocation9 + $0xf38] ss:$24 sps:$4 sm:$0xff]  }
 0x5f8   : > { %12668 = vmatmul.mubr.bf16.vlgmr.msra.gmra.mxu0 %v20687_v40  ;;  %12537 = vmatpush2.bf16.msra.mxu1 %v18360_v26  ;;  %v18404_v26 = vld [vmem:[#allocation9 + $0x6cc] ss:$24 sps:$4 sm:$0xff]  }
 0x5f9   : > { %12718 = vmatpush1.bf16.msra.mxu0 %v18363_v61  ;;  %12749 = vmatprep.mubr.bf16.mxu0 %v20689_v4  ;;  %v18407_v61 = vld [vmem:[#allocation9 + $0xf0c] ss:$24 sps:$4 sm:$0xff]  }
 0x5fa   : > { %12538 = vmatprep.subr.bf16.mxu1 %v18368_v9  ;;  %12719 = vmatprep.subr.bf16.mxu0 %v18371_v45  ;;  %v18405_v9 = vld [vmem:[#allocation9 + $0xf08] ss:$24 sps:$4 sm:$0xff]   ;;  %v18413_v45 = vld [vmem:[#allocation9 + $0x11dc] ss:$24 sps:$4 sm:$0xff]  }
 0x5fc   : > { %12539 = vmatpush2.bf16.msra.mxu1 %v18366_v54  ;;  %v18408_v54 = vld [vmem:[#allocation9 + $0x698] ss:$24 sps:$4 sm:$0xff]  }
 0x5fd   : > { %12720 = vmatpush1.bf16.msra.mxu0 %v18369_v15  ;;  %12540 = vmatprep.subr.bf16.mxu1 %v18374_v2  ;;  %v18416_v15 = vld [vmem:[#allocation9 + $0x66c] ss:$24 sps:$4 sm:$0xff]  }
 0x5fe   : > { %12721 = vmatprep.subr.bf16.mxu0 %v18377_v63  ;;  %v18419_v2 = vld [vmem:[#allocation9 + $0x11ac] ss:$24 sps:$4 sm:$0xff]  }
 0x600   : > { %12541 = vmatpush2.bf16.msra.mxu1 %v18372_v46  ;;  %v18414_v46 = vld [vmem:[#allocation9 + $0x668] ss:$24 sps:$4 sm:$0xff]  }
 0x601   : > { %12722 = vmatpush1.bf16.msra.mxu0 %v18375_v24  ;;  %12542 = vmatprep.subr.bf16.mxu1 %v18380_v35  ;;  %v18417_v24 = vld [vmem:[#allocation9 + $0x11a8] ss:$24 sps:$4 sm:$0xff]   ;;  %v18422_v35 = vld [vmem:[#allocation9 + $0x63c] ss:$24 sps:$4 sm:$0xff]  }
 0x602   : > { %12723 = vmatprep.subr.bf16.mxu0 %v18383_v21 }
 0x604   : > { %12543 = vmatpush2.bf16.msra.mxu1 %v18378_v30  ;;  %v18425_v30 = vld [vmem:[#allocation9 + $0x117c] ss:$24 sps:$4 sm:$0xff]  }
 0x605   : > { %12724 = vmatpush1.bf16.msra.mxu0 %v18381_v39  ;;  %12594 = vmatprep.subr.bf16.mxu1 %v18386_v28  ;;  %v18420_v28 = vld [vmem:[#allocation9 + $0x638] ss:$24 sps:$4 sm:$0xff]  }
 0x606   : > { %12725 = vmatprep.subr.bf16.mxu0 %v18389_v44  ;;  %v18423_v44 = vld [vmem:[#allocation9 + $0x1178] ss:$24 sps:$4 sm:$0xff]  }
 0x607   : > { %v12300_v32 = vpop.f32.mrf.mxu1  ;;  %12545 = vmatmul.mubr.bf16.vlgmr.msra.gmra.mxu1 %v20607_v55 }
 0x608   : > { %v12301_v31 = vadd.f32 %v12300_v32, %v20804_v42  ;;  %12595 = vmatpush1.bf16.msra.mxu1 %v18384_v62  ;;  %12626 = vmatprep.mubr.bf16.mxu1 %v20619_v47  ;;  %v18428_v62 = vld [vmem:[#allocation9 + $0x60c] ss:$24 sps:$4 sm:$0xff]   ;;  %v18429_v32 = vld [vmem:[#allocation9 + $0x1148] ss:$24 sps:$4 sm:$0xff]  }
 0x609   : > { %12726 = vmatpush1.bf16.msra.mxu0 %v18387_v58  ;;  %v12302_v48 = vpop.f32.mrf.mxu1  ;;  %12596 = vmatprep.subr.bf16.mxu1 %v18392_v7  ;;  %v18431_v7 = vld [vmem:[#allocation9 + $0x114c] ss:$24 sps:$4 sm:$0xff]  }
 0x60a   : > { %v12303_v14 = vadd.f32 %v12302_v48, %v20807_v33  ;;  %12727 = vmatprep.subr.bf16.mxu0 %v18395_v53  ;;  %v20820_v41 = vadd.f32 %v20809_v6, %v12301_v31  ;;  %v18402_v33 = vld [vmem:[#allocation9 + $0x6c8] ss:$24 sps:$4 sm:$0xff]   ;;  %v18410_v6 = vld [vmem:[#allocation9 + $0x69c] ss:$24 sps:$4 sm:$0xff]   ;;  %v18432_v48 = vld [vmem:[#allocation9 + $0x8d8] ss:$24 sps:$4 sm:$0xff]  }
 0x60b   : > { %v12304_v0 = vpop.f32.mrf.mxu1  ;;  %v18426_v53 = vld [vmem:[#allocation9 + $0x608] ss:$24 sps:$4 sm:$0xff]   ;;  %v18434_v31 = vld [vmem:[#allocation9 + $0x8dc] ss:$24 sps:$4 sm:$0xff]  }
 0x60c   : > { %12597 = vmatpush1.bf16.msra.mxu1 %v18390_v22  ;;  %v20823_v42 = vadd.f32 %v20811_v5, %v12303_v14  ;;  %v18411_v5 = vld [vmem:[#allocation9 + $0x11d8] ss:$24 sps:$4 sm:$0xff]   ;;  %v18437_v22 = vld [vmem:[#allocation9 + $0x111c] ss:$24 sps:$4 sm:$0xff]   ;;  %v18443_v14 = vld [vmem:[#allocation9 + $0x10ec] ss:$24 sps:$4 sm:$0xff]  }
 0x60d   : > { %12728 = vmatpush1.bf16.msra.mxu0 %v18393_v19  ;;  %v12305_v52 = vpop.f32.mrf.mxu1  ;;  %12598 = vmatprep.subr.bf16.mxu1 %v18398_v12  ;;  %v18435_v19 = vld [vmem:[#allocation9 + $0x1118] ss:$24 sps:$4 sm:$0xff]   ;;  %v18440_v12 = vld [vmem:[#allocation9 + $0x8ac] ss:$24 sps:$4 sm:$0xff]   ;;  %v18441_v0 = vld [vmem:[#allocation9 + $0x10e8] ss:$24 sps:$4 sm:$0xff]  }
 0x60e   : > { %12729 = vmatprep.subr.bf16.mxu0 %v18401_v49  ;;  %v18438_v49 = vld [vmem:[#allocation9 + $0x8a8] ss:$24 sps:$4 sm:$0xff]   ;;  %v18449_v52 = vld [vmem:[#allocation9 + $0x10bc] ss:$24 sps:$4 sm:$0xff]  }
 0x610   : > { %12599 = vmatpush1.bf16.msra.mxu1 %v18396_v8  ;;  %v18446_v8 = vld [vmem:[#allocation9 + $0x87c] ss:$24 sps:$4 sm:$0xff]  }
 0x611   : > { %12730 = vmatpush1.bf16.msra.mxu0 %v18399_v59  ;;  %12600 = vmatprep.subr.bf16.mxu1 %v18404_v26  ;;  %v18444_v59 = vld [vmem:[#allocation9 + $0x878] ss:$24 sps:$4 sm:$0xff]  }
 0x612   : > { %12731 = vmatprep.subr.bf16.mxu0 %v18407_v61  ;;  %v18447_v26 = vld [vmem:[#allocation9 + $0x10b8] ss:$24 sps:$4 sm:$0xff]   ;;  %v18452_v61 = vld [vmem:[#allocation9 + $0x84c] ss:$24 sps:$4 sm:$0xff]  }
 0x614   : > { %12601 = vmatpush1.bf16.msra.mxu1 %v18402_v33  ;;  %v18455_v33 = vld [vmem:[#allocation9 + $0x108c] ss:$24 sps:$4 sm:$0xff]  }
 0x615   : > { %12732 = vmatpush1.bf16.msra.mxu0 %v18405_v9  ;;  %12602 = vmatprep.subr.bf16.mxu1 %v18410_v6  ;;  %v18450_v9 = vld [vmem:[#allocation9 + $0x848] ss:$24 sps:$4 sm:$0xff]  }
 0x616   : > { %12733 = vmatprep.subr.bf16.mxu0 %v18413_v45  ;;  %v18453_v6 = vld [vmem:[#allocation9 + $0x1088] ss:$24 sps:$4 sm:$0xff]   ;;  %v18458_v45 = vld [vmem:[#allocation9 + $0x81c] ss:$24 sps:$4 sm:$0xff]  }
 0x618   : > { %v20825_v63 = vpop.f32.mrf.mxu0  ;;  %12603 = vmatpush1.bf16.msra.mxu1 %v18408_v54  ;;  %v18461_v54 = vld [vmem:[#allocation9 + $0x165c] ss:$24 sps:$4 sm:$0xff]  }
 0x619   : > { %12734 = vmatpush2.bf16.msra.mxu0 %v18411_v5  ;;  %12604 = vmatprep.subr.bf16.mxu1 %v18416_v15  ;;  %v18456_v5 = vld [vmem:[#allocation9 + $0x818] ss:$24 sps:$4 sm:$0xff]  }
 0x61a   : > { %v20827_v21 = vpop.f32.mrf.mxu0  ;;  %12735 = vmatprep.subr.bf16.mxu0 %v18419_v2  ;;  %v18459_v15 = vld [vmem:[#allocation9 + $0x1658] ss:$24 sps:$4 sm:$0xff]   ;;  %v18464_v2 = vld [vmem:[#allocation9 + $0x7ec] ss:$24 sps:$4 sm:$0xff]  }
 0x61c   : > { %v12427_v39 = vpop.f32.mrf.mxu0  ;;  %12605 = vmatpush1.bf16.msra.mxu1 %v18414_v46  ;;  %v18467_v46 = vld [vmem:[#allocation9 + $0x162c] ss:$24 sps:$4 sm:$0xff]  }
 0x61d   : > { %12736 = vmatpush2.bf16.msra.mxu0 %v18417_v24  ;;  %12606 = vmatprep.subr.bf16.mxu1 %v18422_v35  ;;  %v18462_v35 = vld [vmem:[#allocation9 + $0x7e8] ss:$24 sps:$4 sm:$0xff]   ;;  %v18470_v39 = vld [vmem:[#allocation9 + $0x7bc] ss:$24 sps:$4 sm:$0xff]  }
 0x61e   : > { %v12428_v58 = vpop.f32.mrf.mxu0  ;;  %12737 = vmatprep.subr.bf16.mxu0 %v18425_v30  ;;  %v18465_v30 = vld [vmem:[#allocation9 + $0x1628] ss:$24 sps:$4 sm:$0xff]  }
 0x61f   : > { %v18468_v58 = vld [vmem:[#allocation9 + $0x7b8] ss:$24 sps:$4 sm:$0xff]  }
 0x620   : > { %12607 = vmatpush1.bf16.msra.mxu1 %v18420_v28 }
 0x621   : > { %12738 = vmatpush2.bf16.msra.mxu0 %v18423_v44  ;;  %12608 = vmatprep.subr.bf16.mxu1 %v18428_v62  ;;  %v18473_v44 = vld [vmem:[#allocation9 + $0x15fc] ss:$24 sps:$4 sm:$0xff]  }
 0x622   : > { %12739 = vmatprep.subr.bf16.mxu0 %v18431_v7  ;;  %v18471_v7 = vld [vmem:[#allocation9 + $0x15f8] ss:$24 sps:$4 sm:$0xff]  }
 0x624   : > { %12609 = vmatpush1.bf16.msra.mxu1 %v18426_v53  ;;  %v18476_v53 = vld [vmem:[#allocation9 + $0x78c] ss:$24 sps:$4 sm:$0xff]  }
 0x625   : > { %12740 = vmatpush2.bf16.msra.mxu0 %v18429_v32  ;;  %12610 = vmatprep.subr.bf16.mxu1 %v18434_v31  ;;  %v18479_v31 = vld [vmem:[#allocation9 + $0x15cc] ss:$24 sps:$4 sm:$0xff]  }
 0x626   : > { %12741 = vmatprep.subr.bf16.mxu0 %v18437_v22  ;;  %v18474_v22 = vld [vmem:[#allocation9 + $0x788] ss:$24 sps:$4 sm:$0xff]  }
 0x628   : > { %12611 = vmatpush2.bf16.msra.mxu1 %v18432_v48  ;;  %v18477_v48 = vld [vmem:[#allocation9 + $0x15c8] ss:$24 sps:$4 sm:$0xff]  }
 0x629   : > { %12742 = vmatpush2.bf16.msra.mxu0 %v18435_v19  ;;  %12612 = vmatprep.subr.bf16.mxu1 %v18440_v12  ;;  %v18482_v19 = vld [vmem:[#allocation9 + $0xd5c] ss:$24 sps:$4 sm:$0xff]  }
 0x62a   : > { %12743 = vmatprep.subr.bf16.mxu0 %v18443_v14  ;;  %v18485_v12 = vld [vmem:[#allocation9 + $0x159c] ss:$24 sps:$4 sm:$0xff]   ;;  %v18480_v14 = vld [vmem:[#allocation9 + $0xd58] ss:$24 sps:$4 sm:$0xff]  }
 0x62c   : > { %12613 = vmatpush2.bf16.msra.mxu1 %v18438_v49  ;;  %v18483_v49 = vld [vmem:[#allocation9 + $0x1598] ss:$24 sps:$4 sm:$0xff]  }
 0x62d   : > { %12744 = vmatpush2.bf16.msra.mxu0 %v18441_v0  ;;  %12614 = vmatprep.subr.bf16.mxu1 %v18446_v8  ;;  %v18488_v0 = vld [vmem:[#allocation9 + $0xd2c] ss:$24 sps:$4 sm:$0xff]  }
 0x62e   : > { %12745 = vmatprep.subr.bf16.mxu0 %v18449_v52  ;;  %v18491_v8 = vld [vmem:[#allocation9 + $0x156c] ss:$24 sps:$4 sm:$0xff]  }
 0x630   : > { %12615 = vmatpush2.bf16.msra.mxu1 %v18444_v59 }
 0x631   : > { %12746 = vmatpush2.bf16.msra.mxu0 %v18447_v26  ;;  %12616 = vmatprep.subr.bf16.mxu1 %v18452_v61  ;;  %v18486_v26 = vld [vmem:[#allocation9 + $0xd28] ss:$24 sps:$4 sm:$0xff]  }
 0x632   : > { %12747 = vmatprep.subr.bf16.mxu0 %v18455_v33  ;;  %v18489_v33 = vld [vmem:[#allocation9 + $0x1568] ss:$24 sps:$4 sm:$0xff]  }
 0x634   : > { %12617 = vmatpush2.bf16.msra.mxu1 %v18450_v9  ;;  %v18494_v9 = vld [vmem:[#allocation9 + $0xcfc] ss:$24 sps:$4 sm:$0xff]  }
 0x635   : > { %12748 = vmatpush2.bf16.msra.mxu0 %v18453_v6  ;;  %12618 = vmatprep.subr.bf16.mxu1 %v18458_v45  ;;  %v18497_v45 = vld [vmem:[#allocation9 + $0x153c] ss:$24 sps:$4 sm:$0xff]  }
 0x636   : > { %12799 = vmatprep.subr.bf16.mxu0 %v18461_v54 }
 0x638   : > { %v20829_v24 = vpop.f32.mrf.mxu0  ;;  %12750 = vmatmul.mubr.bf16.vlgmr.msra.gmra.mxu0 %v20707_v56  ;;  %12619 = vmatpush2.bf16.msra.mxu1 %v18456_v5 }
 0x639   : > { %12800 = vmatpush1.bf16.msra.mxu0 %v18459_v15  ;;  %12831 = vmatprep.mubr.bf16.mxu0 %v20709_v60  ;;  %v18492_v15 = vld [vmem:[#allocation9 + $0xcf8] ss:$24 sps:$4 sm:$0xff]  }
 0x63a   : > { %v20833_v28 = vpop.f32.mrf.mxu0  ;;  %12620 = vmatprep.subr.bf16.mxu1 %v18464_v2  ;;  %12801 = vmatprep.subr.bf16.mxu0 %v18467_v46  ;;  %v18495_v46 = vld [vmem:[#allocation9 + $0x1538] ss:$24 sps:$4 sm:$0xff]  }
 0x63c   : > { %v12509_v62 = vpop.f32.mrf.mxu0  ;;  %12621 = vmatpush2.bf16.msra.mxu1 %v18462_v35  ;;  %v18500_v35 = vld [vmem:[#allocation9 + $0xccc] ss:$24 sps:$4 sm:$0xff]  }
 0x63d   : > { %12802 = vmatpush1.bf16.msra.mxu0 %v18465_v30  ;;  %12622 = vmatprep.subr.bf16.mxu1 %v18470_v39  ;;  %v18503_v30 = vld [vmem:[#allocation9 + $0x150c] ss:$24 sps:$4 sm:$0xff]   ;;  %v18501_v39 = vld [vmem:[#allocation9 + $0x1508] ss:$24 sps:$4 sm:$0xff]   ;;  %v18504_v62 = vld [vmem:[#allocation9 + $0xc98] ss:$24 sps:$4 sm:$0xff]  }
 0x63e   : > { %v12510_v32 = vpop.f32.mrf.mxu0  ;;  %12803 = vmatprep.subr.bf16.mxu0 %v18473_v44  ;;  %v18509_v44 = vld [vmem:[#allocation9 + $0x17dc] ss:$24 sps:$4 sm:$0xff]  }
 0x63f   : > { %v18513_v32 = vld [vmem:[#allocation9 + $0x17a8] ss:$24 sps:$4 sm:$0xff]  }
 0x640   : > { %12623 = vmatpush2.bf16.msra.mxu1 %v18468_v58  ;;  %v18512_v58 = vld [vmem:[#allocation9 + $0xc6c] ss:$24 sps:$4 sm:$0xff]  }
 0x641   : > { %12804 = vmatpush1.bf16.msra.mxu0 %v18471_v7  ;;  %12624 = vmatprep.subr.bf16.mxu1 %v18476_v53  ;;  %v18515_v7 = vld [vmem:[#allocation9 + $0x17ac] ss:$24 sps:$4 sm:$0xff]   ;;  %v18510_v53 = vld [vmem:[#allocation9 + $0xc68] ss:$24 sps:$4 sm:$0xff]  }
 0x642   : > { %12805 = vmatprep.subr.bf16.mxu0 %v18479_v31  ;;  %v18518_v31 = vld [vmem:[#allocation9 + $0xc3c] ss:$24 sps:$4 sm:$0xff]  }
 0x644   : > { %12625 = vmatpush2.bf16.msra.mxu1 %v18474_v22  ;;  %v18521_v22 = vld [vmem:[#allocation9 + $0x177c] ss:$24 sps:$4 sm:$0xff]  }
 0x645   : > { %12806 = vmatpush1.bf16.msra.mxu0 %v18477_v48  ;;  %12676 = vmatprep.subr.bf16.mxu1 %v18482_v19  ;;  %v18516_v48 = vld [vmem:[#allocation9 + $0xc38] ss:$24 sps:$4 sm:$0xff]  }
 0x646   : > { %12807 = vmatprep.subr.bf16.mxu0 %v18485_v12  ;;  %v18519_v19 = vld [vmem:[#allocation9 + $0x1778] ss:$24 sps:$4 sm:$0xff]   ;;  %v18524_v12 = vld [vmem:[#allocation9 + $0xc0c] ss:$24 sps:$4 sm:$0xff]  }
 0x647   : > { %v12382_v52 = vpop.f32.mrf.mxu1  ;;  %12627 = vmatmul.mubr.bf16.vlgmr.msra.gmra.mxu1 %v20621_v16 }
 0x648   : > { %v12383_v59 = vadd.f32 %v12382_v52, %v20820_v41  ;;  %12677 = vmatpush1.bf16.msra.mxu1 %v18480_v14  ;;  %12708 = vmatprep.mubr.bf16.mxu1 %v20632_v34  ;;  %v18527_v14 = vld [vmem:[#allocation9 + $0x174c] ss:$24 sps:$4 sm:$0xff]   ;;  %v18533_v52 = vld [vmem:[#allocation9 + $0x171c] ss:$24 sps:$4 sm:$0xff]  }
 0x649   : > { %12808 = vmatpush1.bf16.msra.mxu0 %v18483_v49  ;;  %v12384_v61 = vpop.f32.mrf.mxu1  ;;  %12678 = vmatprep.subr.bf16.mxu1 %v18488_v0  ;;  %v18522_v49 = vld [vmem:[#allocation9 + $0xc08] ss:$24 sps:$4 sm:$0xff]  }
 0x64a   : > { %v12385_v6 = vadd.f32 %v12384_v61, %v20823_v42  ;;  %12809 = vmatprep.subr.bf16.mxu0 %v18491_v8  ;;  %v20840_v54 = vadd.f32 %v20825_v63, %v12383_v59  ;;  %v18498_v42 = vld [vmem:[#allocation9 + $0xcc8] ss:$24 sps:$4 sm:$0xff]   ;;  %v18506_v63 = vld [vmem:[#allocation9 + $0xc9c] ss:$24 sps:$4 sm:$0xff]   ;;  %v18528_v59 = vld [vmem:[#allocation9 + $0xed8] ss:$24 sps:$4 sm:$0xff]  }
 0x64b   : > { %v12386_v5 = vpop.f32.mrf.mxu1  ;;  %v18525_v0 = vld [vmem:[#allocation9 + $0x1748] ss:$24 sps:$4 sm:$0xff]   ;;  %v18530_v8 = vld [vmem:[#allocation9 + $0xedc] ss:$24 sps:$4 sm:$0xff]   ;;  %v18536_v61 = vld [vmem:[#allocation9 + $0xeac] ss:$24 sps:$4 sm:$0xff]  }
 0x64c   : > { %12679 = vmatpush1.bf16.msra.mxu1 %v18486_v26  ;;  %v20843_v41 = vadd.f32 %v20827_v21, %v12385_v6  ;;  %v18507_v21 = vld [vmem:[#allocation9 + $0x17d8] ss:$24 sps:$4 sm:$0xff]   ;;  %v18537_v6 = vld [vmem:[#allocation9 + $0x16e8] ss:$24 sps:$4 sm:$0xff]   ;;  %v18545_v5 = vld [vmem:[#allocation9 + $0x16bc] ss:$24 sps:$4 sm:$0xff]  }
 0x64d   : > { %12810 = vmatpush1.bf16.msra.mxu0 %v18489_v33  ;;  %v12387_v2 = vpop.f32.mrf.mxu1  ;;  %12680 = vmatprep.subr.bf16.mxu1 %v18494_v9  ;;  %v18531_v26 = vld [vmem:[#allocation9 + $0x1718] ss:$24 sps:$4 sm:$0xff]   ;;  %v18539_v33 = vld [vmem:[#allocation9 + $0x16ec] ss:$24 sps:$4 sm:$0xff]   ;;  %v18534_v9 = vld [vmem:[#allocation9 + $0xea8] ss:$24 sps:$4 sm:$0xff]  }
 0x64e   : > { %12811 = vmatprep.subr.bf16.mxu0 %v18497_v45  ;;  %v18542_v45 = vld [vmem:[#allocation9 + $0xe7c] ss:$24 sps:$4 sm:$0xff]   ;;  %v18543_v2 = vld [vmem:[#allocation9 + $0x16b8] ss:$24 sps:$4 sm:$0xff]  }
 0x650   : > { %12681 = vmatpush1.bf16.msra.mxu1 %v18492_v15  ;;  %v18540_v15 = vld [vmem:[#allocation9 + $0xe78] ss:$24 sps:$4 sm:$0xff]  }
 0x651   : > { %12812 = vmatpush1.bf16.msra.mxu0 %v18495_v46  ;;  %12682 = vmatprep.subr.bf16.mxu1 %v18500_v35  ;;  %v18548_v46 = vld [vmem:[#allocation9 + $0xe4c] ss:$24 sps:$4 sm:$0xff]  }
 0x652   : > { %12813 = vmatprep.subr.bf16.mxu0 %v18503_v30  ;;  %v18551_v35 = vld [vmem:[#allocation9 + $0x168c] ss:$24 sps:$4 sm:$0xff]   ;;  %v18546_v30 = vld [vmem:[#allocation9 + $0xe48] ss:$24 sps:$4 sm:$0xff]  }
 0x654   : > { %12683 = vmatpush1.bf16.msra.mxu1 %v18498_v42  ;;  %v18549_v42 = vld [vmem:[#allocation9 + $0x1688] ss:$24 sps:$4 sm:$0xff]  }
 0x655   : > { %12814 = vmatpush1.bf16.msra.mxu0 %v18501_v39  ;;  %12684 = vmatprep.subr.bf16.mxu1 %v18506_v63  ;;  %v18554_v39 = vld [vmem:[#allocation9 + $0xe1c] ss:$24 sps:$4 sm:$0xff]  }
 0x656   : > { %12815 = vmatprep.subr.bf16.mxu0 %v18509_v44  ;;  %v18557_v63 = vld [vmem:[#allocation9 + $0x1c5c] ss:$24 sps:$4 sm:$0xff]   ;;  %v18552_v44 = vld [vmem:[#allocation9 + $0xe18] ss:$24 sps:$4 sm:$0xff]  }
 0x658   : > { %12685 = vmatpush1.bf16.msra.mxu1 %v18504_v62  ;;  %v18555_v62 = vld [vmem:[#allocation9 + $0x1c58] ss:$24 sps:$4 sm:$0xff]  }
 0x659   : > { %12816 = vmatpush2.bf16.msra.mxu0 %v18507_v21  ;;  %12686 = vmatprep.subr.bf16.mxu1 %v18512_v58  ;;  %v18560_v21 = vld [vmem:[#allocation9 + $0xdec] ss:$24 sps:$4 sm:$0xff]  }
 0x65a   : > { %12817 = vmatprep.subr.bf16.mxu0 %v18515_v7  ;;  %v18563_v58 = vld [vmem:[#allocation9 + $0x1c2c] ss:$24 sps:$4 sm:$0xff]  }
 0x65c   : > { %12687 = vmatpush1.bf16.msra.mxu1 %v18510_v53  ;;  %v18558_v53 = vld [vmem:[#allocation9 + $0xde8] ss:$24 sps:$4 sm:$0xff]  }
 0x65d   : > { %12818 = vmatpush2.bf16.msra.mxu0 %v18513_v32  ;;  %12688 = vmatprep.subr.bf16.mxu1 %v18518_v31  ;;  %v18561_v32 = vld [vmem:[#allocation9 + $0x1c28] ss:$24 sps:$4 sm:$0xff]   ;;  %v18566_v31 = vld [vmem:[#allocation9 + $0xdbc] ss:$24 sps:$4 sm:$0xff]  }
 0x65e   : > { %12819 = vmatprep.subr.bf16.mxu0 %v18521_v22 }
 0x660   : > { %12689 = vmatpush1.bf16.msra.mxu1 %v18516_v48  ;;  %v18569_v48 = vld [vmem:[#allocation9 + $0x1bfc] ss:$24 sps:$4 sm:$0xff]  }
 0x661   : > { %12820 = vmatpush2.bf16.msra.mxu0 %v18519_v19  ;;  %12690 = vmatprep.subr.bf16.mxu1 %v18524_v12  ;;  %v18564_v12 = vld [vmem:[#allocation9 + $0xdb8] ss:$24 sps:$4 sm:$0xff]  }
 0x662   : > { %12821 = vmatprep.subr.bf16.mxu0 %v18527_v14  ;;  %v18567_v14 = vld [vmem:[#allocation9 + $0x1bf8] ss:$24 sps:$4 sm:$0xff]  }
 0x664   : > { %12691 = vmatpush1.bf16.msra.mxu1 %v18522_v49  ;;  %v18572_v49 = vld [vmem:[#allocation9 + $0xd8c] ss:$24 sps:$4 sm:$0xff]  }
 0x665   : > { %12822 = vmatpush2.bf16.msra.mxu0 %v18525_v0  ;;  %12692 = vmatprep.subr.bf16.mxu1 %v18530_v8  ;;  %v18575_v8 = vld [vmem:[#allocation9 + $0x1bcc] ss:$24 sps:$4 sm:$0xff]  }
 0x666   : > { %12823 = vmatprep.subr.bf16.mxu0 %v18533_v52  ;;  %v18570_v52 = vld [vmem:[#allocation9 + $0xd88] ss:$24 sps:$4 sm:$0xff]  }
 0x668   : > { %12693 = vmatpush2.bf16.msra.mxu1 %v18528_v59  ;;  %v18573_v59 = vld [vmem:[#allocation9 + $0x1bc8] ss:$24 sps:$4 sm:$0xff]  }
 0x669   : > { %12824 = vmatpush2.bf16.msra.mxu0 %v18531_v26  ;;  %12694 = vmatprep.subr.bf16.mxu1 %v18536_v61  ;;  %v18578_v26 = vld [vmem:[#allocation9 + $0x135c] ss:$24 sps:$4 sm:$0xff]  }
 0x66a   : > { %12825 = vmatprep.subr.bf16.mxu0 %v18539_v33  ;;  %v18581_v61 = vld [vmem:[#allocation9 + $0x1b9c] ss:$24 sps:$4 sm:$0xff]   ;;  %v18576_v33 = vld [vmem:[#allocation9 + $0x1358] ss:$24 sps:$4 sm:$0xff]  }
 0x66c   : > { %12695 = vmatpush2.bf16.msra.mxu1 %v18534_v9  ;;  %v18579_v9 = vld [vmem:[#allocation9 + $0x1b98] ss:$24 sps:$4 sm:$0xff]  }
 0x66d   : > { %12826 = vmatpush2.bf16.msra.mxu0 %v18537_v6  ;;  %12696 = vmatprep.subr.bf16.mxu1 %v18542_v45  ;;  %v18584_v6 = vld [vmem:[#allocation9 + $0x132c] ss:$24 sps:$4 sm:$0xff]  }
 0x66e   : > { %12827 = vmatprep.subr.bf16.mxu0 %v18545_v5  ;;  %v18587_v45 = vld [vmem:[#allocation9 + $0x1b6c] ss:$24 sps:$4 sm:$0xff]  }
 0x670   : > { %12697 = vmatpush2.bf16.msra.mxu1 %v18540_v15 }
 0x671   : > { %12828 = vmatpush2.bf16.msra.mxu0 %v18543_v2  ;;  %12698 = vmatprep.subr.bf16.mxu1 %v18548_v46  ;;  %v18582_v2 = vld [vmem:[#allocation9 + $0x1328] ss:$24 sps:$4 sm:$0xff]  }
 0x672   : > { %12829 = vmatprep.subr.bf16.mxu0 %v18551_v35  ;;  %v18585_v35 = vld [vmem:[#allocation9 + $0x1b68] ss:$24 sps:$4 sm:$0xff]  }
 0x674   : > { %12699 = vmatpush2.bf16.msra.mxu1 %v18546_v30  ;;  %v18590_v30 = vld [vmem:[#allocation9 + $0x12fc] ss:$24 sps:$4 sm:$0xff]  }
 0x675   : > { %12830 = vmatpush2.bf16.msra.mxu0 %v18549_v42  ;;  %12700 = vmatprep.subr.bf16.mxu1 %v18554_v39  ;;  %v18593_v39 = vld [vmem:[#allocation9 + $0x1b3c] ss:$24 sps:$4 sm:$0xff]  }
 0x676   : > { %12881 = vmatprep.subr.bf16.mxu0 %v18557_v63 }
 0x678   : > { %v20845_v7 = vpop.f32.mrf.mxu0  ;;  %12832 = vmatmul.mubr.bf16.vlgmr.msra.gmra.mxu0 %v20741_v43  ;;  %12701 = vmatpush2.bf16.msra.mxu1 %v18552_v44  ;;  %v18588_v44 = vld [vmem:[#allocation9 + $0x12f8] ss:$24 sps:$4 sm:$0xff]  }
 0x679   : > { %12882 = vmatpush1.bf16.msra.mxu0 %v18555_v62  ;;  %12913 = vmatprep.mubr.bf16.mxu0 %v20743_v10  ;;  %v18591_v62 = vld [vmem:[#allocation9 + $0x1b38] ss:$24 sps:$4 sm:$0xff]  }
 0x67a   : > { %v20849_v22 = vpop.f32.mrf.mxu0  ;;  %12702 = vmatprep.subr.bf16.mxu1 %v18560_v21  ;;  %12883 = vmatprep.subr.bf16.mxu0 %v18563_v58  ;;  %v18596_v21 = vld [vmem:[#allocation9 + $0x12cc] ss:$24 sps:$4 sm:$0xff]  }
 0x67b   : > { %v18599_v58 = vld [vmem:[#allocation9 + $0x1b0c] ss:$24 sps:$4 sm:$0xff]  }
 0x67c   : > { %v12591_v19 = vpop.f32.mrf.mxu0  ;;  %12703 = vmatpush2.bf16.msra.mxu1 %v18558_v53  ;;  %v18594_v53 = vld [vmem:[#allocation9 + $0x12c8] ss:$24 sps:$4 sm:$0xff]  }
 0x67d   : > { %12884 = vmatpush1.bf16.msra.mxu0 %v18561_v32  ;;  %12704 = vmatprep.subr.bf16.mxu1 %v18566_v31  ;;  %v18597_v32 = vld [vmem:[#allocation9 + $0x1b08] ss:$24 sps:$4 sm:$0xff]   ;;  %v18602_v31 = vld [vmem:[#allocation9 + $0x129c] ss:$24 sps:$4 sm:$0xff]   ;;  %v18603_v19 = vld [vmem:[#allocation9 + $0x1dd8] ss:$24 sps:$4 sm:$0xff]  }
 0x67e   : > { %v12592_v0 = vpop.f32.mrf.mxu0  ;;  %12885 = vmatprep.subr.bf16.mxu0 %v18569_v48  ;;  %v18600_v48 = vld [vmem:[#allocation9 + $0x1298] ss:$24 sps:$4 sm:$0xff]  }
 0x67f   : > { %v18609_v0 = vld [vmem:[#allocation9 + $0x1da8] ss:$24 sps:$4 sm:$0xff]  }
 0x680   : > { %12705 = vmatpush2.bf16.msra.mxu1 %v18564_v12  ;;  %v18608_v12 = vld [vmem:[#allocation9 + $0x126c] ss:$24 sps:$4 sm:$0xff]  }
 0x681   : > { %12886 = vmatpush1.bf16.msra.mxu0 %v18567_v14  ;;  %12706 = vmatprep.subr.bf16.mxu1 %v18572_v49  ;;  %v18611_v14 = vld [vmem:[#allocation9 + $0x1dac] ss:$24 sps:$4 sm:$0xff]   ;;  %v18606_v49 = vld [vmem:[#allocation9 + $0x1268] ss:$24 sps:$4 sm:$0xff]  }
 0x682   : > { %12887 = vmatprep.subr.bf16.mxu0 %v18575_v8  ;;  %v18614_v8 = vld [vmem:[#allocation9 + $0x123c] ss:$24 sps:$4 sm:$0xff]  }
 0x684   : > { %12707 = vmatpush2.bf16.msra.mxu1 %v18570_v52  ;;  %v18617_v52 = vld [vmem:[#allocation9 + $0x1d7c] ss:$24 sps:$4 sm:$0xff]  }
 0x685   : > { %12888 = vmatpush1.bf16.msra.mxu0 %v18573_v59  ;;  %12758 = vmatprep.subr.bf16.mxu1 %v18578_v26  ;;  %v18612_v59 = vld [vmem:[#allocation9 + $0x1238] ss:$24 sps:$4 sm:$0xff]  }
 0x686   : > { %12889 = vmatprep.subr.bf16.mxu0 %v18581_v61  ;;  %v18615_v26 = vld [vmem:[#allocation9 + $0x1d78] ss:$24 sps:$4 sm:$0xff]   ;;  %v18620_v61 = vld [vmem:[#allocation9 + $0x120c] ss:$24 sps:$4 sm:$0xff]  }
 0x687   : > { %v12464_v5 = vpop.f32.mrf.mxu1  ;;  %12709 = vmatmul.mubr.bf16.vlgmr.msra.gmra.mxu1 %v20673_v18 }
 0x688   : > { %v20853_v15 = vadd.f32 %v12464_v5, %v20840_v54  ;;  %12759 = vmatpush1.bf16.msra.mxu1 %v18576_v33  ;;  %12790 = vmatprep.mubr.bf16.mxu1 %v20675_v29  ;;  %v18623_v33 = vld [vmem:[#allocation9 + $0x1d4c] ss:$24 sps:$4 sm:$0xff]   ;;  %v18629_v5 = vld [vmem:[#allocation9 + $0x1d1c] ss:$24 sps:$4 sm:$0xff]  }
 0x689   : > { %12890 = vmatpush1.bf16.msra.mxu0 %v18579_v9  ;;  %v12466_v46 = vpop.f32.mrf.mxu1  ;;  %12760 = vmatprep.subr.bf16.mxu1 %v18584_v6  ;;  %v18618_v9 = vld [vmem:[#allocation9 + $0x1208] ss:$24 sps:$4 sm:$0xff]  }
 0x68a   : > { %v20857_v42 = vadd.f32 %v12466_v46, %v20843_v41  ;;  %12891 = vmatprep.subr.bf16.mxu0 %v18587_v45  ;;  %v18605_v41 = vld [vmem:[#allocation9 + $0x1ddc] ss:$24 sps:$4 sm:$0xff]   ;;  %v18621_v6 = vld [vmem:[#allocation9 + $0x1d48] ss:$24 sps:$4 sm:$0xff]   ;;  %v18627_v46 = vld [vmem:[#allocation9 + $0x1d18] ss:$24 sps:$4 sm:$0xff]  }
 0x68b   : > { %v12468_v63 = vpop.f32.mrf.mxu1  ;;  %v18626_v45 = vld [vmem:[#allocation9 + $0x14dc] ss:$24 sps:$4 sm:$0xff]  }
 0x68c   : > { %12761 = vmatpush1.bf16.msra.mxu1 %v18582_v2  ;;  %v18624_v2 = vld [vmem:[#allocation9 + $0x14d8] ss:$24 sps:$4 sm:$0xff]   ;;  %v18633_v63 = vld [vmem:[#allocation9 + $0x1ce8] ss:$24 sps:$4 sm:$0xff]  }
 0x68d   : > { %12892 = vmatpush1.bf16.msra.mxu0 %v18585_v35  ;;  %v12469_v54 = vpop.f32.mrf.mxu1  ;;  %12762 = vmatprep.subr.bf16.mxu1 %v18590_v30  ;;  %v18632_v35 = vld [vmem:[#allocation9 + $0x14ac] ss:$24 sps:$4 sm:$0xff]  }
 0x68e   : > { %12893 = vmatprep.subr.bf16.mxu0 %v18593_v39  ;;  %v18635_v30 = vld [vmem:[#allocation9 + $0x1cec] ss:$24 sps:$4 sm:$0xff]   ;;  %v18630_v39 = vld [vmem:[#allocation9 + $0x14a8] ss:$24 sps:$4 sm:$0xff]   ;;  %v18641_v54 = vld [vmem:[#allocation9 + $0x1cbc] ss:$24 sps:$4 sm:$0xff]  }
 0x690   : > { %12763 = vmatpush1.bf16.msra.mxu1 %v18588_v44  ;;  %v18638_v44 = vld [vmem:[#allocation9 + $0x147c] ss:$24 sps:$4 sm:$0xff]  }
 0x691   : > { %12894 = vmatpush1.bf16.msra.mxu0 %v18591_v62  ;;  %12764 = vmatprep.subr.bf16.mxu1 %v18596_v21  ;;  %v18636_v62 = vld [vmem:[#allocation9 + $0x1478] ss:$24 sps:$4 sm:$0xff]  }
 0x692   : > { %12895 = vmatprep.subr.bf16.mxu0 %v18599_v58  ;;  %v18639_v21 = vld [vmem:[#allocation9 + $0x1cb8] ss:$24 sps:$4 sm:$0xff]   ;;  %v18644_v58 = vld [vmem:[#allocation9 + $0x144c] ss:$24 sps:$4 sm:$0xff]  }
 0x694   : > { %12765 = vmatpush1.bf16.msra.mxu1 %v18594_v53  ;;  %v18647_v53 = vld [vmem:[#allocation9 + $0x1c8c] ss:$24 sps:$4 sm:$0xff]  }
 0x695   : > { %12896 = vmatpush1.bf16.msra.mxu0 %v18597_v32  ;;  %12766 = vmatprep.subr.bf16.mxu1 %v18602_v31  ;;  %v18642_v32 = vld [vmem:[#allocation9 + $0x1448] ss:$24 sps:$4 sm:$0xff]  }
 0x696   : > { %12897 = vmatprep.subr.bf16.mxu0 %v18605_v41  ;;  %v18645_v31 = vld [vmem:[#allocation9 + $0x1c88] ss:$24 sps:$4 sm:$0xff]   ;;  %v18650_v41 = vld [vmem:[#allocation9 + $0x141c] ss:$24 sps:$4 sm:$0xff]  }
 0x698   : > { %12767 = vmatpush1.bf16.msra.mxu1 %v18600_v48  ;;  %v18653_v48 = vld [vmem:[#allocation9 + $0x225c] ss:$24 sps:$4 sm:$0xff]  }
 0x699   : > { %12898 = vmatpush2.bf16.msra.mxu0 %v18603_v19  ;;  %12768 = vmatprep.subr.bf16.mxu1 %v18608_v12  ;;  %v18648_v19 = vld [vmem:[#allocation9 + $0x1418] ss:$24 sps:$4 sm:$0xff]  }
 0x69a   : > { %12899 = vmatprep.subr.bf16.mxu0 %v18611_v14  ;;  %v18651_v12 = vld [vmem:[#allocation9 + $0x2258] ss:$24 sps:$4 sm:$0xff]   ;;  %v18656_v14 = vld [vmem:[#allocation9 + $0x13ec] ss:$24 sps:$4 sm:$0xff]  }
 0x69c   : > { %12769 = vmatpush1.bf16.msra.mxu1 %v18606_v49  ;;  %v18659_v49 = vld [vmem:[#allocation9 + $0x222c] ss:$24 sps:$4 sm:$0xff]  }
 0x69d   : > { %12900 = vmatpush2.bf16.msra.mxu0 %v18609_v0  ;;  %12770 = vmatprep.subr.bf16.mxu1 %v18614_v8  ;;  %v18654_v8 = vld [vmem:[#allocation9 + $0x13e8] ss:$24 sps:$4 sm:$0xff]  }
 0x69e   : > { %12901 = vmatprep.subr.bf16.mxu0 %v18617_v52  ;;  %v18657_v52 = vld [vmem:[#allocation9 + $0x2228] ss:$24 sps:$4 sm:$0xff]  }
 0x6a0   : > { %12771 = vmatpush1.bf16.msra.mxu1 %v18612_v59  ;;  %v18662_v59 = vld [vmem:[#allocation9 + $0x13bc] ss:$24 sps:$4 sm:$0xff]  }
 0x6a1   : > { %12902 = vmatpush2.bf16.msra.mxu0 %v18615_v26  ;;  %12772 = vmatprep.subr.bf16.mxu1 %v18620_v61  ;;  %v18665_v61 = vld [vmem:[#allocation9 + $0x21fc] ss:$24 sps:$4 sm:$0xff]  }
 0x6a2   : > { %12903 = vmatprep.subr.bf16.mxu0 %v18623_v33 }
 0x6a4   : > { %12773 = vmatpush1.bf16.msra.mxu1 %v18618_v9  ;;  %v18660_v9 = vld [vmem:[#allocation9 + $0x13b8] ss:$24 sps:$4 sm:$0xff]  }
 0x6a5   : > { %12904 = vmatpush2.bf16.msra.mxu0 %v18621_v6  ;;  %12774 = vmatprep.subr.bf16.mxu1 %v18626_v45  ;;  %v18663_v6 = vld [vmem:[#allocation9 + $0x21f8] ss:$24 sps:$4 sm:$0xff]   ;;  %v18668_v45 = vld [vmem:[#allocation9 + $0x138c] ss:$24 sps:$4 sm:$0xff]  }
 0x6a6   : > { %12905 = vmatprep.subr.bf16.mxu0 %v18629_v5 }
 0x6a8   : > { %12775 = vmatpush2.bf16.msra.mxu1 %v18624_v2  ;;  %v18671_v2 = vld [vmem:[#allocation9 + $0x21cc] ss:$24 sps:$4 sm:$0xff]  }
 0x6a9   : > { %12906 = vmatpush2.bf16.msra.mxu0 %v18627_v46  ;;  %12776 = vmatprep.subr.bf16.mxu1 %v18632_v35  ;;  %v18666_v46 = vld [vmem:[#allocation9 + $0x1388] ss:$24 sps:$4 sm:$0xff]  }
 0x6aa   : > { %12907 = vmatprep.subr.bf16.mxu0 %v18635_v30  ;;  %v18669_v35 = vld [vmem:[#allocation9 + $0x21c8] ss:$24 sps:$4 sm:$0xff]   ;;  %v18674_v30 = vld [vmem:[#allocation9 + $0x195c] ss:$24 sps:$4 sm:$0xff]  }
 0x6ac   : > { %12777 = vmatpush2.bf16.msra.mxu1 %v18630_v39  ;;  %v18677_v39 = vld [vmem:[#allocation9 + $0x219c] ss:$24 sps:$4 sm:$0xff]  }
 0x6ad   : > { %12908 = vmatpush2.bf16.msra.mxu0 %v18633_v63  ;;  %12778 = vmatprep.subr.bf16.mxu1 %v18638_v44  ;;  %v18672_v63 = vld [vmem:[#allocation9 + $0x1958] ss:$24 sps:$4 sm:$0xff]  }
 0x6ae   : > { %12909 = vmatprep.subr.bf16.mxu0 %v18641_v54  ;;  %v18675_v44 = vld [vmem:[#allocation9 + $0x2198] ss:$24 sps:$4 sm:$0xff]   ;;  %v18680_v54 = vld [vmem:[#allocation9 + $0x192c] ss:$24 sps:$4 sm:$0xff]  }
 0x6b0   : > { %12779 = vmatpush2.bf16.msra.mxu1 %v18636_v62  ;;  %v18683_v62 = vld [vmem:[#allocation9 + $0x216c] ss:$24 sps:$4 sm:$0xff]  }
 0x6b1   : > { %12910 = vmatpush2.bf16.msra.mxu0 %v18639_v21  ;;  %12780 = vmatprep.subr.bf16.mxu1 %v18644_v58  ;;  %v18678_v58 = vld [vmem:[#allocation9 + $0x1928] ss:$24 sps:$4 sm:$0xff]  }
 0x6b2   : > { %12911 = vmatprep.subr.bf16.mxu0 %v18647_v53 }
 0x6b4   : > { %12781 = vmatpush2.bf16.msra.mxu1 %v18642_v32  ;;  %v18681_v32 = vld [vmem:[#allocation9 + $0x2168] ss:$24 sps:$4 sm:$0xff]  }
 0x6b5   : > { %12912 = vmatpush2.bf16.msra.mxu0 %v18645_v31  ;;  %12782 = vmatprep.subr.bf16.mxu1 %v18650_v41  ;;  %v18686_v31 = vld [vmem:[#allocation9 + $0x18fc] ss:$24 sps:$4 sm:$0xff]  }
 0x6b6   : > { %12963 = vmatprep.subr.bf16.mxu0 %v18653_v48  ;;  %v18689_v41 = vld [vmem:[#allocation9 + $0x213c] ss:$24 sps:$4 sm:$0xff]  }
 0x6b8   : > { %v20859_v0 = vpop.f32.mrf.mxu0  ;;  %12914 = vmatmul.mubr.bf16.vlgmr.msra.gmra.mxu0 %v20775_v13  ;;  %12783 = vmatpush2.bf16.msra.mxu1 %v18648_v19  ;;  %v18684_v19 = vld [vmem:[#allocation9 + $0x18f8] ss:$24 sps:$4 sm:$0xff]  }
 0x6b9   : > { %12964 = vmatpush1.bf16.msra.mxu0 %v18651_v12  ;;  %12995 = vmatprep.mubr.bf16.mxu0 %v20777_v11 }
 0x6ba   : > { %v20863_v26 = vpop.f32.mrf.mxu0  ;;  %12784 = vmatprep.subr.bf16.mxu1 %v18656_v14  ;;  %12965 = vmatprep.subr.bf16.mxu0 %v18659_v49  ;;  %v18687_v14 = vld [vmem:[#allocation9 + $0x2138] ss:$24 sps:$4 sm:$0xff]   ;;  %v18692_v49 = vld [vmem:[#allocation9 + $0x18cc] ss:$24 sps:$4 sm:$0xff]  }
 0x6bc   : > { %v12673_v33 = vpop.f32.mrf.mxu0  ;;  %12785 = vmatpush2.bf16.msra.mxu1 %v18654_v8  ;;  %v18695_v8 = vld [vmem:[#allocation9 + $0x210c] ss:$24 sps:$4 sm:$0xff]  }
 0x6bd   : > { %12966 = vmatpush1.bf16.msra.mxu0 %v18657_v52  ;;  %12786 = vmatprep.subr.bf16.mxu1 %v18662_v59  ;;  %v18690_v52 = vld [vmem:[#allocation9 + $0x18c8] ss:$24 sps:$4 sm:$0xff]   ;;  %v18701_v33 = vld [vmem:[#allocation9 + $0x23dc] ss:$24 sps:$4 sm:$0xff]  }
 0x6be   : > { %v12674_v5 = vpop.f32.mrf.mxu0  ;;  %12967 = vmatprep.subr.bf16.mxu0 %v18665_v61  ;;  %v18693_v59 = vld [vmem:[#allocation9 + $0x2108] ss:$24 sps:$4 sm:$0xff]   ;;  %v18698_v61 = vld [vmem:[#allocation9 + $0x189c] ss:$24 sps:$4 sm:$0xff]  }
 0x6bf   : > { %v18707_v5 = vld [vmem:[#allocation9 + $0x23ac] ss:$24 sps:$4 sm:$0xff]  }
 0x6c0   : > { %12787 = vmatpush2.bf16.msra.mxu1 %v18660_v9  ;;  %v18696_v9 = vld [vmem:[#allocation9 + $0x1898] ss:$24 sps:$4 sm:$0xff]  }
 0x6c1   : > { %12968 = vmatpush1.bf16.msra.mxu0 %v18663_v6  ;;  %12788 = vmatprep.subr.bf16.mxu1 %v18668_v45  ;;  %v18699_v6 = vld [vmem:[#allocation9 + $0x23d8] ss:$24 sps:$4 sm:$0xff]   ;;  %v18704_v45 = vld [vmem:[#allocation9 + $0x186c] ss:$24 sps:$4 sm:$0xff]  }
 0x6c2   : > { %12969 = vmatprep.subr.bf16.mxu0 %v18671_v2  ;;  %v18702_v2 = vld [vmem:[#allocation9 + $0x1868] ss:$24 sps:$4 sm:$0xff]  }
 0x6c4   : > { %12789 = vmatpush2.bf16.msra.mxu1 %v18666_v46  ;;  %v18705_v46 = vld [vmem:[#allocation9 + $0x23a8] ss:$24 sps:$4 sm:$0xff]  }
 0x6c5   : > { %12970 = vmatpush1.bf16.msra.mxu0 %v18669_v35  ;;  %12840 = vmatprep.subr.bf16.mxu1 %v18674_v30  ;;  %v18710_v35 = vld [vmem:[#allocation9 + $0x183c] ss:$24 sps:$4 sm:$0xff]  }
 0x6c6   : > { %12971 = vmatprep.subr.bf16.mxu0 %v18677_v39  ;;  %v18713_v30 = vld [vmem:[#allocation9 + $0x237c] ss:$24 sps:$4 sm:$0xff]   ;;  %v18708_v39 = vld [vmem:[#allocation9 + $0x1838] ss:$24 sps:$4 sm:$0xff]  }
 0x6c7   : > { %v20865_v21 = vpop.f32.mrf.mxu1  ;;  %12791 = vmatmul.mubr.bf16.vlgmr.msra.gmra.mxu1 %v20697_v20 }
 0x6c8   : > { %12841 = vmatpush1.bf16.msra.mxu1 %v18672_v63  ;;  %12872 = vmatprep.mubr.bf16.mxu1 %v20699_v57  ;;  %v18711_v63 = vld [vmem:[#allocation9 + $0x2378] ss:$24 sps:$4 sm:$0xff]  }
 0x6c9   : > { %12972 = vmatpush1.bf16.msra.mxu0 %v18675_v44  ;;  %v20869_v53 = vpop.f32.mrf.mxu1  ;;  %12842 = vmatprep.subr.bf16.mxu1 %v18680_v54  ;;  %v18716_v44 = vld [vmem:[#allocation9 + $0x180c] ss:$24 sps:$4 sm:$0xff]  }
 0x6ca   : > { %12973 = vmatprep.subr.bf16.mxu0 %v18683_v62  ;;  %v18719_v54 = vld [vmem:[#allocation9 + $0x234c] ss:$24 sps:$4 sm:$0xff]   ;;  %v18714_v62 = vld [vmem:[#allocation9 + $0x1808] ss:$24 sps:$4 sm:$0xff]  }
 0x6cb   : > { %v12550_v48 = vpop.f32.mrf.mxu1 }
 0x6cc   : > { %12843 = vmatpush1.bf16.msra.mxu1 %v18678_v58  ;;  %v18717_v58 = vld [vmem:[#allocation9 + $0x2348] ss:$24 sps:$4 sm:$0xff]   ;;  %v18723_v48 = vld [vmem:[#allocation9 + $0x2318] ss:$24 sps:$4 sm:$0xff]  }
 0x6cd   : > { %12974 = vmatpush1.bf16.msra.mxu0 %v18681_v32  ;;  %v12551_v12 = vpop.f32.mrf.mxu1  ;;  %12844 = vmatprep.subr.bf16.mxu1 %v18686_v31  ;;  %v18722_v32 = vld [vmem:[#allocation9 + $0x1adc] ss:$24 sps:$4 sm:$0xff]  }
 0x6ce   : > { %12975 = vmatprep.subr.bf16.mxu0 %v18689_v41  ;;  %v18725_v31 = vld [vmem:[#allocation9 + $0x231c] ss:$24 sps:$4 sm:$0xff]   ;;  %v18720_v41 = vld [vmem:[#allocation9 + $0x1ad8] ss:$24 sps:$4 sm:$0xff]   ;;  %v18731_v12 = vld [vmem:[#allocation9 + $0x22ec] ss:$24 sps:$4 sm:$0xff]  }
 0x6d0   : > { %12845 = vmatpush1.bf16.msra.mxu1 %v18684_v19  ;;  %v18728_v19 = vld [vmem:[#allocation9 + $0x1aac] ss:$24 sps:$4 sm:$0xff]  }
 0x6d1   : > { %12976 = vmatpush1.bf16.msra.mxu0 %v18687_v14  ;;  %12846 = vmatprep.subr.bf16.mxu1 %v18692_v49  ;;  %v18726_v14 = vld [vmem:[#allocation9 + $0x1aa8] ss:$24 sps:$4 sm:$0xff]  }
 0x6d2   : > { %12977 = vmatprep.subr.bf16.mxu0 %v18695_v8  ;;  %v18729_v49 = vld [vmem:[#allocation9 + $0x22e8] ss:$24 sps:$4 sm:$0xff]   ;;  %v18734_v8 = vld [vmem:[#allocation9 + $0x1a7c] ss:$24 sps:$4 sm:$0xff]  }
 0x6d4   : > { %12847 = vmatpush1.bf16.msra.mxu1 %v18690_v52  ;;  %v18737_v52 = vld [vmem:[#allocation9 + $0x22bc] ss:$24 sps:$4 sm:$0xff]  }
 0x6d5   : > { %12978 = vmatpush1.bf16.msra.mxu0 %v18693_v59  ;;  %12848 = vmatprep.subr.bf16.mxu1 %v18698_v61  ;;  %v18732_v59 = vld [vmem:[#allocation9 + $0x1a78] ss:$24 sps:$4 sm:$0xff]  }
 0x6d6   : > { %12979 = vmatprep.subr.bf16.mxu0 %v18701_v33  ;;  %v18735_v61 = vld [vmem:[#allocation9 + $0x22b8] ss:$24 sps:$4 sm:$0xff]   ;;  %v18740_v33 = vld [vmem:[#allocation9 + $0x1a4c] ss:$24 sps:$4 sm:$0xff]  }
 0x6d8   : > { %12849 = vmatpush1.bf16.msra.mxu1 %v18696_v9  ;;  %v18743_v9 = vld [vmem:[#allocation9 + $0x228c] ss:$24 sps:$4 sm:$0xff]  }
 0x6d9   : > { %12980 = vmatpush2.bf16.msra.mxu0 %v18699_v6  ;;  %12850 = vmatprep.subr.bf16.mxu1 %v18704_v45  ;;  %v18738_v6 = vld [vmem:[#allocation9 + $0x1a48] ss:$24 sps:$4 sm:$0xff]  }
 0x6da   : > { %12981 = vmatprep.subr.bf16.mxu0 %v18707_v5  ;;  %v18741_v45 = vld [vmem:[#allocation9 + $0x2288] ss:$24 sps:$4 sm:$0xff]   ;;  %v18746_v5 = vld [vmem:[#allocation9 + $0x1a1c] ss:$24 sps:$4 sm:$0xff]  }
 0x6dc   : > { %12851 = vmatpush1.bf16.msra.mxu1 %v18702_v2  ;;  %v18749_v2 = vld [vmem:[#allocation9 + $0x164] ss:$24 sps:$4 sm:$0xff]  }
 0x6dd   : > { %12982 = vmatpush2.bf16.msra.mxu0 %v18705_v46  ;;  %12852 = vmatprep.subr.bf16.mxu1 %v18710_v35  ;;  %v18744_v46 = vld [vmem:[#allocation9 + $0x1a18] ss:$24 sps:$4 sm:$0xff]  }
 0x6de   : > { %12983 = vmatprep.subr.bf16.mxu0 %v18713_v30  ;;  %v18747_v35 = vld [vmem:[#allocation9 + $0x160] ss:$24 sps:$4 sm:$0xff]   ;;  %v18752_v30 = vld [vmem:[#allocation9 + $0x19ec] ss:$24 sps:$4 sm:$0xff]  }
 0x6e0   : > { %12853 = vmatpush1.bf16.msra.mxu1 %v18708_v39  ;;  %v18755_v39 = vld [vmem:[#allocation9 + $0x134] ss:$24 sps:$4 sm:$0xff]  }
 0x6e1   : > { %12984 = vmatpush2.bf16.msra.mxu0 %v18711_v63  ;;  %12854 = vmatprep.subr.bf16.mxu1 %v18716_v44  ;;  %v18750_v44 = vld [vmem:[#allocation9 + $0x19e8] ss:$24 sps:$4 sm:$0xff]  }
 0x6e2   : > { %12985 = vmatprep.subr.bf16.mxu0 %v18719_v54  ;;  %v18753_v54 = vld [vmem:[#allocation9 + $0x130] ss:$24 sps:$4 sm:$0xff]  }
 0x6e4   : > { %12855 = vmatpush1.bf16.msra.mxu1 %v18714_v62  ;;  %v18758_v62 = vld [vmem:[#allocation9 + $0x19bc] ss:$24 sps:$4 sm:$0xff]  }
 0x6e5   : > { %12986 = vmatpush2.bf16.msra.mxu0 %v18717_v58  ;;  %12856 = vmatprep.subr.bf16.mxu1 %v18722_v32  ;;  %v5959_v58 = vsub.s32 2, %v20731_v17 }
 0x6e6   : > { %12987 = vmatprep.subr.bf16.mxu0 %v18725_v31  ;;  %v18761_v31 = vld [vmem:[#allocation9 + $0x104] ss:$24 sps:$4 sm:$0xff]  }
 0x6e8   : > { %12857 = vmatpush2.bf16.msra.mxu1 %v18720_v41  ;;  %v5963_v41 = vsub.s32 3, %v20731_v17 }
 0x6e9   : > { %12988 = vmatpush2.bf16.msra.mxu0 %v18723_v48  ;;  %12858 = vmatprep.subr.bf16.mxu1 %v18728_v19  ;;  %v18756_v19 = vld [vmem:[#allocation9 + $0x19b8] ss:$24 sps:$4 sm:$0xff]  }
 0x6ea   : > { %12989 = vmatprep.subr.bf16.mxu0 %v18731_v12  ;;  %v18759_v12 = vld [vmem:[#allocation9 + $0x100] ss:$24 sps:$4 sm:$0xff]  }
 0x6ec   : > { %12859 = vmatpush2.bf16.msra.mxu1 %v18726_v14  ;;  %v18764_v14 = vld [vmem:[#allocation9 + $0x198c] ss:$24 sps:$4 sm:$0xff]  }
 0x6ed   : > { %12990 = vmatpush2.bf16.msra.mxu0 %v18729_v49  ;;  %12860 = vmatprep.subr.bf16.mxu1 %v18734_v8  ;;  %v19481_v49 = vld [vmem:[#allocation11] sm:$0x3f] }
 0x6ee   : > { %12991 = vmatprep.subr.bf16.mxu0 %v18737_v52  ;;  %v18767_v52 = vld [vmem:[#allocation9 + $0xd4] ss:$24 sps:$4 sm:$0xff]  }
 0x6f0   : > { %12861 = vmatpush2.bf16.msra.mxu1 %v18732_v59  ;;  %v5964_v59 = vrot.slane %v19481_v49, %v5963_v41 }
 0x6f1   : > { %12992 = vmatpush2.bf16.msra.mxu0 %v18735_v61  ;;  %12862 = vmatprep.subr.bf16.mxu1 %v18740_v33  ;;  %v18762_v61 = vld [vmem:[#allocation9 + $0x1988] ss:$24 sps:$4 sm:$0xff]  }
 0x6f2   : > { %12993 = vmatprep.subr.bf16.mxu0 %v18743_v9  ;;  %v18765_v33 = vld [vmem:[#allocation9 + $0xd0] ss:$24 sps:$4 sm:$0xff]   ;;  %v18770_v9 = vld [vmem:[#allocation9 + $0x1f5c] ss:$24 sps:$4 sm:$0xff]  }
 0x6f4   : > { %12863 = vmatpush2.bf16.msra.mxu1 %v18738_v6 }
 0x6f5   : > { %12994 = vmatpush2.bf16.msra.mxu0 %v18741_v45  ;;  %12864 = vmatprep.subr.bf16.mxu1 %v18746_v5  ;;  %v18773_v45 = vld [vmem:[#allocation9 + $0xa4] ss:$24 sps:$4 sm:$0xff]   ;;  %v12549_v5 = vadd.f32 %v20869_v53, %v5964_v59  ;;  %v18774_v53 = vld [vmem:[#allocation9 + $0x1f28] ss:$24 sps:$4 sm:$0xff]  }
 0x6f6   : > { %13045 = vmatprep.subr.bf16.mxu0 %v18749_v2  ;;  %v18768_v2 = vld [vmem:[#allocation9 + $0x1f58] ss:$24 sps:$4 sm:$0xff]   ;;  %v18797_v59 = vld [vmem:[#allocation9 + $0x2e4] ss:$24 sps:$4 sm:$0xff]  }
 0x6f8   : > { %v20871_v63 = vpop.f32.mrf.mxu0  ;;  %12996 = vmatmul.mubr.bf16.vlgmr.msra.gmra.mxu0 %v20797_v51  ;;  %12865 = vmatpush2.bf16.msra.mxu1 %v18744_v46  ;;  %v18771_v46 = vld [vmem:[#allocation9 + $0xa0] ss:$24 sps:$4 sm:$0xff]  }
 0x6f9   : > { %13046 = vmatpush1.bf16.msra.mxu0 %v18747_v35  ;;  %13077 = vmatprep.mubr.bf16.mxu0 %v20605_v27  ;;  %v5960_v27 = vrot.slane %v19481_v49, %v5959_v58  ;;  %v18776_v35 = vld [vmem:[#allocation9 + $0x1f2c] ss:$24 sps:$4 sm:$0xff]   ;;  %v18777_v58 = vld [vmem:[#allocation9 + $0x70] ss:$24 sps:$4 sm:$0xff]  }
 0x6fa   : > { %v20876_v32 = vpop.f32.mrf.mxu0  ;;  %12866 = vmatprep.subr.bf16.mxu1 %v18752_v30  ;;  %13047 = vmatprep.subr.bf16.mxu0 %v18755_v39  ;;  %v18779_v39 = vld [vmem:[#allocation9 + $0x74] ss:$24 sps:$4 sm:$0xff]  }
 0x6fb   : > { %v12547_v6 = vadd.f32 %v20865_v21, %v5960_v27  ;;  %v12590_v21 = vadd.f32 %v20849_v22, %v12549_v5  ;;  %v18788_v49 = vld [vmem:[#allocation9 + $0x1ecc] ss:$24 sps:$4 sm:$0xff]   ;;  %v18786_v27 = vld [vmem:[#allocation9 + $0x1ec8] ss:$24 sps:$4 sm:$0xff]  }
 0x6fc   : > { %v12755_v48 = vpop.f32.mrf.mxu0  ;;  %12867 = vmatpush2.bf16.msra.mxu1 %v18750_v44  ;;  %v18791_v22 = vld [vmem:[#allocation9 + $0x14] ss:$24 sps:$4 sm:$0xff]   ;;  %v18801_v5 = vld [vmem:[#allocation9 + $0x2b0] ss:$24 sps:$4 sm:$0xff]  }
 0x6fd   : > { %13048 = vmatpush1.bf16.msra.mxu0 %v18753_v54  ;;  %12868 = vmatprep.subr.bf16.mxu1 %v18758_v62  ;;  %v12588_v30 = vadd.f32 %v20845_v7, %v12547_v6  ;;  %v18785_v7 = vld [vmem:[#allocation9 + $0x44] ss:$24 sps:$4 sm:$0xff]   ;;  %v18803_v6 = vld [vmem:[#allocation9 + $0x2b4] ss:$24 sps:$4 sm:$0xff]  }
 0x6fe   : > { %v12756_v8 = vpop.f32.mrf.mxu0  ;;  %13049 = vmatprep.subr.bf16.mxu0 %v18761_v31  ;;  %v18782_v31 = vld [vmem:[#allocation9 + $0x1efc] ss:$24 sps:$4 sm:$0xff]  }
 0x6ff   : > { %v18789_v8 = vld [vmem:[#allocation9 + $0x10] ss:$24 sps:$4 sm:$0xff]  }
 0x700   : > { %12869 = vmatpush2.bf16.msra.mxu1 %v18756_v19  ;;  %v18780_v19 = vld [vmem:[#allocation9 + $0x1ef8] ss:$24 sps:$4 sm:$0xff]  }
 0x701   : > { %13050 = vmatpush1.bf16.msra.mxu0 %v18759_v12  ;;  %12870 = vmatprep.subr.bf16.mxu1 %v18764_v14  ;;  %v18783_v14 = vld [vmem:[#allocation9 + $0x40] ss:$24 sps:$4 sm:$0xff]  }
 0x702   : > { %13051 = vmatprep.subr.bf16.mxu0 %v18767_v52  ;;  %v18794_v52 = vld [vmem:[#allocation9 + $0x1e9c] ss:$24 sps:$4 sm:$0xff]  }
 0x704   : > { %12871 = vmatpush2.bf16.msra.mxu1 %v18762_v61  ;;  %v18792_v61 = vld [vmem:[#allocation9 + $0x1e98] ss:$24 sps:$4 sm:$0xff]  }
 0x705   : > { %13052 = vmatpush1.bf16.msra.mxu0 %v18765_v33  ;;  %12922 = vmatprep.subr.bf16.mxu1 %v18770_v9  ;;  %v18795_v33 = vld [vmem:[#allocation9 + $0x2e0] ss:$24 sps:$4 sm:$0xff]   ;;  %v18800_v9 = vld [vmem:[#allocation9 + $0x1e6c] ss:$24 sps:$4 sm:$0xff]  }
 0x706   : > { %13053 = vmatprep.subr.bf16.mxu0 %v18773_v45  ;;  %v18798_v45 = vld [vmem:[#allocation9 + $0x1e68] ss:$24 sps:$4 sm:$0xff]  }
 0x707   : > { %v12628_v44 = vpop.f32.mrf.mxu1  ;;  %12873 = vmatmul.mubr.bf16.vlgmr.msra.gmra.mxu1 %v20721_v23 }
 0x708   : > { %v20883_v54 = vadd.f32 %v12628_v44, %v12588_v30  ;;  %12923 = vmatpush1.bf16.msra.mxu1 %v18768_v2  ;;  %12954 = vmatprep.mubr.bf16.mxu1 %v20723_v38  ;;  %v18806_v2 = vld [vmem:[#allocation9 + $0x1e3c] ss:$24 sps:$4 sm:$0xff]   ;;  %v18807_v30 = vld [vmem:[#allocation9 + $0x280] ss:$24 sps:$4 sm:$0xff]  }
 0x709   : > { %13054 = vmatpush1.bf16.msra.mxu0 %v18771_v46  ;;  %v12630_v62 = vpop.f32.mrf.mxu1  ;;  %12924 = vmatprep.subr.bf16.mxu1 %v18776_v35  ;;  %v18809_v46 = vld [vmem:[#allocation9 + $0x284] ss:$24 sps:$4 sm:$0xff]   ;;  %v18804_v35 = vld [vmem:[#allocation9 + $0x1e38] ss:$24 sps:$4 sm:$0xff]   ;;  %v18815_v44 = vld [vmem:[#allocation9 + $0x254] ss:$24 sps:$4 sm:$0xff]  }
 0x70a   : > { %v20887_v41 = vadd.f32 %v12630_v62, %v12590_v21  ;;  %13055 = vmatprep.subr.bf16.mxu0 %v18779_v39  ;;  %v18812_v39 = vld [vmem:[#allocation9 + $0x1e0c] ss:$24 sps:$4 sm:$0xff]   ;;  %v18810_v21 = vld [vmem:[#allocation9 + $0x1e08] ss:$24 sps:$4 sm:$0xff]   ;;  %v18818_v62 = vld [vmem:[#allocation9 + $0x20dc] ss:$24 sps:$4 sm:$0xff]  }
 0x70b   : > { %v12632_v48 = vpop.f32.mrf.mxu1 }
 0x70c   : > { %12925 = vmatpush1.bf16.msra.mxu1 %v18774_v53  ;;  %v18813_v53 = vld [vmem:[#allocation9 + $0x250] ss:$24 sps:$4 sm:$0xff]   ;;  %v18824_v48 = vld [vmem:[#allocation9 + $0x20ac] ss:$24 sps:$4 sm:$0xff]  }
 0x70d   : > { %13056 = vmatpush1.bf16.msra.mxu0 %v18777_v58  ;;  %v12633_v12 = vpop.f32.mrf.mxu1  ;;  %12926 = vmatprep.subr.bf16.mxu1 %v18782_v31  ;;  %v18821_v58 = vld [vmem:[#allocation9 + $0x224] ss:$24 sps:$4 sm:$0xff]   ;;  %v18816_v31 = vld [vmem:[#allocation9 + $0x20d8] ss:$24 sps:$4 sm:$0xff]  }
 0x70e   : > { %13057 = vmatprep.subr.bf16.mxu0 %v18785_v7  ;;  %v18819_v7 = vld [vmem:[#allocation9 + $0x220] ss:$24 sps:$4 sm:$0xff]  }
 0x70f   : > { %v18822_v12 = vld [vmem:[#allocation9 + $0x20a8] ss:$24 sps:$4 sm:$0xff]  }
 0x710   : > { %12927 = vmatpush1.bf16.msra.mxu1 %v18780_v19  ;;  %v18827_v19 = vld [vmem:[#allocation9 + $0x1f4] ss:$24 sps:$4 sm:$0xff]  }
 0x711   : > { %13058 = vmatpush1.bf16.msra.mxu0 %v18783_v14  ;;  %12928 = vmatprep.subr.bf16.mxu1 %v18788_v49  ;;  %v18825_v14 = vld [vmem:[#allocation9 + $0x1f0] ss:$24 sps:$4 sm:$0xff]   ;;  %v18830_v49 = vld [vmem:[#allocation9 + $0x207c] ss:$24 sps:$4 sm:$0xff]  }
 0x712   : > { %13059 = vmatprep.subr.bf16.mxu0 %v18791_v22  ;;  %v18833_v22 = vld [vmem:[#allocation9 + $0x1c4] ss:$24 sps:$4 sm:$0xff]  }
 0x714   : > { %12929 = vmatpush1.bf16.msra.mxu1 %v18786_v27  ;;  %v18828_v27 = vld [vmem:[#allocation9 + $0x2078] ss:$24 sps:$4 sm:$0xff]  }
 0x715   : > { %13060 = vmatpush1.bf16.msra.mxu0 %v18789_v8  ;;  %12930 = vmatprep.subr.bf16.mxu1 %v18794_v52  ;;  %v18831_v8 = vld [vmem:[#allocation9 + $0x1c0] ss:$24 sps:$4 sm:$0xff]   ;;  %v18836_v52 = vld [vmem:[#allocation9 + $0x204c] ss:$24 sps:$4 sm:$0xff]  }
 0x716   : > { %13061 = vmatprep.subr.bf16.mxu0 %v18797_v59  ;;  %v18839_v59 = vld [vmem:[#allocation9 + $0x194] ss:$24 sps:$4 sm:$0xff]  }
 0x718   : > { %12931 = vmatpush1.bf16.msra.mxu1 %v18792_v61  ;;  %v18834_v61 = vld [vmem:[#allocation9 + $0x2048] ss:$24 sps:$4 sm:$0xff]  }
 0x719   : > { %13062 = vmatpush2.bf16.msra.mxu0 %v18795_v33  ;;  %12932 = vmatprep.subr.bf16.mxu1 %v18800_v9  ;;  %v18837_v33 = vld [vmem:[#allocation9 + $0x190] ss:$24 sps:$4 sm:$0xff]   ;;  %v18842_v9 = vld [vmem:[#allocation9 + $0x201c] ss:$24 sps:$4 sm:$0xff]  }
 0x71a   : > { %13063 = vmatprep.subr.bf16.mxu0 %v18803_v6  ;;  %v18845_v6 = vld [vmem:[#allocation9 + $0x764] ss:$24 sps:$4 sm:$0xff]  }
 0x71c   : > { %12933 = vmatpush1.bf16.msra.mxu1 %v18798_v45  ;;  %v18840_v45 = vld [vmem:[#allocation9 + $0x2018] ss:$24 sps:$4 sm:$0xff]  }
 0x71d   : > { %13064 = vmatpush2.bf16.msra.mxu0 %v18801_v5  ;;  %12934 = vmatprep.subr.bf16.mxu1 %v18806_v2  ;;  %v18843_v5 = vld [vmem:[#allocation9 + $0x760] ss:$24 sps:$4 sm:$0xff]   ;;  %v18848_v2 = vld [vmem:[#allocation9 + $0x1fec] ss:$24 sps:$4 sm:$0xff]  }
 0x71e   : > { %13065 = vmatprep.subr.bf16.mxu0 %v18809_v46  ;;  %v18851_v46 = vld [vmem:[#allocation9 + $0x734] ss:$24 sps:$4 sm:$0xff]  }
 0x720   : > { %12935 = vmatpush1.bf16.msra.mxu1 %v18804_v35 }
 0x721   : > { %13066 = vmatpush2.bf16.msra.mxu0 %v18807_v30  ;;  %12936 = vmatprep.subr.bf16.mxu1 %v18812_v39  ;;  %v18846_v30 = vld [vmem:[#allocation9 + $0x1fe8] ss:$24 sps:$4 sm:$0xff]  }
 0x722   : > { %13067 = vmatprep.subr.bf16.mxu0 %v18815_v44  ;;  %v18849_v39 = vld [vmem:[#allocation9 + $0x730] ss:$24 sps:$4 sm:$0xff]   ;;  %v18854_v44 = vld [vmem:[#allocation9 + $0x1fbc] ss:$24 sps:$4 sm:$0xff]  }
 0x724   : > { %12937 = vmatpush1.bf16.msra.mxu1 %v18810_v21 }
 0x725   : > { %13068 = vmatpush2.bf16.msra.mxu0 %v18813_v53  ;;  %12938 = vmatprep.subr.bf16.mxu1 %v18818_v62  ;;  %v18857_v53 = vld [vmem:[#allocation9 + $0x704] ss:$24 sps:$4 sm:$0xff]  }
 0x726   : > { %13069 = vmatprep.subr.bf16.mxu0 %v18821_v58  ;;  %v18852_v58 = vld [vmem:[#allocation9 + $0x1fb8] ss:$24 sps:$4 sm:$0xff]  }
 0x728   : > { %12939 = vmatpush2.bf16.msra.mxu1 %v18816_v31  ;;  %v18855_v31 = vld [vmem:[#allocation9 + $0x700] ss:$24 sps:$4 sm:$0xff]  }
 0x729   : > { %13070 = vmatpush2.bf16.msra.mxu0 %v18819_v7  ;;  %12940 = vmatprep.subr.bf16.mxu1 %v18824_v48  ;;  %v18860_v7 = vld [vmem:[#allocation9 + $0x1f8c] ss:$24 sps:$4 sm:$0xff]  }
 0x72a   : > { %13071 = vmatprep.subr.bf16.mxu0 %v18827_v19  ;;  %v18863_v48 = vld [vmem:[#allocation9 + $0x6d4] ss:$24 sps:$4 sm:$0xff]   ;;  %v18858_v19 = vld [vmem:[#allocation9 + $0x1f88] ss:$24 sps:$4 sm:$0xff]  }
 0x72c   : > { %12941 = vmatpush2.bf16.msra.mxu1 %v18822_v12  ;;  %v18866_v12 = vld [vmem:[#allocation9 + $0x255c] ss:$24 sps:$4 sm:$0xff]  }
 0x72d   : > { %13072 = vmatpush2.bf16.msra.mxu0 %v18825_v14  ;;  %12942 = vmatprep.subr.bf16.mxu1 %v18830_v49  ;;  %v18869_v14 = vld [vmem:[#allocation9 + $0x6a4] ss:$24 sps:$4 sm:$0xff]   ;;  %v18864_v49 = vld [vmem:[#allocation9 + $0x2558] ss:$24 sps:$4 sm:$0xff]  }
 0x72e   : > { %13073 = vmatprep.subr.bf16.mxu0 %v18833_v22  ;;  %v18867_v22 = vld [vmem:[#allocation9 + $0x6a0] ss:$24 sps:$4 sm:$0xff]  }
 0x730   : > { %12943 = vmatpush2.bf16.msra.mxu1 %v18828_v27  ;;  %v18872_v27 = vld [vmem:[#allocation9 + $0x252c] ss:$24 sps:$4 sm:$0xff]  }
 0x731   : > { %13074 = vmatpush2.bf16.msra.mxu0 %v18831_v8  ;;  %12944 = vmatprep.subr.bf16.mxu1 %v18836_v52  ;;  %v12670_v8 = vadd.f32 %v20859_v0, %v20883_v54  ;;  %v18875_v52 = vld [vmem:[#allocation9 + $0x674] ss:$24 sps:$4 sm:$0xff]   ;;  %v18881_v54 = vld [vmem:[#allocation9 + $0x644] ss:$24 sps:$4 sm:$0xff]  }
 0x732   : > { %13075 = vmatprep.subr.bf16.mxu0 %v18839_v59 }
 0x734   : > { %12945 = vmatpush2.bf16.msra.mxu1 %v18834_v61 }
 0x735   : > { %13076 = vmatpush2.bf16.msra.mxu0 %v18837_v33  ;;  %12946 = vmatprep.subr.bf16.mxu1 %v18842_v9  ;;  %v12672_v33 = vadd.f32 %v20863_v26, %v20887_v41  ;;  %v18870_v9 = vld [vmem:[#allocation9 + $0x2528] ss:$24 sps:$4 sm:$0xff]   ;;  %v18884_v26 = vld [vmem:[#allocation9 + $0x24cc] ss:$24 sps:$4 sm:$0xff]  }
 0x736   : > { %13127 = vmatprep.subr.bf16.mxu0 %v18845_v6  ;;  %v18887_v41 = vld [vmem:[#allocation9 + $0x614] ss:$24 sps:$4 sm:$0xff]  }
 0x738   : > { %v20889_v35 = vpop.f32.mrf.mxu0  ;;  %13078 = vmatmul.mubr.bf16.vlgmr.msra.gmra.mxu0 %v20607_v55  ;;  %12947 = vmatpush2.bf16.msra.mxu1 %v18840_v45  ;;  %v18873_v45 = vld [vmem:[#allocation9 + $0x670] ss:$24 sps:$4 sm:$0xff]  }
 0x739   : > { %13128 = vmatpush1.bf16.msra.mxu0 %v18843_v5  ;;  %13159 = vmatprep.mubr.bf16.mxu0 %v20619_v47  ;;  %v18861_v47 = vld [vmem:[#allocation9 + $0x6d0] ss:$24 sps:$4 sm:$0xff]   ;;  %v18878_v5 = vld [vmem:[#allocation9 + $0x24fc] ss:$24 sps:$4 sm:$0xff]  }
 0x73a   : > { %v20893_v21 = vpop.f32.mrf.mxu0  ;;  %12948 = vmatprep.subr.bf16.mxu1 %v18848_v2  ;;  %13129 = vmatprep.subr.bf16.mxu0 %v18851_v46  ;;  %v18876_v46 = vld [vmem:[#allocation9 + $0x24f8] ss:$24 sps:$4 sm:$0xff]  }
 0x73c   : > { %v12837_v62 = vpop.f32.mrf.mxu0  ;;  %12949 = vmatpush2.bf16.msra.mxu1 %v18846_v30 }
 0x73d   : > { %13130 = vmatpush1.bf16.msra.mxu0 %v18849_v39  ;;  %12950 = vmatprep.subr.bf16.mxu1 %v18854_v44  ;;  %v18879_v39 = vld [vmem:[#allocation9 + $0x640] ss:$24 sps:$4 sm:$0xff]   ;;  %v18890_v62 = vld [vmem:[#allocation9 + $0x249c] ss:$24 sps:$4 sm:$0xff]  }
 0x73e   : > { %v12838_v55 = vpop.f32.mrf.mxu0  ;;  %13131 = vmatprep.subr.bf16.mxu0 %v18857_v53  ;;  %v18882_v44 = vld [vmem:[#allocation9 + $0x24c8] ss:$24 sps:$4 sm:$0xff]  }
 0x73f   : > { %v18885_v53 = vld [vmem:[#allocation9 + $0x610] ss:$24 sps:$4 sm:$0xff]   ;;  %v18896_v55 = vld [vmem:[#allocation9 + $0x246c] ss:$24 sps:$4 sm:$0xff]  }
 0x740   : > { %12951 = vmatpush2.bf16.msra.mxu1 %v18852_v58  ;;  %v18893_v58 = vld [vmem:[#allocation9 + $0x8e4] ss:$24 sps:$4 sm:$0xff]  }
 0x741   : > { %13132 = vmatpush1.bf16.msra.mxu0 %v18855_v31  ;;  %12952 = vmatprep.subr.bf16.mxu1 %v18860_v7  ;;  %v18888_v31 = vld [vmem:[#allocation9 + $0x2498] ss:$24 sps:$4 sm:$0xff]  }
 0x742   : > { %13133 = vmatprep.subr.bf16.mxu0 %v18863_v48  ;;  %v18891_v7 = vld [vmem:[#allocation9 + $0x8e0] ss:$24 sps:$4 sm:$0xff]   ;;  %v18899_v48 = vld [vmem:[#allocation9 + $0x8b4] ss:$24 sps:$4 sm:$0xff]  }
 0x744   : > { %12953 = vmatpush2.bf16.msra.mxu1 %v18858_v19  ;;  %v18894_v19 = vld [vmem:[#allocation9 + $0x2468] ss:$24 sps:$4 sm:$0xff]  }
 0x745   : > { %13134 = vmatpush1.bf16.msra.mxu0 %v18861_v47  ;;  %13004 = vmatprep.subr.bf16.mxu1 %v18866_v12  ;;  %v18897_v47 = vld [vmem:[#allocation9 + $0x8b0] ss:$24 sps:$4 sm:$0xff]   ;;  %v18902_v12 = vld [vmem:[#allocation9 + $0x243c] ss:$24 sps:$4 sm:$0xff]  }
 0x746   : > { %13135 = vmatprep.subr.bf16.mxu0 %v18869_v14  ;;  %v18905_v14 = vld [vmem:[#allocation9 + $0x884] ss:$24 sps:$4 sm:$0xff]  }
 0x747   : > { %v12710_v59 = vpop.f32.mrf.mxu1  ;;  %12955 = vmatmul.mubr.bf16.vlgmr.msra.gmra.mxu1 %v20757_v36 }
 0x748   : > { %v20898_v61 = vadd.f32 %v12710_v59, %v12670_v8  ;;  %13005 = vmatpush1.bf16.msra.mxu1 %v18864_v49  ;;  %13036 = vmatprep.mubr.bf16.mxu1 %v19758_v37  ;;  %v18900_v49 = vld [vmem:[#allocation9 + $0x2438] ss:$24 sps:$4 sm:$0xff]   ;;  %v18911_v8 = vld [vmem:[#allocation9 + $0x854] ss:$24 sps:$4 sm:$0xff]  }
 0x749   : > { %13136 = vmatpush1.bf16.msra.mxu0 %v18867_v22  ;;  %v12712_v6 = vpop.f32.mrf.mxu1  ;;  %13006 = vmatprep.subr.bf16.mxu1 %v18872_v27  ;;  %v18903_v22 = vld [vmem:[#allocation9 + $0x880] ss:$24 sps:$4 sm:$0xff]   ;;  %v18908_v27 = vld [vmem:[#allocation9 + $0x240c] ss:$24 sps:$4 sm:$0xff]   ;;  %v18909_v59 = vld [vmem:[#allocation9 + $0x850] ss:$24 sps:$4 sm:$0xff]  }
 0x74a   : > { %v20903_v0 = vadd.f32 %v12712_v6, %v12672_v33  ;;  %13137 = vmatprep.subr.bf16.mxu0 %v18875_v52  ;;  %v18906_v52 = vld [vmem:[#allocation9 + $0x2408] ss:$24 sps:$4 sm:$0xff]   ;;  %v18914_v33 = vld [vmem:[#allocation9 + $0x464] ss:$24 sps:$4 sm:$0xff]  }
 0x74b   : > { %v12714_v2 = vpop.f32.mrf.mxu1  ;;  %v18912_v6 = vld [vmem:[#allocation9 + $0x460] ss:$24 sps:$4 sm:$0xff]  }
 0x74c   : > { %13007 = vmatpush1.bf16.msra.mxu1 %v18870_v9  ;;  %v18917_v9 = vld [vmem:[#allocation9 + $0x824] ss:$24 sps:$4 sm:$0xff]   ;;  %v18918_v2 = vld [vmem:[#allocation9 + $0x430] ss:$24 sps:$4 sm:$0xff]  }
 0x74d   : > { %13138 = vmatpush1.bf16.msra.mxu0 %v18873_v45  ;;  %v12715_v30 = vpop.f32.mrf.mxu1  ;;  %13008 = vmatprep.subr.bf16.mxu1 %v18878_v5  ;;  %v18915_v45 = vld [vmem:[#allocation9 + $0x820] ss:$24 sps:$4 sm:$0xff]   ;;  %v18920_v5 = vld [vmem:[#allocation9 + $0x434] ss:$24 sps:$4 sm:$0xff]  }
 0x74e   : > { %13139 = vmatprep.subr.bf16.mxu0 %v18881_v54  ;;  %v18923_v54 = vld [vmem:[#allocation9 + $0x7f4] ss:$24 sps:$4 sm:$0xff]   ;;  %v18926_v30 = vld [vmem:[#allocation9 + $0x404] ss:$24 sps:$4 sm:$0xff]  }
 0x750   : > { %13009 = vmatpush1.bf16.msra.mxu1 %v18876_v46  ;;  %v18921_v46 = vld [vmem:[#allocation9 + $0x7f0] ss:$24 sps:$4 sm:$0xff]  }
 0x751   : > { %13140 = vmatpush1.bf16.msra.mxu0 %v18879_v39  ;;  %13010 = vmatprep.subr.bf16.mxu1 %v18884_v26  ;;  %v18929_v39 = vld [vmem:[#allocation9 + $0x7c4] ss:$24 sps:$4 sm:$0xff]   ;;  %v18924_v26 = vld [vmem:[#allocation9 + $0x400] ss:$24 sps:$4 sm:$0xff]  }
 0x752   : > { %13141 = vmatprep.subr.bf16.mxu0 %v18887_v41  ;;  %v18927_v41 = vld [vmem:[#allocation9 + $0x7c0] ss:$24 sps:$4 sm:$0xff]  }
 0x754   : > { %13011 = vmatpush1.bf16.msra.mxu1 %v18882_v44  ;;  %v18932_v44 = vld [vmem:[#allocation9 + $0x3d4] ss:$24 sps:$4 sm:$0xff]  }
 0x755   : > { %13142 = vmatpush1.bf16.msra.mxu0 %v18885_v53  ;;  %13012 = vmatprep.subr.bf16.mxu1 %v18890_v62  ;;  %v18935_v53 = vld [vmem:[#allocation9 + $0x794] ss:$24 sps:$4 sm:$0xff]   ;;  %v18930_v62 = vld [vmem:[#allocation9 + $0x3d0] ss:$24 sps:$4 sm:$0xff]  }
 0x756   : > { %13143 = vmatprep.subr.bf16.mxu0 %v18893_v58  ;;  %v18938_v58 = vld [vmem:[#allocation9 + $0x3a4] ss:$24 sps:$4 sm:$0xff]  }
 0x758   : > { %13013 = vmatpush1.bf16.msra.mxu1 %v18888_v31  ;;  %v18941_v31 = vld [vmem:[#allocation9 + $0xd64] ss:$24 sps:$4 sm:$0xff]  }
 0x759   : > { %13144 = vmatpush2.bf16.msra.mxu0 %v18891_v7  ;;  %13014 = vmatprep.subr.bf16.mxu1 %v18896_v55  ;;  %v18936_v7 = vld [vmem:[#allocation9 + $0x3a0] ss:$24 sps:$4 sm:$0xff]  }
 0x75a   : > { %13145 = vmatprep.subr.bf16.mxu0 %v18899_v48  ;;  %v18939_v55 = vld [vmem:[#allocation9 + $0xd60] ss:$24 sps:$4 sm:$0xff]   ;;  %v18944_v48 = vld [vmem:[#allocation9 + $0x374] ss:$24 sps:$4 sm:$0xff]  }
 0x75c   : > { %13015 = vmatpush1.bf16.msra.mxu1 %v18894_v19  ;;  %v18947_v19 = vld [vmem:[#allocation9 + $0xd34] ss:$24 sps:$4 sm:$0xff]  }
 0x75d   : > { %13146 = vmatpush2.bf16.msra.mxu0 %v18897_v47  ;;  %13016 = vmatprep.subr.bf16.mxu1 %v18902_v12  ;;  %v18942_v12 = vld [vmem:[#allocation9 + $0x370] ss:$24 sps:$4 sm:$0xff]  }
 0x75e   : > { %13147 = vmatprep.subr.bf16.mxu0 %v18905_v14  ;;  %v18945_v14 = vld [vmem:[#allocation9 + $0xd30] ss:$24 sps:$4 sm:$0xff]  }
 0x760   : > { %13017 = vmatpush1.bf16.msra.mxu1 %v18900_v49  ;;  %v18950_v49 = vld [vmem:[#allocation9 + $0x344] ss:$24 sps:$4 sm:$0xff]  }
 0x761   : > { %13148 = vmatpush2.bf16.msra.mxu0 %v18903_v22  ;;  %13018 = vmatprep.subr.bf16.mxu1 %v18908_v27  ;;  %v18953_v27 = vld [vmem:[#allocation9 + $0xd04] ss:$24 sps:$4 sm:$0xff]  }
 0x762   : > { %13149 = vmatprep.subr.bf16.mxu0 %v18911_v8 }
 0x764   : > { %13019 = vmatpush1.bf16.msra.mxu1 %v18906_v52  ;;  %v18948_v52 = vld [vmem:[#allocation9 + $0x340] ss:$24 sps:$4 sm:$0xff]  }
 0x765   : > { %13150 = vmatpush2.bf16.msra.mxu0 %v18909_v59  ;;  %13086 = vmatprep.subr.bf16.mxu1 %v18914_v33  ;;  %v18951_v59 = vld [vmem:[#allocation9 + $0xd00] ss:$24 sps:$4 sm:$0xff]   ;;  %v18956_v33 = vld [vmem:[#allocation9 + $0x314] ss:$24 sps:$4 sm:$0xff]  }
 0x766   : > { %13151 = vmatprep.subr.bf16.mxu0 %v18917_v9  ;;  %v18959_v9 = vld [vmem:[#allocation9 + $0xcd4] ss:$24 sps:$4 sm:$0xff]  }
 0x767   : > { %13037 = vmatmul.mubr.bf16.vlgmr.msra.gmra.mxu1 %v20767_v1 }
 0x768   : > { %13087 = vmatpush1.bf16.msra.mxu1 %v18912_v6  ;;  %13118 = vmatprep.mubr.bf16.mxu1 %v20612_v25  ;;  %v18933_v25 = vld [vmem:[#allocation9 + $0x790] ss:$24 sps:$4 sm:$0xff]  }
 0x769   : > { %13152 = vmatpush2.bf16.msra.mxu0 %v18915_v45  ;;  %13088 = vmatprep.subr.bf16.mxu1 %v18920_v5  ;;  %v18954_v6 = vld [vmem:[#allocation9 + $0x310] ss:$24 sps:$4 sm:$0xff]   ;;  %v18962_v45 = vld [vmem:[#allocation9 + $0x5e4] ss:$24 sps:$4 sm:$0xff]  }
 0x76a   : > { %13153 = vmatprep.subr.bf16.mxu0 %v18923_v54  ;;  %v18965_v5 = vld [vmem:[#allocation9 + $0xca4] ss:$24 sps:$4 sm:$0xff]   ;;  %v18960_v54 = vld [vmem:[#allocation9 + $0x5e0] ss:$24 sps:$4 sm:$0xff]  }
 0x76c   : > { %13089 = vmatpush1.bf16.msra.mxu1 %v18918_v2  ;;  %v18963_v2 = vld [vmem:[#allocation9 + $0xca0] ss:$24 sps:$4 sm:$0xff]  }
 0x76d   : > { %13154 = vmatpush2.bf16.msra.mxu0 %v18921_v46  ;;  %13090 = vmatprep.subr.bf16.mxu1 %v18926_v30  ;;  %v18968_v46 = vld [vmem:[#allocation9 + $0x5b4] ss:$24 sps:$4 sm:$0xff]   ;;  %v12752_v30 = vadd.f32 %v20871_v63, %v20898_v61  ;;  %v18972_v61 = vld [vmem:[#allocation9 + $0x580] ss:$24 sps:$4 sm:$0xff]  }
 0x76e   : > { %13155 = vmatprep.subr.bf16.mxu0 %v18929_v39  ;;  %v18971_v39 = vld [vmem:[#allocation9 + $0xc74] ss:$24 sps:$4 sm:$0xff]  }
 0x770   : > { %13091 = vmatpush1.bf16.msra.mxu1 %v18924_v26 }
 0x771   : > { %13156 = vmatpush2.bf16.msra.mxu0 %v18927_v41  ;;  %13092 = vmatprep.subr.bf16.mxu1 %v18932_v44  ;;  %v12754_v44 = vadd.f32 %v20876_v32, %v20903_v0  ;;  %v18983_v32 = vld [vmem:[#allocation9 + $0xc14] ss:$24 sps:$4 sm:$0xff]   ;;  %v18978_v0 = vld [vmem:[#allocation9 + $0x550] ss:$24 sps:$4 sm:$0xff]  }
 0x772   : > { %13157 = vmatprep.subr.bf16.mxu0 %v18935_v53  ;;  %v18966_v53 = vld [vmem:[#allocation9 + $0x5b0] ss:$24 sps:$4 sm:$0xff]  }
 0x774   : > { %13093 = vmatpush1.bf16.msra.mxu1 %v18930_v62 }
 0x775   : > { %13158 = vmatpush2.bf16.msra.mxu0 %v18933_v25  ;;  %13094 = vmatprep.subr.bf16.mxu1 %v18938_v58  ;;  %v18969_v25 = vld [vmem:[#allocation9 + $0xc70] ss:$24 sps:$4 sm:$0xff]   ;;  %v18974_v58 = vld [vmem:[#allocation9 + $0x584] ss:$24 sps:$4 sm:$0xff]  }
 0x776   : > { %13209 = vmatprep.subr.bf16.mxu0 %v18941_v31 }
 0x778   : > { %v20907_v47 = vpop.f32.mrf.mxu0  ;;  %13160 = vmatmul.mubr.bf16.vlgmr.msra.gmra.mxu0 %v20621_v16  ;;  %13095 = vmatpush1.bf16.msra.mxu1 %v18936_v7  ;;  %v18977_v7 = vld [vmem:[#allocation9 + $0xc44] ss:$24 sps:$4 sm:$0xff]  }
 0x779   : > { %13210 = vmatpush1.bf16.msra.mxu0 %v18939_v55  ;;  %13241 = vmatprep.mubr.bf16.mxu0 %v20632_v34  ;;  %v18957_v34 = vld [vmem:[#allocation9 + $0xcd0] ss:$24 sps:$4 sm:$0xff]  }
 0x77a   : > { %v20911_v22 = vpop.f32.mrf.mxu0  ;;  %13096 = vmatprep.subr.bf16.mxu1 %v18944_v48  ;;  %13211 = vmatprep.subr.bf16.mxu0 %v18947_v19  ;;  %v18975_v48 = vld [vmem:[#allocation9 + $0xc40] ss:$24 sps:$4 sm:$0xff]   ;;  %v18980_v19 = vld [vmem:[#allocation9 + $0x554] ss:$24 sps:$4 sm:$0xff]  }
 0x77c   : > { %v12919_v8 = vpop.f32.mrf.mxu0  ;;  %13097 = vmatpush1.bf16.msra.mxu1 %v18942_v12  ;;  %v18981_v12 = vld [vmem:[#allocation9 + $0xc10] ss:$24 sps:$4 sm:$0xff]  }
 0x77d   : > { %13212 = vmatpush1.bf16.msra.mxu0 %v18945_v14  ;;  %13098 = vmatprep.subr.bf16.mxu1 %v18950_v49  ;;  %v18986_v14 = vld [vmem:[#allocation9 + $0x524] ss:$24 sps:$4 sm:$0xff]   ;;  %v18987_v8 = vld [vmem:[#allocation9 + $0xee0] ss:$24 sps:$4 sm:$0xff]  }
 0x77e   : > { %v12920_v16 = vpop.f32.mrf.mxu0  ;;  %13213 = vmatprep.subr.bf16.mxu0 %v18953_v27  ;;  %v18989_v49 = vld [vmem:[#allocation9 + $0xee4] ss:$24 sps:$4 sm:$0xff]   ;;  %v18984_v27 = vld [vmem:[#allocation9 + $0x520] ss:$24 sps:$4 sm:$0xff]  }
 0x77f   : > { %v18993_v16 = vld [vmem:[#allocation9 + $0xeb0] ss:$24 sps:$4 sm:$0xff]  }
 0x780   : > { %13099 = vmatpush1.bf16.msra.mxu1 %v18948_v52  ;;  %v18992_v52 = vld [vmem:[#allocation9 + $0x4f4] ss:$24 sps:$4 sm:$0xff]  }
 0x781   : > { %13214 = vmatpush1.bf16.msra.mxu0 %v18951_v59  ;;  %13100 = vmatprep.subr.bf16.mxu1 %v18956_v33  ;;  %v18995_v59 = vld [vmem:[#allocation9 + $0xeb4] ss:$24 sps:$4 sm:$0xff]   ;;  %v18990_v33 = vld [vmem:[#allocation9 + $0x4f0] ss:$24 sps:$4 sm:$0xff]  }
 0x782   : > { %13215 = vmatprep.subr.bf16.mxu0 %v18959_v9  ;;  %v18998_v9 = vld [vmem:[#allocation9 + $0x4c4] ss:$24 sps:$4 sm:$0xff]  }
 0x784   : > { %13101 = vmatpush1.bf16.msra.mxu1 %v18954_v6  ;;  %v19001_v6 = vld [vmem:[#allocation9 + $0xe84] ss:$24 sps:$4 sm:$0xff]  }
 0x785   : > { %13216 = vmatpush1.bf16.msra.mxu0 %v18957_v34  ;;  %13102 = vmatprep.subr.bf16.mxu1 %v18962_v45  ;;  %v18996_v34 = vld [vmem:[#allocation9 + $0x4c0] ss:$24 sps:$4 sm:$0xff]  }
 0x786   : > { %13217 = vmatprep.subr.bf16.mxu0 %v18965_v5  ;;  %v18999_v45 = vld [vmem:[#allocation9 + $0xe80] ss:$24 sps:$4 sm:$0xff]   ;;  %v19004_v5 = vld [vmem:[#allocation9 + $0x494] ss:$24 sps:$4 sm:$0xff]  }
 0x787   : > { %v12792_v26 = vpop.f32.mrf.mxu1 }
 0x788   : > { %v20915_v41 = vadd.f32 %v12792_v26, %v12752_v30  ;;  %13103 = vmatpush2.bf16.msra.mxu1 %v18960_v54  ;;  %v19007_v54 = vld [vmem:[#allocation9 + $0xe54] ss:$24 sps:$4 sm:$0xff]   ;;  %v19010_v30 = vld [vmem:[#allocation9 + $0xa64] ss:$24 sps:$4 sm:$0xff]   ;;  %v19008_v26 = vld [vmem:[#allocation9 + $0xa60] ss:$24 sps:$4 sm:$0xff]  }
 0x789   : > { %13218 = vmatpush1.bf16.msra.mxu0 %v18963_v2  ;;  %v12794_v62 = vpop.f32.mrf.mxu1  ;;  %13104 = vmatprep.subr.bf16.mxu1 %v18968_v46  ;;  %v19002_v2 = vld [vmem:[#allocation9 + $0x490] ss:$24 sps:$4 sm:$0xff]  }
 0x78a   : > { %v20919_v31 = vadd.f32 %v12794_v62, %v12754_v44  ;;  %13219 = vmatprep.subr.bf16.mxu0 %v18971_v39  ;;  %v19005_v46 = vld [vmem:[#allocation9 + $0xe50] ss:$24 sps:$4 sm:$0xff]   ;;  %v19013_v39 = vld [vmem:[#allocation9 + $0xe24] ss:$24 sps:$4 sm:$0xff]   ;;  %v19011_v44 = vld [vmem:[#allocation9 + $0xe20] ss:$24 sps:$4 sm:$0xff]  }
 0x78b   : > { %v12796_v63 = vpop.f32.mrf.mxu1  ;;  %v19019_v62 = vld [vmem:[#allocation9 + $0xdf4] ss:$24 sps:$4 sm:$0xff]  }
 0x78c   : > { %13105 = vmatpush2.bf16.msra.mxu1 %v18966_v53  ;;  %v19016_v53 = vld [vmem:[#allocation9 + $0xa34] ss:$24 sps:$4 sm:$0xff]   ;;  %v19025_v63 = vld [vmem:[#allocation9 + $0xdc4] ss:$24 sps:$4 sm:$0xff]  }
 0x78d   : > { %13220 = vmatpush1.bf16.msra.mxu0 %v18969_v25  ;;  %v12797_v55 = vpop.f32.mrf.mxu1  ;;  %13106 = vmatprep.subr.bf16.mxu1 %v18974_v58  ;;  %v19014_v25 = vld [vmem:[#allocation9 + $0xa30] ss:$24 sps:$4 sm:$0xff]  }
 0x78e   : > { %13221 = vmatprep.subr.bf16.mxu0 %v18977_v7  ;;  %v19017_v58 = vld [vmem:[#allocation9 + $0xdf0] ss:$24 sps:$4 sm:$0xff]   ;;  %v19022_v7 = vld [vmem:[#allocation9 + $0xa04] ss:$24 sps:$4 sm:$0xff]   ;;  %v19023_v55 = vld [vmem:[#allocation9 + $0xdc0] ss:$24 sps:$4 sm:$0xff]  }
 0x790   : > { %13107 = vmatpush2.bf16.msra.mxu1 %v18972_v61  ;;  %v19020_v61 = vld [vmem:[#allocation9 + $0xa00] ss:$24 sps:$4 sm:$0xff]  }
 0x791   : > { %13222 = vmatpush1.bf16.msra.mxu0 %v18975_v48  ;;  %13108 = vmatprep.subr.bf16.mxu1 %v18980_v19  ;;  %v19028_v48 = vld [vmem:[#allocation9 + $0x9d4] ss:$24 sps:$4 sm:$0xff]  }
 0x792   : > { %13223 = vmatprep.subr.bf16.mxu0 %v18983_v32  ;;  %v19031_v19 = vld [vmem:[#allocation9 + $0xd94] ss:$24 sps:$4 sm:$0xff]   ;;  %v19034_v32 = vld [vmem:[#allocation9 + $0x9a4] ss:$24 sps:$4 sm:$0xff]  }
 0x794   : > { %13109 = vmatpush2.bf16.msra.mxu1 %v18978_v0  ;;  %v19037_v0 = vld [vmem:[#allocation9 + $0x1364] ss:$24 sps:$4 sm:$0xff]  }
 0x795   : > { %13224 = vmatpush1.bf16.msra.mxu0 %v18981_v12  ;;  %13110 = vmatprep.subr.bf16.mxu1 %v18986_v14  ;;  %v19032_v12 = vld [vmem:[#allocation9 + $0x9a0] ss:$24 sps:$4 sm:$0xff]  }
 0x796   : > { %13225 = vmatprep.subr.bf16.mxu0 %v18989_v49  ;;  %v19035_v14 = vld [vmem:[#allocation9 + $0x1360] ss:$24 sps:$4 sm:$0xff]   ;;  %v19040_v49 = vld [vmem:[#allocation9 + $0x974] ss:$24 sps:$4 sm:$0xff]  }
 0x798   : > { %13111 = vmatpush2.bf16.msra.mxu1 %v18984_v27  ;;  %v19043_v27 = vld [vmem:[#allocation9 + $0x1334] ss:$24 sps:$4 sm:$0xff]  }
 0x799   : > { %13226 = vmatpush2.bf16.msra.mxu0 %v18987_v8  ;;  %13112 = vmatprep.subr.bf16.mxu1 %v18992_v52  ;;  %v19038_v52 = vld [vmem:[#allocation9 + $0x970] ss:$24 sps:$4 sm:$0xff]  }
 0x79a   : > { %13227 = vmatprep.subr.bf16.mxu0 %v18995_v59  ;;  %v19041_v59 = vld [vmem:[#allocation9 + $0x1330] ss:$24 sps:$4 sm:$0xff]  }
 0x79c   : > { %13113 = vmatpush2.bf16.msra.mxu1 %v18990_v33  ;;  %v19046_v33 = vld [vmem:[#allocation9 + $0x944] ss:$24 sps:$4 sm:$0xff]  }
 0x79d   : > { %13228 = vmatpush2.bf16.msra.mxu0 %v18993_v16  ;;  %13114 = vmatprep.subr.bf16.mxu1 %v18998_v9  ;;  %v19049_v9 = vld [vmem:[#allocation9 + $0x1304] ss:$24 sps:$4 sm:$0xff]  }
 0x79e   : > { %13229 = vmatprep.subr.bf16.mxu0 %v19001_v6 }
 0x7a0   : > { %13115 = vmatpush2.bf16.msra.mxu1 %v18996_v34  ;;  %v19044_v34 = vld [vmem:[#allocation9 + $0x940] ss:$24 sps:$4 sm:$0xff]  }
 0x7a1   : > { %13230 = vmatpush2.bf16.msra.mxu0 %v18999_v45  ;;  %13116 = vmatprep.subr.bf16.mxu1 %v19004_v5  ;;  %v19047_v45 = vld [vmem:[#allocation9 + $0x1300] ss:$24 sps:$4 sm:$0xff]   ;;  %v19052_v5 = vld [vmem:[#allocation9 + $0x914] ss:$24 sps:$4 sm:$0xff]  }
 0x7a2   : > { %13231 = vmatprep.subr.bf16.mxu0 %v19007_v54  ;;  %v19055_v54 = vld [vmem:[#allocation9 + $0x12d4] ss:$24 sps:$4 sm:$0xff]  }
 0x7a4   : > { %13117 = vmatpush2.bf16.msra.mxu1 %v19002_v2  ;;  %v19050_v2 = vld [vmem:[#allocation9 + $0x910] ss:$24 sps:$4 sm:$0xff]  }
 0x7a5   : > { %13232 = vmatpush2.bf16.msra.mxu0 %v19005_v46  ;;  %13168 = vmatprep.subr.bf16.mxu1 %v19010_v30  ;;  %v19058_v46 = vld [vmem:[#allocation9 + $0xbe4] ss:$24 sps:$4 sm:$0xff]  }
 0x7a6   : > { %13233 = vmatprep.subr.bf16.mxu0 %v19013_v39  ;;  %v19061_v30 = vld [vmem:[#allocation9 + $0x12a4] ss:$24 sps:$4 sm:$0xff]   ;;  %v19056_v39 = vld [vmem:[#allocation9 + $0xbe0] ss:$24 sps:$4 sm:$0xff]  }
 0x7a7   : > { %13119 = vmatmul.mubr.bf16.vlgmr.msra.gmra.mxu1 %v20655_v3  ;;  %v19026_v3 = vld [vmem:[#allocation9 + $0x9d0] ss:$24 sps:$4 sm:$0xff]  }
 0x7a8   : > { %13169 = vmatpush1.bf16.msra.mxu1 %v19008_v26  ;;  %13200 = vmatprep.mubr.bf16.mxu1 %v20657_v50  ;;  %v19029_v50 = vld [vmem:[#allocation9 + $0xd90] ss:$24 sps:$4 sm:$0xff]   ;;  %v19059_v26 = vld [vmem:[#allocation9 + $0x12a0] ss:$24 sps:$4 sm:$0xff]  }
 0x7a9   : > { %13234 = vmatpush2.bf16.msra.mxu0 %v19011_v44  ;;  %13170 = vmatprep.subr.bf16.mxu1 %v19016_v53  ;;  %v19064_v44 = vld [vmem:[#allocation9 + $0xbb4] ss:$24 sps:$4 sm:$0xff]   ;;  %v12834_v53 = vadd.f32 %v20889_v35, %v20915_v41  ;;  %v19068_v41 = vld [vmem:[#allocation9 + $0xb80] ss:$24 sps:$4 sm:$0xff]  }
 0x7aa   : > { %13235 = vmatprep.subr.bf16.mxu0 %v19019_v62  ;;  %v19067_v62 = vld [vmem:[#allocation9 + $0x1274] ss:$24 sps:$4 sm:$0xff]  }
 0x7ac   : > { %13171 = vmatpush1.bf16.msra.mxu1 %v19014_v25 }
 0x7ad   : > { %13236 = vmatpush2.bf16.msra.mxu0 %v19017_v58  ;;  %13172 = vmatprep.subr.bf16.mxu1 %v19022_v7  ;;  %v12836_v7 = vadd.f32 %v20893_v21, %v20919_v31  ;;  %v19079_v21 = vld [vmem:[#allocation9 + $0x1214] ss:$24 sps:$4 sm:$0xff]   ;;  %v19074_v31 = vld [vmem:[#allocation9 + $0xb50] ss:$24 sps:$4 sm:$0xff]  }
 0x7ae   : > { %13237 = vmatprep.subr.bf16.mxu0 %v19025_v63  ;;  %v19062_v63 = vld [vmem:[#allocation9 + $0xbb0] ss:$24 sps:$4 sm:$0xff]  }
 0x7b0   : > { %13173 = vmatpush1.bf16.msra.mxu1 %v19020_v61 }
 0x7b1   : > { %13238 = vmatpush2.bf16.msra.mxu0 %v19023_v55  ;;  %13174 = vmatprep.subr.bf16.mxu1 %v19028_v48  ;;  %v19065_v55 = vld [vmem:[#allocation9 + $0x1270] ss:$24 sps:$4 sm:$0xff]   ;;  %v19070_v48 = vld [vmem:[#allocation9 + $0xb84] ss:$24 sps:$4 sm:$0xff]  }
 0x7b2   : > { %13239 = vmatprep.subr.bf16.mxu0 %v19031_v19 }
 0x7b4   : > { %13175 = vmatpush1.bf16.msra.mxu1 %v19026_v3  ;;  %v19073_v3 = vld [vmem:[#allocation9 + $0x1244] ss:$24 sps:$4 sm:$0xff]  }
 0x7b5   : > { %13240 = vmatpush2.bf16.msra.mxu0 %v19029_v50  ;;  %13176 = vmatprep.subr.bf16.mxu1 %v19034_v32  ;;  %v19071_v32 = vld [vmem:[#allocation9 + $0x1240] ss:$24 sps:$4 sm:$0xff]  }
 0x7b6   : > { %13291 = vmatprep.subr.bf16.mxu0 %v19037_v0  ;;  %v19076_v0 = vld [vmem:[#allocation9 + $0xb54] ss:$24 sps:$4 sm:$0xff]  }
 0x7b8   : > { %v20923_v8 = vpop.f32.mrf.mxu0  ;;  %13242 = vmatmul.mubr.bf16.vlgmr.msra.gmra.mxu0 %v20673_v18  ;;  %13177 = vmatpush1.bf16.msra.mxu1 %v19032_v12  ;;  %v19077_v12 = vld [vmem:[#allocation9 + $0x1210] ss:$24 sps:$4 sm:$0xff]  }
 0x7b9   : > { %13292 = vmatpush1.bf16.msra.mxu0 %v19035_v14  ;;  %13323 = vmatprep.mubr.bf16.mxu0 %v20675_v29  ;;  %v19053_v29 = vld [vmem:[#allocation9 + $0x12d0] ss:$24 sps:$4 sm:$0xff]   ;;  %v19082_v14 = vld [vmem:[#allocation9 + $0xb24] ss:$24 sps:$4 sm:$0xff]  }
 0x7ba   : > { %v20927_v16 = vpop.f32.mrf.mxu0  ;;  %13178 = vmatprep.subr.bf16.mxu1 %v19040_v49  ;;  %13293 = vmatprep.subr.bf16.mxu0 %v19043_v27  ;;  %v19085_v49 = vld [vmem:[#allocation9 + $0x14e4] ss:$24 sps:$4 sm:$0xff]   ;;  %v19080_v27 = vld [vmem:[#allocation9 + $0xb20] ss:$24 sps:$4 sm:$0xff]  }
 0x7bc   : > { %v13001_v6 = vpop.f32.mrf.mxu0  ;;  %13179 = vmatpush1.bf16.msra.mxu1 %v19038_v52  ;;  %v19083_v52 = vld [vmem:[#allocation9 + $0x14e0] ss:$24 sps:$4 sm:$0xff]  }
 0x7bd   : > { %13294 = vmatpush1.bf16.msra.mxu0 %v19041_v59  ;;  %13180 = vmatprep.subr.bf16.mxu1 %v19046_v33  ;;  %v19088_v59 = vld [vmem:[#allocation9 + $0xaf4] ss:$24 sps:$4 sm:$0xff]   ;;  %v19089_v6 = vld [vmem:[#allocation9 + $0x14b0] ss:$24 sps:$4 sm:$0xff]  }
 0x7be   : > { %v13002_v18 = vpop.f32.mrf.mxu0  ;;  %13295 = vmatprep.subr.bf16.mxu0 %v19049_v9  ;;  %v19091_v33 = vld [vmem:[#allocation9 + $0x14b4] ss:$24 sps:$4 sm:$0xff]   ;;  %v19086_v9 = vld [vmem:[#allocation9 + $0xaf0] ss:$24 sps:$4 sm:$0xff]  }
 0x7bf   : > { %v19095_v18 = vld [vmem:[#allocation9 + $0x1480] ss:$24 sps:$4 sm:$0xff]  }
 0x7c0   : > { %13181 = vmatpush1.bf16.msra.mxu1 %v19044_v34  ;;  %v19094_v34 = vld [vmem:[#allocation9 + $0xac4] ss:$24 sps:$4 sm:$0xff]  }
 0x7c1   : > { %13296 = vmatpush1.bf16.msra.mxu0 %v19047_v45  ;;  %13182 = vmatprep.subr.bf16.mxu1 %v19052_v5  ;;  %v19097_v45 = vld [vmem:[#allocation9 + $0x1484] ss:$24 sps:$4 sm:$0xff]   ;;  %v19092_v5 = vld [vmem:[#allocation9 + $0xac0] ss:$24 sps:$4 sm:$0xff]  }
 0x7c2   : > { %13297 = vmatprep.subr.bf16.mxu0 %v19055_v54  ;;  %v19100_v54 = vld [vmem:[#allocation9 + $0xa94] ss:$24 sps:$4 sm:$0xff]  }
 0x7c4   : > { %13183 = vmatpush1.bf16.msra.mxu1 %v19050_v2  ;;  %v19103_v2 = vld [vmem:[#allocation9 + $0x1454] ss:$24 sps:$4 sm:$0xff]  }
 0x7c5   : > { %13298 = vmatpush1.bf16.msra.mxu0 %v19053_v29  ;;  %13184 = vmatprep.subr.bf16.mxu1 %v19058_v46  ;;  %v19098_v29 = vld [vmem:[#allocation9 + $0xa90] ss:$24 sps:$4 sm:$0xff]  }
 0x7c6   : > { %13299 = vmatprep.subr.bf16.mxu0 %v19061_v30  ;;  %v19101_v46 = vld [vmem:[#allocation9 + $0x1450] ss:$24 sps:$4 sm:$0xff]   ;;  %v19106_v30 = vld [vmem:[#allocation9 + $0x1064] ss:$24 sps:$4 sm:$0xff]  }
 0x7c7   : > { %v12874_v25 = vpop.f32.mrf.mxu1 }
 0x7c8   : > { %v20931_v58 = vadd.f32 %v12874_v25, %v12834_v53  ;;  %13185 = vmatpush2.bf16.msra.mxu1 %v19056_v39  ;;  %v19109_v39 = vld [vmem:[#allocation9 + $0x1424] ss:$24 sps:$4 sm:$0xff]   ;;  %v19112_v53 = vld [vmem:[#allocation9 + $0x1034] ss:$24 sps:$4 sm:$0xff]   ;;  %v19110_v25 = vld [vmem:[#allocation9 + $0x1030] ss:$24 sps:$4 sm:$0xff]  }
 0x7c9   : > { %13300 = vmatpush1.bf16.msra.mxu0 %v19059_v26  ;;  %v12876_v61 = vpop.f32.mrf.mxu1  ;;  %13186 = vmatprep.subr.bf16.mxu1 %v19064_v44  ;;  %v19104_v26 = vld [vmem:[#allocation9 + $0x1060] ss:$24 sps:$4 sm:$0xff]  }
 0x7ca   : > { %v20935_v19 = vadd.f32 %v12876_v61, %v12836_v7  ;;  %13301 = vmatprep.subr.bf16.mxu0 %v19067_v62  ;;  %v19107_v44 = vld [vmem:[#allocation9 + $0x1420] ss:$24 sps:$4 sm:$0xff]   ;;  %v19115_v62 = vld [vmem:[#allocation9 + $0x13f4] ss:$24 sps:$4 sm:$0xff]   ;;  %v19113_v7 = vld [vmem:[#allocation9 + $0x13f0] ss:$24 sps:$4 sm:$0xff]  }
 0x7cb   : > { %v12878_v35 = vpop.f32.mrf.mxu1  ;;  %v19121_v61 = vld [vmem:[#allocation9 + $0x13c4] ss:$24 sps:$4 sm:$0xff]  }
 0x7cc   : > { %13187 = vmatpush2.bf16.msra.mxu1 %v19062_v63  ;;  %v19118_v63 = vld [vmem:[#allocation9 + $0x1004] ss:$24 sps:$4 sm:$0xff]   ;;  %v19127_v35 = vld [vmem:[#allocation9 + $0x1394] ss:$24 sps:$4 sm:$0xff]  }
 0x7cd   : > { %13302 = vmatpush1.bf16.msra.mxu0 %v19065_v55  ;;  %v12879_v50 = vpop.f32.mrf.mxu1  ;;  %13188 = vmatprep.subr.bf16.mxu1 %v19070_v48  ;;  %v19116_v55 = vld [vmem:[#allocation9 + $0x1000] ss:$24 sps:$4 sm:$0xff]  }
 0x7ce   : > { %13303 = vmatprep.subr.bf16.mxu0 %v19073_v3  ;;  %v19119_v48 = vld [vmem:[#allocation9 + $0x13c0] ss:$24 sps:$4 sm:$0xff]   ;;  %v19124_v3 = vld [vmem:[#allocation9 + $0xfd4] ss:$24 sps:$4 sm:$0xff]   ;;  %v19133_v50 = vld [vmem:[#allocation9 + $0x1964] ss:$24 sps:$4 sm:$0xff]  }
 0x7d0   : > { %13189 = vmatpush2.bf16.msra.mxu1 %v19068_v41  ;;  %v19130_v41 = vld [vmem:[#allocation9 + $0xfa4] ss:$24 sps:$4 sm:$0xff]  }
 0x7d1   : > { %13304 = vmatpush1.bf16.msra.mxu0 %v19071_v32  ;;  %13190 = vmatprep.subr.bf16.mxu1 %v19076_v0  ;;  %v19128_v32 = vld [vmem:[#allocation9 + $0xfa0] ss:$24 sps:$4 sm:$0xff]  }
 0x7d2   : > { %13305 = vmatprep.subr.bf16.mxu0 %v19079_v21  ;;  %v19131_v0 = vld [vmem:[#allocation9 + $0x1960] ss:$24 sps:$4 sm:$0xff]   ;;  %v19136_v21 = vld [vmem:[#allocation9 + $0xf74] ss:$24 sps:$4 sm:$0xff]  }
 0x7d4   : > { %13191 = vmatpush2.bf16.msra.mxu1 %v19074_v31  ;;  %v19139_v31 = vld [vmem:[#allocation9 + $0x1934] ss:$24 sps:$4 sm:$0xff]  }
 0x7d5   : > { %13306 = vmatpush1.bf16.msra.mxu0 %v19077_v12  ;;  %13192 = vmatprep.subr.bf16.mxu1 %v19082_v14  ;;  %v19134_v14 = vld [vmem:[#allocation9 + $0xf70] ss:$24 sps:$4 sm:$0xff]  }
 0x7d6   : > { %13307 = vmatprep.subr.bf16.mxu0 %v19085_v49  ;;  %v19137_v49 = vld [vmem:[#allocation9 + $0x1930] ss:$24 sps:$4 sm:$0xff]  }
 0x7d8   : > { %13193 = vmatpush2.bf16.msra.mxu1 %v19080_v27  ;;  %v19142_v27 = vld [vmem:[#allocation9 + $0xf44] ss:$24 sps:$4 sm:$0xff]  }
 0x7d9   : > { %13308 = vmatpush2.bf16.msra.mxu0 %v19083_v52  ;;  %13194 = vmatprep.subr.bf16.mxu1 %v19088_v59  ;;  %v19145_v59 = vld [vmem:[#allocation9 + $0x1904] ss:$24 sps:$4 sm:$0xff]  }
 0x7da   : > { %13309 = vmatprep.subr.bf16.mxu0 %v19091_v33 }
 0x7dc   : > { %13195 = vmatpush2.bf16.msra.mxu1 %v19086_v9  ;;  %v19140_v9 = vld [vmem:[#allocation9 + $0xf40] ss:$24 sps:$4 sm:$0xff]  }
 0x7dd   : > { %13310 = vmatpush2.bf16.msra.mxu0 %v19089_v6  ;;  %13196 = vmatprep.subr.bf16.mxu1 %v19094_v34  ;;  %v19143_v6 = vld [vmem:[#allocation9 + $0x1900] ss:$24 sps:$4 sm:$0xff]   ;;  %v19148_v34 = vld [vmem:[#allocation9 + $0xf14] ss:$24 sps:$4 sm:$0xff]  }
 0x7de   : > { %13311 = vmatprep.subr.bf16.mxu0 %v19097_v45  ;;  %v19151_v45 = vld [vmem:[#allocation9 + $0x18d4] ss:$24 sps:$4 sm:$0xff]  }
 0x7e0   : > { %13197 = vmatpush2.bf16.msra.mxu1 %v19092_v5  ;;  %v19146_v5 = vld [vmem:[#allocation9 + $0xf10] ss:$24 sps:$4 sm:$0xff]  }
 0x7e1   : > { %13312 = vmatpush2.bf16.msra.mxu0 %v19095_v18  ;;  %13198 = vmatprep.subr.bf16.mxu1 %v19100_v54  ;;  %v19154_v18 = vld [vmem:[#allocation9 + $0x11e4] ss:$24 sps:$4 sm:$0xff]  }
 0x7e2   : > { %13313 = vmatprep.subr.bf16.mxu0 %v19103_v2  ;;  %v19157_v54 = vld [vmem:[#allocation9 + $0x18a4] ss:$24 sps:$4 sm:$0xff]   ;;  %v19152_v2 = vld [vmem:[#allocation9 + $0x11e0] ss:$24 sps:$4 sm:$0xff]  }
 0x7e4   : > { %13199 = vmatpush2.bf16.msra.mxu1 %v19098_v29  ;;  %v19155_v29 = vld [vmem:[#allocation9 + $0x18a0] ss:$24 sps:$4 sm:$0xff]  }
 0x7e5   : > { %13314 = vmatpush2.bf16.msra.mxu0 %v19101_v46  ;;  %13250 = vmatprep.subr.bf16.mxu1 %v19106_v30  ;;  %v19160_v46 = vld [vmem:[#allocation9 + $0x11b4] ss:$24 sps:$4 sm:$0xff]   ;;  %v12916_v30 = vadd.f32 %v20907_v47, %v20931_v58  ;;  %v19164_v58 = vld [vmem:[#allocation9 + $0x1180] ss:$24 sps:$4 sm:$0xff]  }
 0x7e6   : > { %13315 = vmatprep.subr.bf16.mxu0 %v19109_v39  ;;  %v19163_v39 = vld [vmem:[#allocation9 + $0x1874] ss:$24 sps:$4 sm:$0xff]  }
 0x7e7   : > { %13201 = vmatmul.mubr.bf16.vlgmr.msra.gmra.mxu1 %v20687_v40  ;;  %v19122_v40 = vld [vmem:[#allocation9 + $0xfd0] ss:$24 sps:$4 sm:$0xff]  }
 0x7e8   : > { %13251 = vmatpush1.bf16.msra.mxu1 %v19104_v26  ;;  %13282 = vmatprep.mubr.bf16.mxu1 %v20689_v4  ;;  %v19125_v4 = vld [vmem:[#allocation9 + $0x1390] ss:$24 sps:$4 sm:$0xff]  }
 0x7e9   : > { %13316 = vmatpush2.bf16.msra.mxu0 %v19107_v44  ;;  %13252 = vmatprep.subr.bf16.mxu1 %v19112_v53  ;;  %v12918_v53 = vadd.f32 %v20911_v22, %v20935_v19  ;;  %v19175_v22 = vld [vmem:[#allocation9 + $0x1814] ss:$24 sps:$4 sm:$0xff]   ;;  %v19170_v19 = vld [vmem:[#allocation9 + $0x1150] ss:$24 sps:$4 sm:$0xff]  }
 0x7ea   : > { %13317 = vmatprep.subr.bf16.mxu0 %v19115_v62  ;;  %v19158_v62 = vld [vmem:[#allocation9 + $0x11b0] ss:$24 sps:$4 sm:$0xff]  }
 0x7ec   : > { %13253 = vmatpush1.bf16.msra.mxu1 %v19110_v25 }
 0x7ed   : > { %13318 = vmatpush2.bf16.msra.mxu0 %v19113_v7  ;;  %13254 = vmatprep.subr.bf16.mxu1 %v19118_v63  ;;  %v19161_v7 = vld [vmem:[#allocation9 + $0x1870] ss:$24 sps:$4 sm:$0xff]   ;;  %v19166_v63 = vld [vmem:[#allocation9 + $0x1184] ss:$24 sps:$4 sm:$0xff]  }
 0x7ee   : > { %13319 = vmatprep.subr.bf16.mxu0 %v19121_v61 }
 0x7f0   : > { %13255 = vmatpush1.bf16.msra.mxu1 %v19116_v55  ;;  %v19169_v55 = vld [vmem:[#allocation9 + $0x1844] ss:$24 sps:$4 sm:$0xff]  }
 0x7f1   : > { %13320 = vmatpush2.bf16.msra.mxu0 %v19119_v48  ;;  %13256 = vmatprep.subr.bf16.mxu1 %v19124_v3  ;;  %v19167_v3 = vld [vmem:[#allocation9 + $0x1840] ss:$24 sps:$4 sm:$0xff]  }
 0x7f2   : > { %13321 = vmatprep.subr.bf16.mxu0 %v19127_v35  ;;  %v19172_v35 = vld [vmem:[#allocation9 + $0x1154] ss:$24 sps:$4 sm:$0xff]  }
 0x7f4   : > { %13257 = vmatpush1.bf16.msra.mxu1 %v19122_v40  ;;  %v19173_v40 = vld [vmem:[#allocation9 + $0x1810] ss:$24 sps:$4 sm:$0xff]  }
 0x7f5   : > { %13322 = vmatpush2.bf16.msra.mxu0 %v19125_v4  ;;  %13258 = vmatprep.subr.bf16.mxu1 %v19130_v41  ;;  %v19178_v4 = vld [vmem:[#allocation9 + $0x1124] ss:$24 sps:$4 sm:$0xff]  }
 0x7f6   : > { %13373 = vmatprep.subr.bf16.mxu0 %v19133_v50  ;;  %v19181_v41 = vld [vmem:[#allocation9 + $0x1ae4] ss:$24 sps:$4 sm:$0xff]   ;;  %v19176_v50 = vld [vmem:[#allocation9 + $0x1120] ss:$24 sps:$4 sm:$0xff]  }
 0x7f8   : > { %v20939_v12 = vpop.f32.mrf.mxu0  ;;  %13324 = vmatmul.mubr.bf16.vlgmr.msra.gmra.mxu0 %v20697_v20  ;;  %13259 = vmatpush1.bf16.msra.mxu1 %v19128_v32  ;;  %v19179_v32 = vld [vmem:[#allocation9 + $0x1ae0] ss:$24 sps:$4 sm:$0xff]  }
 0x7f9   : > { %13374 = vmatpush1.bf16.msra.mxu0 %v19131_v0  ;;  %13405 = vmatprep.mubr.bf16.mxu0 %v20699_v57  ;;  %v19149_v57 = vld [vmem:[#allocation9 + $0x18d0] ss:$24 sps:$4 sm:$0xff]   ;;  %v19184_v0 = vld [vmem:[#allocation9 + $0x10f4] ss:$24 sps:$4 sm:$0xff]  }
 0x7fa   : > { %v20943_v52 = vpop.f32.mrf.mxu0  ;;  %13260 = vmatprep.subr.bf16.mxu1 %v19136_v21  ;;  %13375 = vmatprep.subr.bf16.mxu0 %v19139_v31  ;;  %v19187_v21 = vld [vmem:[#allocation9 + $0x1ab4] ss:$24 sps:$4 sm:$0xff]   ;;  %v19182_v31 = vld [vmem:[#allocation9 + $0x10f0] ss:$24 sps:$4 sm:$0xff]  }
 0x7fc   : > { %v13083_v33 = vpop.f32.mrf.mxu0  ;;  %13261 = vmatpush1.bf16.msra.mxu1 %v19134_v14  ;;  %v19185_v14 = vld [vmem:[#allocation9 + $0x1ab0] ss:$24 sps:$4 sm:$0xff]  }
 0x7fd   : > { %13376 = vmatpush1.bf16.msra.mxu0 %v19137_v49  ;;  %13262 = vmatprep.subr.bf16.mxu1 %v19142_v27  ;;  %v19190_v49 = vld [vmem:[#allocation9 + $0x10c4] ss:$24 sps:$4 sm:$0xff]   ;;  %v19191_v33 = vld [vmem:[#allocation9 + $0x1a80] ss:$24 sps:$4 sm:$0xff]  }
 0x7fe   : > { %v13084_v20 = vpop.f32.mrf.mxu0  ;;  %13377 = vmatprep.subr.bf16.mxu0 %v19145_v59  ;;  %v19193_v27 = vld [vmem:[#allocation9 + $0x1a84] ss:$24 sps:$4 sm:$0xff]   ;;  %v19188_v59 = vld [vmem:[#allocation9 + $0x10c0] ss:$24 sps:$4 sm:$0xff]  }
 0x7ff   : > { %v19197_v20 = vld [vmem:[#allocation9 + $0x1a50] ss:$24 sps:$4 sm:$0xff]  }
 0x800   : > { %13263 = vmatpush1.bf16.msra.mxu1 %v19140_v9  ;;  %v19196_v9 = vld [vmem:[#allocation9 + $0x1094] ss:$24 sps:$4 sm:$0xff]  }
 0x801   : > { %13378 = vmatpush1.bf16.msra.mxu0 %v19143_v6  ;;  %13264 = vmatprep.subr.bf16.mxu1 %v19148_v34  ;;  %v19199_v6 = vld [vmem:[#allocation9 + $0x1a54] ss:$24 sps:$4 sm:$0xff]   ;;  %v19194_v34 = vld [vmem:[#allocation9 + $0x1090] ss:$24 sps:$4 sm:$0xff]  }
 0x802   : > { %13379 = vmatprep.subr.bf16.mxu0 %v19151_v45  ;;  %v19202_v45 = vld [vmem:[#allocation9 + $0x1664] ss:$24 sps:$4 sm:$0xff]  }
 0x804   : > { %13265 = vmatpush1.bf16.msra.mxu1 %v19146_v5  ;;  %v19205_v5 = vld [vmem:[#allocation9 + $0x1a24] ss:$24 sps:$4 sm:$0xff]  }
 0x805   : > { %13380 = vmatpush1.bf16.msra.mxu0 %v19149_v57  ;;  %13266 = vmatprep.subr.bf16.mxu1 %v19154_v18  ;;  %v19200_v57 = vld [vmem:[#allocation9 + $0x1660] ss:$24 sps:$4 sm:$0xff]  }
 0x806   : > { %13381 = vmatprep.subr.bf16.mxu0 %v19157_v54  ;;  %v19203_v18 = vld [vmem:[#allocation9 + $0x1a20] ss:$24 sps:$4 sm:$0xff]   ;;  %v19208_v54 = vld [vmem:[#allocation9 + $0x1634] ss:$24 sps:$4 sm:$0xff]  }
 0x807   : > { %v12956_v26 = vpop.f32.mrf.mxu1 }
 0x808   : > { %v20947_v44 = vadd.f32 %v12956_v26, %v12916_v30  ;;  %13267 = vmatpush2.bf16.msra.mxu1 %v19152_v2  ;;  %v19206_v26 = vld [vmem:[#allocation9 + $0x1630] ss:$24 sps:$4 sm:$0xff]  }
 0x809   : > { %13382 = vmatpush1.bf16.msra.mxu0 %v19155_v29  ;;  %v12958_v25 = vpop.f32.mrf.mxu1  ;;  %13268 = vmatprep.subr.bf16.mxu1 %v19160_v46  ;;  %v19211_v29 = vld [vmem:[#allocation9 + $0x19f4] ss:$24 sps:$4 sm:$0xff]  }
 0x80a   : > { %v20951_v61 = vadd.f32 %v12958_v25, %v12918_v53  ;;  %13383 = vmatprep.subr.bf16.mxu0 %v19163_v39  ;;  %v12998_v2 = vadd.f32 %v20923_v8, %v20947_v44  ;;  %v19214_v25 = vld [vmem:[#allocation9 + $0x1604] ss:$24 sps:$4 sm:$0xff]  }
 0x80b   : > { %v12960_v47 = vpop.f32.mrf.mxu1  ;;  %v19217_v44 = vld [vmem:[#allocation9 + $0x19c4] ss:$24 sps:$4 sm:$0xff]  }
 0x80c   : > { %13269 = vmatpush2.bf16.msra.mxu1 %v19158_v62  ;;  %v13000_v39 = vadd.f32 %v20927_v16, %v20951_v61  ;;  %v19209_v62 = vld [vmem:[#allocation9 + $0x19f0] ss:$24 sps:$4 sm:$0xff]   ;;  %v19223_v16 = vld [vmem:[#allocation9 + $0x1994] ss:$24 sps:$4 sm:$0xff]  }
 0x80d   : > { %13384 = vmatpush1.bf16.msra.mxu0 %v19161_v7  ;;  %v12961_v48 = vpop.f32.mrf.mxu1  ;;  %13270 = vmatprep.subr.bf16.mxu1 %v19166_v63  ;;  %v19218_v61 = vld [vmem:[#allocation9 + $0x15d0] ss:$24 sps:$4 sm:$0xff]  }
 0x80e   : > { %13385 = vmatprep.subr.bf16.mxu0 %v19169_v55  ;;  %v19220_v55 = vld [vmem:[#allocation9 + $0x15d4] ss:$24 sps:$4 sm:$0xff]   ;;  %v19221_v47 = vld [vmem:[#allocation9 + $0x1990] ss:$24 sps:$4 sm:$0xff]   ;;  %v19229_v48 = vld [vmem:[#allocation9 + $0x1f64] ss:$24 sps:$4 sm:$0xff]  }
 0x810   : > { %13271 = vmatpush2.bf16.msra.mxu1 %v19164_v58  ;;  %v19226_v58 = vld [vmem:[#allocation9 + $0x15a4] ss:$24 sps:$4 sm:$0xff]  }
 0x811   : > { %13386 = vmatpush1.bf16.msra.mxu0 %v19167_v3  ;;  %13272 = vmatprep.subr.bf16.mxu1 %v19172_v35  ;;  %v19224_v3 = vld [vmem:[#allocation9 + $0x15a0] ss:$24 sps:$4 sm:$0xff]  }
 0x812   : > { %13387 = vmatprep.subr.bf16.mxu0 %v19175_v22  ;;  %v19227_v35 = vld [vmem:[#allocation9 + $0x1f60] ss:$24 sps:$4 sm:$0xff]   ;;  %v19232_v22 = vld [vmem:[#allocation9 + $0x1574] ss:$24 sps:$4 sm:$0xff]  }
 0x814   : > { %13273 = vmatpush2.bf16.msra.mxu1 %v19170_v19  ;;  %v19235_v19 = vld [vmem:[#allocation9 + $0x1f34] ss:$24 sps:$4 sm:$0xff]  }
 0x815   : > { %13388 = vmatpush1.bf16.msra.mxu0 %v19173_v40  ;;  %13274 = vmatprep.subr.bf16.mxu1 %v19178_v4  ;;  %v19230_v4 = vld [vmem:[#allocation9 + $0x1570] ss:$24 sps:$4 sm:$0xff]  }
 0x816   : > { %13389 = vmatprep.subr.bf16.mxu0 %v19181_v41  ;;  %v19233_v41 = vld [vmem:[#allocation9 + $0x1f30] ss:$24 sps:$4 sm:$0xff]  }
 0x818   : > { %13275 = vmatpush2.bf16.msra.mxu1 %v19176_v50  ;;  %v19238_v50 = vld [vmem:[#allocation9 + $0x1544] ss:$24 sps:$4 sm:$0xff]  }
 0x819   : > { %13390 = vmatpush2.bf16.msra.mxu0 %v19179_v32  ;;  %13276 = vmatprep.subr.bf16.mxu1 %v19184_v0  ;;  %v19241_v0 = vld [vmem:[#allocation9 + $0x1f04] ss:$24 sps:$4 sm:$0xff]  }
 0x81a   : > { %13391 = vmatprep.subr.bf16.mxu0 %v19187_v21 }
 0x81c   : > { %13277 = vmatpush2.bf16.msra.mxu1 %v19182_v31  ;;  %v19236_v31 = vld [vmem:[#allocation9 + $0x1540] ss:$24 sps:$4 sm:$0xff]  }
 0x81d   : > { %13392 = vmatpush2.bf16.msra.mxu0 %v19185_v14  ;;  %13278 = vmatprep.subr.bf16.mxu1 %v19190_v49  ;;  %v19239_v14 = vld [vmem:[#allocation9 + $0x1f00] ss:$24 sps:$4 sm:$0xff]   ;;  %v19244_v49 = vld [vmem:[#allocation9 + $0x1514] ss:$24 sps:$4 sm:$0xff]  }
 0x81e   : > { %13393 = vmatprep.subr.bf16.mxu0 %v19193_v27  ;;  %v19247_v27 = vld [vmem:[#allocation9 + $0x1ed4] ss:$24 sps:$4 sm:$0xff]  }
 0x820   : > { %13279 = vmatpush2.bf16.msra.mxu1 %v19188_v59  ;;  %v19242_v59 = vld [vmem:[#allocation9 + $0x1510] ss:$24 sps:$4 sm:$0xff]  }
 0x821   : > { %13394 = vmatpush2.bf16.msra.mxu0 %v19191_v33  ;;  %13280 = vmatprep.subr.bf16.mxu1 %v19196_v9  ;;  %v19250_v33 = vld [vmem:[#allocation9 + $0x17e4] ss:$24 sps:$4 sm:$0xff]  }
 0x822   : > { %13395 = vmatprep.subr.bf16.mxu0 %v19199_v6  ;;  %v19253_v9 = vld [vmem:[#allocation9 + $0x1ea4] ss:$24 sps:$4 sm:$0xff]   ;;  %v19248_v6 = vld [vmem:[#allocation9 + $0x17e0] ss:$24 sps:$4 sm:$0xff]  }
 0x824   : > { %13281 = vmatpush2.bf16.msra.mxu1 %v19194_v34  ;;  %v19251_v34 = vld [vmem:[#allocation9 + $0x1ea0] ss:$24 sps:$4 sm:$0xff]  }
 0x825   : > { %13396 = vmatpush2.bf16.msra.mxu0 %v19197_v20  ;;  %13332 = vmatprep.subr.bf16.mxu1 %v19202_v45  ;;  %v19256_v20 = vld [vmem:[#allocation9 + $0x17b4] ss:$24 sps:$4 sm:$0xff]  }
 0x826   : > { %13397 = vmatprep.subr.bf16.mxu0 %v19205_v5  ;;  %v19259_v45 = vld [vmem:[#allocation9 + $0x1e74] ss:$24 sps:$4 sm:$0xff]   ;;  %v19254_v5 = vld [vmem:[#allocation9 + $0x17b0] ss:$24 sps:$4 sm:$0xff]  }
 0x827   : > { %v13038_v46 = vpop.f32.mrf.mxu1  ;;  %13283 = vmatmul.mubr.bf16.vlgmr.msra.gmra.mxu1 %v20707_v56  ;;  %v19212_v56 = vld [vmem:[#allocation9 + $0x1600] ss:$24 sps:$4 sm:$0xff]  }
 0x828   : > { %v20956_v30 = vadd.f32 %v13038_v46, %v12998_v2  ;;  %13333 = vmatpush1.bf16.msra.mxu1 %v19200_v57  ;;  %13364 = vmatprep.mubr.bf16.mxu1 %v20709_v60  ;;  %v19215_v60 = vld [vmem:[#allocation9 + $0x19c0] ss:$24 sps:$4 sm:$0xff]   ;;  %v19257_v57 = vld [vmem:[#allocation9 + $0x1e70] ss:$24 sps:$4 sm:$0xff]   ;;  %v19268_v46 = vld [vmem:[#allocation9 + $0x1754] ss:$24 sps:$4 sm:$0xff]  }
 0x829   : > { %13398 = vmatpush2.bf16.msra.mxu0 %v19203_v18  ;;  %v13040_v53 = vpop.f32.mrf.mxu1  ;;  %13334 = vmatprep.subr.bf16.mxu1 %v19208_v54  ;;  %v19262_v18 = vld [vmem:[#allocation9 + $0x1784] ss:$24 sps:$4 sm:$0xff]   ;;  %v19260_v2 = vld [vmem:[#allocation9 + $0x1780] ss:$24 sps:$4 sm:$0xff]  }
 0x82a   : > { %v20961_v8 = vadd.f32 %v13040_v53, %v13000_v39  ;;  %13399 = vmatprep.subr.bf16.mxu0 %v19211_v29  ;;  %v19265_v54 = vld [vmem:[#allocation9 + $0x1e44] ss:$24 sps:$4 sm:$0xff]   ;;  %v19263_v29 = vld [vmem:[#allocation9 + $0x1e40] ss:$24 sps:$4 sm:$0xff]   ;;  %v19271_v39 = vld [vmem:[#allocation9 + $0x1e14] ss:$24 sps:$4 sm:$0xff]  }
 0x82b   : > { %v13042_v7 = vpop.f32.mrf.mxu1  ;;  %v19269_v53 = vld [vmem:[#allocation9 + $0x1e10] ss:$24 sps:$4 sm:$0xff]  }
 0x82c   : > { %13335 = vmatpush1.bf16.msra.mxu1 %v19206_v26  ;;  %v19266_v26 = vld [vmem:[#allocation9 + $0x1750] ss:$24 sps:$4 sm:$0xff]   ;;  %v19275_v7 = vld [vmem:[#allocation9 + $0x20e0] ss:$24 sps:$4 sm:$0xff]  }
 0x82d   : > { %13400 = vmatpush2.bf16.msra.mxu0 %v19209_v62  ;;  %v13043_v63 = vpop.f32.mrf.mxu1  ;;  %13336 = vmatprep.subr.bf16.mxu1 %v19214_v25  ;;  %v19274_v62 = vld [vmem:[#allocation9 + $0x1724] ss:$24 sps:$4 sm:$0xff]  }
 0x82e   : > { %13401 = vmatprep.subr.bf16.mxu0 %v19217_v44  ;;  %v19277_v25 = vld [vmem:[#allocation9 + $0x20e4] ss:$24 sps:$4 sm:$0xff]   ;;  %v19272_v44 = vld [vmem:[#allocation9 + $0x1720] ss:$24 sps:$4 sm:$0xff]   ;;  %v19283_v63 = vld [vmem:[#allocation9 + $0x20b4] ss:$24 sps:$4 sm:$0xff]  }
 0x830   : > { %13337 = vmatpush1.bf16.msra.mxu1 %v19212_v56  ;;  %v19280_v56 = vld [vmem:[#allocation9 + $0x16f4] ss:$24 sps:$4 sm:$0xff]  }
 0x831   : > { %13402 = vmatpush2.bf16.msra.mxu0 %v19215_v60  ;;  %13338 = vmatprep.subr.bf16.mxu1 %v19220_v55  ;;  %v19278_v60 = vld [vmem:[#allocation9 + $0x16f0] ss:$24 sps:$4 sm:$0xff]  }
 0x832   : > { %13403 = vmatprep.subr.bf16.mxu0 %v19223_v16  ;;  %v19281_v55 = vld [vmem:[#allocation9 + $0x20b0] ss:$24 sps:$4 sm:$0xff]   ;;  %v19286_v16 = vld [vmem:[#allocation9 + $0x16c4] ss:$24 sps:$4 sm:$0xff]  }
 0x834   : > { %13339 = vmatpush1.bf16.msra.mxu1 %v19218_v61  ;;  %v19289_v61 = vld [vmem:[#allocation9 + $0x2084] ss:$24 sps:$4 sm:$0xff]  }
 0x835   : > { %13404 = vmatpush2.bf16.msra.mxu0 %v19221_v47  ;;  %13340 = vmatprep.subr.bf16.mxu1 %v19226_v58  ;;  %v19284_v47 = vld [vmem:[#allocation9 + $0x16c0] ss:$24 sps:$4 sm:$0xff]  }
 0x836   : > { %13455 = vmatprep.subr.bf16.mxu0 %v19229_v48  ;;  %v19287_v58 = vld [vmem:[#allocation9 + $0x2080] ss:$24 sps:$4 sm:$0xff]   ;;  %v19292_v48 = vld [vmem:[#allocation9 + $0x1694] ss:$24 sps:$4 sm:$0xff]  }
 0x838   : > { %v20963_v40 = vpop.f32.mrf.mxu0  ;;  %13406 = vmatmul.mubr.bf16.vlgmr.msra.gmra.mxu0 %v20721_v23  ;;  %13341 = vmatpush1.bf16.msra.mxu1 %v19224_v3  ;;  %v5967_v3 = vsub.s32 4, %v20731_v17 }
 0x839   : > { %13456 = vmatpush1.bf16.msra.mxu0 %v19227_v35  ;;  %13487 = vmatprep.mubr.bf16.mxu0 %v20723_v38  ;;  %v19245_v38 = vld [vmem:[#allocation9 + $0x1ed0] ss:$24 sps:$4 sm:$0xff]   ;;  %v19295_v35 = vld [vmem:[#allocation9 + $0x2054] ss:$24 sps:$4 sm:$0xff]  }
 0x83a   : > { %v20967_v32 = vpop.f32.mrf.mxu0  ;;  %13342 = vmatprep.subr.bf16.mxu1 %v19232_v22  ;;  %13457 = vmatprep.subr.bf16.mxu0 %v19235_v19  ;;  %v5971_v22 = vsub.s32 5, %v20731_v17  ;;  %v19290_v19 = vld [vmem:[#allocation9 + $0x1690] ss:$24 sps:$4 sm:$0xff]   ;;  %v19307_v17 = vld [vmem:[#allocation9 + $0x1ff4] ss:$24 sps:$4 sm:$0xff]  }
 0x83c   : > { %v13165_v21 = vpop.f32.mrf.mxu0  ;;  %13343 = vmatpush1.bf16.msra.mxu1 %v19230_v4  ;;  %v19293_v4 = vld [vmem:[#allocation9 + $0x2050] ss:$24 sps:$4 sm:$0xff]  }
 0x83d   : > { %13458 = vmatpush1.bf16.msra.mxu0 %v19233_v41  ;;  %13344 = vmatprep.subr.bf16.mxu1 %v19238_v50  ;;  %v19298_v41 = vld [vmem:[#allocation9 + $0x1c64] ss:$24 sps:$4 sm:$0xff]  }
 0x83e   : > { %v13166_v23 = vpop.f32.mrf.mxu0  ;;  %13459 = vmatprep.subr.bf16.mxu0 %v19241_v0  ;;  %v19482_v50 = vld [vmem:[#allocation11] sm:$0x3f] }
 0x83f   : > { %v5968_v0 = vrot.slane %v19482_v50, %v5967_v3  ;;  %v19301_v21 = vld [vmem:[#allocation9 + $0x2024] ss:$24 sps:$4 sm:$0xff]   ;;  %v19304_v23 = vld [vmem:[#allocation9 + $0x1c34] ss:$24 sps:$4 sm:$0xff]   ;;  %v19341_v3 = vld [vmem:[#allocation9 + $0x24d0] ss:$24 sps:$4 sm:$0xff]  }
 0x840   : > { %13345 = vmatpush1.bf16.msra.mxu1 %v19236_v31  ;;  %v5972_v31 = vrot.slane %v19482_v50, %v5971_v22  ;;  %v19349_v22 = vld [vmem:[#allocation9 + $0x24a4] ss:$24 sps:$4 sm:$0xff]   ;;  %v19350_v50 = vld [vmem:[#allocation9 + $0x1db0] ss:$24 sps:$4 sm:$0xff]  }
 0x841   : > { %13460 = vmatpush1.bf16.msra.mxu0 %v19239_v14  ;;  %13346 = vmatprep.subr.bf16.mxu1 %v19244_v49  ;;  %v19296_v14 = vld [vmem:[#allocation9 + $0x1c60] ss:$24 sps:$4 sm:$0xff]  }
 0x842   : > { %13461 = vmatprep.subr.bf16.mxu0 %v19247_v27  ;;  %v19299_v49 = vld [vmem:[#allocation9 + $0x2020] ss:$24 sps:$4 sm:$0xff]   ;;  %v13080_v27 = vadd.f32 %v20939_v12, %v5968_v0  ;;  %v19313_v12 = vld [vmem:[#allocation9 + $0x1fc4] ss:$24 sps:$4 sm:$0xff]   ;;  %v19353_v0 = vld [vmem:[#allocation9 + $0x2470] ss:$24 sps:$4 sm:$0xff]  }
 0x844   : > { %13347 = vmatpush1.bf16.msra.mxu1 %v19242_v59 }
 0x845   : > { %13462 = vmatpush1.bf16.msra.mxu0 %v19245_v38  ;;  %13348 = vmatprep.subr.bf16.mxu1 %v19250_v33  ;;  %v13082_v38 = vadd.f32 %v20943_v52, %v5972_v31  ;;  %v19361_v31 = vld [vmem:[#allocation9 + $0x2444] ss:$24 sps:$4 sm:$0xff]  }
 0x846   : > { %13463 = vmatprep.subr.bf16.mxu0 %v19253_v9  ;;  %v19302_v9 = vld [vmem:[#allocation9 + $0x1c30] ss:$24 sps:$4 sm:$0xff]  }
 0x848   : > { %13349 = vmatpush2.bf16.msra.mxu1 %v19248_v6 }
 0x849   : > { %13464 = vmatpush1.bf16.msra.mxu0 %v19251_v34  ;;  %13350 = vmatprep.subr.bf16.mxu1 %v19256_v20  ;;  %v19305_v34 = vld [vmem:[#allocation9 + $0x1ff0] ss:$24 sps:$4 sm:$0xff]   ;;  %v19310_v20 = vld [vmem:[#allocation9 + $0x1c04] ss:$24 sps:$4 sm:$0xff]  }
 0x84a   : > { %13465 = vmatprep.subr.bf16.mxu0 %v19259_v45 }
 0x84c   : > { %13351 = vmatpush2.bf16.msra.mxu1 %v19254_v5 }
 0x84d   : > { %13466 = vmatpush1.bf16.msra.mxu0 %v19257_v57  ;;  %13352 = vmatprep.subr.bf16.mxu1 %v19262_v18  ;;  %v19311_v18 = vld [vmem:[#allocation9 + $0x1fc0] ss:$24 sps:$4 sm:$0xff]  }
 0x84e   : > { %13467 = vmatprep.subr.bf16.mxu0 %v19265_v54  ;;  %v19316_v54 = vld [vmem:[#allocation9 + $0x1bd4] ss:$24 sps:$4 sm:$0xff]  }
 0x850   : > { %13353 = vmatpush2.bf16.msra.mxu1 %v19260_v2  ;;  %v19319_v2 = vld [vmem:[#allocation9 + $0x1f94] ss:$24 sps:$4 sm:$0xff]  }
 0x851   : > { %13468 = vmatpush1.bf16.msra.mxu0 %v19263_v29  ;;  %13354 = vmatprep.subr.bf16.mxu1 %v19268_v46  ;;  %v19314_v29 = vld [vmem:[#allocation9 + $0x1bd0] ss:$24 sps:$4 sm:$0xff]  }
 0x852   : > { %13469 = vmatprep.subr.bf16.mxu0 %v19271_v39  ;;  %v19317_v46 = vld [vmem:[#allocation9 + $0x1f90] ss:$24 sps:$4 sm:$0xff]   ;;  %v19325_v39 = vld [vmem:[#allocation9 + $0x2564] ss:$24 sps:$4 sm:$0xff]  }
 0x854   : > { %13355 = vmatpush2.bf16.msra.mxu1 %v19266_v26  ;;  %v19320_v26 = vld [vmem:[#allocation9 + $0x1ba0] ss:$24 sps:$4 sm:$0xff]  }
 0x855   : > { %13470 = vmatpush1.bf16.msra.mxu0 %v19269_v53  ;;  %13356 = vmatprep.subr.bf16.mxu1 %v19274_v62  ;;  %v19328_v53 = vld [vmem:[#allocation9 + $0x1b74] ss:$24 sps:$4 sm:$0xff]  }
 0x856   : > { %13471 = vmatprep.subr.bf16.mxu0 %v19277_v25  ;;  %v19331_v62 = vld [vmem:[#allocation9 + $0x2534] ss:$24 sps:$4 sm:$0xff]  }
 0x858   : > { %13357 = vmatpush2.bf16.msra.mxu1 %v19272_v44  ;;  %v19326_v44 = vld [vmem:[#allocation9 + $0x1b70] ss:$24 sps:$4 sm:$0xff]  }
 0x859   : > { %13472 = vmatpush2.bf16.msra.mxu0 %v19275_v7  ;;  %13358 = vmatprep.subr.bf16.mxu1 %v19280_v56  ;;  %v19329_v7 = vld [vmem:[#allocation9 + $0x2530] ss:$24 sps:$4 sm:$0xff]   ;;  %v19334_v56 = vld [vmem:[#allocation9 + $0x1b44] ss:$24 sps:$4 sm:$0xff]  }
 0x85a   : > { %13473 = vmatprep.subr.bf16.mxu0 %v19283_v63 }
 0x85c   : > { %13359 = vmatpush2.bf16.msra.mxu1 %v19278_v60  ;;  %v19337_v60 = vld [vmem:[#allocation9 + $0x2504] ss:$24 sps:$4 sm:$0xff]  }
 0x85d   : > { %13474 = vmatpush2.bf16.msra.mxu0 %v19281_v55  ;;  %13360 = vmatprep.subr.bf16.mxu1 %v19286_v16  ;;  %v19332_v16 = vld [vmem:[#allocation9 + $0x1b40] ss:$24 sps:$4 sm:$0xff]  }
 0x85e   : > { %13475 = vmatprep.subr.bf16.mxu0 %v19289_v61  ;;  %v19335_v61 = vld [vmem:[#allocation9 + $0x2500] ss:$24 sps:$4 sm:$0xff]  }
 0x860   : > { %13361 = vmatpush2.bf16.msra.mxu1 %v19284_v47  ;;  %v19340_v47 = vld [vmem:[#allocation9 + $0x1b14] ss:$24 sps:$4 sm:$0xff]  }
 0x861   : > { %13476 = vmatpush2.bf16.msra.mxu0 %v19287_v58  ;;  %13362 = vmatprep.subr.bf16.mxu1 %v19292_v48  ;;  %v19343_v58 = vld [vmem:[#allocation9 + $0x24d4] ss:$24 sps:$4 sm:$0xff]   ;;  %v19338_v48 = vld [vmem:[#allocation9 + $0x1b10] ss:$24 sps:$4 sm:$0xff]  }
 0x862   : > { %13477 = vmatprep.subr.bf16.mxu0 %v19295_v35  ;;  %v19346_v35 = vld [vmem:[#allocation9 + $0x1de4] ss:$24 sps:$4 sm:$0xff]  }
 0x864   : > { %13363 = vmatpush2.bf16.msra.mxu1 %v19290_v19  ;;  %v19347_v19 = vld [vmem:[#allocation9 + $0x24a0] ss:$24 sps:$4 sm:$0xff]  }
 0x865   : > { %13478 = vmatpush2.bf16.msra.mxu0 %v19293_v4  ;;  %13414 = vmatprep.subr.bf16.mxu1 %v19298_v41  ;;  %v19352_v4 = vld [vmem:[#allocation9 + $0x1db4] ss:$24 sps:$4 sm:$0xff]  }
 0x866   : > { %13479 = vmatprep.subr.bf16.mxu0 %v19301_v21  ;;  %v19355_v41 = vld [vmem:[#allocation9 + $0x2474] ss:$24 sps:$4 sm:$0xff]   ;;  %v19358_v21 = vld [vmem:[#allocation9 + $0x1d84] ss:$24 sps:$4 sm:$0xff]  }
 0x867   : > { %v13120_v59 = vpop.f32.mrf.mxu1  ;;  %13365 = vmatmul.mubr.bf16.vlgmr.msra.gmra.mxu1 %v20741_v43  ;;  %v19308_v43 = vld [vmem:[#allocation9 + $0x1c00] ss:$24 sps:$4 sm:$0xff]  }
 0x868   : > { %v13121_v33 = vadd.f32 %v13120_v59, %v13080_v27  ;;  %13415 = vmatpush1.bf16.msra.mxu1 %v19296_v14  ;;  %13446 = vmatprep.mubr.bf16.mxu1 %v20743_v10  ;;  %v19356_v14 = vld [vmem:[#allocation9 + $0x1d80] ss:$24 sps:$4 sm:$0xff]   ;;  %v19367_v27 = vld [vmem:[#allocation9 + $0x2414] ss:$24 sps:$4 sm:$0xff]   ;;  %v19365_v59 = vld [vmem:[#allocation9 + $0x2410] ss:$24 sps:$4 sm:$0xff]  }
 0x869   : > { %13480 = vmatpush2.bf16.msra.mxu0 %v19299_v49  ;;  %v13122_v6 = vpop.f32.mrf.mxu1  ;;  %13416 = vmatprep.subr.bf16.mxu1 %v19304_v23  ;;  %v19359_v49 = vld [vmem:[#allocation9 + $0x2440] ss:$24 sps:$4 sm:$0xff]   ;;  %v19364_v23 = vld [vmem:[#allocation9 + $0x1d54] ss:$24 sps:$4 sm:$0xff]  }
 0x86a   : > { %v13123_v45 = vadd.f32 %v13122_v6, %v13082_v38  ;;  %13481 = vmatprep.subr.bf16.mxu0 %v19307_v17  ;;  %v20976_v5 = vadd.f32 %v20963_v40, %v13121_v33  ;;  %v19322_v40 = vld [vmem:[#allocation9 + $0x1ba4] ss:$24 sps:$4 sm:$0xff]   ;;  %v19362_v17 = vld [vmem:[#allocation9 + $0x1d50] ss:$24 sps:$4 sm:$0xff]   ;;  %v19368_v6 = vld [vmem:[#allocation9 + $0x1d20] ss:$24 sps:$4 sm:$0xff]  }
 0x86b   : > { %v13124_v57 = vpop.f32.mrf.mxu1  ;;  %v19370_v38 = vld [vmem:[#allocation9 + $0x1d24] ss:$24 sps:$4 sm:$0xff]  }
 0x86c   : > { %13417 = vmatpush1.bf16.msra.mxu1 %v19302_v9  ;;  %v20979_v52 = vadd.f32 %v20967_v32, %v13123_v45  ;;  %v19323_v32 = vld [vmem:[#allocation9 + $0x2560] ss:$24 sps:$4 sm:$0xff]   ;;  %v13581_v9 = vmax.f32 %v20961_v8, 0.0  ;;  %v19373_v57 = vld [vmem:[#allocation9 + $0x1cf0] ss:$24 sps:$4 sm:$0xff]  }
 0x86d   : > { %13482 = vmatpush2.bf16.msra.mxu0 %v19305_v34  ;;  %v13125_v10 = vpop.f32.mrf.mxu1  ;;  %13418 = vmatprep.subr.bf16.mxu1 %v19310_v20  ;;  %v19371_v33 = vld [vmem:[#allocation12 + $0xf8] sm:$0xff]   ;;  %v19375_v20 = vld [vmem:[#allocation9 + $0x1cf4] ss:$24 sps:$4 sm:$0xff]  }
 0x86e   : > { %13483 = vmatprep.subr.bf16.mxu0 %v19313_v12  ;;  %v19372_v34 = vld [vmem:[#allocation12 + $0xb8] sm:$0xff]   ;;  %v19376_v45 = vld [vmem:[#allocation12 + $0xf0] sm:$0xff]   ;;  %v13587_v12 = vpack.c.bf16 %v13581_v9, %v13581_v9  ;;  %v19381_v8 = vld [vmem:[#allocation12 + $0xe8] sm:$0xff]  }
 0x86f   : > { %v19380_v10 = vld [vmem:[#allocation9 + $0x1cc4] ss:$24 sps:$4 sm:$0xff]   ;;  %v19426_v9 = vld [vmem:[#allocation9 + $0x2380] ss:$24 sps:$4 sm:$0xff]  }
 0x870   : > { %13419 = vmatpush1.bf16.msra.mxu1 %v19308_v43  ;;  %v19377_v43 = vld [vmem:[#allocation12 + $0xb0] sm:$0xff]  }
 0x871   : > { %13484 = vmatpush2.bf16.msra.mxu0 %v19311_v18  ;;  %13420 = vmatprep.subr.bf16.mxu1 %v19316_v54  ;;  %v19378_v18 = vld [vmem:[#allocation9 + $0x1cc0] ss:$24 sps:$4 sm:$0xff]   ;;  %v19382_v54 = vld [vmem:[#allocation12 + $0xa8] sm:$0xff]  }
 0x872   : > { %13485 = vmatprep.subr.bf16.mxu0 %v19319_v2  ;;  %v19385_v2 = vld [vmem:[#allocation9 + $0x1c94] ss:$24 sps:$4 sm:$0xff]  }
 0x874   : > { %13421 = vmatpush1.bf16.msra.mxu1 %v19314_v29  ;;  %v19386_v29 = vld [vmem:[#allocation12 + $0xe0] sm:$0xff]  }
 0x875   : > { %13486 = vmatpush2.bf16.msra.mxu0 %v19317_v46  ;;  %13422 = vmatprep.subr.bf16.mxu1 %v19322_v40  ;;  %v19383_v46 = vld [vmem:[#allocation9 + $0x1c90] ss:$24 sps:$4 sm:$0xff]   ;;  %v19390_v40 = vld [vmem:[#allocation9 + $0x2264] ss:$24 sps:$4 sm:$0xff]  }
 0x876   : > { %13537 = vmatprep.subr.bf16.mxu0 %v19325_v39  ;;  %v19391_v39 = vld [vmem:[#allocation12 + $0xd8] sm:$0xff]  }
 0x878   : > { %v20981_v25 = vpop.f32.mrf.mxu0  ;;  %13488 = vmatmul.mubr.bf16.vlgmr.msra.gmra.mxu0 %v20757_v36  ;;  %13423 = vmatpush1.bf16.msra.mxu1 %v19320_v26  ;;  %v19388_v26 = vld [vmem:[#allocation9 + $0x2260] ss:$24 sps:$4 sm:$0xff]  }
 0x879   : > { %13538 = vmatpush1.bf16.msra.mxu0 %v19323_v32  ;;  %13424 = vmatprep.subr.bf16.mxu1 %v19328_v53  ;;  %v19392_v32 = vld [vmem:[#allocation12 + $0x98] sm:$0xff]   ;;  %v19395_v53 = vld [vmem:[#allocation9 + $0x2234] ss:$24 sps:$4 sm:$0xff]  }
 0x87a   : > { %v20984_v63 = vpop.f32.mrf.mxu0  ;;  %13539 = vmatprep.subr.bf16.mxu0 %v19331_v62  ;;  %13569 = vmatprep.mubr.bf16.mxu0 %v19758_v37  ;;  %v19344_v37 = vld [vmem:[#allocation9 + $0x1de0] ss:$24 sps:$4 sm:$0xff]  }
 0x87b   : > { %v19396_v62 = vld [vmem:[#allocation12 + $0xd0] sm:$0xff]  }
 0x87c   : > { %v13247_v55 = vpop.f32.mrf.mxu0  ;;  %13425 = vmatpush1.bf16.msra.mxu1 %v19326_v44 }
 0x87d   : > { %13540 = vmatpush1.bf16.msra.mxu0 %v19329_v7  ;;  %13426 = vmatprep.subr.bf16.mxu1 %v19334_v56  ;;  %v19393_v56 = vld [vmem:[#allocation9 + $0x2230] ss:$24 sps:$4 sm:$0xff]   ;;  %v19397_v55 = vld [vmem:[#allocation12 + $0x90] sm:$0xff]  }
 0x87e   : > { %v13248_v36 = vpop.f32.mrf.mxu0  ;;  %13541 = vmatprep.subr.bf16.mxu0 %v19337_v60 }
 0x880   : > { %13427 = vmatpush1.bf16.msra.mxu1 %v19332_v16  ;;  %v19400_v16 = vld [vmem:[#allocation9 + $0x2204] ss:$24 sps:$4 sm:$0xff]  }
 0x881   : > { %13542 = vmatpush1.bf16.msra.mxu0 %v19335_v61  ;;  %13428 = vmatprep.subr.bf16.mxu1 %v19340_v47  ;;  %v19401_v47 = vld [vmem:[#allocation12 + $0xc8] sm:$0xff]  }
 0x882   : > { %13543 = vmatprep.subr.bf16.mxu0 %v19343_v58 }
 0x884   : > { %13429 = vmatpush1.bf16.msra.mxu1 %v19338_v48  ;;  %v19402_v48 = vld [vmem:[#allocation12 + $0x88] sm:$0xff]  }
 0x885   : > { %13544 = vmatpush1.bf16.msra.mxu0 %v19341_v3  ;;  %13430 = vmatprep.subr.bf16.mxu1 %v19346_v35  ;;  %v19405_v3 = vld [vmem:[#allocation9 + $0x21d4] ss:$24 sps:$4 sm:$0xff]  }
 0x886   : > { %13545 = vmatprep.subr.bf16.mxu0 %v19349_v22  ;;  %v19406_v35 = vld [vmem:[#allocation12 + $0xc0] sm:$0xff]  }
 0x887   : > { %v19407_v22 = vld [vmem:[#allocation12 + $0x80] sm:$0xff]  }
 0x888   : > { %13431 = vmatpush2.bf16.msra.mxu1 %v19344_v37  ;;  %v13580_v37 = vmax.f32 %v20956_v30, 0.0  ;;  %v19419_v30 = vld [vmem:[#allocation9 + $0x2114] ss:$24 sps:$4 sm:$0xff]  }
 0x889   : > { %13546 = vmatpush1.bf16.msra.mxu0 %v19347_v19  ;;  %13432 = vmatprep.subr.bf16.mxu1 %v19352_v4  ;;  %v19408_v19 = vld [vmem:[#allocation9 + $0x21a0] ss:$24 sps:$4 sm:$0xff]  }
 0x88a   : > { %13547 = vmatprep.subr.bf16.mxu0 %v19355_v41  ;;  %v13586_v4 = vpack.c.bf16 %v13580_v37, %v13580_v37  ;;  %v19460_v37 = vld [vmem:[#allocation12 + $0x178] sm:$0xff]  }
 0x88c   : > { %13433 = vmatpush2.bf16.msra.mxu1 %v19350_v50  ;;  %v19411_v50 = vld [vmem:[#allocation9 + $0x2170] ss:$24 sps:$4 sm:$0xff]  }
 0x88d   : > { %13548 = vmatpush1.bf16.msra.mxu0 %v19353_v0  ;;  %13434 = vmatprep.subr.bf16.mxu1 %v19358_v21  ;;  %v19416_v0 = vld [vmem:[#allocation9 + $0x2144] ss:$24 sps:$4 sm:$0xff]  }
 0x88e   : > { %13549 = vmatprep.subr.bf16.mxu0 %v19361_v31 }
 0x890   : > { %13435 = vmatpush2.bf16.msra.mxu1 %v19356_v14  ;;  %v19414_v14 = vld [vmem:[#allocation9 + $0x2140] ss:$24 sps:$4 sm:$0xff]  }
 0x891   : > { %13550 = vmatpush1.bf16.msra.mxu0 %v19359_v49  ;;  %13436 = vmatprep.subr.bf16.mxu1 %v19364_v23  ;;  %v19417_v23 = vld [vmem:[#allocation9 + $0x2110] ss:$24 sps:$4 sm:$0xff]  }
 0x892   : > { %13551 = vmatprep.subr.bf16.mxu0 %v19367_v27  ;;  %v19422_v27 = vld [vmem:[#allocation9 + $0x23e4] ss:$24 sps:$4 sm:$0xff]  }
 0x894   : > { %13437 = vmatpush2.bf16.msra.mxu1 %v19362_v17  ;;  %v19420_v17 = vld [vmem:[#allocation9 + $0x23e0] ss:$24 sps:$4 sm:$0xff]  }
 0x895   : > { %13552 = vmatpush1.bf16.msra.mxu0 %v19365_v59  ;;  %13438 = vmatprep.subr.bf16.mxu1 %v19370_v38  ;;  %v19425_v59 = vld [vmem:[#allocation9 + $0x23b4] ss:$24 sps:$4 sm:$0xff]   ;;  %v19423_v38 = vld [vmem:[#allocation9 + $0x23b0] ss:$24 sps:$4 sm:$0xff]  }
 0x896   : > { %16839 = vmatprep.subr.bf16.mxu0 %v19371_v33  ;;  %v19428_v33 = vld [vmem:[#allocation9 + $0x2384] ss:$24 sps:$4 sm:$0xff]  }
 0x898   : > { %13570 = vmatmul.mubr.bf16.vlgmr.msra.gmra.mxu0 %v20767_v1  ;;  %13439 = vmatpush2.bf16.msra.mxu1 %v19368_v6  ;;  %v19387_v1 = vld [vmem:[#allocation12 + $0xa0] sm:$0xff]  }
 0x899   : > { %16840 = vmatpush3.bf16.msra.mxu0 %v19372_v34  ;;  %14053 = vmatprep.mubr.bf16.mxu0 %v13587_v12  ;;  %v19431_v6 = vld [vmem:[#allocation9 + $0x2354] ss:$24 sps:$4 sm:$0xff]   ;;  %v19429_v34 = vld [vmem:[#allocation9 + $0x2350] ss:$24 sps:$4 sm:$0xff]  }
 0x89a   : > { %13440 = vmatprep.subr.bf16.mxu1 %v19375_v20  ;;  %16841 = vmatprep.subr.bf16.mxu0 %v19376_v45  ;;  %v19434_v20 = vld [vmem:[#allocation9 + $0x2324] ss:$24 sps:$4 sm:$0xff]   ;;  %v19432_v45 = vld [vmem:[#allocation9 + $0x2320] ss:$24 sps:$4 sm:$0xff]   ;;  %v19437_v12 = vld [vmem:[#allocation9 + $0x22f4] ss:$24 sps:$4 sm:$0xff]  }
 0x89c   : > { %13441 = vmatpush2.bf16.msra.mxu1 %v19373_v57  ;;  %v19435_v57 = vld [vmem:[#allocation9 + $0x22f0] ss:$24 sps:$4 sm:$0xff]  }
 0x89d   : > { %16842 = vmatpush3.bf16.msra.mxu0 %v19377_v43  ;;  %13442 = vmatprep.subr.bf16.mxu1 %v19380_v10  ;;  %v19440_v43 = vld [vmem:[#allocation9 + $0x22c4] ss:$24 sps:$4 sm:$0xff]   ;;  %v19438_v10 = vld [vmem:[#allocation9 + $0x22c0] ss:$24 sps:$4 sm:$0xff]  }
 0x89e   : > { %16843 = vmatprep.subr.bf16.mxu0 %v19381_v8  ;;  %v19443_v8 = vld [vmem:[#allocation9 + $0x2294] ss:$24 sps:$4 sm:$0xff]  }
 0x8a0   : > { %13443 = vmatpush2.bf16.msra.mxu1 %v19378_v18  ;;  %v12508_v18 = vadd.f32 %v20833_v28, %v20857_v42  ;;  %v19448_v28 = vld [vmem:[#allocation12 + $0x68] sm:$0xff]  }
 0x8a1   : > { %16844 = vmatpush3.bf16.msra.mxu0 %v19382_v54  ;;  %13444 = vmatprep.subr.bf16.mxu1 %v19385_v2  ;;  %v19441_v54 = vld [vmem:[#allocation9 + $0x2290] ss:$24 sps:$4 sm:$0xff]   ;;  %v19444_v2 = vld [vmem:[#allocation12 + $0x78] sm:$0xff]  }
 0x8a2   : > { %16845 = vmatprep.subr.bf16.mxu0 %v19386_v29  ;;  %v13579_v29 = vmax.f32 %v12508_v18, 0.0 }
 0x8a4   : > { %13445 = vmatpush2.bf16.msra.mxu1 %v19383_v46  ;;  %v19445_v46 = vld [vmem:[#allocation12 + $0x38] sm:$0xff]  }
 0x8a5   : > { %16846 = vmatpush3.bf16.msra.mxu0 %v19387_v1  ;;  %13496 = vmatprep.subr.bf16.mxu1 %v19390_v40  ;;  %v19446_v1 = vld [vmem:[#allocation12 + $0x70] sm:$0xff]   ;;  %v13585_v40 = vpack.c.bf16 %v13579_v29, %v13579_v29 }
 0x8a6   : > { %16847 = vmatprep.subr.bf16.mxu0 %v19391_v39 }
 0x8a7   : > { %v13202_v44 = vpop.f32.mrf.mxu1  ;;  %13447 = vmatmul.mubr.bf16.vlgmr.msra.gmra.mxu1 %v20775_v13  ;;  %v19398_v13 = vld [vmem:[#allocation9 + $0x2200] ss:$24 sps:$4 sm:$0xff]  }
 0x8a8   : > { %v13203_v7 = vadd.f32 %v13202_v44, %v20976_v5  ;;  %13497 = vmatpush1.bf16.msra.mxu1 %v19388_v26  ;;  %13528 = vmatprep.mubr.bf16.mxu1 %v20777_v11 }
 0x8a9   : > { %16848 = vmatpush3.bf16.msra.mxu0 %v19392_v32  ;;  %v13204_v60 = vpop.f32.mrf.mxu1  ;;  %13498 = vmatprep.subr.bf16.mxu1 %v19395_v53  ;;  %v19447_v32 = vld [vmem:[#allocation12 + $0x30] sm:$0xff]  }
 0x8aa   : > { %v13205_v61 = vadd.f32 %v13204_v60, %v20979_v52  ;;  %16849 = vmatprep.subr.bf16.mxu0 %v19396_v62  ;;  %v20994_v36 = vadd.f32 %v20981_v25, %v13203_v7  ;;  %v19403_v52 = vld [vmem:[#allocation9 + $0x21d0] ss:$24 sps:$4 sm:$0xff]   ;;  %v19410_v25 = vld [vmem:[#allocation9 + $0x21a4] ss:$24 sps:$4 sm:$0xff]  }
 0x8ab   : > { %v13206_v58 = vpop.f32.mrf.mxu1  ;;  %v19449_v7 = vld [vmem:[#allocation12 + $0x28] sm:$0xff]  }
 0x8ac   : > { %13499 = vmatpush1.bf16.msra.mxu1 %v19393_v56  ;;  %v20997_v5 = vadd.f32 %v20984_v63, %v13205_v61  ;;  %v19413_v63 = vld [vmem:[#allocation9 + $0x2174] ss:$24 sps:$4 sm:$0xff]   ;;  %v19453_v61 = vld [vmem:[#allocation12 + $0x18] sm:$0xff]  }
 0x8ad   : > { %16850 = vmatpush3.bf16.msra.mxu0 %v19397_v55  ;;  %v13207_v11 = vpop.f32.mrf.mxu1  ;;  %13500 = vmatprep.subr.bf16.mxu1 %v19400_v16  ;;  %v19451_v55 = vld [vmem:[#allocation12 + $0x20] sm:$0xff]   ;;  %v19452_v16 = vld [vmem:[#allocation12 + $0x58] sm:$0xff]   ;;  %v19455_v58 = vld [vmem:[#allocation12 + $0x10] sm:$0xff]  }
 0x8ae   : > { %16851 = vmatprep.subr.bf16.mxu0 %v19401_v47  ;;  %v19454_v47 = vld [vmem:[#allocation12 + $0x50] sm:$0xff]  }
 0x8b0   : > { %13501 = vmatpush1.bf16.msra.mxu1 %v19398_v13  ;;  %v19456_v13 = vld [vmem:[#allocation12 + $0x48] sm:$0xff]  }
 0x8b1   : > { %16852 = vmatpush3.bf16.msra.mxu0 %v19402_v48  ;;  %13502 = vmatprep.subr.bf16.mxu1 %v19405_v3  ;;  %v19457_v48 = vld [vmem:[#allocation12 + $0x8] sm:$0xff]   ;;  %v12506_v3 = vadd.f32 %v20829_v24, %v20853_v15  ;;  %v19466_v15 = vld [vmem:[#allocation12 + $0x160] sm:$0xff]  }
 0x8b2   : > { %16853 = vmatprep.subr.bf16.mxu0 %v19406_v35  ;;  %v19458_v35 = vld [vmem:[#allocation12 + $0x40] sm:$0xff]   ;;  %v19465_v24 = vld [vmem:[#allocation12 + $0x128] sm:$0xff]  }
 0x8b4   : > { %13503 = vmatpush1.bf16.msra.mxu1 %v19403_v52 }
 0x8b5   : > { %16854 = vmatpush3.bf16.msra.mxu0 %v19407_v22  ;;  %13504 = vmatprep.subr.bf16.mxu1 %v19410_v25  ;;  %v19459_v22 = vld [vmem:[#allocation12] sm:$0xff]   ;;  %v13578_v25 = vmax.f32 %v12506_v3, 0.0 }
 0x8b6   : > { %v15887_v3 = vld [vmem:[#allocation14] ss:$0 sm:$0xff] }
 0x8b8   : > { %v21000_v41 = vpop.f32.mrf.mxu0  ;;  %14054 = vmatmul.mubr.bf16.vlgmr.msra.gmra.mxu0 %v13586_v4  ;;  %13505 = vmatpush1.bf16.msra.mxu1 %v19408_v19  ;;  %v19461_v19 = vld [vmem:[#allocation12 + $0x138] sm:$0xff]   ;;  %v19462_v4 = vld [vmem:[#allocation12 + $0x170] sm:$0xff]  }
 0x8b9   : > { %13506 = vmatprep.subr.bf16.mxu1 %v19413_v63  ;;  %v13584_v63 = vpack.c.bf16 %v13578_v25, %v13578_v25 }
 0x8ba   : > { %v21002_v21 = vpop.f32.mrf.mxu0 }
 0x8bc   : > { %v13329_v31 = vpop.f32.mrf.mxu0  ;;  %13507 = vmatpush1.bf16.msra.mxu1 %v19411_v50  ;;  %v19464_v50 = vld [vmem:[#allocation12 + $0x168] sm:$0xff]  }
 0x8bd   : > { %13508 = vmatprep.subr.bf16.mxu1 %v19416_v0  ;;  %v19467_v0 = vld [vmem:[#allocation12 + $0x120] sm:$0xff]   ;;  %v19469_v31 = vld [vmem:[#allocation12 + $0x118] sm:$0xff]  }
 0x8be   : > { %v13330_v49 = vpop.f32.mrf.mxu0 }
 0x8bf   : > { %v19471_v49 = vld [vmem:[#allocation12 + $0x110] sm:$0xff]  }
 0x8c0   : > { %13509 = vmatpush1.bf16.msra.mxu1 %v19414_v14  ;;  %v19470_v14 = vld [vmem:[#allocation12 + $0x150] sm:$0xff]  }
 0x8c1   : > { %13510 = vmatprep.subr.bf16.mxu1 %v19419_v30 }
 0x8c4   : > { %13511 = vmatpush1.bf16.msra.mxu1 %v19417_v23 }
 0x8c5   : > { %13512 = vmatprep.subr.bf16.mxu1 %v19422_v27 }
 0x8c8   : > { %13513 = vmatpush2.bf16.msra.mxu1 %v19420_v17 }
 0x8c9   : > { %13514 = vmatprep.subr.bf16.mxu1 %v19425_v59 }
 0x8cc   : > { %13515 = vmatpush2.bf16.msra.mxu1 %v19423_v38  ;;  %v19472_v38 = vld [vmem:[#allocation12 + $0x148] sm:$0xff]  }
 0x8cd   : > { %13516 = vmatprep.subr.bf16.mxu1 %v19428_v33 }
 0x8d0   : > { %13517 = vmatpush2.bf16.msra.mxu1 %v19426_v9  ;;  %v19473_v9 = vld [vmem:[#allocation12 + $0x108] sm:$0xff]  }
 0x8d1   : > { %13518 = vmatprep.subr.bf16.mxu1 %v19431_v6 }
 0x8d4   : > { %13519 = vmatpush2.bf16.msra.mxu1 %v19429_v34 }
 0x8d5   : > { %13520 = vmatprep.subr.bf16.mxu1 %v19434_v20  ;;  %v19474_v20 = vld [vmem:[#allocation12 + $0x140] sm:$0xff]  }
 0x8d8   : > { %13521 = vmatpush2.bf16.msra.mxu1 %v19432_v45  ;;  %v19475_v45 = vld [vmem:[#allocation12 + $0x100] sm:$0xff]  }
 0x8d9   : > { %13522 = vmatprep.subr.bf16.mxu1 %v19437_v12 }
 0x8dc   : > { %13523 = vmatpush2.bf16.msra.mxu1 %v19435_v57 }
 0x8dd   : > { %13524 = vmatprep.subr.bf16.mxu1 %v19440_v43 }
 0x8e0   : > { %13525 = vmatpush2.bf16.msra.mxu1 %v19438_v10 }
 0x8e1   : > { %13526 = vmatprep.subr.bf16.mxu1 %v19443_v8 }
 0x8e4   : > { %13527 = vmatpush2.bf16.msra.mxu1 %v19441_v54 }
 0x8e5   : > { %16817 = vmatprep.subr.bf16.mxu1 %v19444_v2 }
 0x8e7   : > { %v13284_v39 = vpop.f32.mrf.mxu1  ;;  %13529 = vmatmul.mubr.bf16.vlgmr.msra.gmra.mxu1 %v20797_v51  ;;  %v19450_v51 = vld [vmem:[#allocation12 + $0x60] sm:$0xff]  }
 0x8e8   : > { %v13285_v26 = vadd.f32 %v13284_v39, %v20994_v36  ;;  %16818 = vmatpush3.bf16.msra.mxu1 %v19445_v46  ;;  %14013 = vmatprep.mubr.bf16.mxu1 %v13585_v40 }
 0x8e9   : > { %v13286_v53 = vpop.f32.mrf.mxu1  ;;  %16819 = vmatprep.subr.bf16.mxu1 %v19446_v1 }
 0x8ea   : > { %v13287_v42 = vadd.f32 %v13286_v53, %v20997_v5  ;;  %v13326_v62 = vadd.f32 %v21000_v41, %v13285_v26  ;;  %v19463_v41 = vld [vmem:[#allocation12 + $0x130] sm:$0xff]  }
 0x8eb   : > { %v13288_v44 = vpop.f32.mrf.mxu1 }
 0x8ec   : > { %16820 = vmatpush3.bf16.msra.mxu1 %v19447_v32  ;;  %v13328_v56 = vadd.f32 %v21002_v21, %v13287_v42  ;;  %v19468_v21 = vld [vmem:[#allocation12 + $0x158] sm:$0xff]  }
 0x8ed   : > { %v13289_v60 = vpop.f32.mrf.mxu1  ;;  %16821 = vmatprep.subr.bf16.mxu1 %v19448_v28 }
 0x8f0   : > { %16822 = vmatpush3.bf16.msra.mxu1 %v19449_v7 }
 0x8f1   : > { %16823 = vmatprep.subr.bf16.mxu1 %v19450_v51 }
 0x8f4   : > { %16824 = vmatpush3.bf16.msra.mxu1 %v19451_v55 }
 0x8f5   : > { %16825 = vmatprep.subr.bf16.mxu1 %v19452_v16 }
 0x8f8   : > { %v13407_v36 = vpop.f32.mrf.mxu0  ;;  %16826 = vmatpush3.bf16.msra.mxu1 %v19453_v61 }
 0x8f9   : > { %16827 = vmatprep.subr.bf16.mxu1 %v19454_v47 }
 0x8fa   : > { %v13409_v5 = vpop.f32.mrf.mxu0 }
 0x8fc   : > { %v13411_v11 = vpop.f32.mrf.mxu0  ;;  %16828 = vmatpush3.bf16.msra.mxu1 %v19455_v58 }
 0x8fd   : > { %16829 = vmatprep.subr.bf16.mxu1 %v19456_v13 }
 0x8fe   : > { %v13412_v52 = vpop.f32.mrf.mxu0 }
 0x900   : > { %16830 = vmatpush3.bf16.msra.mxu1 %v19457_v48 }
 0x901   : > { %16831 = vmatprep.subr.bf16.mxu1 %v19458_v35 }
 0x904   : > { %16832 = vmatpush3.bf16.msra.mxu1 %v19459_v22 }
 0x905   : > { %16861 = vmatprep.subr.bf16.mxu1 %v19460_v37 }
 0x907   : > { %14014 = vmatmul.mubr.bf16.vlgmr.msra.gmra.mxu1 %v13584_v63 }
 0x908   : > { %16862 = vmatpush3.bf16.msra.mxu1 %v19461_v19 }
 0x909   : > { %16863 = vmatprep.subr.bf16.mxu1 %v19462_v4 }
 0x90c   : > { %16864 = vmatpush3.bf16.msra.mxu1 %v19463_v41 }
 0x90d   : > { %16865 = vmatprep.subr.bf16.mxu1 %v19464_v50 }
 0x910   : > { %16866 = vmatpush3.bf16.msra.mxu1 %v19465_v24 }
 0x911   : > { %16867 = vmatprep.subr.bf16.mxu1 %v19466_v15 }
 0x914   : > { %16868 = vmatpush3.bf16.msra.mxu1 %v19467_v0 }
 0x915   : > { %16869 = vmatprep.subr.bf16.mxu1 %v19468_v21 }
 0x918   : > { %16870 = vmatpush3.bf16.msra.mxu1 %v19469_v31 }
 0x919   : > { %16871 = vmatprep.subr.bf16.mxu1 %v19470_v14 }
 0x91c   : > { %16872 = vmatpush3.bf16.msra.mxu1 %v19471_v49 }
 0x91d   : > { %16873 = vmatprep.subr.bf16.mxu1 %v19472_v38 }
 0x920   : > { %16874 = vmatpush3.bf16.msra.mxu1 %v19473_v9 }
 0x921   : > { %16875 = vmatprep.subr.bf16.mxu1 %v19474_v20 }
 0x924   : > { %16876 = vmatpush3.bf16.msra.mxu1 %v19475_v45 }
 0x927   : > { %v13366_v30 = vpop.f32.mrf.mxu1 }
 0x928   : > { %v13367_v23 = vadd.f32 %v13366_v30, %v13326_v62 }
 0x929   : > { %v13368_v27 = vpop.f32.mrf.mxu1 }
 0x92a   : > { %v13369_v17 = vadd.f32 %v13368_v27, %v13328_v56  ;;  %v13408_v59 = vadd.f32 %v13407_v36, %v13367_v23 }
 0x92b   : > { %v13370_v33 = vpop.f32.mrf.mxu1 }
 0x92c   : > { %v13410_v6 = vadd.f32 %v13409_v5, %v13369_v17 }
 0x92d   : > { %v13371_v34 = vpop.f32.mrf.mxu1 }
 0x938   : > { %v13489_v12 = vpop.f32.mrf.mxu0 }
 0x93a   : > { %v13491_v57 = vpop.f32.mrf.mxu0 }
 0x93c   : > { %v13493_v43 = vpop.f32.mrf.mxu0 }
 0x93e   : > { %v13494_v10 = vpop.f32.mrf.mxu0 }
 0x958   : > { %v13571_v8 = vpop.f32.mrf.mxu0 }
 0x95a   : > { %v13573_v18 = vpop.f32.mrf.mxu0 }
 0x95c   : > { %v13575_v54 = vpop.f32.mrf.mxu0 }
 0x95e   : > { %v13576_v2 = vpop.f32.mrf.mxu0 }
 0x967   : > { %v13448_v29 = vpop.f32.mrf.mxu1 }
 0x968   : > { %v13449_v46 = vadd.f32 %v13448_v29, %v13408_v59 }
 0x969   : > { %v13450_v1 = vpop.f32.mrf.mxu1 }
 0x96a   : > { %v13451_v40 = vadd.f32 %v13450_v1, %v13410_v6  ;;  %v13490_v39 = vadd.f32 %v13489_v12, %v13449_v46 }
 0x96b   : > { %v13452_v26 = vpop.f32.mrf.mxu1 }
 0x96c   : > { %v13492_v32 = vadd.f32 %v13491_v57, %v13451_v40 }
 0x96d   : > { %v13453_v53 = vpop.f32.mrf.mxu1 }
 0x978   : > { %v16855_v28 = vpop.f32.mrf.mxu0 }
 0x97a   : > { %v16856_v42 = vpop.f32.mrf.mxu0 }
 0x97b   : > { %v16857_v62 = vadd.f32 %v16856_v42, %v16855_v28 }
 0x97c   : > { %v16858_v44 = vpop.f32.mrf.mxu0 }
 0x97e   : > { %v16859_v7 = vpop.f32.mrf.mxu0 }
 0x9a7   : > { %v13530_v56 = vpop.f32.mrf.mxu1 }
 0x9a8   : > { %v13531_v60 = vadd.f32 %v13530_v56, %v13490_v39 }
 0x9a9   : > { %v13532_v51 = vpop.f32.mrf.mxu1 }
 0x9aa   : > { %v13572_v55 = vadd.f32 %v13571_v8, %v13531_v60  ;;  %v13533_v16 = vadd.f32 %v13532_v51, %v13492_v32 }
 0x9ab   : > { %v13534_v61 = vpop.f32.mrf.mxu1 }
 0x9ac   : > { %v13574_v47 = vadd.f32 %v13573_v18, %v13533_v16  ;;  %v13582_v36 = vmax.f32 %v13572_v55, 0.0 }
 0x9ad   : > { %v13535_v58 = vpop.f32.mrf.mxu1 }
 0x9ae   : > { %v13583_v13 = vmax.f32 %v13574_v47, 0.0  ;;  %v13588_v11 = vpack.c.bf16 %v13582_v36, %v13582_v36 }
 0x9b0   : > { %v13589_v5 = vpack.c.bf16 %v13583_v13, %v13583_v13 }
 0x9b2   : > { %14093 = vmatprep.mubr.bf16.mxu1 %v13589_v5 }
 0x9b3   : > { %14094 = vmatmul.mubr.bf16.vlgmr.msra.gmra.mxu1 %v13588_v11 }
 0x9c7   : > { %v16833_v48 = vpop.f32.mrf.mxu1 }
 0x9c9   : > { %v16834_v35 = vpop.f32.mrf.mxu1 }
 0x9ca   : > { %v16835_v52 = vadd.f32 %v16834_v35, %v16833_v48 }
 0x9cb   : > { %v16836_v22 = vpop.f32.mrf.mxu1 }
 0x9cc   : > { %v14016_v25 = vadd.f32 %v16835_v52, %v15887_v3 }
 0x9cd   : > { %v16837_v37 = vpop.f32.mrf.mxu1 }
 0x9ce   : > { %v14056_v19 = vadd.f32 %v16857_v62, %v14016_v25 }
 0xa73   : > { %v16877_v63 = vpop.f32.mrf.mxu1 }
 0xa75   : > { %v16878_v4 = vpop.f32.mrf.mxu1 }
 0xa76   : > { %v16879_v41 = vadd.f32 %v16878_v4, %v16877_v63 }
 0xa77   : > { %v16880_v50 = vpop.f32.mrf.mxu1 }
 0xa78   : > { %v14096_v24 = vadd.f32 %v16879_v41, %v14056_v19 }
 0xa79   : > { %v16881_v15 = vpop.f32.mrf.mxu1 }
 0xa7a   : > { %14101 = vst [vmem:[%s395_s10] sm:$0xff] %v14096_v24 }
 0xa7b   : > { %19678 = shalt.err (!%p19675_p0)
}
 0xa7c   : > { %s19679_s13 = scalar_lea.hbm %s21018_s21, 128  ;;  %s19683_s19 = scalar_lea.hbm %s21061_s8, 256 }
 0xa7d   : > { %p19680_p3 = scmp.ne.s32.totalorder %s21018_s21, %s19679_s13  ;;  %p19684_p9 = scmp.lt.s32.totalorder %s21018_s21, %s21061_s8 }
 0xa7e   : > { %p19685_p2 = scmp.lt.s32.totalorder %s19683_s19, %s19679_s13 }
 0xa7f   : > { %p19681_p6 = pnand %p19680_p3, %p21084_p8 }
 0xa80   : > { %p19686_p4 = por %p19685_p2, %p19684_p9 }
 0xa81   : > { %p19682_p12 = pneg %p19681_p6 }
 0xa83   : > { %p19687_p7 = pnand %p19686_p4, %p19682_p12 }
 0xa85   : > { %19690 = shalt.err (!%p19687_p7)
}
 0xa86   : > { %17033 = dma.vmem_to_hbm [thread:$0]  (%p21084_p8), %s14117_s22, 128, %s21018_s21, %s14103_s25  }
 0xa87 PF: > { %p17075_p5 = scmp.ge.s32.totalorder %s19741_s30, 2  ;;  %s14128_s14 = sand.u32 1, %s19729_s27  }
 0xa88   : > { %p21085_p10 = scmp.ne.s32.totalorder %s21069_s16, 0  ;;  %s14129_s18 = scalar_lea.sflag [#allocation5], %s14128_s14 }
 0xa8a   : > { %p17058_p11 = pnand %p17075_p5, %p21085_p10 }
 0xa8c   : > { %p17059_p1 = pneg %p17058_p11 }
 0xa8e   : > { %19724 = dma.done.wait (%p17059_p1), %s14129_s18, 128  }
 0xa8f   : > { %19726 = vsyncadd (%p17059_p1), %s14129_s18, 4294967168  ;;  %s21086_s17 = sld [smem:[#allocation21_spill]]  ;;  %p22_p13 = scmp.ge.s32.totalorder %s19830_s11, 4  }
 0xa90   : > { %s21087_s27 = smov %s19733_s28  ;;  %s21088_s28 = smov %s19737_s29 }
 0xa91   : > { %s21090_s30 = smov %s19830_s11  ;;  %24 = sbr.rel (!%p22_p13) target bundleno = 7 (0x7), region = 116 }
 0xa95   : > { %s21089_s29 = smov %s21086_s17 }
 0xa96   :  { %14134 = vsyncpa [#allocation4], 1 }
 0xa97   :  { %14136 = vsyncpa [#allocation4 + $0x1], 1 }
 0xa98   :  { %14137 = vsyncpa [#allocation7], 1 }
 0xa99   :  { %14138 = vsyncpa [#allocation10], 1 }
 0xa9a   :  { %14139 = vsyncpa [#allocation13], 1 }
 0xa9b   :  { %14140 = vsyncpa [#allocation5], 1 }
 0xa9c   :  { %14142 = vsyncpa [#allocation5 + $0x1], 1 }

</bundles_post_ra>
